<compile_context>
chip_gen: v5e
topology: v5e:2x2
jax: 0.10.0
libtpu: 0.0.40
codegen_flags: <defaults>
</compile_context>

<pallas_src>
import functools

import numpy as np
import jax
import jax.numpy as jnp
from jax.experimental import pallas as pl
from jax.experimental.pallas import tpu as pltpu


def _round_up(n, m=128):
    return ((n + m - 1) // m) * m


# ----------------------------------------------------------------------------
# Fused MLP kernel: out = relu(relu(x @ w1 + b1) @ w2 + b2)   (single program)
# ----------------------------------------------------------------------------
def _mlp_kernel(x_ref, w1_ref, b1_ref, w2_ref, b2_ref, o_ref):
    h = jnp.dot(x_ref[...], w1_ref[...], preferred_element_type=jnp.float32)
    h = jnp.maximum(h + b1_ref[...], 0.0).astype(w2_ref.dtype)
    o = jnp.dot(h, w2_ref[...], preferred_element_type=jnp.float32)
    o = jnp.maximum(o + b2_ref[...], 0.0)
    o_ref[...] = o.astype(o_ref.dtype)


def mlp_fused(x, w1, b1, w2, b2):
    bs = x.shape[0]
    dout = w2.shape[1]
    vmem = pl.BlockSpec(memory_space=pltpu.MemorySpace.VMEM)
    return pl.pallas_call(
        _mlp_kernel,
        out_shape=jax.ShapeDtypeStruct((bs, dout), jnp.bfloat16),
        in_specs=[vmem] * 5,
        out_specs=vmem,
    )(x, w1, b1, w2, b2)


# ----------------------------------------------------------------------------
# Fused conv kernel (stride 1, "same" padding), NHWC, flattened spatial dim.
#
# The input ref holds one batch element, H-padded by ph rows of zeros, flattened
# to ((H+2ph)*W,) rows with an extra pw zero rows at each end.  For tap (i, j)
# the patch covering all outputs of the row-tile is a single contiguous window
# of the flat array shifted by i*W + j; out-of-row columns are zeroed with a
# precomputed per-tap mask.  Accumulation: f32, one MXU matmul per tap.
# ----------------------------------------------------------------------------
def _conv_kernel(x_ref, w_ref, b_ref, mask_ref, o_ref, *,
                 kh, kw, W, tile_m, n_tiles, apply_relu):
    pw = kw // 2

    if n_tiles == 1:
        # Fully static slicing path (always taken at these decoder sizes).
        def tap(i, j):
            return x_ref[0, pl.ds(i * W + j, tile_m), :]
    else:
        # Row-tiled path: load one aligned halo window, slice taps statically.
        win_len = tile_m + (kh - 1) * W + (kw - 1)
        base = pl.multiple_of(pl.program_id(1) * tile_m, 32)
        win = x_ref[0, pl.ds(base, win_len), :]

        def tap(i, j):
            s0 = i * W + j
            return jax.lax.slice_in_dim(win, s0, s0 + tile_m, axis=0)

    acc = jnp.zeros((tile_m, o_ref.shape[-1]), jnp.float32)
    for i in range(kh):
        for j in range(kw):
            patch = tap(i, j)
            if j != pw:
                # zero columns whose source column falls outside [0, W)
                patch = patch * mask_ref[j]
            acc = acc + jnp.dot(patch, w_ref[i * kw + j],
                                preferred_element_type=jnp.float32)
    acc = acc + b_ref[...]
    if apply_relu:
        acc = jnp.maximum(acc, 0.0)
    o_ref[0] = acc.astype(o_ref.dtype)


def _pick_row_tile(H, W, cin, cout, budget_bytes=4 * 1024 * 1024):
    """Largest row tile that keeps per-program tiles comfortably in VMEM."""
    if H * W * max(cin, cout) * 4 <= budget_bytes:
        return H
    for th in range(H - 1, 0, -1):
        if H % th == 0 and (th * W) % 32 == 0 \
                and th * W * max(cin, cout) * 4 <= budget_bytes:
            return th
    return H


def _col_masks(kw, W, tile_m):
    """(kw, tile_m, 1) 0/1 mask: valid iff (p mod W) + j - kw//2 in [0, W)."""
    pw = kw // 2
    p = np.arange(tile_m) % W
    dj = np.arange(kw) - pw
    src = p[None, :] + dj[:, None]
    valid = (src >= 0) & (src < W)
    return valid.astype(np.float32)[:, :, None]


def conv2d_nhwc(x, w, b, *, kh, kw, apply_relu, out_dtype):
    """x: (bs, H, W, Cin_pad) NHWC; w: (kh*kw, Cin_pad, Cout_pad); b: (1, Cout_pad)."""
    bs, H, W, cin = x.shape
    T, cin_w, cout = w.shape
    assert T == kh * kw and cin_w == cin
    ph, pw = kh // 2, kw // 2
    M = H * W
    Lp = (H + 2 * ph) * W + 2 * pw

    tile_h = _pick_row_tile(H, W, cin, cout)
    tile_m = tile_h * W
    n_tiles = H // tile_h

    # Pad rows with ph zero-rows, flatten spatial, pad pw zeros at both ends.
    xp = jnp.pad(x, ((0, 0), (ph, ph), (0, 0), (0, 0)))
    xf = xp.reshape(bs, (H + 2 * ph) * W, cin)
    xf = jnp.pad(xf, ((0, 0), (pw, pw), (0, 0)))

    masks = jnp.asarray(_col_masks(kw, W, tile_m), dtype=x.dtype)

    kern = functools.partial(_conv_kernel, kh=kh, kw=kw, W=W,
                             tile_m=tile_m, n_tiles=n_tiles,
                             apply_relu=apply_relu)

    out = pl.pallas_call(
        kern,
        out_shape=jax.ShapeDtypeStruct((bs, M, cout), out_dtype),
        grid=(bs, n_tiles),
        in_specs=[
            pl.BlockSpec((1, Lp, cin), lambda bb, r: (bb, 0, 0)),
            pl.BlockSpec((T, cin, cout), lambda bb, r: (0, 0, 0)),
            pl.BlockSpec((1, cout), lambda bb, r: (0, 0)),
            pl.BlockSpec((kw, tile_m, 1), lambda bb, r: (0, 0, 0)),
        ],
        out_specs=pl.BlockSpec((1, tile_m, cout), lambda bb, r: (bb, r, 0)),
        compiler_params=pltpu.CompilerParams(
            dimension_semantics=("parallel", "arbitrary"),
            vmem_limit_bytes=48 * 1024 * 1024,
        ),
    )(xf, w, b, masks)
    return out.reshape(bs, H, W, cout)


def upsample2_nhwc(x):
    """nn.Upsample(scale_factor=2), nearest, on NHWC."""
    # TODO(synk): fold the x2 nearest upsample into the conv's input indexing
    # (read src = out // 2) to avoid one HBM pass over the upsampled tensor.
    return jnp.repeat(jnp.repeat(x, 2, axis=1), 2, axis=2)


# ----------------------------------------------------------------------------
# One-time parameter preparation: NHWC column order, 128-padded channels, bf16.
# ----------------------------------------------------------------------------
def prepare_params(params, img_size, out_channels):
    s = img_size // 4
    p200 = _round_up(200)
    p150 = _round_up(150)
    p100 = _round_up(100)
    pout = _round_up(out_channels)

    def prep_conv(w, b, cin_pad, cout_pad):
        cout, cin, kh, kw = w.shape
        wt = jnp.transpose(w, (2, 3, 1, 0)).reshape(kh * kw, cin, cout)
        wt = jnp.pad(wt, ((0, 0), (0, cin_pad - cin), (0, cout_pad - cout)))
        bt = jnp.pad(b, (0, cout_pad - cout)).reshape(1, cout_pad)
        return wt.astype(jnp.bfloat16), bt.astype(jnp.float32)

    fc4 = params["mlp_w2"].shape[0]
    # MLP layer 2: reorder columns (c, h, w) -> (h, w, c) so its output is
    # directly NHWC, and zero-pad channels 200 -> p200.
    w2 = params["mlp_w2"].reshape(fc4, 200, s, s)
    w2 = jnp.transpose(w2, (0, 2, 3, 1))
    w2 = jnp.pad(w2, ((0, 0), (0, 0), (0, 0), (0, p200 - 200)))
    w2 = w2.reshape(fc4, s * s * p200)
    b2 = params["mlp_b2"].reshape(200, s, s)
    b2 = jnp.transpose(b2, (1, 2, 0))
    b2 = jnp.pad(b2, ((0, 0), (0, 0), (0, p200 - 200))).reshape(1, s * s * p200)

    c3_w, c3_b = prep_conv(params["c3_w"], params["c3_b"], p200, p150)
    c2_w, c2_b = prep_conv(params["c2_w"], params["c2_b"], p150, p100)
    c1_w, c1_b = prep_conv(params["c1_w"], params["c1_b"], p100, pout)

    return {
        "mlp_w1": params["mlp_w1"].astype(jnp.bfloat16),
        "mlp_b1": params["mlp_b1"].reshape(1, -1).astype(jnp.float32),
        "mlp_w2": w2.astype(jnp.bfloat16),
        "mlp_b2": b2.astype(jnp.float32),
        "c3_w": c3_w, "c3_b": c3_b,
        "c2_w": c2_w, "c2_b": c2_b,
        "c1_w": c1_w, "c1_b": c1_b,
    }


# ----------------------------------------------------------------------------
# Decoder forward (Pallas)
# ----------------------------------------------------------------------------
def decoder_forward(x, pp, *, img_size, out_channels):
    bs = x.shape[0]
    s = img_size // 4
    h = mlp_fused(x.astype(jnp.bfloat16), pp["mlp_w1"], pp["mlp_b1"],
                  pp["mlp_w2"], pp["mlp_b2"])
    h = h.reshape(bs, s, s, -1)                       # NHWC, channels padded
    h = conv2d_nhwc(h, pp["c3_w"], pp["c3_b"], kh=3, kw=3,
                    apply_relu=True, out_dtype=jnp.bfloat16)
    h = upsample2_nhwc(h)
    h = conv2d_nhwc(h, pp["c2_w"], pp["c2_b"], kh=5, kw=5,
                    apply_relu=True, out_dtype=jnp.bfloat16)
    h = upsample2_nhwc(h)
    h = conv2d_nhwc(h, pp["c1_w"], pp["c1_b"], kh=5, kw=5,
                    apply_relu=False, out_dtype=jnp.float32)
    h = h[:, :, :, :out_channels]
    return jnp.transpose(h, (0, 3, 1, 2))             # NCHW at module boundary


# Independent pure-JAX reference (lax.conv_general_dilated, f32).
def decoder_forward_ref(x, params, img_size):
    bs = x.shape[0]
    s = img_size // 4
    hp = jax.lax.Precision.HIGHEST

    def mm(a, w, b, relu):
        y = jnp.dot(a, w, precision=hp) + b
        return jnp.maximum(y, 0.0) if relu else y

    def conv(a, w, b, pad, relu):
        y = jax.lax.conv_general_dilated(
            a, w, window_strides=(1, 1), padding=[(pad, pad), (pad, pad)],
            dimension_numbers=("NCHW", "OIHW", "NCHW"), precision=hp)
        y = y + b.reshape(1, -1, 1, 1)
        return jnp.maximum(y, 0.0) if relu else y

    def up(a):
        return jnp.repeat(jnp.repeat(a, 2, axis=2), 2, axis=3)

    h = mm(x, params["mlp_w1"], params["mlp_b1"], True)
    h = mm(h, params["mlp_w2"], params["mlp_b2"], True)
    h = h.reshape(bs, 200, s, s)
    h = conv(h, params["c3_w"], params["c3_b"], 1, True)
    h = conv(up(h), params["c2_w"], params["c2_b"], 2, True)
    h = conv(up(h), params["c1_w"], params["c1_b"], 2, False)
    return h


# ----------------------------------------------------------------------------
# Deterministic parameter init (synthetic; PyTorch layouts, no checkpoint)
# ----------------------------------------------------------------------------
def init_params(key, img_size, out_channels, fc4, fc5):
    s = img_size // 4
    keys = jax.random.split(key, 10)
    scale = 0.05

    def rnd(k, shape):
        return scale * jax.random.normal(k, shape, dtype=jnp.float32)

    return {
        # Linear weights stored as (in, out) so forward is x @ W + b.
        "mlp_w1": rnd(keys[0], (fc5, fc4)),
        "mlp_b1": rnd(keys[1], (fc4,)),
        "mlp_w2": rnd(keys[2], (fc4, s * s * 200)),
        "mlp_b2": rnd(keys[3], (s * s * 200,)),
        # Conv weights in PyTorch layout (out_c, in_c, kh, kw).
        "c3_w": rnd(keys[4], (150, 200, 3, 3)),
        "c3_b": rnd(keys[5], (150,)),
        "c2_w": rnd(keys[6], (100, 150, 5, 5)),
        "c2_b": rnd(keys[7], (100,)),
        "c1_w": rnd(keys[8], (out_channels, 100, 5, 5)),
        "c1_b": rnd(keys[9], (out_channels,)),
    }


if __name__ == "__main__":
    img_size = 8        # -> img_size // 4 = 2 spatial at the MLP output
    out_channels = 3
    fc4, fc5 = 32, 16
    bs = 2

    key = jax.random.PRNGKey(0)
    pkey, xkey = jax.random.split(key)
    params = init_params(pkey, img_size, out_channels, fc4, fc5)
    x = jax.random.normal(xkey, (bs, fc5), dtype=jnp.float32)

    prepped = prepare_params(params, img_size, out_channels)
    fwd = jax.jit(functools.partial(decoder_forward, img_size=img_size,
                                    out_channels=out_channels))
    out = jax.block_until_ready(fwd(x, prepped))
    assert out.shape == (bs, out_channels, img_size, img_size), out.shape

    ref = decoder_forward_ref(x, params, img_size)
    max_err = float(jnp.max(jnp.abs(out - ref)))
    assert max_err < 2e-2, f"max abs error too large: {max_err}"

    print("KERNEL_OK")
</pallas_src>

<mosaic_0001>
module attributes {stable_mosaic.version = 11 : i64} {
  func.func @_mlp_kernel(%arg0: memref<2x16xbf16, #tpu.memory_space<vmem>>, %arg1: memref<16x32xbf16, #tpu.memory_space<vmem>>, %arg2: memref<1x32xf32, #tpu.memory_space<vmem>>, %arg3: memref<32x1024xbf16, #tpu.memory_space<vmem>>, %arg4: memref<1x1024xf32, #tpu.memory_space<vmem>>, %arg5: memref<2x1024xbf16, #tpu.memory_space<vmem>>) attributes {dimension_semantics = [], scalar_prefetch = 0 : i64, scratch_operands = 0 : i64, tpu.core_type = #tpu.core_type<tc>} {
    %c0 = arith.constant 0 : index
    %c0_0 = arith.constant 0 : index
    %0 = vector.load %arg0[%c0, %c0_0] : memref<2x16xbf16, #tpu.memory_space<vmem>>, vector<2x16xbf16>
    %c0_1 = arith.constant 0 : index
    %c0_2 = arith.constant 0 : index
    %1 = vector.load %arg1[%c0_1, %c0_2] : memref<16x32xbf16, #tpu.memory_space<vmem>>, vector<16x32xbf16>
    %cst = arith.constant dense<0.000000e+00> : vector<2x32xf32>
    %2 = tpu.matmul %0, %1, %cst {dimension_numbers = #tpu.dot_dimension_numbers<[1], [0], [0], [1], [0, 0, 1, 1], [], []>} : vector<2x16xbf16>, vector<16x32xbf16>, vector<2x32xf32> -> vector<2x32xf32>
    %c0_3 = arith.constant 0 : index
    %c0_4 = arith.constant 0 : index
    %3 = vector.load %arg2[%c0_3, %c0_4] : memref<1x32xf32, #tpu.memory_space<vmem>>, vector<1x32xf32>
    %4 = vector.broadcast %3 : vector<1x32xf32> to vector<2x32xf32>
    %5 = arith.addf %2, %4 : vector<2x32xf32>
    %cst_5 = arith.constant 0.000000e+00 : f32
    %6 = vector.broadcast %cst_5 : f32 to vector<2x32xf32>
    %7 = arith.maximumf %5, %6 : vector<2x32xf32>
    %8 = arith.truncf %7 : vector<2x32xf32> to vector<2x32xbf16>
    %c0_6 = arith.constant 0 : index
    %c0_7 = arith.constant 0 : index
    %9 = vector.load %arg3[%c0_6, %c0_7] : memref<32x1024xbf16, #tpu.memory_space<vmem>>, vector<32x1024xbf16>
    %cst_8 = arith.constant dense<0.000000e+00> : vector<2x1024xf32>
    %10 = tpu.matmul %8, %9, %cst_8 {dimension_numbers = #tpu.dot_dimension_numbers<[1], [0], [0], [1], [0, 0, 1, 1], [], []>} : vector<2x32xbf16>, vector<32x1024xbf16>, vector<2x1024xf32> -> vector<2x1024xf32>
    %c0_9 = arith.constant 0 : index
    %c0_10 = arith.constant 0 : index
    %11 = vector.load %arg4[%c0_9, %c0_10] : memref<1x1024xf32, #tpu.memory_space<vmem>>, vector<1x1024xf32>
    %12 = vector.broadcast %11 : vector<1x1024xf32> to vector<2x1024xf32>
    %13 = arith.addf %10, %12 : vector<2x1024xf32>
    %cst_11 = arith.constant 0.000000e+00 : f32
    %14 = vector.broadcast %cst_11 : f32 to vector<2x1024xf32>
    %15 = arith.maximumf %13, %14 : vector<2x1024xf32>
    %16 = arith.truncf %15 : vector<2x1024xf32> to vector<2x1024xbf16>
    %c0_12 = arith.constant 0 : index
    %c0_13 = arith.constant 0 : index
    %17 = vector.load %arg5[%c0_12, %c0_13] : memref<2x1024xbf16, #tpu.memory_space<vmem>>, vector<2x1024xbf16>
    tpu.vector_store %arg5[%c0_12, %c0_13], %16 {strides = array<i32>} : memref<2x1024xbf16, #tpu.memory_space<vmem>>, vector<2x1024xbf16>,
    return
  }
}

module attributes {stable_mosaic.version = 11 : i64} {
  func.func @_conv_kernel(%arg0: i32, %arg1: i32, %arg2: memref<1x10x256xbf16, #tpu.memory_space<vmem>>, %arg3: memref<9x256x256xbf16, #tpu.memory_space<vmem>>, %arg4: memref<1x256xf32, #tpu.memory_space<vmem>>, %arg5: memref<3x4x1xbf16, #tpu.memory_space<vmem>>, %arg6: memref<1x4x256xbf16, #tpu.memory_space<vmem>>) attributes {dimension_semantics = [#tpu.dimension_semantics<parallel>, #tpu.dimension_semantics<arbitrary>], iteration_bounds = array<i64: 2, 1>, scalar_prefetch = 0 : i64, scratch_operands = 0 : i64, tpu.core_type = #tpu.core_type<tc>, window_params = [{transform_indices = @transform_0, window_bounds = array<i64: 1, 10, 256>}, {pipeline_mode = #tpu.pipeline_mode<synchronous>, transform_indices = @transform_1, window_bounds = array<i64: 9, 256, 256>}, {pipeline_mode = #tpu.pipeline_mode<synchronous>, transform_indices = @transform_2, window_bounds = array<i64: 1, 256>}, {pipeline_mode = #tpu.pipeline_mode<synchronous>, transform_indices = @transform_3, window_bounds = array<i64: 3, 4, 1>}, {transform_indices = @transform_4, window_bounds = array<i64: 1, 4, 256>}]} {
    %cst = arith.constant 0.000000e+00 : f32
    %0 = vector.broadcast %cst : f32 to vector<4x256xf32>
    %c0 = arith.constant 0 : index
    %c0_0 = arith.constant 0 : index
    %c0_1 = arith.constant 0 : index
    %1 = vector.load %arg2[%c0, %c0_0, %c0_1] : memref<1x10x256xbf16, #tpu.memory_space<vmem>>, vector<1x4x256xbf16>
    %2 = vector.shape_cast %1 : vector<1x4x256xbf16> to vector<4x256xbf16>
    %c0_2 = arith.constant 0 : index
    %c0_3 = arith.constant 0 : index
    %c0_4 = arith.constant 0 : index
    %3 = vector.load %arg5[%c0_2, %c0_3, %c0_4] : memref<3x4x1xbf16, #tpu.memory_space<vmem>>, vector<1x4x1xbf16>
    %4 = vector.shape_cast %3 : vector<1x4x1xbf16> to vector<4x1xbf16>
    %5 = vector.broadcast %4 : vector<4x1xbf16> to vector<4x256xbf16>
    %6 = arith.mulf %2, %5 : vector<4x256xbf16>
    %c0_5 = arith.constant 0 : index
    %c0_6 = arith.constant 0 : index
    %c0_7 = arith.constant 0 : index
    %7 = vector.load %arg3[%c0_5, %c0_6, %c0_7] : memref<9x256x256xbf16, #tpu.memory_space<vmem>>, vector<1x256x256xbf16>
    %8 = vector.shape_cast %7 : vector<1x256x256xbf16> to vector<256x256xbf16>
    %cst_8 = arith.constant dense<0.000000e+00> : vector<4x256xf32>
    %9 = tpu.matmul %6, %8, %cst_8 {dimension_numbers = #tpu.dot_dimension_numbers<[1], [0], [0], [1], [0, 0, 1, 1], [], []>} : vector<4x256xbf16>, vector<256x256xbf16>, vector<4x256xf32> -> vector<4x256xf32>
    %10 = arith.addf %0, %9 : vector<4x256xf32>
    %c0_9 = arith.constant 0 : index
    %c1 = arith.constant 1 : index
    %c0_10 = arith.constant 0 : index
    %11 = vector.load %arg2[%c0_9, %c1, %c0_10] : memref<1x10x256xbf16, #tpu.memory_space<vmem>>, vector<1x4x256xbf16>
    %12 = vector.shape_cast %11 : vector<1x4x256xbf16> to vector<4x256xbf16>
    %c1_11 = arith.constant 1 : index
    %c0_12 = arith.constant 0 : index
    %c0_13 = arith.constant 0 : index
    %13 = vector.load %arg3[%c1_11, %c0_12, %c0_13] : memref<9x256x256xbf16, #tpu.memory_space<vmem>>, vector<1x256x256xbf16>
    %14 = vector.shape_cast %13 : vector<1x256x256xbf16> to vector<256x256xbf16>
    %cst_14 = arith.constant dense<0.000000e+00> : vector<4x256xf32>
    %15 = tpu.matmul %12, %14, %cst_14 {dimension_numbers = #tpu.dot_dimension_numbers<[1], [0], [0], [1], [0, 0, 1, 1], [], []>} : vector<4x256xbf16>, vector<256x256xbf16>, vector<4x256xf32> -> vector<4x256xf32>
    %16 = arith.addf %10, %15 : vector<4x256xf32>
    %c0_15 = arith.constant 0 : index
    %c2 = arith.constant 2 : index
    %c0_16 = arith.constant 0 : index
    %17 = vector.load %arg2[%c0_15, %c2, %c0_16] : memref<1x10x256xbf16, #tpu.memory_space<vmem>>, vector<1x4x256xbf16>
    %18 = vector.shape_cast %17 : vector<1x4x256xbf16> to vector<4x256xbf16>
    %c2_17 = arith.constant 2 : index
    %c0_18 = arith.constant 0 : index
    %c0_19 = arith.constant 0 : index
    %19 = vector.load %arg5[%c2_17, %c0_18, %c0_19] : memref<3x4x1xbf16, #tpu.memory_space<vmem>>, vector<1x4x1xbf16>
    %20 = vector.shape_cast %19 : vector<1x4x1xbf16> to vector<4x1xbf16>
    %21 = vector.broadcast %20 : vector<4x1xbf16> to vector<4x256xbf16>
    %22 = arith.mulf %18, %21 : vector<4x256xbf16>
    %c2_20 = arith.constant 2 : index
    %c0_21 = arith.constant 0 : index
    %c0_22 = arith.constant 0 : index
    %23 = vector.load %arg3[%c2_20, %c0_21, %c0_22] : memref<9x256x256xbf16, #tpu.memory_space<vmem>>, vector<1x256x256xbf16>
    %24 = vector.shape_cast %23 : vector<1x256x256xbf16> to vector<256x256xbf16>
    %cst_23 = arith.constant dense<0.000000e+00> : vector<4x256xf32>
    %25 = tpu.matmul %22, %24, %cst_23 {dimension_numbers = #tpu.dot_dimension_numbers<[1], [0], [0], [1], [0, 0, 1, 1], [], []>} : vector<4x256xbf16>, vector<256x256xbf16>, vector<4x256xf32> -> vector<4x256xf32>
    %26 = arith.addf %16, %25 : vector<4x256xf32>
    %c0_24 = arith.constant 0 : index
    %c2_25 = arith.constant 2 : index
    %c0_26 = arith.constant 0 : index
    %27 = vector.load %arg2[%c0_24, %c2_25, %c0_26] : memref<1x10x256xbf16, #tpu.memory_space<vmem>>, vector<1x4x256xbf16>
    %28 = vector.shape_cast %27 : vector<1x4x256xbf16> to vector<4x256xbf16>
    %c0_27 = arith.constant 0 : index
    %c0_28 = arith.constant 0 : index
    %c0_29 = arith.constant 0 : index
    %29 = vector.load %arg5[%c0_27, %c0_28, %c0_29] : memref<3x4x1xbf16, #tpu.memory_space<vmem>>, vector<1x4x1xbf16>
    %30 = vector.shape_cast %29 : vector<1x4x1xbf16> to vector<4x1xbf16>
    %31 = vector.broadcast %30 : vector<4x1xbf16> to vector<4x256xbf16>
    %32 = arith.mulf %28, %31 : vector<4x256xbf16>
    %c3 = arith.constant 3 : index
    %c0_30 = arith.constant 0 : index
    %c0_31 = arith.constant 0 : index
    %33 = vector.load %arg3[%c3, %c0_30, %c0_31] : memref<9x256x256xbf16, #tpu.memory_space<vmem>>, vector<1x256x256xbf16>
    %34 = vector.shape_cast %33 : vector<1x256x256xbf16> to vector<256x256xbf16>
    %cst_32 = arith.constant dense<0.000000e+00> : vector<4x256xf32>
    %35 = tpu.matmul %32, %34, %cst_32 {dimension_numbers = #tpu.dot_dimension_numbers<[1], [0], [0], [1], [0, 0, 1, 1], [], []>} : vector<4x256xbf16>, vector<256x256xbf16>, vector<4x256xf32> -> vector<4x256xf32>
    %36 = arith.addf %26, %35 : vector<4x256xf32>
    %c0_33 = arith.constant 0 : index
    %c3_34 = arith.constant 3 : index
    %c0_35 = arith.constant 0 : index
    %37 = vector.load %arg2[%c0_33, %c3_34, %c0_35] : memref<1x10x256xbf16, #tpu.memory_space<vmem>>, vector<1x4x256xbf16>
    %38 = vector.shape_cast %37 : vector<1x4x256xbf16> to vector<4x256xbf16>
    %c4 = arith.constant 4 : index
    %c0_36 = arith.constant 0 : index
    %c0_37 = arith.constant 0 : index
    %39 = vector.load %arg3[%c4, %c0_36, %c0_37] : memref<9x256x256xbf16, #tpu.memory_space<vmem>>, vector<1x256x256xbf16>
    %40 = vector.shape_cast %39 : vector<1x256x256xbf16> to vector<256x256xbf16>
    %cst_38 = arith.constant dense<0.000000e+00> : vector<4x256xf32>
    %41 = tpu.matmul %38, %40, %cst_38 {dimension_numbers = #tpu.dot_dimension_numbers<[1], [0], [0], [1], [0, 0, 1, 1], [], []>} : vector<4x256xbf16>, vector<256x256xbf16>, vector<4x256xf32> -> vector<4x256xf32>
    %42 = arith.addf %36, %41 : vector<4x256xf32>
    %c0_39 = arith.constant 0 : index
    %c4_40 = arith.constant 4 : index
    %c0_41 = arith.constant 0 : index
    %43 = vector.load %arg2[%c0_39, %c4_40, %c0_41] : memref<1x10x256xbf16, #tpu.memory_space<vmem>>, vector<1x4x256xbf16>
    %44 = vector.shape_cast %43 : vector<1x4x256xbf16> to vector<4x256xbf16>
    %c2_42 = arith.constant 2 : index
    %c0_43 = arith.constant 0 : index
    %c0_44 = arith.constant 0 : index
    %45 = vector.load %arg5[%c2_42, %c0_43, %c0_44] : memref<3x4x1xbf16, #tpu.memory_space<vmem>>, vector<1x4x1xbf16>
    %46 = vector.shape_cast %45 : vector<1x4x1xbf16> to vector<4x1xbf16>
    %47 = vector.broadcast %46 : vector<4x1xbf16> to vector<4x256xbf16>
    %48 = arith.mulf %44, %47 : vector<4x256xbf16>
    %c5 = arith.constant 5 : index
    %c0_45 = arith.constant 0 : index
    %c0_46 = arith.constant 0 : index
    %49 = vector.load %arg3[%c5, %c0_45, %c0_46] : memref<9x256x256xbf16, #tpu.memory_space<vmem>>, vector<1x256x256xbf16>
    %50 = vector.shape_cast %49 : vector<1x256x256xbf16> to vector<256x256xbf16>
    %cst_47 = arith.constant dense<0.000000e+00> : vector<4x256xf32>
    %51 = tpu.matmul %48, %50, %cst_47 {dimension_numbers = #tpu.dot_dimension_numbers<[1], [0], [0], [1], [0, 0, 1, 1], [], []>} : vector<4x256xbf16>, vector<256x256xbf16>, vector<4x256xf32> -> vector<4x256xf32>
    %52 = arith.addf %42, %51 : vector<4x256xf32>
    %c0_48 = arith.constant 0 : index
    %c4_49 = arith.constant 4 : index
    %c0_50 = arith.constant 0 : index
    %53 = vector.load %arg2[%c0_48, %c4_49, %c0_50] : memref<1x10x256xbf16, #tpu.memory_space<vmem>>, vector<1x4x256xbf16>
    %54 = vector.shape_cast %53 : vector<1x4x256xbf16> to vector<4x256xbf16>
    %c0_51 = arith.constant 0 : index
    %c0_52 = arith.constant 0 : index
    %c0_53 = arith.constant 0 : index
    %55 = vector.load %arg5[%c0_51, %c0_52, %c0_53] : memref<3x4x1xbf16, #tpu.memory_space<vmem>>, vector<1x4x1xbf16>
    %56 = vector.shape_cast %55 : vector<1x4x1xbf16> to vector<4x1xbf16>
    %57 = vector.broadcast %56 : vector<4x1xbf16> to vector<4x256xbf16>
    %58 = arith.mulf %54, %57 : vector<4x256xbf16>
    %c6 = arith.constant 6 : index
    %c0_54 = arith.constant 0 : index
    %c0_55 = arith.constant 0 : index
    %59 = vector.load %arg3[%c6, %c0_54, %c0_55] : memref<9x256x256xbf16, #tpu.memory_space<vmem>>, vector<1x256x256xbf16>
    %60 = vector.shape_cast %59 : vector<1x256x256xbf16> to vector<256x256xbf16>
    %cst_56 = arith.constant dense<0.000000e+00> : vector<4x256xf32>
    %61 = tpu.matmul %58, %60, %cst_56 {dimension_numbers = #tpu.dot_dimension_numbers<[1], [0], [0], [1], [0, 0, 1, 1], [], []>} : vector<4x256xbf16>, vector<256x256xbf16>, vector<4x256xf32> -> vector<4x256xf32>
    %62 = arith.addf %52, %61 : vector<4x256xf32>
    %c0_57 = arith.constant 0 : index
    %c5_58 = arith.constant 5 : index
    %c0_59 = arith.constant 0 : index
    %63 = vector.load %arg2[%c0_57, %c5_58, %c0_59] : memref<1x10x256xbf16, #tpu.memory_space<vmem>>, vector<1x4x256xbf16>
    %64 = vector.shape_cast %63 : vector<1x4x256xbf16> to vector<4x256xbf16>
    %c7 = arith.constant 7 : index
    %c0_60 = arith.constant 0 : index
    %c0_61 = arith.constant 0 : index
    %65 = vector.load %arg3[%c7, %c0_60, %c0_61] : memref<9x256x256xbf16, #tpu.memory_space<vmem>>, vector<1x256x256xbf16>
    %66 = vector.shape_cast %65 : vector<1x256x256xbf16> to vector<256x256xbf16>
    %cst_62 = arith.constant dense<0.000000e+00> : vector<4x256xf32>
    %67 = tpu.matmul %64, %66, %cst_62 {dimension_numbers = #tpu.dot_dimension_numbers<[1], [0], [0], [1], [0, 0, 1, 1], [], []>} : vector<4x256xbf16>, vector<256x256xbf16>, vector<4x256xf32> -> vector<4x256xf32>
    %68 = arith.addf %62, %67 : vector<4x256xf32>
    %c0_63 = arith.constant 0 : index
    %c6_64 = arith.constant 6 : index
    %c0_65 = arith.constant 0 : index
    %69 = vector.load %arg2[%c0_63, %c6_64, %c0_65] : memref<1x10x256xbf16, #tpu.memory_space<vmem>>, vector<1x4x256xbf16>
    %70 = vector.shape_cast %69 : vector<1x4x256xbf16> to vector<4x256xbf16>
    %c2_66 = arith.constant 2 : index
    %c0_67 = arith.constant 0 : index
    %c0_68 = arith.constant 0 : index
    %71 = vector.load %arg5[%c2_66, %c0_67, %c0_68] : memref<3x4x1xbf16, #tpu.memory_space<vmem>>, vector<1x4x1xbf16>
    %72 = vector.shape_cast %71 : vector<1x4x1xbf16> to vector<4x1xbf16>
    %73 = vector.broadcast %72 : vector<4x1xbf16> to vector<4x256xbf16>
    %74 = arith.mulf %70, %73 : vector<4x256xbf16>
    %c8 = arith.constant 8 : index
    %c0_69 = arith.constant 0 : index
    %c0_70 = arith.constant 0 : index
    %75 = vector.load %arg3[%c8, %c0_69, %c0_70] : memref<9x256x256xbf16, #tpu.memory_space<vmem>>, vector<1x256x256xbf16>
    %76 = vector.shape_cast %75 : vector<1x256x256xbf16> to vector<256x256xbf16>
    %cst_71 = arith.constant dense<0.000000e+00> : vector<4x256xf32>
    %77 = tpu.matmul %74, %76, %cst_71 {dimension_numbers = #tpu.dot_dimension_numbers<[1], [0], [0], [1], [0, 0, 1, 1], [], []>} : vector<4x256xbf16>, vector<256x256xbf16>, vector<4x256xf32> -> vector<4x256xf32>
    %78 = arith.addf %68, %77 : vector<4x256xf32>
    %c0_72 = arith.constant 0 : index
    %c0_73 = arith.constant 0 : index
    %79 = vector.load %arg4[%c0_72, %c0_73] : memref<1x256xf32, #tpu.memory_space<vmem>>, vector<1x256xf32>
    %80 = vector.broadcast %79 : vector<1x256xf32> to vector<4x256xf32>
    %81 = arith.addf %78, %80 : vector<4x256xf32>
    %cst_74 = arith.constant 0.000000e+00 : f32
    %82 = vector.broadcast %cst_74 : f32 to vector<4x256xf32>
    %83 = arith.maximumf %81, %82 : vector<4x256xf32>
    %84 = arith.truncf %83 : vector<4x256xf32> to vector<4x256xbf16>
    %c0_75 = arith.constant 0 : index
    %c0_76 = arith.constant 0 : index
    %c0_77 = arith.constant 0 : index
    %85 = vector.load %arg6[%c0_75, %c0_76, %c0_77] : memref<1x4x256xbf16, #tpu.memory_space<vmem>>, vector<1x4x256xbf16>
    %86 = vector.shape_cast %85 : vector<1x4x256xbf16> to vector<4x256xbf16>
    %87 = vector.shape_cast %84 : vector<4x256xbf16> to vector<1x4x256xbf16>
    tpu.vector_store %arg6[%c0_75, %c0_76, %c0_77], %87 {strides = array<i32>} : memref<1x4x256xbf16, #tpu.memory_space<vmem>>, vector<1x4x256xbf16>,
    return
  }
  func.func @transform_0(%arg0: i32, %arg1: i32) -> (i32, i32, i32) {
    %c0_i32 = arith.constant 0 : i32
    %c0_i32_0 = arith.constant 0 : i32
    %c0_i32_1 = arith.constant 0 : i32
    return %arg0, %c0_i32, %c0_i32_0 : i32, i32, i32
  }
  func.func @transform_1(%arg0: i32, %arg1: i32) -> (i32, i32, i32) {
    %c0_i32 = arith.constant 0 : i32
    %c0_i32_0 = arith.constant 0 : i32
    %c0_i32_1 = arith.constant 0 : i32
    %c0_i32_2 = arith.constant 0 : i32
    return %c0_i32, %c0_i32_0, %c0_i32_1 : i32, i32, i32
  }
  func.func @transform_2(%arg0: i32, %arg1: i32) -> (i32, i32) {
    %c0_i32 = arith.constant 0 : i32
    %c0_i32_0 = arith.constant 0 : i32
    %c0_i32_1 = arith.constant 0 : i32
    return %c0_i32, %c0_i32_0 : i32, i32
  }
  func.func @transform_3(%arg0: i32, %arg1: i32) -> (i32, i32, i32) {
    %c0_i32 = arith.constant 0 : i32
    %c0_i32_0 = arith.constant 0 : i32
    %c0_i32_1 = arith.constant 0 : i32
    %c0_i32_2 = arith.constant 0 : i32
    return %c0_i32, %c0_i32_0, %c0_i32_1 : i32, i32, i32
  }
  func.func @transform_4(%arg0: i32, %arg1: i32) -> (i32, i32, i32) {
    %c0_i32 = arith.constant 0 : i32
    %c0_i32_0 = arith.constant 0 : i32
    return %arg0, %arg1, %c0_i32 : i32, i32, i32
  }
}

module attributes {stable_mosaic.version = 11 : i64} {
  func.func @_conv_kernel(%arg0: i32, %arg1: i32, %arg2: memref<1x36x256xbf16, #tpu.memory_space<vmem>>, %arg3: memref<25x256x128xbf16, #tpu.memory_space<vmem>>, %arg4: memref<1x128xf32, #tpu.memory_space<vmem>>, %arg5: memref<5x16x1xbf16, #tpu.memory_space<vmem>>, %arg6: memref<1x16x128xbf16, #tpu.memory_space<vmem>>) attributes {dimension_semantics = [#tpu.dimension_semantics<parallel>, #tpu.dimension_semantics<arbitrary>], iteration_bounds = array<i64: 2, 1>, scalar_prefetch = 0 : i64, scratch_operands = 0 : i64, tpu.core_type = #tpu.core_type<tc>, window_params = [{transform_indices = @transform_0, window_bounds = array<i64: 1, 36, 256>}, {pipeline_mode = #tpu.pipeline_mode<synchronous>, transform_indices = @transform_1, window_bounds = array<i64: 25, 256, 128>}, {pipeline_mode = #tpu.pipeline_mode<synchronous>, transform_indices = @transform_2, window_bounds = array<i64: 1, 128>}, {pipeline_mode = #tpu.pipeline_mode<synchronous>, transform_indices = @transform_3, window_bounds = array<i64: 5, 16, 1>}, {transform_indices = @transform_4, window_bounds = array<i64: 1, 16, 128>}]} {
    %cst = arith.constant 0.000000e+00 : f32
    %0 = vector.broadcast %cst : f32 to vector<16x128xf32>
    %c0 = arith.constant 0 : index
    %c0_0 = arith.constant 0 : index
    %c0_1 = arith.constant 0 : index
    %1 = vector.load %arg2[%c0, %c0_0, %c0_1] : memref<1x36x256xbf16, #tpu.memory_space<vmem>>, vector<1x16x256xbf16>
    %2 = vector.shape_cast %1 : vector<1x16x256xbf16> to vector<16x256xbf16>
    %c0_2 = arith.constant 0 : index
    %c0_3 = arith.constant 0 : index
    %c0_4 = arith.constant 0 : index
    %3 = vector.load %arg5[%c0_2, %c0_3, %c0_4] : memref<5x16x1xbf16, #tpu.memory_space<vmem>>, vector<1x16x1xbf16>
    %4 = vector.shape_cast %3 : vector<1x16x1xbf16> to vector<16x1xbf16>
    %5 = vector.broadcast %4 : vector<16x1xbf16> to vector<16x256xbf16>
    %6 = arith.mulf %2, %5 : vector<16x256xbf16>
    %c0_5 = arith.constant 0 : index
    %c0_6 = arith.constant 0 : index
    %c0_7 = arith.constant 0 : index
    %7 = vector.load %arg3[%c0_5, %c0_6, %c0_7] : memref<25x256x128xbf16, #tpu.memory_space<vmem>>, vector<1x256x128xbf16>
    %8 = vector.shape_cast %7 : vector<1x256x128xbf16> to vector<256x128xbf16>
    %cst_8 = arith.constant dense<0.000000e+00> : vector<16x128xf32>
    %9 = tpu.matmul %6, %8, %cst_8 {dimension_numbers = #tpu.dot_dimension_numbers<[1], [0], [0], [1], [0, 0, 1, 1], [], []>} : vector<16x256xbf16>, vector<256x128xbf16>, vector<16x128xf32> -> vector<16x128xf32>
    %10 = arith.addf %0, %9 : vector<16x128xf32>
    %c0_9 = arith.constant 0 : index
    %c1 = arith.constant 1 : index
    %c0_10 = arith.constant 0 : index
    %11 = vector.load %arg2[%c0_9, %c1, %c0_10] : memref<1x36x256xbf16, #tpu.memory_space<vmem>>, vector<1x16x256xbf16>
    %12 = vector.shape_cast %11 : vector<1x16x256xbf16> to vector<16x256xbf16>
    %c1_11 = arith.constant 1 : index
    %c0_12 = arith.constant 0 : index
    %c0_13 = arith.constant 0 : index
    %13 = vector.load %arg5[%c1_11, %c0_12, %c0_13] : memref<5x16x1xbf16, #tpu.memory_space<vmem>>, vector<1x16x1xbf16>
    %14 = vector.shape_cast %13 : vector<1x16x1xbf16> to vector<16x1xbf16>
    %15 = vector.broadcast %14 : vector<16x1xbf16> to vector<16x256xbf16>
    %16 = arith.mulf %12, %15 : vector<16x256xbf16>
    %c1_14 = arith.constant 1 : index
    %c0_15 = arith.constant 0 : index
    %c0_16 = arith.constant 0 : index
    %17 = vector.load %arg3[%c1_14, %c0_15, %c0_16] : memref<25x256x128xbf16, #tpu.memory_space<vmem>>, vector<1x256x128xbf16>
    %18 = vector.shape_cast %17 : vector<1x256x128xbf16> to vector<256x128xbf16>
    %cst_17 = arith.constant dense<0.000000e+00> : vector<16x128xf32>
    %19 = tpu.matmul %16, %18, %cst_17 {dimension_numbers = #tpu.dot_dimension_numbers<[1], [0], [0], [1], [0, 0, 1, 1], [], []>} : vector<16x256xbf16>, vector<256x128xbf16>, vector<16x128xf32> -> vector<16x128xf32>
    %20 = arith.addf %10, %19 : vector<16x128xf32>
    %c0_18 = arith.constant 0 : index
    %c2 = arith.constant 2 : index
    %c0_19 = arith.constant 0 : index
    %21 = vector.load %arg2[%c0_18, %c2, %c0_19] : memref<1x36x256xbf16, #tpu.memory_space<vmem>>, vector<1x16x256xbf16>
    %22 = vector.shape_cast %21 : vector<1x16x256xbf16> to vector<16x256xbf16>
    %c2_20 = arith.constant 2 : index
    %c0_21 = arith.constant 0 : index
    %c0_22 = arith.constant 0 : index
    %23 = vector.load %arg3[%c2_20, %c0_21, %c0_22] : memref<25x256x128xbf16, #tpu.memory_space<vmem>>, vector<1x256x128xbf16>
    %24 = vector.shape_cast %23 : vector<1x256x128xbf16> to vector<256x128xbf16>
    %cst_23 = arith.constant dense<0.000000e+00> : vector<16x128xf32>
    %25 = tpu.matmul %22, %24, %cst_23 {dimension_numbers = #tpu.dot_dimension_numbers<[1], [0], [0], [1], [0, 0, 1, 1], [], []>} : vector<16x256xbf16>, vector<256x128xbf16>, vector<16x128xf32> -> vector<16x128xf32>
    %26 = arith.addf %20, %25 : vector<16x128xf32>
    %c0_24 = arith.constant 0 : index
    %c3 = arith.constant 3 : index
    %c0_25 = arith.constant 0 : index
    %27 = vector.load %arg2[%c0_24, %c3, %c0_25] : memref<1x36x256xbf16, #tpu.memory_space<vmem>>, vector<1x16x256xbf16>
    %28 = vector.shape_cast %27 : vector<1x16x256xbf16> to vector<16x256xbf16>
    %c3_26 = arith.constant 3 : index
    %c0_27 = arith.constant 0 : index
    %c0_28 = arith.constant 0 : index
    %29 = vector.load %arg5[%c3_26, %c0_27, %c0_28] : memref<5x16x1xbf16, #tpu.memory_space<vmem>>, vector<1x16x1xbf16>
    %30 = vector.shape_cast %29 : vector<1x16x1xbf16> to vector<16x1xbf16>
    %31 = vector.broadcast %30 : vector<16x1xbf16> to vector<16x256xbf16>
    %32 = arith.mulf %28, %31 : vector<16x256xbf16>
    %c3_29 = arith.constant 3 : index
    %c0_30 = arith.constant 0 : index
    %c0_31 = arith.constant 0 : index
    %33 = vector.load %arg3[%c3_29, %c0_30, %c0_31] : memref<25x256x128xbf16, #tpu.memory_space<vmem>>, vector<1x256x128xbf16>
    %34 = vector.shape_cast %33 : vector<1x256x128xbf16> to vector<256x128xbf16>
    %cst_32 = arith.constant dense<0.000000e+00> : vector<16x128xf32>
    %35 = tpu.matmul %32, %34, %cst_32 {dimension_numbers = #tpu.dot_dimension_numbers<[1], [0], [0], [1], [0, 0, 1, 1], [], []>} : vector<16x256xbf16>, vector<256x128xbf16>, vector<16x128xf32> -> vector<16x128xf32>
    %36 = arith.addf %26, %35 : vector<16x128xf32>
    %c0_33 = arith.constant 0 : index
    %c4 = arith.constant 4 : index
    %c0_34 = arith.constant 0 : index
    %37 = vector.load %arg2[%c0_33, %c4, %c0_34] : memref<1x36x256xbf16, #tpu.memory_space<vmem>>, vector<1x16x256xbf16>
    %38 = vector.shape_cast %37 : vector<1x16x256xbf16> to vector<16x256xbf16>
    %c4_35 = arith.constant 4 : index
    %c0_36 = arith.constant 0 : index
    %c0_37 = arith.constant 0 : index
    %39 = vector.load %arg5[%c4_35, %c0_36, %c0_37] : memref<5x16x1xbf16, #tpu.memory_space<vmem>>, vector<1x16x1xbf16>
    %40 = vector.shape_cast %39 : vector<1x16x1xbf16> to vector<16x1xbf16>
    %41 = vector.broadcast %40 : vector<16x1xbf16> to vector<16x256xbf16>
    %42 = arith.mulf %38, %41 : vector<16x256xbf16>
    %c4_38 = arith.constant 4 : index
    %c0_39 = arith.constant 0 : index
    %c0_40 = arith.constant 0 : index
    %43 = vector.load %arg3[%c4_38, %c0_39, %c0_40] : memref<25x256x128xbf16, #tpu.memory_space<vmem>>, vector<1x256x128xbf16>
    %44 = vector.shape_cast %43 : vector<1x256x128xbf16> to vector<256x128xbf16>
    %cst_41 = arith.constant dense<0.000000e+00> : vector<16x128xf32>
    %45 = tpu.matmul %42, %44, %cst_41 {dimension_numbers = #tpu.dot_dimension_numbers<[1], [0], [0], [1], [0, 0, 1, 1], [], []>} : vector<16x256xbf16>, vector<256x128xbf16>, vector<16x128xf32> -> vector<16x128xf32>
    %46 = arith.addf %36, %45 : vector<16x128xf32>
    %c0_42 = arith.constant 0 : index
    %c4_43 = arith.constant 4 : index
    %c0_44 = arith.constant 0 : index
    %47 = vector.load %arg2[%c0_42, %c4_43, %c0_44] : memref<1x36x256xbf16, #tpu.memory_space<vmem>>, vector<1x16x256xbf16>
    %48 = vector.shape_cast %47 : vector<1x16x256xbf16> to vector<16x256xbf16>
    %c0_45 = arith.constant 0 : index
    %c0_46 = arith.constant 0 : index
    %c0_47 = arith.constant 0 : index
    %49 = vector.load %arg5[%c0_45, %c0_46, %c0_47] : memref<5x16x1xbf16, #tpu.memory_space<vmem>>, vector<1x16x1xbf16>
    %50 = vector.shape_cast %49 : vector<1x16x1xbf16> to vector<16x1xbf16>
    %51 = vector.broadcast %50 : vector<16x1xbf16> to vector<16x256xbf16>
    %52 = arith.mulf %48, %51 : vector<16x256xbf16>
    %c5 = arith.constant 5 : index
    %c0_48 = arith.constant 0 : index
    %c0_49 = arith.constant 0 : index
    %53 = vector.load %arg3[%c5, %c0_48, %c0_49] : memref<25x256x128xbf16, #tpu.memory_space<vmem>>, vector<1x256x128xbf16>
    %54 = vector.shape_cast %53 : vector<1x256x128xbf16> to vector<256x128xbf16>
    %cst_50 = arith.constant dense<0.000000e+00> : vector<16x128xf32>
    %55 = tpu.matmul %52, %54, %cst_50 {dimension_numbers = #tpu.dot_dimension_numbers<[1], [0], [0], [1], [0, 0, 1, 1], [], []>} : vector<16x256xbf16>, vector<256x128xbf16>, vector<16x128xf32> -> vector<16x128xf32>
    %56 = arith.addf %46, %55 : vector<16x128xf32>
    %c0_51 = arith.constant 0 : index
    %c5_52 = arith.constant 5 : index
    %c0_53 = arith.constant 0 : index
    %57 = vector.load %arg2[%c0_51, %c5_52, %c0_53] : memref<1x36x256xbf16, #tpu.memory_space<vmem>>, vector<1x16x256xbf16>
    %58 = vector.shape_cast %57 : vector<1x16x256xbf16> to vector<16x256xbf16>
    %c1_54 = arith.constant 1 : index
    %c0_55 = arith.constant 0 : index
    %c0_56 = arith.constant 0 : index
    %59 = vector.load %arg5[%c1_54, %c0_55, %c0_56] : memref<5x16x1xbf16, #tpu.memory_space<vmem>>, vector<1x16x1xbf16>
    %60 = vector.shape_cast %59 : vector<1x16x1xbf16> to vector<16x1xbf16>
    %61 = vector.broadcast %60 : vector<16x1xbf16> to vector<16x256xbf16>
    %62 = arith.mulf %58, %61 : vector<16x256xbf16>
    %c6 = arith.constant 6 : index
    %c0_57 = arith.constant 0 : index
    %c0_58 = arith.constant 0 : index
    %63 = vector.load %arg3[%c6, %c0_57, %c0_58] : memref<25x256x128xbf16, #tpu.memory_space<vmem>>, vector<1x256x128xbf16>
    %64 = vector.shape_cast %63 : vector<1x256x128xbf16> to vector<256x128xbf16>
    %cst_59 = arith.constant dense<0.000000e+00> : vector<16x128xf32>
    %65 = tpu.matmul %62, %64, %cst_59 {dimension_numbers = #tpu.dot_dimension_numbers<[1], [0], [0], [1], [0, 0, 1, 1], [], []>} : vector<16x256xbf16>, vector<256x128xbf16>, vector<16x128xf32> -> vector<16x128xf32>
    %66 = arith.addf %56, %65 : vector<16x128xf32>
    %c0_60 = arith.constant 0 : index
    %c6_61 = arith.constant 6 : index
    %c0_62 = arith.constant 0 : index
    %67 = vector.load %arg2[%c0_60, %c6_61, %c0_62] : memref<1x36x256xbf16, #tpu.memory_space<vmem>>, vector<1x16x256xbf16>
    %68 = vector.shape_cast %67 : vector<1x16x256xbf16> to vector<16x256xbf16>
    %c7 = arith.constant 7 : index
    %c0_63 = arith.constant 0 : index
    %c0_64 = arith.constant 0 : index
    %69 = vector.load %arg3[%c7, %c0_63, %c0_64] : memref<25x256x128xbf16, #tpu.memory_space<vmem>>, vector<1x256x128xbf16>
    %70 = vector.shape_cast %69 : vector<1x256x128xbf16> to vector<256x128xbf16>
    %cst_65 = arith.constant dense<0.000000e+00> : vector<16x128xf32>
    %71 = tpu.matmul %68, %70, %cst_65 {dimension_numbers = #tpu.dot_dimension_numbers<[1], [0], [0], [1], [0, 0, 1, 1], [], []>} : vector<16x256xbf16>, vector<256x128xbf16>, vector<16x128xf32> -> vector<16x128xf32>
    %72 = arith.addf %66, %71 : vector<16x128xf32>
    %c0_66 = arith.constant 0 : index
    %c7_67 = arith.constant 7 : index
    %c0_68 = arith.constant 0 : index
    %73 = vector.load %arg2[%c0_66, %c7_67, %c0_68] : memref<1x36x256xbf16, #tpu.memory_space<vmem>>, vector<1x16x256xbf16>
    %74 = vector.shape_cast %73 : vector<1x16x256xbf16> to vector<16x256xbf16>
    %c3_69 = arith.constant 3 : index
    %c0_70 = arith.constant 0 : index
    %c0_71 = arith.constant 0 : index
    %75 = vector.load %arg5[%c3_69, %c0_70, %c0_71] : memref<5x16x1xbf16, #tpu.memory_space<vmem>>, vector<1x16x1xbf16>
    %76 = vector.shape_cast %75 : vector<1x16x1xbf16> to vector<16x1xbf16>
    %77 = vector.broadcast %76 : vector<16x1xbf16> to vector<16x256xbf16>
    %78 = arith.mulf %74, %77 : vector<16x256xbf16>
    %c8 = arith.constant 8 : index
    %c0_72 = arith.constant 0 : index
    %c0_73 = arith.constant 0 : index
    %79 = vector.load %arg3[%c8, %c0_72, %c0_73] : memref<25x256x128xbf16, #tpu.memory_space<vmem>>, vector<1x256x128xbf16>
    %80 = vector.shape_cast %79 : vector<1x256x128xbf16> to vector<256x128xbf16>
    %cst_74 = arith.constant dense<0.000000e+00> : vector<16x128xf32>
    %81 = tpu.matmul %78, %80, %cst_74 {dimension_numbers = #tpu.dot_dimension_numbers<[1], [0], [0], [1], [0, 0, 1, 1], [], []>} : vector<16x256xbf16>, vector<256x128xbf16>, vector<16x128xf32> -> vector<16x128xf32>
    %82 = arith.addf %72, %81 : vector<16x128xf32>
    %c0_75 = arith.constant 0 : index
    %c8_76 = arith.constant 8 : index
    %c0_77 = arith.constant 0 : index
    %83 = vector.load %arg2[%c0_75, %c8_76, %c0_77] : memref<1x36x256xbf16, #tpu.memory_space<vmem>>, vector<1x16x256xbf16>
    %84 = vector.shape_cast %83 : vector<1x16x256xbf16> to vector<16x256xbf16>
    %c4_78 = arith.constant 4 : index
    %c0_79 = arith.constant 0 : index
    %c0_80 = arith.constant 0 : index
    %85 = vector.load %arg5[%c4_78, %c0_79, %c0_80] : memref<5x16x1xbf16, #tpu.memory_space<vmem>>, vector<1x16x1xbf16>
    %86 = vector.shape_cast %85 : vector<1x16x1xbf16> to vector<16x1xbf16>
    %87 = vector.broadcast %86 : vector<16x1xbf16> to vector<16x256xbf16>
    %88 = arith.mulf %84, %87 : vector<16x256xbf16>
    %c9 = arith.constant 9 : index
    %c0_81 = arith.constant 0 : index
    %c0_82 = arith.constant 0 : index
    %89 = vector.load %arg3[%c9, %c0_81, %c0_82] : memref<25x256x128xbf16, #tpu.memory_space<vmem>>, vector<1x256x128xbf16>
    %90 = vector.shape_cast %89 : vector<1x256x128xbf16> to vector<256x128xbf16>
    %cst_83 = arith.constant dense<0.000000e+00> : vector<16x128xf32>
    %91 = tpu.matmul %88, %90, %cst_83 {dimension_numbers = #tpu.dot_dimension_numbers<[1], [0], [0], [1], [0, 0, 1, 1], [], []>} : vector<16x256xbf16>, vector<256x128xbf16>, vector<16x128xf32> -> vector<16x128xf32>
    %92 = arith.addf %82, %91 : vector<16x128xf32>
    %c0_84 = arith.constant 0 : index
    %c8_85 = arith.constant 8 : index
    %c0_86 = arith.constant 0 : index
    %93 = vector.load %arg2[%c0_84, %c8_85, %c0_86] : memref<1x36x256xbf16, #tpu.memory_space<vmem>>, vector<1x16x256xbf16>
    %94 = vector.shape_cast %93 : vector<1x16x256xbf16> to vector<16x256xbf16>
    %c0_87 = arith.constant 0 : index
    %c0_88 = arith.constant 0 : index
    %c0_89 = arith.constant 0 : index
    %95 = vector.load %arg5[%c0_87, %c0_88, %c0_89] : memref<5x16x1xbf16, #tpu.memory_space<vmem>>, vector<1x16x1xbf16>
    %96 = vector.shape_cast %95 : vector<1x16x1xbf16> to vector<16x1xbf16>
    %97 = vector.broadcast %96 : vector<16x1xbf16> to vector<16x256xbf16>
    %98 = arith.mulf %94, %97 : vector<16x256xbf16>
    %c10 = arith.constant 10 : index
    %c0_90 = arith.constant 0 : index
    %c0_91 = arith.constant 0 : index
    %99 = vector.load %arg3[%c10, %c0_90, %c0_91] : memref<25x256x128xbf16, #tpu.memory_space<vmem>>, vector<1x256x128xbf16>
    %100 = vector.shape_cast %99 : vector<1x256x128xbf16> to vector<256x128xbf16>
    %cst_92 = arith.constant dense<0.000000e+00> : vector<16x128xf32>
    %101 = tpu.matmul %98, %100, %cst_92 {dimension_numbers = #tpu.dot_dimension_numbers<[1], [0], [0], [1], [0, 0, 1, 1], [], []>} : vector<16x256xbf16>, vector<256x128xbf16>, vector<16x128xf32> -> vector<16x128xf32>
    %102 = arith.addf %92, %101 : vector<16x128xf32>
    %c0_93 = arith.constant 0 : index
    %c9_94 = arith.constant 9 : index
    %c0_95 = arith.constant 0 : index
    %103 = vector.load %arg2[%c0_93, %c9_94, %c0_95] : memref<1x36x256xbf16, #tpu.memory_space<vmem>>, vector<1x16x256xbf16>
    %104 = vector.shape_cast %103 : vector<1x16x256xbf16> to vector<16x256xbf16>
    %c1_96 = arith.constant 1 : index
    %c0_97 = arith.constant 0 : index
    %c0_98 = arith.constant 0 : index
    %105 = vector.load %arg5[%c1_96, %c0_97, %c0_98] : memref<5x16x1xbf16, #tpu.memory_space<vmem>>, vector<1x16x1xbf16>
    %106 = vector.shape_cast %105 : vector<1x16x1xbf16> to vector<16x1xbf16>
    %107 = vector.broadcast %106 : vector<16x1xbf16> to vector<16x256xbf16>
    %108 = arith.mulf %104, %107 : vector<16x256xbf16>
    %c11 = arith.constant 11 : index
    %c0_99 = arith.constant 0 : index
    %c0_100 = arith.constant 0 : index
    %109 = vector.load %arg3[%c11, %c0_99, %c0_100] : memref<25x256x128xbf16, #tpu.memory_space<vmem>>, vector<1x256x128xbf16>
    %110 = vector.shape_cast %109 : vector<1x256x128xbf16> to vector<256x128xbf16>
    %cst_101 = arith.constant dense<0.000000e+00> : vector<16x128xf32>
    %111 = tpu.matmul %108, %110, %cst_101 {dimension_numbers = #tpu.dot_dimension_numbers<[1], [0], [0], [1], [0, 0, 1, 1], [], []>} : vector<16x256xbf16>, vector<256x128xbf16>, vector<16x128xf32> -> vector<16x128xf32>
    %112 = arith.addf %102, %111 : vector<16x128xf32>
    %c0_102 = arith.constant 0 : index
    %c10_103 = arith.constant 10 : index
    %c0_104 = arith.constant 0 : index
    %113 = vector.load %arg2[%c0_102, %c10_103, %c0_104] : memref<1x36x256xbf16, #tpu.memory_space<vmem>>, vector<1x16x256xbf16>
    %114 = vector.shape_cast %113 : vector<1x16x256xbf16> to vector<16x256xbf16>
    %c12 = arith.constant 12 : index
    %c0_105 = arith.constant 0 : index
    %c0_106 = arith.constant 0 : index
    %115 = vector.load %arg3[%c12, %c0_105, %c0_106] : memref<25x256x128xbf16, #tpu.memory_space<vmem>>, vector<1x256x128xbf16>
    %116 = vector.shape_cast %115 : vector<1x256x128xbf16> to vector<256x128xbf16>
    %cst_107 = arith.constant dense<0.000000e+00> : vector<16x128xf32>
    %117 = tpu.matmul %114, %116, %cst_107 {dimension_numbers = #tpu.dot_dimension_numbers<[1], [0], [0], [1], [0, 0, 1, 1], [], []>} : vector<16x256xbf16>, vector<256x128xbf16>, vector<16x128xf32> -> vector<16x128xf32>
    %118 = arith.addf %112, %117 : vector<16x128xf32>
    %c0_108 = arith.constant 0 : index
    %c11_109 = arith.constant 11 : index
    %c0_110 = arith.constant 0 : index
    %119 = vector.load %arg2[%c0_108, %c11_109, %c0_110] : memref<1x36x256xbf16, #tpu.memory_space<vmem>>, vector<1x16x256xbf16>
    %120 = vector.shape_cast %119 : vector<1x16x256xbf16> to vector<16x256xbf16>
    %c3_111 = arith.constant 3 : index
    %c0_112 = arith.constant 0 : index
    %c0_113 = arith.constant 0 : index
    %121 = vector.load %arg5[%c3_111, %c0_112, %c0_113] : memref<5x16x1xbf16, #tpu.memory_space<vmem>>, vector<1x16x1xbf16>
    %122 = vector.shape_cast %121 : vector<1x16x1xbf16> to vector<16x1xbf16>
    %123 = vector.broadcast %122 : vector<16x1xbf16> to vector<16x256xbf16>
    %124 = arith.mulf %120, %123 : vector<16x256xbf16>
    %c13 = arith.constant 13 : index
    %c0_114 = arith.constant 0 : index
    %c0_115 = arith.constant 0 : index
    %125 = vector.load %arg3[%c13, %c0_114, %c0_115] : memref<25x256x128xbf16, #tpu.memory_space<vmem>>, vector<1x256x128xbf16>
    %126 = vector.shape_cast %125 : vector<1x256x128xbf16> to vector<256x128xbf16>
    %cst_116 = arith.constant dense<0.000000e+00> : vector<16x128xf32>
    %127 = tpu.matmul %124, %126, %cst_116 {dimension_numbers = #tpu.dot_dimension_numbers<[1], [0], [0], [1], [0, 0, 1, 1], [], []>} : vector<16x256xbf16>, vector<256x128xbf16>, vector<16x128xf32> -> vector<16x128xf32>
    %128 = arith.addf %118, %127 : vector<16x128xf32>
    %c0_117 = arith.constant 0 : index
    %c12_118 = arith.constant 12 : index
    %c0_119 = arith.constant 0 : index
    %129 = vector.load %arg2[%c0_117, %c12_118, %c0_119] : memref<1x36x256xbf16, #tpu.memory_space<vmem>>, vector<1x16x256xbf16>
    %130 = vector.shape_cast %129 : vector<1x16x256xbf16> to vector<16x256xbf16>
    %c4_120 = arith.constant 4 : index
    %c0_121 = arith.constant 0 : index
    %c0_122 = arith.constant 0 : index
    %131 = vector.load %arg5[%c4_120, %c0_121, %c0_122] : memref<5x16x1xbf16, #tpu.memory_space<vmem>>, vector<1x16x1xbf16>
    %132 = vector.shape_cast %131 : vector<1x16x1xbf16> to vector<16x1xbf16>
    %133 = vector.broadcast %132 : vector<16x1xbf16> to vector<16x256xbf16>
    %134 = arith.mulf %130, %133 : vector<16x256xbf16>
    %c14 = arith.constant 14 : index
    %c0_123 = arith.constant 0 : index
    %c0_124 = arith.constant 0 : index
    %135 = vector.load %arg3[%c14, %c0_123, %c0_124] : memref<25x256x128xbf16, #tpu.memory_space<vmem>>, vector<1x256x128xbf16>
    %136 = vector.shape_cast %135 : vector<1x256x128xbf16> to vector<256x128xbf16>
    %cst_125 = arith.constant dense<0.000000e+00> : vector<16x128xf32>
    %137 = tpu.matmul %134, %136, %cst_125 {dimension_numbers = #tpu.dot_dimension_numbers<[1], [0], [0], [1], [0, 0, 1, 1], [], []>} : vector<16x256xbf16>, vector<256x128xbf16>, vector<16x128xf32> -> vector<16x128xf32>
    %138 = arith.addf %128, %137 : vector<16x128xf32>
    %c0_126 = arith.constant 0 : index
    %c12_127 = arith.constant 12 : index
    %c0_128 = arith.constant 0 : index
    %139 = vector.load %arg2[%c0_126, %c12_127, %c0_128] : memref<1x36x256xbf16, #tpu.memory_space<vmem>>, vector<1x16x256xbf16>
    %140 = vector.shape_cast %139 : vector<1x16x256xbf16> to vector<16x256xbf16>
    %c0_129 = arith.constant 0 : index
    %c0_130 = arith.constant 0 : index
    %c0_131 = arith.constant 0 : index
    %141 = vector.load %arg5[%c0_129, %c0_130, %c0_131] : memref<5x16x1xbf16, #tpu.memory_space<vmem>>, vector<1x16x1xbf16>
    %142 = vector.shape_cast %141 : vector<1x16x1xbf16> to vector<16x1xbf16>
    %143 = vector.broadcast %142 : vector<16x1xbf16> to vector<16x256xbf16>
    %144 = arith.mulf %140, %143 : vector<16x256xbf16>
    %c15 = arith.constant 15 : index
    %c0_132 = arith.constant 0 : index
    %c0_133 = arith.constant 0 : index
    %145 = vector.load %arg3[%c15, %c0_132, %c0_133] : memref<25x256x128xbf16, #tpu.memory_space<vmem>>, vector<1x256x128xbf16>
    %146 = vector.shape_cast %145 : vector<1x256x128xbf16> to vector<256x128xbf16>
    %cst_134 = arith.constant dense<0.000000e+00> : vector<16x128xf32>
    %147 = tpu.matmul %144, %146, %cst_134 {dimension_numbers = #tpu.dot_dimension_numbers<[1], [0], [0], [1], [0, 0, 1, 1], [], []>} : vector<16x256xbf16>, vector<256x128xbf16>, vector<16x128xf32> -> vector<16x128xf32>
    %148 = arith.addf %138, %147 : vector<16x128xf32>
    %c0_135 = arith.constant 0 : index
    %c13_136 = arith.constant 13 : index
    %c0_137 = arith.constant 0 : index
    %149 = vector.load %arg2[%c0_135, %c13_136, %c0_137] : memref<1x36x256xbf16, #tpu.memory_space<vmem>>, vector<1x16x256xbf16>
    %150 = vector.shape_cast %149 : vector<1x16x256xbf16> to vector<16x256xbf16>
    %c1_138 = arith.constant 1 : index
    %c0_139 = arith.constant 0 : index
    %c0_140 = arith.constant 0 : index
    %151 = vector.load %arg5[%c1_138, %c0_139, %c0_140] : memref<5x16x1xbf16, #tpu.memory_space<vmem>>, vector<1x16x1xbf16>
    %152 = vector.shape_cast %151 : vector<1x16x1xbf16> to vector<16x1xbf16>
    %153 = vector.broadcast %152 : vector<16x1xbf16> to vector<16x256xbf16>
    %154 = arith.mulf %150, %153 : vector<16x256xbf16>
    %c16 = arith.constant 16 : index
    %c0_141 = arith.constant 0 : index
    %c0_142 = arith.constant 0 : index
    %155 = vector.load %arg3[%c16, %c0_141, %c0_142] : memref<25x256x128xbf16, #tpu.memory_space<vmem>>, vector<1x256x128xbf16>
    %156 = vector.shape_cast %155 : vector<1x256x128xbf16> to vector<256x128xbf16>
    %cst_143 = arith.constant dense<0.000000e+00> : vector<16x128xf32>
    %157 = tpu.matmul %154, %156, %cst_143 {dimension_numbers = #tpu.dot_dimension_numbers<[1], [0], [0], [1], [0, 0, 1, 1], [], []>} : vector<16x256xbf16>, vector<256x128xbf16>, vector<16x128xf32> -> vector<16x128xf32>
    %158 = arith.addf %148, %157 : vector<16x128xf32>
    %c0_144 = arith.constant 0 : index
    %c14_145 = arith.constant 14 : index
    %c0_146 = arith.constant 0 : index
    %159 = vector.load %arg2[%c0_144, %c14_145, %c0_146] : memref<1x36x256xbf16, #tpu.memory_space<vmem>>, vector<1x16x256xbf16>
    %160 = vector.shape_cast %159 : vector<1x16x256xbf16> to vector<16x256xbf16>
    %c17 = arith.constant 17 : index
    %c0_147 = arith.constant 0 : index
    %c0_148 = arith.constant 0 : index
    %161 = vector.load %arg3[%c17, %c0_147, %c0_148] : memref<25x256x128xbf16, #tpu.memory_space<vmem>>, vector<1x256x128xbf16>
    %162 = vector.shape_cast %161 : vector<1x256x128xbf16> to vector<256x128xbf16>
    %cst_149 = arith.constant dense<0.000000e+00> : vector<16x128xf32>
    %163 = tpu.matmul %160, %162, %cst_149 {dimension_numbers = #tpu.dot_dimension_numbers<[1], [0], [0], [1], [0, 0, 1, 1], [], []>} : vector<16x256xbf16>, vector<256x128xbf16>, vector<16x128xf32> -> vector<16x128xf32>
    %164 = arith.addf %158, %163 : vector<16x128xf32>
    %c0_150 = arith.constant 0 : index
    %c15_151 = arith.constant 15 : index
    %c0_152 = arith.constant 0 : index
    %165 = vector.load %arg2[%c0_150, %c15_151, %c0_152] : memref<1x36x256xbf16, #tpu.memory_space<vmem>>, vector<1x16x256xbf16>
    %166 = vector.shape_cast %165 : vector<1x16x256xbf16> to vector<16x256xbf16>
    %c3_153 = arith.constant 3 : index
    %c0_154 = arith.constant 0 : index
    %c0_155 = arith.constant 0 : index
    %167 = vector.load %arg5[%c3_153, %c0_154, %c0_155] : memref<5x16x1xbf16, #tpu.memory_space<vmem>>, vector<1x16x1xbf16>
    %168 = vector.shape_cast %167 : vector<1x16x1xbf16> to vector<16x1xbf16>
    %169 = vector.broadcast %168 : vector<16x1xbf16> to vector<16x256xbf16>
    %170 = arith.mulf %166, %169 : vector<16x256xbf16>
    %c18 = arith.constant 18 : index
    %c0_156 = arith.constant 0 : index
    %c0_157 = arith.constant 0 : index
    %171 = vector.load %arg3[%c18, %c0_156, %c0_157] : memref<25x256x128xbf16, #tpu.memory_space<vmem>>, vector<1x256x128xbf16>
    %172 = vector.shape_cast %171 : vector<1x256x128xbf16> to vector<256x128xbf16>
    %cst_158 = arith.constant dense<0.000000e+00> : vector<16x128xf32>
    %173 = tpu.matmul %170, %172, %cst_158 {dimension_numbers = #tpu.dot_dimension_numbers<[1], [0], [0], [1], [0, 0, 1, 1], [], []>} : vector<16x256xbf16>, vector<256x128xbf16>, vector<16x128xf32> -> vector<16x128xf32>
    %174 = arith.addf %164, %173 : vector<16x128xf32>
    %c0_159 = arith.constant 0 : index
    %c16_160 = arith.constant 16 : index
    %c0_161 = arith.constant 0 : index
    %175 = vector.load %arg2[%c0_159, %c16_160, %c0_161] : memref<1x36x256xbf16, #tpu.memory_space<vmem>>, vector<1x16x256xbf16>
    %176 = vector.shape_cast %175 : vector<1x16x256xbf16> to vector<16x256xbf16>
    %c4_162 = arith.constant 4 : index
    %c0_163 = arith.constant 0 : index
    %c0_164 = arith.constant 0 : index
    %177 = vector.load %arg5[%c4_162, %c0_163, %c0_164] : memref<5x16x1xbf16, #tpu.memory_space<vmem>>, vector<1x16x1xbf16>
    %178 = vector.shape_cast %177 : vector<1x16x1xbf16> to vector<16x1xbf16>
    %179 = vector.broadcast %178 : vector<16x1xbf16> to vector<16x256xbf16>
    %180 = arith.mulf %176, %179 : vector<16x256xbf16>
    %c19 = arith.constant 19 : index
    %c0_165 = arith.constant 0 : index
    %c0_166 = arith.constant 0 : index
    %181 = vector.load %arg3[%c19, %c0_165, %c0_166] : memref<25x256x128xbf16, #tpu.memory_space<vmem>>, vector<1x256x128xbf16>
    %182 = vector.shape_cast %181 : vector<1x256x128xbf16> to vector<256x128xbf16>
    %cst_167 = arith.constant dense<0.000000e+00> : vector<16x128xf32>
    %183 = tpu.matmul %180, %182, %cst_167 {dimension_numbers = #tpu.dot_dimension_numbers<[1], [0], [0], [1], [0, 0, 1, 1], [], []>} : vector<16x256xbf16>, vector<256x128xbf16>, vector<16x128xf32> -> vector<16x128xf32>
    %184 = arith.addf %174, %183 : vector<16x128xf32>
    %c0_168 = arith.constant 0 : index
    %c16_169 = arith.constant 16 : index
    %c0_170 = arith.constant 0 : index
    %185 = vector.load %arg2[%c0_168, %c16_169, %c0_170] : memref<1x36x256xbf16, #tpu.memory_space<vmem>>, vector<1x16x256xbf16>
    %186 = vector.shape_cast %185 : vector<1x16x256xbf16> to vector<16x256xbf16>
    %c0_171 = arith.constant 0 : index
    %c0_172 = arith.constant 0 : index
    %c0_173 = arith.constant 0 : index
    %187 = vector.load %arg5[%c0_171, %c0_172, %c0_173] : memref<5x16x1xbf16, #tpu.memory_space<vmem>>, vector<1x16x1xbf16>
    %188 = vector.shape_cast %187 : vector<1x16x1xbf16> to vector<16x1xbf16>
    %189 = vector.broadcast %188 : vector<16x1xbf16> to vector<16x256xbf16>
    %190 = arith.mulf %186, %189 : vector<16x256xbf16>
    %c20 = arith.constant 20 : index
    %c0_174 = arith.constant 0 : index
    %c0_175 = arith.constant 0 : index
    %191 = vector.load %arg3[%c20, %c0_174, %c0_175] : memref<25x256x128xbf16, #tpu.memory_space<vmem>>, vector<1x256x128xbf16>
    %192 = vector.shape_cast %191 : vector<1x256x128xbf16> to vector<256x128xbf16>
    %cst_176 = arith.constant dense<0.000000e+00> : vector<16x128xf32>
    %193 = tpu.matmul %190, %192, %cst_176 {dimension_numbers = #tpu.dot_dimension_numbers<[1], [0], [0], [1], [0, 0, 1, 1], [], []>} : vector<16x256xbf16>, vector<256x128xbf16>, vector<16x128xf32> -> vector<16x128xf32>
    %194 = arith.addf %184, %193 : vector<16x128xf32>
    %c0_177 = arith.constant 0 : index
    %c17_178 = arith.constant 17 : index
    %c0_179 = arith.constant 0 : index
    %195 = vector.load %arg2[%c0_177, %c17_178, %c0_179] : memref<1x36x256xbf16, #tpu.memory_space<vmem>>, vector<1x16x256xbf16>
    %196 = vector.shape_cast %195 : vector<1x16x256xbf16> to vector<16x256xbf16>
    %c1_180 = arith.constant 1 : index
    %c0_181 = arith.constant 0 : index
    %c0_182 = arith.constant 0 : index
    %197 = vector.load %arg5[%c1_180, %c0_181, %c0_182] : memref<5x16x1xbf16, #tpu.memory_space<vmem>>, vector<1x16x1xbf16>
    %198 = vector.shape_cast %197 : vector<1x16x1xbf16> to vector<16x1xbf16>
    %199 = vector.broadcast %198 : vector<16x1xbf16> to vector<16x256xbf16>
    %200 = arith.mulf %196, %199 : vector<16x256xbf16>
    %c21 = arith.constant 21 : index
    %c0_183 = arith.constant 0 : index
    %c0_184 = arith.constant 0 : index
    %201 = vector.load %arg3[%c21, %c0_183, %c0_184] : memref<25x256x128xbf16, #tpu.memory_space<vmem>>, vector<1x256x128xbf16>
    %202 = vector.shape_cast %201 : vector<1x256x128xbf16> to vector<256x128xbf16>
    %cst_185 = arith.constant dense<0.000000e+00> : vector<16x128xf32>
    %203 = tpu.matmul %200, %202, %cst_185 {dimension_numbers = #tpu.dot_dimension_numbers<[1], [0], [0], [1], [0, 0, 1, 1], [], []>} : vector<16x256xbf16>, vector<256x128xbf16>, vector<16x128xf32> -> vector<16x128xf32>
    %204 = arith.addf %194, %203 : vector<16x128xf32>
    %c0_186 = arith.constant 0 : index
    %c18_187 = arith.constant 18 : index
    %c0_188 = arith.constant 0 : index
    %205 = vector.load %arg2[%c0_186, %c18_187, %c0_188] : memref<1x36x256xbf16, #tpu.memory_space<vmem>>, vector<1x16x256xbf16>
    %206 = vector.shape_cast %205 : vector<1x16x256xbf16> to vector<16x256xbf16>
    %c22 = arith.constant 22 : index
    %c0_189 = arith.constant 0 : index
    %c0_190 = arith.constant 0 : index
    %207 = vector.load %arg3[%c22, %c0_189, %c0_190] : memref<25x256x128xbf16, #tpu.memory_space<vmem>>, vector<1x256x128xbf16>
    %208 = vector.shape_cast %207 : vector<1x256x128xbf16> to vector<256x128xbf16>
    %cst_191 = arith.constant dense<0.000000e+00> : vector<16x128xf32>
    %209 = tpu.matmul %206, %208, %cst_191 {dimension_numbers = #tpu.dot_dimension_numbers<[1], [0], [0], [1], [0, 0, 1, 1], [], []>} : vector<16x256xbf16>, vector<256x128xbf16>, vector<16x128xf32> -> vector<16x128xf32>
    %210 = arith.addf %204, %209 : vector<16x128xf32>
    %c0_192 = arith.constant 0 : index
    %c19_193 = arith.constant 19 : index
    %c0_194 = arith.constant 0 : index
    %211 = vector.load %arg2[%c0_192, %c19_193, %c0_194] : memref<1x36x256xbf16, #tpu.memory_space<vmem>>, vector<1x16x256xbf16>
    %212 = vector.shape_cast %211 : vector<1x16x256xbf16> to vector<16x256xbf16>
    %c3_195 = arith.constant 3 : index
    %c0_196 = arith.constant 0 : index
    %c0_197 = arith.constant 0 : index
    %213 = vector.load %arg5[%c3_195, %c0_196, %c0_197] : memref<5x16x1xbf16, #tpu.memory_space<vmem>>, vector<1x16x1xbf16>
    %214 = vector.shape_cast %213 : vector<1x16x1xbf16> to vector<16x1xbf16>
    %215 = vector.broadcast %214 : vector<16x1xbf16> to vector<16x256xbf16>
    %216 = arith.mulf %212, %215 : vector<16x256xbf16>
    %c23 = arith.constant 23 : index
    %c0_198 = arith.constant 0 : index
    %c0_199 = arith.constant 0 : index
    %217 = vector.load %arg3[%c23, %c0_198, %c0_199] : memref<25x256x128xbf16, #tpu.memory_space<vmem>>, vector<1x256x128xbf16>
    %218 = vector.shape_cast %217 : vector<1x256x128xbf16> to vector<256x128xbf16>
    %cst_200 = arith.constant dense<0.000000e+00> : vector<16x128xf32>
    %219 = tpu.matmul %216, %218, %cst_200 {dimension_numbers = #tpu.dot_dimension_numbers<[1], [0], [0], [1], [0, 0, 1, 1], [], []>} : vector<16x256xbf16>, vector<256x128xbf16>, vector<16x128xf32> -> vector<16x128xf32>
    %220 = arith.addf %210, %219 : vector<16x128xf32>
    %c0_201 = arith.constant 0 : index
    %c20_202 = arith.constant 20 : index
    %c0_203 = arith.constant 0 : index
    %221 = vector.load %arg2[%c0_201, %c20_202, %c0_203] : memref<1x36x256xbf16, #tpu.memory_space<vmem>>, vector<1x16x256xbf16>
    %222 = vector.shape_cast %221 : vector<1x16x256xbf16> to vector<16x256xbf16>
    %c4_204 = arith.constant 4 : index
    %c0_205 = arith.constant 0 : index
    %c0_206 = arith.constant 0 : index
    %223 = vector.load %arg5[%c4_204, %c0_205, %c0_206] : memref<5x16x1xbf16, #tpu.memory_space<vmem>>, vector<1x16x1xbf16>
    %224 = vector.shape_cast %223 : vector<1x16x1xbf16> to vector<16x1xbf16>
    %225 = vector.broadcast %224 : vector<16x1xbf16> to vector<16x256xbf16>
    %226 = arith.mulf %222, %225 : vector<16x256xbf16>
    %c24 = arith.constant 24 : index
    %c0_207 = arith.constant 0 : index
    %c0_208 = arith.constant 0 : index
    %227 = vector.load %arg3[%c24, %c0_207, %c0_208] : memref<25x256x128xbf16, #tpu.memory_space<vmem>>, vector<1x256x128xbf16>
    %228 = vector.shape_cast %227 : vector<1x256x128xbf16> to vector<256x128xbf16>
    %cst_209 = arith.constant dense<0.000000e+00> : vector<16x128xf32>
    %229 = tpu.matmul %226, %228, %cst_209 {dimension_numbers = #tpu.dot_dimension_numbers<[1], [0], [0], [1], [0, 0, 1, 1], [], []>} : vector<16x256xbf16>, vector<256x128xbf16>, vector<16x128xf32> -> vector<16x128xf32>
    %230 = arith.addf %220, %229 : vector<16x128xf32>
    %c0_210 = arith.constant 0 : index
    %c0_211 = arith.constant 0 : index
    %231 = vector.load %arg4[%c0_210, %c0_211] : memref<1x128xf32, #tpu.memory_space<vmem>>, vector<1x128xf32>
    %232 = vector.broadcast %231 : vector<1x128xf32> to vector<16x128xf32>
    %233 = arith.addf %230, %232 : vector<16x128xf32>
    %cst_212 = arith.constant 0.000000e+00 : f32
    %234 = vector.broadcast %cst_212 : f32 to vector<16x128xf32>
    %235 = arith.maximumf %233, %234 : vector<16x128xf32>
    %236 = arith.truncf %235 : vector<16x128xf32> to vector<16x128xbf16>
    %c0_213 = arith.constant 0 : index
    %c0_214 = arith.constant 0 : index
    %c0_215 = arith.constant 0 : index
    %237 = vector.load %arg6[%c0_213, %c0_214, %c0_215] : memref<1x16x128xbf16, #tpu.memory_space<vmem>>, vector<1x16x128xbf16>
    %238 = vector.shape_cast %237 : vector<1x16x128xbf16> to vector<16x128xbf16>
    %239 = vector.shape_cast %236 : vector<16x128xbf16> to vector<1x16x128xbf16>
    tpu.vector_store %arg6[%c0_213, %c0_214, %c0_215], %239 {strides = array<i32>} : memref<1x16x128xbf16, #tpu.memory_space<vmem>>, vector<1x16x128xbf16>,
    return
  }
  func.func @transform_0(%arg0: i32, %arg1: i32) -> (i32, i32, i32) {
    %c0_i32 = arith.constant 0 : i32
    %c0_i32_0 = arith.constant 0 : i32
    %c0_i32_1 = arith.constant 0 : i32
    return %arg0, %c0_i32, %c0_i32_0 : i32, i32, i32
  }
  func.func @transform_1(%arg0: i32, %arg1: i32) -> (i32, i32, i32) {
    %c0_i32 = arith.constant 0 : i32
    %c0_i32_0 = arith.constant 0 : i32
    %c0_i32_1 = arith.constant 0 : i32
    %c0_i32_2 = arith.constant 0 : i32
    return %c0_i32, %c0_i32_0, %c0_i32_1 : i32, i32, i32
  }
  func.func @transform_2(%arg0: i32, %arg1: i32) -> (i32, i32) {
    %c0_i32 = arith.constant 0 : i32
    %c0_i32_0 = arith.constant 0 : i32
    %c0_i32_1 = arith.constant 0 : i32
    return %c0_i32, %c0_i32_0 : i32, i32
  }
  func.func @transform_3(%arg0: i32, %arg1: i32) -> (i32, i32, i32) {
    %c0_i32 = arith.constant 0 : i32
    %c0_i32_0 = arith.constant 0 : i32
    %c0_i32_1 = arith.constant 0 : i32
    %c0_i32_2 = arith.constant 0 : i32
    return %c0_i32, %c0_i32_0, %c0_i32_1 : i32, i32, i32
  }
  func.func @transform_4(%arg0: i32, %arg1: i32) -> (i32, i32, i32) {
    %c0_i32 = arith.constant 0 : i32
    %c0_i32_0 = arith.constant 0 : i32
    return %arg0, %arg1, %c0_i32 : i32, i32, i32
  }
}

module attributes {stable_mosaic.version = 11 : i64} {
  func.func @_conv_kernel(%arg0: i32, %arg1: i32, %arg2: memref<1x100x128xbf16, #tpu.memory_space<vmem>>, %arg3: memref<25x128x128xbf16, #tpu.memory_space<vmem>>, %arg4: memref<1x128xf32, #tpu.memory_space<vmem>>, %arg5: memref<5x64x1xbf16, #tpu.memory_space<vmem>>, %arg6: memref<1x64x128xf32, #tpu.memory_space<vmem>>) attributes {dimension_semantics = [#tpu.dimension_semantics<parallel>, #tpu.dimension_semantics<arbitrary>], iteration_bounds = array<i64: 2, 1>, scalar_prefetch = 0 : i64, scratch_operands = 0 : i64, tpu.core_type = #tpu.core_type<tc>, window_params = [{transform_indices = @transform_0, window_bounds = array<i64: 1, 100, 128>}, {pipeline_mode = #tpu.pipeline_mode<synchronous>, transform_indices = @transform_1, window_bounds = array<i64: 25, 128, 128>}, {pipeline_mode = #tpu.pipeline_mode<synchronous>, transform_indices = @transform_2, window_bounds = array<i64: 1, 128>}, {pipeline_mode = #tpu.pipeline_mode<synchronous>, transform_indices = @transform_3, window_bounds = array<i64: 5, 64, 1>}, {transform_indices = @transform_4, window_bounds = array<i64: 1, 64, 128>}]} {
    %cst = arith.constant 0.000000e+00 : f32
    %0 = vector.broadcast %cst : f32 to vector<64x128xf32>
    %c0 = arith.constant 0 : index
    %c0_0 = arith.constant 0 : index
    %c0_1 = arith.constant 0 : index
    %1 = vector.load %arg2[%c0, %c0_0, %c0_1] : memref<1x100x128xbf16, #tpu.memory_space<vmem>>, vector<1x64x128xbf16>
    %2 = vector.shape_cast %1 : vector<1x64x128xbf16> to vector<64x128xbf16>
    %c0_2 = arith.constant 0 : index
    %c0_3 = arith.constant 0 : index
    %c0_4 = arith.constant 0 : index
    %3 = vector.load %arg5[%c0_2, %c0_3, %c0_4] : memref<5x64x1xbf16, #tpu.memory_space<vmem>>, vector<1x64x1xbf16>
    %4 = vector.shape_cast %3 : vector<1x64x1xbf16> to vector<64x1xbf16>
    %5 = vector.broadcast %4 : vector<64x1xbf16> to vector<64x128xbf16>
    %6 = arith.mulf %2, %5 : vector<64x128xbf16>
    %c0_5 = arith.constant 0 : index
    %c0_6 = arith.constant 0 : index
    %c0_7 = arith.constant 0 : index
    %7 = vector.load %arg3[%c0_5, %c0_6, %c0_7] : memref<25x128x128xbf16, #tpu.memory_space<vmem>>, vector<1x128x128xbf16>
    %8 = vector.shape_cast %7 : vector<1x128x128xbf16> to vector<128x128xbf16>
    %cst_8 = arith.constant dense<0.000000e+00> : vector<64x128xf32>
    %9 = tpu.matmul %6, %8, %cst_8 {dimension_numbers = #tpu.dot_dimension_numbers<[1], [0], [0], [1], [0, 0, 1, 1], [], []>} : vector<64x128xbf16>, vector<128x128xbf16>, vector<64x128xf32> -> vector<64x128xf32>
    %10 = arith.addf %0, %9 : vector<64x128xf32>
    %c0_9 = arith.constant 0 : index
    %c1 = arith.constant 1 : index
    %c0_10 = arith.constant 0 : index
    %11 = vector.load %arg2[%c0_9, %c1, %c0_10] : memref<1x100x128xbf16, #tpu.memory_space<vmem>>, vector<1x64x128xbf16>
    %12 = vector.shape_cast %11 : vector<1x64x128xbf16> to vector<64x128xbf16>
    %c1_11 = arith.constant 1 : index
    %c0_12 = arith.constant 0 : index
    %c0_13 = arith.constant 0 : index
    %13 = vector.load %arg5[%c1_11, %c0_12, %c0_13] : memref<5x64x1xbf16, #tpu.memory_space<vmem>>, vector<1x64x1xbf16>
    %14 = vector.shape_cast %13 : vector<1x64x1xbf16> to vector<64x1xbf16>
    %15 = vector.broadcast %14 : vector<64x1xbf16> to vector<64x128xbf16>
    %16 = arith.mulf %12, %15 : vector<64x128xbf16>
    %c1_14 = arith.constant 1 : index
    %c0_15 = arith.constant 0 : index
    %c0_16 = arith.constant 0 : index
    %17 = vector.load %arg3[%c1_14, %c0_15, %c0_16] : memref<25x128x128xbf16, #tpu.memory_space<vmem>>, vector<1x128x128xbf16>
    %18 = vector.shape_cast %17 : vector<1x128x128xbf16> to vector<128x128xbf16>
    %cst_17 = arith.constant dense<0.000000e+00> : vector<64x128xf32>
    %19 = tpu.matmul %16, %18, %cst_17 {dimension_numbers = #tpu.dot_dimension_numbers<[1], [0], [0], [1], [0, 0, 1, 1], [], []>} : vector<64x128xbf16>, vector<128x128xbf16>, vector<64x128xf32> -> vector<64x128xf32>
    %20 = arith.addf %10, %19 : vector<64x128xf32>
    %c0_18 = arith.constant 0 : index
    %c2 = arith.constant 2 : index
    %c0_19 = arith.constant 0 : index
    %21 = vector.load %arg2[%c0_18, %c2, %c0_19] : memref<1x100x128xbf16, #tpu.memory_space<vmem>>, vector<1x64x128xbf16>
    %22 = vector.shape_cast %21 : vector<1x64x128xbf16> to vector<64x128xbf16>
    %c2_20 = arith.constant 2 : index
    %c0_21 = arith.constant 0 : index
    %c0_22 = arith.constant 0 : index
    %23 = vector.load %arg3[%c2_20, %c0_21, %c0_22] : memref<25x128x128xbf16, #tpu.memory_space<vmem>>, vector<1x128x128xbf16>
    %24 = vector.shape_cast %23 : vector<1x128x128xbf16> to vector<128x128xbf16>
    %cst_23 = arith.constant dense<0.000000e+00> : vector<64x128xf32>
    %25 = tpu.matmul %22, %24, %cst_23 {dimension_numbers = #tpu.dot_dimension_numbers<[1], [0], [0], [1], [0, 0, 1, 1], [], []>} : vector<64x128xbf16>, vector<128x128xbf16>, vector<64x128xf32> -> vector<64x128xf32>
    %26 = arith.addf %20, %25 : vector<64x128xf32>
    %c0_24 = arith.constant 0 : index
    %c3 = arith.constant 3 : index
    %c0_25 = arith.constant 0 : index
    %27 = vector.load %arg2[%c0_24, %c3, %c0_25] : memref<1x100x128xbf16, #tpu.memory_space<vmem>>, vector<1x64x128xbf16>
    %28 = vector.shape_cast %27 : vector<1x64x128xbf16> to vector<64x128xbf16>
    %c3_26 = arith.constant 3 : index
    %c0_27 = arith.constant 0 : index
    %c0_28 = arith.constant 0 : index
    %29 = vector.load %arg5[%c3_26, %c0_27, %c0_28] : memref<5x64x1xbf16, #tpu.memory_space<vmem>>, vector<1x64x1xbf16>
    %30 = vector.shape_cast %29 : vector<1x64x1xbf16> to vector<64x1xbf16>
    %31 = vector.broadcast %30 : vector<64x1xbf16> to vector<64x128xbf16>
    %32 = arith.mulf %28, %31 : vector<64x128xbf16>
    %c3_29 = arith.constant 3 : index
    %c0_30 = arith.constant 0 : index
    %c0_31 = arith.constant 0 : index
    %33 = vector.load %arg3[%c3_29, %c0_30, %c0_31] : memref<25x128x128xbf16, #tpu.memory_space<vmem>>, vector<1x128x128xbf16>
    %34 = vector.shape_cast %33 : vector<1x128x128xbf16> to vector<128x128xbf16>
    %cst_32 = arith.constant dense<0.000000e+00> : vector<64x128xf32>
    %35 = tpu.matmul %32, %34, %cst_32 {dimension_numbers = #tpu.dot_dimension_numbers<[1], [0], [0], [1], [0, 0, 1, 1], [], []>} : vector<64x128xbf16>, vector<128x128xbf16>, vector<64x128xf32> -> vector<64x128xf32>
    %36 = arith.addf %26, %35 : vector<64x128xf32>
    %c0_33 = arith.constant 0 : index
    %c4 = arith.constant 4 : index
    %c0_34 = arith.constant 0 : index
    %37 = vector.load %arg2[%c0_33, %c4, %c0_34] : memref<1x100x128xbf16, #tpu.memory_space<vmem>>, vector<1x64x128xbf16>
    %38 = vector.shape_cast %37 : vector<1x64x128xbf16> to vector<64x128xbf16>
    %c4_35 = arith.constant 4 : index
    %c0_36 = arith.constant 0 : index
    %c0_37 = arith.constant 0 : index
    %39 = vector.load %arg5[%c4_35, %c0_36, %c0_37] : memref<5x64x1xbf16, #tpu.memory_space<vmem>>, vector<1x64x1xbf16>
    %40 = vector.shape_cast %39 : vector<1x64x1xbf16> to vector<64x1xbf16>
    %41 = vector.broadcast %40 : vector<64x1xbf16> to vector<64x128xbf16>
    %42 = arith.mulf %38, %41 : vector<64x128xbf16>
    %c4_38 = arith.constant 4 : index
    %c0_39 = arith.constant 0 : index
    %c0_40 = arith.constant 0 : index
    %43 = vector.load %arg3[%c4_38, %c0_39, %c0_40] : memref<25x128x128xbf16, #tpu.memory_space<vmem>>, vector<1x128x128xbf16>
    %44 = vector.shape_cast %43 : vector<1x128x128xbf16> to vector<128x128xbf16>
    %cst_41 = arith.constant dense<0.000000e+00> : vector<64x128xf32>
    %45 = tpu.matmul %42, %44, %cst_41 {dimension_numbers = #tpu.dot_dimension_numbers<[1], [0], [0], [1], [0, 0, 1, 1], [], []>} : vector<64x128xbf16>, vector<128x128xbf16>, vector<64x128xf32> -> vector<64x128xf32>
    %46 = arith.addf %36, %45 : vector<64x128xf32>
    %c0_42 = arith.constant 0 : index
    %c8 = arith.constant 8 : index
    %c0_43 = arith.constant 0 : index
    %47 = vector.load %arg2[%c0_42, %c8, %c0_43] : memref<1x100x128xbf16, #tpu.memory_space<vmem>>, vector<1x64x128xbf16>
    %48 = vector.shape_cast %47 : vector<1x64x128xbf16> to vector<64x128xbf16>
    %c0_44 = arith.constant 0 : index
    %c0_45 = arith.constant 0 : index
    %c0_46 = arith.constant 0 : index
    %49 = vector.load %arg5[%c0_44, %c0_45, %c0_46] : memref<5x64x1xbf16, #tpu.memory_space<vmem>>, vector<1x64x1xbf16>
    %50 = vector.shape_cast %49 : vector<1x64x1xbf16> to vector<64x1xbf16>
    %51 = vector.broadcast %50 : vector<64x1xbf16> to vector<64x128xbf16>
    %52 = arith.mulf %48, %51 : vector<64x128xbf16>
    %c5 = arith.constant 5 : index
    %c0_47 = arith.constant 0 : index
    %c0_48 = arith.constant 0 : index
    %53 = vector.load %arg3[%c5, %c0_47, %c0_48] : memref<25x128x128xbf16, #tpu.memory_space<vmem>>, vector<1x128x128xbf16>
    %54 = vector.shape_cast %53 : vector<1x128x128xbf16> to vector<128x128xbf16>
    %cst_49 = arith.constant dense<0.000000e+00> : vector<64x128xf32>
    %55 = tpu.matmul %52, %54, %cst_49 {dimension_numbers = #tpu.dot_dimension_numbers<[1], [0], [0], [1], [0, 0, 1, 1], [], []>} : vector<64x128xbf16>, vector<128x128xbf16>, vector<64x128xf32> -> vector<64x128xf32>
    %56 = arith.addf %46, %55 : vector<64x128xf32>
    %c0_50 = arith.constant 0 : index
    %c9 = arith.constant 9 : index
    %c0_51 = arith.constant 0 : index
    %57 = vector.load %arg2[%c0_50, %c9, %c0_51] : memref<1x100x128xbf16, #tpu.memory_space<vmem>>, vector<1x64x128xbf16>
    %58 = vector.shape_cast %57 : vector<1x64x128xbf16> to vector<64x128xbf16>
    %c1_52 = arith.constant 1 : index
    %c0_53 = arith.constant 0 : index
    %c0_54 = arith.constant 0 : index
    %59 = vector.load %arg5[%c1_52, %c0_53, %c0_54] : memref<5x64x1xbf16, #tpu.memory_space<vmem>>, vector<1x64x1xbf16>
    %60 = vector.shape_cast %59 : vector<1x64x1xbf16> to vector<64x1xbf16>
    %61 = vector.broadcast %60 : vector<64x1xbf16> to vector<64x128xbf16>
    %62 = arith.mulf %58, %61 : vector<64x128xbf16>
    %c6 = arith.constant 6 : index
    %c0_55 = arith.constant 0 : index
    %c0_56 = arith.constant 0 : index
    %63 = vector.load %arg3[%c6, %c0_55, %c0_56] : memref<25x128x128xbf16, #tpu.memory_space<vmem>>, vector<1x128x128xbf16>
    %64 = vector.shape_cast %63 : vector<1x128x128xbf16> to vector<128x128xbf16>
    %cst_57 = arith.constant dense<0.000000e+00> : vector<64x128xf32>
    %65 = tpu.matmul %62, %64, %cst_57 {dimension_numbers = #tpu.dot_dimension_numbers<[1], [0], [0], [1], [0, 0, 1, 1], [], []>} : vector<64x128xbf16>, vector<128x128xbf16>, vector<64x128xf32> -> vector<64x128xf32>
    %66 = arith.addf %56, %65 : vector<64x128xf32>
    %c0_58 = arith.constant 0 : index
    %c10 = arith.constant 10 : index
    %c0_59 = arith.constant 0 : index
    %67 = vector.load %arg2[%c0_58, %c10, %c0_59] : memref<1x100x128xbf16, #tpu.memory_space<vmem>>, vector<1x64x128xbf16>
    %68 = vector.shape_cast %67 : vector<1x64x128xbf16> to vector<64x128xbf16>
    %c7 = arith.constant 7 : index
    %c0_60 = arith.constant 0 : index
    %c0_61 = arith.constant 0 : index
    %69 = vector.load %arg3[%c7, %c0_60, %c0_61] : memref<25x128x128xbf16, #tpu.memory_space<vmem>>, vector<1x128x128xbf16>
    %70 = vector.shape_cast %69 : vector<1x128x128xbf16> to vector<128x128xbf16>
    %cst_62 = arith.constant dense<0.000000e+00> : vector<64x128xf32>
    %71 = tpu.matmul %68, %70, %cst_62 {dimension_numbers = #tpu.dot_dimension_numbers<[1], [0], [0], [1], [0, 0, 1, 1], [], []>} : vector<64x128xbf16>, vector<128x128xbf16>, vector<64x128xf32> -> vector<64x128xf32>
    %72 = arith.addf %66, %71 : vector<64x128xf32>
    %c0_63 = arith.constant 0 : index
    %c11 = arith.constant 11 : index
    %c0_64 = arith.constant 0 : index
    %73 = vector.load %arg2[%c0_63, %c11, %c0_64] : memref<1x100x128xbf16, #tpu.memory_space<vmem>>, vector<1x64x128xbf16>
    %74 = vector.shape_cast %73 : vector<1x64x128xbf16> to vector<64x128xbf16>
    %c3_65 = arith.constant 3 : index
    %c0_66 = arith.constant 0 : index
    %c0_67 = arith.constant 0 : index
    %75 = vector.load %arg5[%c3_65, %c0_66, %c0_67] : memref<5x64x1xbf16, #tpu.memory_space<vmem>>, vector<1x64x1xbf16>
    %76 = vector.shape_cast %75 : vector<1x64x1xbf16> to vector<64x1xbf16>
    %77 = vector.broadcast %76 : vector<64x1xbf16> to vector<64x128xbf16>
    %78 = arith.mulf %74, %77 : vector<64x128xbf16>
    %c8_68 = arith.constant 8 : index
    %c0_69 = arith.constant 0 : index
    %c0_70 = arith.constant 0 : index
    %79 = vector.load %arg3[%c8_68, %c0_69, %c0_70] : memref<25x128x128xbf16, #tpu.memory_space<vmem>>, vector<1x128x128xbf16>
    %80 = vector.shape_cast %79 : vector<1x128x128xbf16> to vector<128x128xbf16>
    %cst_71 = arith.constant dense<0.000000e+00> : vector<64x128xf32>
    %81 = tpu.matmul %78, %80, %cst_71 {dimension_numbers = #tpu.dot_dimension_numbers<[1], [0], [0], [1], [0, 0, 1, 1], [], []>} : vector<64x128xbf16>, vector<128x128xbf16>, vector<64x128xf32> -> vector<64x128xf32>
    %82 = arith.addf %72, %81 : vector<64x128xf32>
    %c0_72 = arith.constant 0 : index
    %c12 = arith.constant 12 : index
    %c0_73 = arith.constant 0 : index
    %83 = vector.load %arg2[%c0_72, %c12, %c0_73] : memref<1x100x128xbf16, #tpu.memory_space<vmem>>, vector<1x64x128xbf16>
    %84 = vector.shape_cast %83 : vector<1x64x128xbf16> to vector<64x128xbf16>
    %c4_74 = arith.constant 4 : index
    %c0_75 = arith.constant 0 : index
    %c0_76 = arith.constant 0 : index
    %85 = vector.load %arg5[%c4_74, %c0_75, %c0_76] : memref<5x64x1xbf16, #tpu.memory_space<vmem>>, vector<1x64x1xbf16>
    %86 = vector.shape_cast %85 : vector<1x64x1xbf16> to vector<64x1xbf16>
    %87 = vector.broadcast %86 : vector<64x1xbf16> to vector<64x128xbf16>
    %88 = arith.mulf %84, %87 : vector<64x128xbf16>
    %c9_77 = arith.constant 9 : index
    %c0_78 = arith.constant 0 : index
    %c0_79 = arith.constant 0 : index
    %89 = vector.load %arg3[%c9_77, %c0_78, %c0_79] : memref<25x128x128xbf16, #tpu.memory_space<vmem>>, vector<1x128x128xbf16>
    %90 = vector.shape_cast %89 : vector<1x128x128xbf16> to vector<128x128xbf16>
    %cst_80 = arith.constant dense<0.000000e+00> : vector<64x128xf32>
    %91 = tpu.matmul %88, %90, %cst_80 {dimension_numbers = #tpu.dot_dimension_numbers<[1], [0], [0], [1], [0, 0, 1, 1], [], []>} : vector<64x128xbf16>, vector<128x128xbf16>, vector<64x128xf32> -> vector<64x128xf32>
    %92 = arith.addf %82, %91 : vector<64x128xf32>
    %c0_81 = arith.constant 0 : index
    %c16 = arith.constant 16 : index
    %c0_82 = arith.constant 0 : index
    %93 = vector.load %arg2[%c0_81, %c16, %c0_82] : memref<1x100x128xbf16, #tpu.memory_space<vmem>>, vector<1x64x128xbf16>
    %94 = vector.shape_cast %93 : vector<1x64x128xbf16> to vector<64x128xbf16>
    %c0_83 = arith.constant 0 : index
    %c0_84 = arith.constant 0 : index
    %c0_85 = arith.constant 0 : index
    %95 = vector.load %arg5[%c0_83, %c0_84, %c0_85] : memref<5x64x1xbf16, #tpu.memory_space<vmem>>, vector<1x64x1xbf16>
    %96 = vector.shape_cast %95 : vector<1x64x1xbf16> to vector<64x1xbf16>
    %97 = vector.broadcast %96 : vector<64x1xbf16> to vector<64x128xbf16>
    %98 = arith.mulf %94, %97 : vector<64x128xbf16>
    %c10_86 = arith.constant 10 : index
    %c0_87 = arith.constant 0 : index
    %c0_88 = arith.constant 0 : index
    %99 = vector.load %arg3[%c10_86, %c0_87, %c0_88] : memref<25x128x128xbf16, #tpu.memory_space<vmem>>, vector<1x128x128xbf16>
    %100 = vector.shape_cast %99 : vector<1x128x128xbf16> to vector<128x128xbf16>
    %cst_89 = arith.constant dense<0.000000e+00> : vector<64x128xf32>
    %101 = tpu.matmul %98, %100, %cst_89 {dimension_numbers = #tpu.dot_dimension_numbers<[1], [0], [0], [1], [0, 0, 1, 1], [], []>} : vector<64x128xbf16>, vector<128x128xbf16>, vector<64x128xf32> -> vector<64x128xf32>
    %102 = arith.addf %92, %101 : vector<64x128xf32>
    %c0_90 = arith.constant 0 : index
    %c17 = arith.constant 17 : index
    %c0_91 = arith.constant 0 : index
    %103 = vector.load %arg2[%c0_90, %c17, %c0_91] : memref<1x100x128xbf16, #tpu.memory_space<vmem>>, vector<1x64x128xbf16>
    %104 = vector.shape_cast %103 : vector<1x64x128xbf16> to vector<64x128xbf16>
    %c1_92 = arith.constant 1 : index
    %c0_93 = arith.constant 0 : index
    %c0_94 = arith.constant 0 : index
    %105 = vector.load %arg5[%c1_92, %c0_93, %c0_94] : memref<5x64x1xbf16, #tpu.memory_space<vmem>>, vector<1x64x1xbf16>
    %106 = vector.shape_cast %105 : vector<1x64x1xbf16> to vector<64x1xbf16>
    %107 = vector.broadcast %106 : vector<64x1xbf16> to vector<64x128xbf16>
    %108 = arith.mulf %104, %107 : vector<64x128xbf16>
    %c11_95 = arith.constant 11 : index
    %c0_96 = arith.constant 0 : index
    %c0_97 = arith.constant 0 : index
    %109 = vector.load %arg3[%c11_95, %c0_96, %c0_97] : memref<25x128x128xbf16, #tpu.memory_space<vmem>>, vector<1x128x128xbf16>
    %110 = vector.shape_cast %109 : vector<1x128x128xbf16> to vector<128x128xbf16>
    %cst_98 = arith.constant dense<0.000000e+00> : vector<64x128xf32>
    %111 = tpu.matmul %108, %110, %cst_98 {dimension_numbers = #tpu.dot_dimension_numbers<[1], [0], [0], [1], [0, 0, 1, 1], [], []>} : vector<64x128xbf16>, vector<128x128xbf16>, vector<64x128xf32> -> vector<64x128xf32>
    %112 = arith.addf %102, %111 : vector<64x128xf32>
    %c0_99 = arith.constant 0 : index
    %c18 = arith.constant 18 : index
    %c0_100 = arith.constant 0 : index
    %113 = vector.load %arg2[%c0_99, %c18, %c0_100] : memref<1x100x128xbf16, #tpu.memory_space<vmem>>, vector<1x64x128xbf16>
    %114 = vector.shape_cast %113 : vector<1x64x128xbf16> to vector<64x128xbf16>
    %c12_101 = arith.constant 12 : index
    %c0_102 = arith.constant 0 : index
    %c0_103 = arith.constant 0 : index
    %115 = vector.load %arg3[%c12_101, %c0_102, %c0_103] : memref<25x128x128xbf16, #tpu.memory_space<vmem>>, vector<1x128x128xbf16>
    %116 = vector.shape_cast %115 : vector<1x128x128xbf16> to vector<128x128xbf16>
    %cst_104 = arith.constant dense<0.000000e+00> : vector<64x128xf32>
    %117 = tpu.matmul %114, %116, %cst_104 {dimension_numbers = #tpu.dot_dimension_numbers<[1], [0], [0], [1], [0, 0, 1, 1], [], []>} : vector<64x128xbf16>, vector<128x128xbf16>, vector<64x128xf32> -> vector<64x128xf32>
    %118 = arith.addf %112, %117 : vector<64x128xf32>
    %c0_105 = arith.constant 0 : index
    %c19 = arith.constant 19 : index
    %c0_106 = arith.constant 0 : index
    %119 = vector.load %arg2[%c0_105, %c19, %c0_106] : memref<1x100x128xbf16, #tpu.memory_space<vmem>>, vector<1x64x128xbf16>
    %120 = vector.shape_cast %119 : vector<1x64x128xbf16> to vector<64x128xbf16>
    %c3_107 = arith.constant 3 : index
    %c0_108 = arith.constant 0 : index
    %c0_109 = arith.constant 0 : index
    %121 = vector.load %arg5[%c3_107, %c0_108, %c0_109] : memref<5x64x1xbf16, #tpu.memory_space<vmem>>, vector<1x64x1xbf16>
    %122 = vector.shape_cast %121 : vector<1x64x1xbf16> to vector<64x1xbf16>
    %123 = vector.broadcast %122 : vector<64x1xbf16> to vector<64x128xbf16>
    %124 = arith.mulf %120, %123 : vector<64x128xbf16>
    %c13 = arith.constant 13 : index
    %c0_110 = arith.constant 0 : index
    %c0_111 = arith.constant 0 : index
    %125 = vector.load %arg3[%c13, %c0_110, %c0_111] : memref<25x128x128xbf16, #tpu.memory_space<vmem>>, vector<1x128x128xbf16>
    %126 = vector.shape_cast %125 : vector<1x128x128xbf16> to vector<128x128xbf16>
    %cst_112 = arith.constant dense<0.000000e+00> : vector<64x128xf32>
    %127 = tpu.matmul %124, %126, %cst_112 {dimension_numbers = #tpu.dot_dimension_numbers<[1], [0], [0], [1], [0, 0, 1, 1], [], []>} : vector<64x128xbf16>, vector<128x128xbf16>, vector<64x128xf32> -> vector<64x128xf32>
    %128 = arith.addf %118, %127 : vector<64x128xf32>
    %c0_113 = arith.constant 0 : index
    %c20 = arith.constant 20 : index
    %c0_114 = arith.constant 0 : index
    %129 = vector.load %arg2[%c0_113, %c20, %c0_114] : memref<1x100x128xbf16, #tpu.memory_space<vmem>>, vector<1x64x128xbf16>
    %130 = vector.shape_cast %129 : vector<1x64x128xbf16> to vector<64x128xbf16>
    %c4_115 = arith.constant 4 : index
    %c0_116 = arith.constant 0 : index
    %c0_117 = arith.constant 0 : index
    %131 = vector.load %arg5[%c4_115, %c0_116, %c0_117] : memref<5x64x1xbf16, #tpu.memory_space<vmem>>, vector<1x64x1xbf16>
    %132 = vector.shape_cast %131 : vector<1x64x1xbf16> to vector<64x1xbf16>
    %133 = vector.broadcast %132 : vector<64x1xbf16> to vector<64x128xbf16>
    %134 = arith.mulf %130, %133 : vector<64x128xbf16>
    %c14 = arith.constant 14 : index
    %c0_118 = arith.constant 0 : index
    %c0_119 = arith.constant 0 : index
    %135 = vector.load %arg3[%c14, %c0_118, %c0_119] : memref<25x128x128xbf16, #tpu.memory_space<vmem>>, vector<1x128x128xbf16>
    %136 = vector.shape_cast %135 : vector<1x128x128xbf16> to vector<128x128xbf16>
    %cst_120 = arith.constant dense<0.000000e+00> : vector<64x128xf32>
    %137 = tpu.matmul %134, %136, %cst_120 {dimension_numbers = #tpu.dot_dimension_numbers<[1], [0], [0], [1], [0, 0, 1, 1], [], []>} : vector<64x128xbf16>, vector<128x128xbf16>, vector<64x128xf32> -> vector<64x128xf32>
    %138 = arith.addf %128, %137 : vector<64x128xf32>
    %c0_121 = arith.constant 0 : index
    %c24 = arith.constant 24 : index
    %c0_122 = arith.constant 0 : index
    %139 = vector.load %arg2[%c0_121, %c24, %c0_122] : memref<1x100x128xbf16, #tpu.memory_space<vmem>>, vector<1x64x128xbf16>
    %140 = vector.shape_cast %139 : vector<1x64x128xbf16> to vector<64x128xbf16>
    %c0_123 = arith.constant 0 : index
    %c0_124 = arith.constant 0 : index
    %c0_125 = arith.constant 0 : index
    %141 = vector.load %arg5[%c0_123, %c0_124, %c0_125] : memref<5x64x1xbf16, #tpu.memory_space<vmem>>, vector<1x64x1xbf16>
    %142 = vector.shape_cast %141 : vector<1x64x1xbf16> to vector<64x1xbf16>
    %143 = vector.broadcast %142 : vector<64x1xbf16> to vector<64x128xbf16>
    %144 = arith.mulf %140, %143 : vector<64x128xbf16>
    %c15 = arith.constant 15 : index
    %c0_126 = arith.constant 0 : index
    %c0_127 = arith.constant 0 : index
    %145 = vector.load %arg3[%c15, %c0_126, %c0_127] : memref<25x128x128xbf16, #tpu.memory_space<vmem>>, vector<1x128x128xbf16>
    %146 = vector.shape_cast %145 : vector<1x128x128xbf16> to vector<128x128xbf16>
    %cst_128 = arith.constant dense<0.000000e+00> : vector<64x128xf32>
    %147 = tpu.matmul %144, %146, %cst_128 {dimension_numbers = #tpu.dot_dimension_numbers<[1], [0], [0], [1], [0, 0, 1, 1], [], []>} : vector<64x128xbf16>, vector<128x128xbf16>, vector<64x128xf32> -> vector<64x128xf32>
    %148 = arith.addf %138, %147 : vector<64x128xf32>
    %c0_129 = arith.constant 0 : index
    %c25 = arith.constant 25 : index
    %c0_130 = arith.constant 0 : index
    %149 = vector.load %arg2[%c0_129, %c25, %c0_130] : memref<1x100x128xbf16, #tpu.memory_space<vmem>>, vector<1x64x128xbf16>
    %150 = vector.shape_cast %149 : vector<1x64x128xbf16> to vector<64x128xbf16>
    %c1_131 = arith.constant 1 : index
    %c0_132 = arith.constant 0 : index
    %c0_133 = arith.constant 0 : index
    %151 = vector.load %arg5[%c1_131, %c0_132, %c0_133] : memref<5x64x1xbf16, #tpu.memory_space<vmem>>, vector<1x64x1xbf16>
    %152 = vector.shape_cast %151 : vector<1x64x1xbf16> to vector<64x1xbf16>
    %153 = vector.broadcast %152 : vector<64x1xbf16> to vector<64x128xbf16>
    %154 = arith.mulf %150, %153 : vector<64x128xbf16>
    %c16_134 = arith.constant 16 : index
    %c0_135 = arith.constant 0 : index
    %c0_136 = arith.constant 0 : index
    %155 = vector.load %arg3[%c16_134, %c0_135, %c0_136] : memref<25x128x128xbf16, #tpu.memory_space<vmem>>, vector<1x128x128xbf16>
    %156 = vector.shape_cast %155 : vector<1x128x128xbf16> to vector<128x128xbf16>
    %cst_137 = arith.constant dense<0.000000e+00> : vector<64x128xf32>
    %157 = tpu.matmul %154, %156, %cst_137 {dimension_numbers = #tpu.dot_dimension_numbers<[1], [0], [0], [1], [0, 0, 1, 1], [], []>} : vector<64x128xbf16>, vector<128x128xbf16>, vector<64x128xf32> -> vector<64x128xf32>
    %158 = arith.addf %148, %157 : vector<64x128xf32>
    %c0_138 = arith.constant 0 : index
    %c26 = arith.constant 26 : index
    %c0_139 = arith.constant 0 : index
    %159 = vector.load %arg2[%c0_138, %c26, %c0_139] : memref<1x100x128xbf16, #tpu.memory_space<vmem>>, vector<1x64x128xbf16>
    %160 = vector.shape_cast %159 : vector<1x64x128xbf16> to vector<64x128xbf16>
    %c17_140 = arith.constant 17 : index
    %c0_141 = arith.constant 0 : index
    %c0_142 = arith.constant 0 : index
    %161 = vector.load %arg3[%c17_140, %c0_141, %c0_142] : memref<25x128x128xbf16, #tpu.memory_space<vmem>>, vector<1x128x128xbf16>
    %162 = vector.shape_cast %161 : vector<1x128x128xbf16> to vector<128x128xbf16>
    %cst_143 = arith.constant dense<0.000000e+00> : vector<64x128xf32>
    %163 = tpu.matmul %160, %162, %cst_143 {dimension_numbers = #tpu.dot_dimension_numbers<[1], [0], [0], [1], [0, 0, 1, 1], [], []>} : vector<64x128xbf16>, vector<128x128xbf16>, vector<64x128xf32> -> vector<64x128xf32>
    %164 = arith.addf %158, %163 : vector<64x128xf32>
    %c0_144 = arith.constant 0 : index
    %c27 = arith.constant 27 : index
    %c0_145 = arith.constant 0 : index
    %165 = vector.load %arg2[%c0_144, %c27, %c0_145] : memref<1x100x128xbf16, #tpu.memory_space<vmem>>, vector<1x64x128xbf16>
    %166 = vector.shape_cast %165 : vector<1x64x128xbf16> to vector<64x128xbf16>
    %c3_146 = arith.constant 3 : index
    %c0_147 = arith.constant 0 : index
    %c0_148 = arith.constant 0 : index
    %167 = vector.load %arg5[%c3_146, %c0_147, %c0_148] : memref<5x64x1xbf16, #tpu.memory_space<vmem>>, vector<1x64x1xbf16>
    %168 = vector.shape_cast %167 : vector<1x64x1xbf16> to vector<64x1xbf16>
    %169 = vector.broadcast %168 : vector<64x1xbf16> to vector<64x128xbf16>
    %170 = arith.mulf %166, %169 : vector<64x128xbf16>
    %c18_149 = arith.constant 18 : index
    %c0_150 = arith.constant 0 : index
    %c0_151 = arith.constant 0 : index
    %171 = vector.load %arg3[%c18_149, %c0_150, %c0_151] : memref<25x128x128xbf16, #tpu.memory_space<vmem>>, vector<1x128x128xbf16>
    %172 = vector.shape_cast %171 : vector<1x128x128xbf16> to vector<128x128xbf16>
    %cst_152 = arith.constant dense<0.000000e+00> : vector<64x128xf32>
    %173 = tpu.matmul %170, %172, %cst_152 {dimension_numbers = #tpu.dot_dimension_numbers<[1], [0], [0], [1], [0, 0, 1, 1], [], []>} : vector<64x128xbf16>, vector<128x128xbf16>, vector<64x128xf32> -> vector<64x128xf32>
    %174 = arith.addf %164, %173 : vector<64x128xf32>
    %c0_153 = arith.constant 0 : index
    %c28 = arith.constant 28 : index
    %c0_154 = arith.constant 0 : index
    %175 = vector.load %arg2[%c0_153, %c28, %c0_154] : memref<1x100x128xbf16, #tpu.memory_space<vmem>>, vector<1x64x128xbf16>
    %176 = vector.shape_cast %175 : vector<1x64x128xbf16> to vector<64x128xbf16>
    %c4_155 = arith.constant 4 : index
    %c0_156 = arith.constant 0 : index
    %c0_157 = arith.constant 0 : index
    %177 = vector.load %arg5[%c4_155, %c0_156, %c0_157] : memref<5x64x1xbf16, #tpu.memory_space<vmem>>, vector<1x64x1xbf16>
    %178 = vector.shape_cast %177 : vector<1x64x1xbf16> to vector<64x1xbf16>
    %179 = vector.broadcast %178 : vector<64x1xbf16> to vector<64x128xbf16>
    %180 = arith.mulf %176, %179 : vector<64x128xbf16>
    %c19_158 = arith.constant 19 : index
    %c0_159 = arith.constant 0 : index
    %c0_160 = arith.constant 0 : index
    %181 = vector.load %arg3[%c19_158, %c0_159, %c0_160] : memref<25x128x128xbf16, #tpu.memory_space<vmem>>, vector<1x128x128xbf16>
    %182 = vector.shape_cast %181 : vector<1x128x128xbf16> to vector<128x128xbf16>
    %cst_161 = arith.constant dense<0.000000e+00> : vector<64x128xf32>
    %183 = tpu.matmul %180, %182, %cst_161 {dimension_numbers = #tpu.dot_dimension_numbers<[1], [0], [0], [1], [0, 0, 1, 1], [], []>} : vector<64x128xbf16>, vector<128x128xbf16>, vector<64x128xf32> -> vector<64x128xf32>
    %184 = arith.addf %174, %183 : vector<64x128xf32>
    %c0_162 = arith.constant 0 : index
    %c32 = arith.constant 32 : index
    %c0_163 = arith.constant 0 : index
    %185 = vector.load %arg2[%c0_162, %c32, %c0_163] : memref<1x100x128xbf16, #tpu.memory_space<vmem>>, vector<1x64x128xbf16>
    %186 = vector.shape_cast %185 : vector<1x64x128xbf16> to vector<64x128xbf16>
    %c0_164 = arith.constant 0 : index
    %c0_165 = arith.constant 0 : index
    %c0_166 = arith.constant 0 : index
    %187 = vector.load %arg5[%c0_164, %c0_165, %c0_166] : memref<5x64x1xbf16, #tpu.memory_space<vmem>>, vector<1x64x1xbf16>
    %188 = vector.shape_cast %187 : vector<1x64x1xbf16> to vector<64x1xbf16>
    %189 = vector.broadcast %188 : vector<64x1xbf16> to vector<64x128xbf16>
    %190 = arith.mulf %186, %189 : vector<64x128xbf16>
    %c20_167 = arith.constant 20 : index
    %c0_168 = arith.constant 0 : index
    %c0_169 = arith.constant 0 : index
    %191 = vector.load %arg3[%c20_167, %c0_168, %c0_169] : memref<25x128x128xbf16, #tpu.memory_space<vmem>>, vector<1x128x128xbf16>
    %192 = vector.shape_cast %191 : vector<1x128x128xbf16> to vector<128x128xbf16>
    %cst_170 = arith.constant dense<0.000000e+00> : vector<64x128xf32>
    %193 = tpu.matmul %190, %192, %cst_170 {dimension_numbers = #tpu.dot_dimension_numbers<[1], [0], [0], [1], [0, 0, 1, 1], [], []>} : vector<64x128xbf16>, vector<128x128xbf16>, vector<64x128xf32> -> vector<64x128xf32>
    %194 = arith.addf %184, %193 : vector<64x128xf32>
    %c0_171 = arith.constant 0 : index
    %c33 = arith.constant 33 : index
    %c0_172 = arith.constant 0 : index
    %195 = vector.load %arg2[%c0_171, %c33, %c0_172] : memref<1x100x128xbf16, #tpu.memory_space<vmem>>, vector<1x64x128xbf16>
    %196 = vector.shape_cast %195 : vector<1x64x128xbf16> to vector<64x128xbf16>
    %c1_173 = arith.constant 1 : index
    %c0_174 = arith.constant 0 : index
    %c0_175 = arith.constant 0 : index
    %197 = vector.load %arg5[%c1_173, %c0_174, %c0_175] : memref<5x64x1xbf16, #tpu.memory_space<vmem>>, vector<1x64x1xbf16>
    %198 = vector.shape_cast %197 : vector<1x64x1xbf16> to vector<64x1xbf16>
    %199 = vector.broadcast %198 : vector<64x1xbf16> to vector<64x128xbf16>
    %200 = arith.mulf %196, %199 : vector<64x128xbf16>
    %c21 = arith.constant 21 : index
    %c0_176 = arith.constant 0 : index
    %c0_177 = arith.constant 0 : index
    %201 = vector.load %arg3[%c21, %c0_176, %c0_177] : memref<25x128x128xbf16, #tpu.memory_space<vmem>>, vector<1x128x128xbf16>
    %202 = vector.shape_cast %201 : vector<1x128x128xbf16> to vector<128x128xbf16>
    %cst_178 = arith.constant dense<0.000000e+00> : vector<64x128xf32>
    %203 = tpu.matmul %200, %202, %cst_178 {dimension_numbers = #tpu.dot_dimension_numbers<[1], [0], [0], [1], [0, 0, 1, 1], [], []>} : vector<64x128xbf16>, vector<128x128xbf16>, vector<64x128xf32> -> vector<64x128xf32>
    %204 = arith.addf %194, %203 : vector<64x128xf32>
    %c0_179 = arith.constant 0 : index
    %c34 = arith.constant 34 : index
    %c0_180 = arith.constant 0 : index
    %205 = vector.load %arg2[%c0_179, %c34, %c0_180] : memref<1x100x128xbf16, #tpu.memory_space<vmem>>, vector<1x64x128xbf16>
    %206 = vector.shape_cast %205 : vector<1x64x128xbf16> to vector<64x128xbf16>
    %c22 = arith.constant 22 : index
    %c0_181 = arith.constant 0 : index
    %c0_182 = arith.constant 0 : index
    %207 = vector.load %arg3[%c22, %c0_181, %c0_182] : memref<25x128x128xbf16, #tpu.memory_space<vmem>>, vector<1x128x128xbf16>
    %208 = vector.shape_cast %207 : vector<1x128x128xbf16> to vector<128x128xbf16>
    %cst_183 = arith.constant dense<0.000000e+00> : vector<64x128xf32>
    %209 = tpu.matmul %206, %208, %cst_183 {dimension_numbers = #tpu.dot_dimension_numbers<[1], [0], [0], [1], [0, 0, 1, 1], [], []>} : vector<64x128xbf16>, vector<128x128xbf16>, vector<64x128xf32> -> vector<64x128xf32>
    %210 = arith.addf %204, %209 : vector<64x128xf32>
    %c0_184 = arith.constant 0 : index
    %c35 = arith.constant 35 : index
    %c0_185 = arith.constant 0 : index
    %211 = vector.load %arg2[%c0_184, %c35, %c0_185] : memref<1x100x128xbf16, #tpu.memory_space<vmem>>, vector<1x64x128xbf16>
    %212 = vector.shape_cast %211 : vector<1x64x128xbf16> to vector<64x128xbf16>
    %c3_186 = arith.constant 3 : index
    %c0_187 = arith.constant 0 : index
    %c0_188 = arith.constant 0 : index
    %213 = vector.load %arg5[%c3_186, %c0_187, %c0_188] : memref<5x64x1xbf16, #tpu.memory_space<vmem>>, vector<1x64x1xbf16>
    %214 = vector.shape_cast %213 : vector<1x64x1xbf16> to vector<64x1xbf16>
    %215 = vector.broadcast %214 : vector<64x1xbf16> to vector<64x128xbf16>
    %216 = arith.mulf %212, %215 : vector<64x128xbf16>
    %c23 = arith.constant 23 : index
    %c0_189 = arith.constant 0 : index
    %c0_190 = arith.constant 0 : index
    %217 = vector.load %arg3[%c23, %c0_189, %c0_190] : memref<25x128x128xbf16, #tpu.memory_space<vmem>>, vector<1x128x128xbf16>
    %218 = vector.shape_cast %217 : vector<1x128x128xbf16> to vector<128x128xbf16>
    %cst_191 = arith.constant dense<0.000000e+00> : vector<64x128xf32>
    %219 = tpu.matmul %216, %218, %cst_191 {dimension_numbers = #tpu.dot_dimension_numbers<[1], [0], [0], [1], [0, 0, 1, 1], [], []>} : vector<64x128xbf16>, vector<128x128xbf16>, vector<64x128xf32> -> vector<64x128xf32>
    %220 = arith.addf %210, %219 : vector<64x128xf32>
    %c0_192 = arith.constant 0 : index
    %c36 = arith.constant 36 : index
    %c0_193 = arith.constant 0 : index
    %221 = vector.load %arg2[%c0_192, %c36, %c0_193] : memref<1x100x128xbf16, #tpu.memory_space<vmem>>, vector<1x64x128xbf16>
    %222 = vector.shape_cast %221 : vector<1x64x128xbf16> to vector<64x128xbf16>
    %c4_194 = arith.constant 4 : index
    %c0_195 = arith.constant 0 : index
    %c0_196 = arith.constant 0 : index
    %223 = vector.load %arg5[%c4_194, %c0_195, %c0_196] : memref<5x64x1xbf16, #tpu.memory_space<vmem>>, vector<1x64x1xbf16>
    %224 = vector.shape_cast %223 : vector<1x64x1xbf16> to vector<64x1xbf16>
    %225 = vector.broadcast %224 : vector<64x1xbf16> to vector<64x128xbf16>
    %226 = arith.mulf %222, %225 : vector<64x128xbf16>
    %c24_197 = arith.constant 24 : index
    %c0_198 = arith.constant 0 : index
    %c0_199 = arith.constant 0 : index
    %227 = vector.load %arg3[%c24_197, %c0_198, %c0_199] : memref<25x128x128xbf16, #tpu.memory_space<vmem>>, vector<1x128x128xbf16>
    %228 = vector.shape_cast %227 : vector<1x128x128xbf16> to vector<128x128xbf16>
    %cst_200 = arith.constant dense<0.000000e+00> : vector<64x128xf32>
    %229 = tpu.matmul %226, %228, %cst_200 {dimension_numbers = #tpu.dot_dimension_numbers<[1], [0], [0], [1], [0, 0, 1, 1], [], []>} : vector<64x128xbf16>, vector<128x128xbf16>, vector<64x128xf32> -> vector<64x128xf32>
    %230 = arith.addf %220, %229 : vector<64x128xf32>
    %c0_201 = arith.constant 0 : index
    %c0_202 = arith.constant 0 : index
    %231 = vector.load %arg4[%c0_201, %c0_202] : memref<1x128xf32, #tpu.memory_space<vmem>>, vector<1x128xf32>
    %232 = vector.broadcast %231 : vector<1x128xf32> to vector<64x128xf32>
    %233 = arith.addf %230, %232 : vector<64x128xf32>
    %c0_203 = arith.constant 0 : index
    %c0_204 = arith.constant 0 : index
    %c0_205 = arith.constant 0 : index
    %234 = vector.load %arg6[%c0_203, %c0_204, %c0_205] : memref<1x64x128xf32, #tpu.memory_space<vmem>>, vector<1x64x128xf32>
    %235 = vector.shape_cast %234 : vector<1x64x128xf32> to vector<64x128xf32>
    %236 = vector.shape_cast %233 : vector<64x128xf32> to vector<1x64x128xf32>
    tpu.vector_store %arg6[%c0_203, %c0_204, %c0_205], %236 {strides = array<i32>} : memref<1x64x128xf32, #tpu.memory_space<vmem>>, vector<1x64x128xf32>,
    return
  }
  func.func @transform_0(%arg0: i32, %arg1: i32) -> (i32, i32, i32) {
    %c0_i32 = arith.constant 0 : i32
    %c0_i32_0 = arith.constant 0 : i32
    %c0_i32_1 = arith.constant 0 : i32
    return %arg0, %c0_i32, %c0_i32_0 : i32, i32, i32
  }
  func.func @transform_1(%arg0: i32, %arg1: i32) -> (i32, i32, i32) {
    %c0_i32 = arith.constant 0 : i32
    %c0_i32_0 = arith.constant 0 : i32
    %c0_i32_1 = arith.constant 0 : i32
    %c0_i32_2 = arith.constant 0 : i32
    return %c0_i32, %c0_i32_0, %c0_i32_1 : i32, i32, i32
  }
  func.func @transform_2(%arg0: i32, %arg1: i32) -> (i32, i32) {
    %c0_i32 = arith.constant 0 : i32
    %c0_i32_0 = arith.constant 0 : i32
    %c0_i32_1 = arith.constant 0 : i32
    return %c0_i32, %c0_i32_0 : i32, i32
  }
  func.func @transform_3(%arg0: i32, %arg1: i32) -> (i32, i32, i32) {
    %c0_i32 = arith.constant 0 : i32
    %c0_i32_0 = arith.constant 0 : i32
    %c0_i32_1 = arith.constant 0 : i32
    %c0_i32_2 = arith.constant 0 : i32
    return %c0_i32, %c0_i32_0, %c0_i32_1 : i32, i32, i32
  }
  func.func @transform_4(%arg0: i32, %arg1: i32) -> (i32, i32, i32) {
    %c0_i32 = arith.constant 0 : i32
    %c0_i32_0 = arith.constant 0 : i32
    return %arg0, %arg1, %c0_i32 : i32, i32, i32
  }
}

</mosaic_0001>

<bundles_post_ra>
// kernel: decoder_forward.4
= control target key start
LH: loop header
LB: loop body
LE: loop exit
PB: predicated region body
PF: predicated region fallthrough
CT: control target
= control target key end

     0   :  { %10 = vsyncpa [#allocation3], 0  ;;  %s650_s0 = inlined_call_operand.vmem [shape: bf16[2,16], index: 0, kind: input, shape index: {}]   ;;  %s651_s1 = inlined_call_operand.hbm [shape: bf16[16,32], index: 1, kind: input, shape index: {}]   ;;  %s652_s2 = inlined_call_operand.hbm [shape: f32[1,32], index: 2, kind: input, shape index: {}]   ;;  %s653_s3 = inlined_call_operand.hbm [shape: bf16[32,1024], index: 3, kind: input, shape index: {}]   ;;  %s654_s4 = inlined_call_operand.hbm [shape: f32[1,1024], index: 4, kind: input, shape index: {}]   ;;  %s655_s5 = inlined_call_operand.vmem [shape: bf16[2,1024], index: 5, kind: output, shape index: {}]  }
   0x1   :  { %11 = vsyncpa [#allocation5], 0  ;;  %s33_s20 = sshll.u32 %s652_s2, 4  ;;  %s34_s20 = int_to_ptr.hbm [resolvable:$true] %s33_s20 }
   0x2   :  { %12 = vsyncpa [#allocation8], 0  ;;  %s593_s21 = smov [#allocation4]   ;;  %s19_s25 = sshll.u32 %s651_s1, 4  ;;  %s20_s25 = int_to_ptr.hbm [resolvable:$true] %s19_s25 }
   0x3   :  { %s35_s22 = sshll.u32 %s593_s21, 4  ;;  %s594_s26 = smov [#allocation2]   ;;  %s36_s22 = int_to_ptr.vmem [resolvable:$true] %s35_s22 }
   0x4   :  { %38 = dma.hbm_to_vmem [thread:$0]  %s34_s20, 16, %s36_s22, [#allocation5]  }
   0x5   :  { %s21_s27 = sshll.u32 %s594_s26, 4  ;;  %s595_s28 = smov 64   ;;  %s22_s27 = int_to_ptr.vmem [resolvable:$true] %s21_s27 }
   0x6   :  { %s596_s29 = smov 4   ;;  %s43_s2 = sshll.u32 %s653_s3, 4  ;;  %s44_s2 = int_to_ptr.hbm [resolvable:$true] %s43_s2 }
   0x7   :  { %27 = dma.hbm_to_vmem [thread:$0]  %s20_s25, 128, %s22_s27, [#allocation3], %s595_s28, %s595_s28, %s596_s29  }
   0x8   :  { %s597_s7 = smov [#allocation6]   ;;  %s57_s1 = sshll.u32 %s654_s4, 4  ;;  %s58_s1 = int_to_ptr.hbm [resolvable:$true] %s57_s1 }
   0x9   :  { %s45_s8 = sshll.u32 %s597_s7, 4  ;;  %s598_s11 = smov 512   ;;  %s46_s8 = int_to_ptr.vmem [resolvable:$true] %s45_s8 }
   0xa   :  { %s599_s12 = smov 32   ;;  %s600_s13 = smov [#allocation7]  }
   0xb   :  { %51 = dma.hbm_to_vmem [thread:$0]  %s44_s2, 2048, %s46_s8, [#allocation5], %s598_s11, %s598_s11, %s599_s12  }
   0xc   :  { %s59_s14 = sshll.u32 %s600_s13, 4  ;;  %s60_s14 = int_to_ptr.vmem [resolvable:$true] %s59_s14 }
   0xd   :  { %62 = dma.hbm_to_vmem [thread:$0]  %s58_s1, 128, %s60_s14, [#allocation8]  }
   0xe   :  { %587 = dma.done.wait [#allocation3], 128  }
   0xf   :  { %588 = vsyncadd [#allocation3], 4294967168 }
  0x10   :  { %589 = dma.done.wait [#allocation5], 2064  }
  0x11   :  { %590 = vsyncadd [#allocation5], 4294965232 }
  0x12   :  { %591 = dma.done.wait [#allocation8], 128  }
  0x13   :  { %592 = vsyncadd [#allocation8], 4294967168  ;;  %v465_v0 = vld [vmem:[#allocation2] sm:$0xff]  ;;  %v475_v1 = vld [vmem:[#allocation6 + $0x4c] sm:$0xf]  ;;  %vm93_vm0 = vcmask 130048  }
  0x14   :  { %v437_v2 = vld [vmem:[#allocation6 + $0x68] sm:$0xf0]  ;;  %104 = vmatpush.bf16.msra.mxu0 %v465_v0  ;;  %v80_v3 = vld [vmem:[%s650_s0] sm:$0x1]  ;;  %v427_v5 = vld [vmem:[#allocation6 + $0x40] sm:$0xf] }
  0x15   :  { %v440_v4 = vor.u32 %v475_v1, %v437_v2  ;;  %v478_v6 = vld [vmem:[#allocation6 + $0x5c] sm:$0xf0]  ;;  %v474_v7 = vld [vmem:[#allocation6 + $0x44] sm:$0xf]  ;;  %v435_v10 = vld [vmem:[#allocation6 + $0x48] sm:$0xf] }
  0x16   :  { %v428_v8 = vor.u32 %v478_v6, %v427_v5  ;;  %v429_v9 = vld [vmem:[#allocation6 + $0x60] sm:$0xf0]  ;;  %v479_v11 = vld [vmem:[#allocation6 + $0x64] sm:$0xf0]  ;;  %v395_v14 = vld [vmem:[#allocation6] sm:$0xf] }
  0x17   :  { %392 = vmatmul.msk.bf16.vlgmr.msra.gmra.mxu0 %vm93_vm0, %v80_v3  ;;  %v432_v12 = vor.u32 %v474_v7, %v429_v9  ;;  %v436_v13 = vor.u32 %v479_v11, %v435_v10  ;;  %v470_v15 = vld [vmem:[#allocation6 + $0x1c] sm:$0xf0]  ;;  %v466_v16 = vld [vmem:[#allocation6 + $0x4] sm:$0xf]  ;;  %v403_v19 = vld [vmem:[#allocation6 + $0x8] sm:$0xf] }
  0x18   :  { %275 = vmatpush.bf16.msrb.mxu0 %v440_v4  ;;  %236 = vmatpush.bf16.msra.mxu1 %v428_v8  ;;  %v396_v17 = vor.u32 %v470_v15, %v395_v14  ;;  %v397_v18 = vld [vmem:[#allocation6 + $0x20] sm:$0xf0]  ;;  %v471_v20 = vld [vmem:[#allocation6 + $0x24] sm:$0xf0]  ;;  %v467_v23 = vld [vmem:[#allocation6 + $0xc] sm:$0xf] }
  0x19   :  { %249 = vmatpush.bf16.msra.mxu2 %v432_v12  ;;  %262 = vmatpush.bf16.msra.mxu3 %v436_v13  ;;  %v400_v21 = vor.u32 %v466_v16, %v397_v18  ;;  %v404_v22 = vor.u32 %v471_v20, %v403_v19  ;;  %v405_v24 = vld [vmem:[#allocation6 + $0x28] sm:$0xf0]  ;;  %v476_v26 = vld [vmem:[#allocation6 + $0x54] sm:$0xf]  ;;  %v451_v28 = vld [vmem:[#allocation6 + $0x58] sm:$0xf] }
  0x1a   :  { %v408_v25 = vor.u32 %v467_v23, %v405_v24  ;;  %v445_v27 = vld [vmem:[#allocation6 + $0x70] sm:$0xf0]  ;;  %v481_v30 = vld [vmem:[#allocation6 + $0x74] sm:$0xf0]  ;;  %v443_v31 = vld [vmem:[#allocation6 + $0x50] sm:$0xf] }
  0x1b   :  { %v448_v29 = vor.u32 %v476_v26, %v445_v27  ;;  %v480_v32 = vld [vmem:[#allocation6 + $0x6c] sm:$0xf0]  ;;  %v452_v33 = vor.u32 %v481_v30, %v451_v28  ;;  %v477_v35 = vld [vmem:[#allocation6 + $0x5c] sm:$0xf]  ;;  %v468_v37 = vld [vmem:[#allocation6 + $0x14] sm:$0xf] }
  0x1c   :  { %237 = vmatpush.bf16.msra.mxu1 %v396_v17  ;;  %276 = vmatpush.bf16.msrb.mxu0 %v408_v25  ;;  %v444_v34 = vor.u32 %v480_v32, %v443_v31  ;;  %v453_v36 = vld [vmem:[#allocation6 + $0x78] sm:$0xf0]  ;;  %v413_v39 = vld [vmem:[#allocation6 + $0x30] sm:$0xf0]  ;;  %v419_v40 = vld [vmem:[#allocation6 + $0x18] sm:$0xf] }
  0x1d   :  { %250 = vmatpush.bf16.msra.mxu2 %v400_v21  ;;  %263 = vmatpush.bf16.msra.mxu3 %v404_v22  ;;  %v456_v38 = vor.u32 %v477_v35, %v453_v36  ;;  %v473_v41 = vld [vmem:[#allocation6 + $0x34] sm:$0xf0]  ;;  %v416_v42 = vor.u32 %v468_v37, %v413_v39  ;;  %v411_v44 = vld [vmem:[#allocation6 + $0x10] sm:$0xf]  ;;  %v469_v46 = vld [vmem:[#allocation6 + $0x1c] sm:$0xf] }
  0x1e   :  { %v420_v43 = vor.u32 %v473_v41, %v419_v40  ;;  %v472_v45 = vld [vmem:[#allocation6 + $0x2c] sm:$0xf0]  ;;  %v421_v48 = vld [vmem:[#allocation6 + $0x38] sm:$0xf0]  ;;  %vm226_vm1 = vcmask 261120   ;;  %v128_v60 = vld [vmem:[#allocation7] sm:$0xff] }
  0x1f   :  { %v412_v47 = vor.u32 %v472_v45, %v411_v44  ;;  %v424_v49 = vor.u32 %v469_v46, %v421_v48  ;;  %v490_v50 = vld [vmem:[#allocation4] ss:$0 sm:$0xff]  ;;  %v131_v62 = vperm.slane %v128_v60, 1  ;;  %v132_v0 = vperm.slane %v128_v60, 2 }
  0x20   :  { %288 = vmatpush.bf16.msrb.mxu1 %v444_v34  ;;  %327 = vmatpush.bf16.msra.mxu0 %v456_v38  ;;  %v130_v1 = vperm.slane %v128_v60, 0  ;;  %v133_v2 = vperm.slane %v128_v60, 3  ;;  %v134_v11 = vperm.slane %v128_v60, 4  ;;  %v137_v14 = vperm.slane %v128_v60, 7 }
  0x21   :  { %301 = vmatpush.bf16.msrb.mxu2 %v448_v29  ;;  %314 = vmatpush.bf16.msrb.mxu3 %v452_v33  ;;  %v135_v16 = vperm.slane %v128_v60, 5  ;;  %v136_v18 = vperm.slane %v128_v60, 6  ;;  %vm357_vm2 = vcmask 1040384   ;;  %vm361_vm3 = vcmask 1042434  }
  0x22   :  { %vm365_vm4 = vcmask 1041408   ;;  %vm367_vm5 = vcmask 1044484   ;;  %vm371_vm6 = vcmask 1046534   ;;  %vm375_vm7 = vcmask 1045508  }
  0x23   :  { %vm377_vm8 = vcmask 1043456  }
  0x24   :  { %289 = vmatpush.bf16.msrb.mxu1 %v412_v47  ;;  %328 = vmatpush.bf16.msra.mxu0 %v424_v49 }
  0x25   :  { %302 = vmatpush.bf16.msrb.mxu2 %v416_v42  ;;  %315 = vmatpush.bf16.msrb.mxu3 %v420_v43 }
  0x94   :  { %v106_v51 = vpop.f32.mrf.mxu0 }
  0x95   :  { %v107_v52 = vadd.f32 %v490_v50, %v106_v51 }
  0x97   :  { %v110_v53 = vmax.f32 %v107_v52, 0.0 }
  0x99   :  { %v111_v54 = vpack.c.bf16 %v110_v53, %v110_v53 }
  0x9b   :  { %457 = vmatmul.msk.bf16.vlgmr.msra.gmra.mxu1 %vm226_vm1, %v111_v54  ;;  %458 = vmatmul.msk.bf16.vlgmr.msra.gmra.mxu2 %vm226_vm1, %v111_v54 }
  0x9c   :  { %459 = vmatmul.msk.bf16.vlgmr.msra.gmra.mxu3 %vm226_vm1, %v111_v54  ;;  %460 = vmatmul.msk.bf16.vlgmr.msrb.gmra.mxu0 %vm226_vm1, %v111_v54  ;;  %v108_v55 = vpop.f32.mrf.mxu0 }
  0xab   :  { %461 = vmatmul.msk.bf16.vlgmr.msrb.gmra.mxu1 %vm226_vm1, %v111_v54  ;;  %462 = vmatmul.msk.bf16.vlgmr.msrb.gmra.mxu2 %vm226_vm1, %v111_v54 }
  0xac   :  { %463 = vmatmul.msk.bf16.vlgmr.msrb.gmra.mxu3 %vm226_vm1, %v111_v54  ;;  %464 = vmatmul.msk.bf16.vlgmr.msra.gmra.mxu0 %vm226_vm1, %v111_v54 }
 0x118   :  { %v239_v56 = vpop.f32.mrf.mxu1 }
 0x119   :  { %v278_v57 = vpop.f32.mrf.mxu0  ;;  %v240_v6 = vadd.f32 %v239_v56, %v130_v1 }
 0x11a   :  { %v279_v8 = vadd.f32 %v278_v57, %v133_v2 }
 0x11b   :  { %v334_v15 = vmax.f32 %v240_v6, 0.0 }
 0x11c   :  { %v337_v17 = vmax.f32 %v279_v8, 0.0 }
 0x11e   :  { %v252_v58 = vpop.f32.mrf.mxu2 }
 0x11f   :  { %v265_v59 = vpop.f32.mrf.mxu3  ;;  %v253_v3 = vadd.f32 %v252_v58, %v131_v62 }
 0x120   :  { %v241_v61 = vpop.f32.mrf.mxu1  ;;  %v266_v4 = vadd.f32 %v265_v59, %v132_v0 }
 0x121   :  { %v280_v63 = vpop.f32.mrf.mxu0  ;;  %v335_v10 = vmax.f32 %v253_v3, 0.0 }
 0x122   :  { %v336_v13 = vmax.f32 %v266_v4, 0.0 }
 0x123   :  { %v342_v19 = vpack.c.bf16 %v335_v10, %v334_v15 }
 0x124   :  { %v343_v21 = vpack.c.bf16 %v337_v17, %v336_v13 }
 0x125   :  { %v350_v28 = vrot.slane %v342_v19, 3 }
 0x126   :  { %v254_v5 = vpop.f32.mrf.mxu2  ;;  %v351_v32 = vrot.slane %v343_v21, 6  ;;  %v352_v33 = vrot.slane %v343_v21, 1 }
 0x127   :  { %v267_v7 = vpop.f32.mrf.mxu3  ;;  %v360_v40 = vsel %vm357_vm2, %v342_v19, %v350_v28 }
 0x128   :  { %v291_v9 = vpop.f32.mrf.mxu1  ;;  %v364_v41 = vsel %vm361_vm3, %v351_v32, %v352_v33 }
 0x129   :  { %v330_v12 = vpop.f32.mrf.mxu0  ;;  %v292_v20 = vadd.f32 %v291_v9, %v134_v11  ;;  %v366_v48 = vsel %vm365_vm4, %v360_v40, %v364_v41 }
 0x12a   :  { %v331_v22 = vadd.f32 %v330_v12, %v137_v14 }
 0x12b   :  { %v338_v29 = vmax.f32 %v292_v20, 0.0 }
 0x12c   :  { %v341_v34 = vmax.f32 %v331_v22, 0.0 }
 0x12e   :  { %v304_v23 = vpop.f32.mrf.mxu2 }
 0x12f   :  { %v305_v24 = vadd.f32 %v304_v23, %v135_v16  ;;  %v317_v25 = vpop.f32.mrf.mxu3 }
 0x130   :  { %v318_v26 = vadd.f32 %v317_v25, %v136_v18  ;;  %v293_v27 = vpop.f32.mrf.mxu1 }
 0x131   :  { %v339_v30 = vmax.f32 %v305_v24, 0.0  ;;  %v332_v31 = vpop.f32.mrf.mxu0 }
 0x132   :  { %v340_v35 = vmax.f32 %v318_v26, 0.0 }
 0x133   :  { %v344_v36 = vpack.c.bf16 %v339_v30, %v338_v29 }
 0x134   :  { %v345_v37 = vpack.c.bf16 %v341_v34, %v340_v35 }
 0x135   :  { %v353_v38 = vrot.slane %v344_v36, 4  ;;  %v354_v39 = vrot.slane %v344_v36, 7 }
 0x136   :  { %v355_v42 = vrot.slane %v345_v37, 2  ;;  %v356_v43 = vrot.slane %v345_v37, 5  ;;  %v306_v44 = vpop.f32.mrf.mxu2 }
 0x137   :  { %v370_v45 = vsel %vm367_vm5, %v353_v38, %v354_v39  ;;  %v319_v46 = vpop.f32.mrf.mxu3 }
 0x138   :  { %v374_v47 = vsel %vm371_vm6, %v355_v42, %v356_v43 }
 0x139   :  { %v376_v49 = vsel %vm375_vm7, %v370_v45, %v374_v47 }
 0x13a   :  { %v378_v50 = vsel %vm377_vm8, %v366_v48, %v376_v49 }
 0x13b   :  { %380 = vst [vmem:[%s655_s5] sm:$0xff] %v378_v50 }
 0x13c   :  { %385 = vsyncpa [#allocation3], 1 }
 0x13d   :  { %386 = vsyncpa [#allocation5], 1 }
 0x13e   :  { %387 = vsyncpa [#allocation8], 1 }

// kernel: decoder_forward.5
= control target key start
LH: loop header
LB: loop body
LE: loop exit
PB: predicated region body
PF: predicated region fallthrough
CT: control target
= control target key end

     0   :  { %9 = vsyncpa [#allocation3], 0  ;;  %s4692_s0 = inlined_call_operand.vmem [shape: bf16[2,10,256], index: 0, kind: input, shape index: {}]   ;;  %s4693_s1 = inlined_call_operand.hbm [shape: bf16[9,256,256], index: 1, kind: input, shape index: {}]   ;;  %s4694_s2 = inlined_call_operand.hbm [shape: f32[1,256], index: 2, kind: input, shape index: {}]   ;;  %s4695_s3 = inlined_call_operand.hbm [shape: bf16[3,4,1], index: 3, kind: input, shape index: {}]   ;;  %s4696_s4 = inlined_call_operand.vmem [shape: bf16[2,4,256], index: 4, kind: output, shape index: {}]  }
   0x1   :  { %10 = vsyncpa [#allocation5], 0  ;;  %s4514_s15 = smov 0   ;;  %s4516_s16 = smov 0  }
   0x2   :  { %s4518_s17 = smov 0  }
   0x3 LB: > { %s176_s20 = sshll.u32 %s4694_s2, 4  ;;  %s2827_s21 = sadd.s32 4294967295, %s4478_s17   ;;  %s4478_s17 = sphi %s4518_s17, %s16_s17   ;;  %s4474_s16 = sphi %s4516_s16, %s4701_s16   ;;  %s4470_s15 = sphi %s4514_s15, %s4700_s15   ;;  %s177_s20 = int_to_ptr.hbm [resolvable:$true] %s176_s20 }
   0x4   : > { %p2829_p0 = scmp.ge.s32.totalorder %s4478_s17, 1  ;;  %p150_p1 = scmp.lt.s32.totalorder %s4478_s17, 3 }
   0x5   : > { %p4535_p2 = scmp.eq.s32.totalorder %s2827_s21, 0  ;;  %s4480_s24 = smov [#allocation4]  }
   0x6   : > { %p4539_p3 = pnand %p2829_p0, %p150_p1  ;;  %s178_s25 = sshll.u32 %s4480_s24, 4  ;;  %s179_s25 = int_to_ptr.vmem [resolvable:$true] %s178_s25 }
   0x7   : > { %s28_s27 = sadd.s32 1, %s4474_s16  ;;  %s161_s30 = sshll.u32 %s4693_s1, 4  ;;  %s162_s30 = int_to_ptr.hbm [resolvable:$true] %s161_s30 }
   0x8   : > { %p4308_p4 = pneg %p4539_p3  ;;  %p30_p6 = scmp.ge.s32.totalorder %s28_s27, 2 }
   0x9   : > { %s4481_s5 = smov [#allocation2]   ;;  %s187_s9 = sshll.u32 %s4695_s3, 4  ;;  %s188_s9 = int_to_ptr.hbm [resolvable:$true] %s187_s9 }
   0xa   : > { %p4547_p5 = pnand %p4535_p2, %p4308_p4  ;;  %s4703_s27 = smov (%p30_p6, %s28_s27), 0 }
   0xb   : > { %s163_s6 = sshll.u32 %s4481_s5, 4  ;;  %s4482_s10 = smov 128   ;;  %s164_s6 = int_to_ptr.vmem [resolvable:$true] %s163_s6 }
   0xc   : > { %4314 = dma.hbm_to_vmem [thread:$0]  (!%p4547_p5), %s177_s20, 32, %s179_s25, [#allocation5]  }
   0xd   : > { %s4483_s11 = smov 8   ;;  %s4484_s12 = smov [#allocation6]  }
   0xe   : > { %4311 = dma.hbm_to_vmem [thread:$0]  (!%p4547_p5), %s162_s30, 36864, %s164_s6, [#allocation3], %s4482_s10, %s4482_s10, %s4483_s11  }
   0xf   : > { %s189_s13 = sshll.u32 %s4484_s12, 4  ;;  %s4485_s14 = smov 32   ;;  %s190_s13 = int_to_ptr.vmem [resolvable:$true] %s189_s13 }
  0x10   : > { %s4486_s18 = smov 2   ;;  %213 = sbr.rel (%p4539_p3) target bundleno = 497 (0x1f1), region = 36 }
  0x11   : > { %4317 = dma.hbm_to_vmem [thread:$0]  (!%p4547_p5), %s188_s9, 96, %s190_s13, [#allocation5], %s4485_s14, %s4485_s14, %s4486_s18  }
  0x15   : > { %4461 = dma.done.wait (%p4535_p2), [#allocation3], 36864  }
  0x16   : > { %4463 = vsyncadd (%p4535_p2), [#allocation3], 4294930432 }
  0x17   : > { %4465 = dma.done.wait (%p4535_p2), [#allocation5], 128  }
  0x18   : > { %4467 = vsyncadd (%p4535_p2), [#allocation5], 4294967168  ;;  %v4487_v0 = vmov 0   ;;  %v269_v1 = vld [vmem:[#allocation6] sm:$0x3]  ;;  %p254_p7 = scmp.lt.s32.totalorder %s4470_s15, 1 }
  0x19   : > { %4357 = vset.pattern.permute.xlu0 %v4487_v0  ;;  %v2900_v2 = vld [vmem:[#allocation2 + $0x170] sm:$0xf]  ;;  %v4053_v3 = vld [vmem:[#allocation2 + $0x174] sm:$0xf0]  ;;  %v4052_v8 = vld [vmem:[#allocation2 + $0x174] sm:$0xf] }
  0x1a   : > { %272 = vperm.xlu0 %4357, %v269_v1   ;;  %v2964_v4 = vld [vmem:[#allocation2 + $0x1f0] sm:$0xf]  ;;  %v4069_v5 = vld [vmem:[#allocation2 + $0x1f4] sm:$0xf0]  ;;  %v2901_v6 = vor.u32 %v4053_v3, %v2900_v2  ;;  %v2902_v9 = vld [vmem:[#allocation2 + $0x178] sm:$0xf0] }
  0x1b   : > { %v2965_v7 = vor.u32 %v4069_v5, %v2964_v4  ;;  %v4068_v10 = vld [vmem:[#allocation2 + $0x1f4] sm:$0xf]  ;;  %v2905_v11 = vor.u32 %v4052_v8, %v2902_v9  ;;  %v2966_v12 = vld [vmem:[#allocation2 + $0x1f8] sm:$0xf0]  ;;  %v2892_v13 = vld [vmem:[#allocation2 + $0x160] sm:$0xf] }
  0x1c   : > { %v4051_v14 = vld [vmem:[#allocation2 + $0x164] sm:$0xf0]  ;;  %v805_v15 = vld [vmem:[#allocation6 + $0x4] sm:$0x3]  ;;  %539 = vmatpush.bf16.msra.mxu0 %v2901_v6  ;;  %v2969_v16 = vor.u32 %v4068_v10, %v2966_v12  ;;  %v2956_v18 = vld [vmem:[#allocation2 + $0x1e0] sm:$0xf] }
  0x1d   : > { %552 = vmatpush.bf16.msra.mxu1 %v2965_v7  ;;  %v2893_v17 = vor.u32 %v4051_v14, %v2892_v13  ;;  %v4067_v19 = vld [vmem:[#allocation2 + $0x1e4] sm:$0xf0]  ;;  %v4050_v20 = vld [vmem:[#allocation2 + $0x164] sm:$0xf]  ;;  %565 = vmatpush.bf16.msra.mxu2 %v2905_v11  ;;  %v2894_v22 = vld [vmem:[#allocation2 + $0x168] sm:$0xf0] }
  0x1e   : > { %v2957_v21 = vor.u32 %v4067_v19, %v2956_v18  ;;  %v4066_v23 = vld [vmem:[#allocation2 + $0x1e4] sm:$0xf]  ;;  %v2958_v24 = vld [vmem:[#allocation2 + $0x1e8] sm:$0xf0]  ;;  %578 = vmatpush.bf16.msra.mxu3 %v2969_v16  ;;  %v2897_v25 = vor.u32 %v4050_v20, %v2894_v22  ;;  %v2884_v27 = vld [vmem:[#allocation2 + $0x150] sm:$0xf] }
  0x1f   : > { %v2961_v26 = vor.u32 %v4066_v23, %v2958_v24  ;;  %v4049_v28 = vld [vmem:[#allocation2 + $0x154] sm:$0xf0]  ;;  %v2948_v29 = vld [vmem:[#allocation2 + $0x1d0] sm:$0xf]  ;;  %v4048_v31 = vld [vmem:[#allocation2 + $0x154] sm:$0xf] }
  0x20   : > { %v4065_v30 = vld [vmem:[#allocation2 + $0x1d4] sm:$0xf0]  ;;  %v2886_v32 = vld [vmem:[#allocation2 + $0x158] sm:$0xf0]  ;;  %540 = vmatpush.bf16.msra.mxu0 %v2893_v17  ;;  %v2885_v33 = vor.u32 %v4049_v28, %v2884_v27  ;;  %v4064_v35 = vld [vmem:[#allocation2 + $0x1d4] sm:$0xf] }
  0x21   : > { %553 = vmatpush.bf16.msra.mxu1 %v2957_v21  ;;  %v2949_v34 = vor.u32 %v4065_v30, %v2948_v29  ;;  %v2950_v36 = vld [vmem:[#allocation2 + $0x1d8] sm:$0xf0]  ;;  %v2876_v37 = vld [vmem:[#allocation2 + $0x140] sm:$0xf]  ;;  %566 = vmatpush.bf16.msra.mxu2 %v2897_v25  ;;  %v2889_v38 = vor.u32 %v4048_v31, %v2886_v32  ;;  %v4047_v39 = vld [vmem:[#allocation2 + $0x144] sm:$0xf0] }
  0x22   : > { %808 = vperm.xlu0 %4357, %v805_v15   ;;  %v2940_v40 = vld [vmem:[#allocation2 + $0x1c0] sm:$0xf]  ;;  %v4063_v41 = vld [vmem:[#allocation2 + $0x1c4] sm:$0xf0]  ;;  %579 = vmatpush.bf16.msra.mxu3 %v2961_v26  ;;  %v2953_v42 = vor.u32 %v4064_v35, %v2950_v36  ;;  %v4046_v43 = vld [vmem:[#allocation2 + $0x144] sm:$0xf]  ;;  %v2877_v47 = vor.u32 %v4047_v39, %v2876_v37 }
  0x23   : > { %v2878_v44 = vld [vmem:[#allocation2 + $0x148] sm:$0xf0]  ;;  %v4062_v45 = vld [vmem:[#allocation2 + $0x1c4] sm:$0xf]  ;;  %v2941_v48 = vor.u32 %v4063_v41, %v2940_v40  ;;  %v2868_v49 = vld [vmem:[#allocation2 + $0x130] sm:$0xf] }
  0x24   : > { %v2942_v46 = vld [vmem:[#allocation2 + $0x1c8] sm:$0xf0]  ;;  %541 = vmatpush.bf16.msra.mxu0 %v2885_v33  ;;  %v2881_v50 = vor.u32 %v4046_v43, %v2878_v44  ;;  %v4045_v51 = vld [vmem:[#allocation2 + $0x134] sm:$0xf0]  ;;  %v2932_v52 = vld [vmem:[#allocation2 + $0x1b0] sm:$0xf] }
  0x25   : > { %554 = vmatpush.bf16.msra.mxu1 %v2949_v34  ;;  %567 = vmatpush.bf16.msra.mxu2 %v2889_v38  ;;  %v4061_v53 = vld [vmem:[#allocation2 + $0x1b4] sm:$0xf0]  ;;  %v2945_v54 = vor.u32 %v4062_v45, %v2942_v46  ;;  %v4044_v55 = vld [vmem:[#allocation2 + $0x134] sm:$0xf]  ;;  %v2870_v56 = vld [vmem:[#allocation2 + $0x138] sm:$0xf0]  ;;  %v2869_v59 = vor.u32 %v4045_v51, %v2868_v49 }
  0x26   : > { %580 = vmatpush.bf16.msra.mxu3 %v2953_v42  ;;  %v4060_v57 = vld [vmem:[#allocation2 + $0x1b4] sm:$0xf]  ;;  %v2934_v58 = vld [vmem:[#allocation2 + $0x1b8] sm:$0xf0]  ;;  %v2933_v60 = vor.u32 %v4061_v53, %v2932_v52  ;;  %v2860_v61 = vld [vmem:[#allocation2 + $0x120] sm:$0xf]  ;;  %v2873_v62 = vor.u32 %v4044_v55, %v2870_v56 }
  0x27   : > { %v4043_v63 = vld [vmem:[#allocation2 + $0x124] sm:$0xf0]  ;;  %v2924_v0 = vld [vmem:[#allocation2 + $0x1a0] sm:$0xf]  ;;  %v2937_v2 = vor.u32 %v4060_v57, %v2934_v58  ;;  %v4042_v3 = vld [vmem:[#allocation2 + $0x124] sm:$0xf] }
  0x28   : > { %542 = vmatpush.bf16.msra.mxu0 %v2877_v47  ;;  %v4059_v1 = vld [vmem:[#allocation2 + $0x1a4] sm:$0xf0]  ;;  %v2862_v4 = vld [vmem:[#allocation2 + $0x128] sm:$0xf0]  ;;  %v4058_v5 = vld [vmem:[#allocation2 + $0x1a4] sm:$0xf]  ;;  %v2861_v7 = vor.u32 %v4043_v63, %v2860_v61 }
  0x29   : > { %555 = vmatpush.bf16.msra.mxu1 %v2941_v48  ;;  %568 = vmatpush.bf16.msra.mxu2 %v2881_v50  ;;  %v2926_v6 = vld [vmem:[#allocation2 + $0x1a8] sm:$0xf0]  ;;  %v2925_v8 = vor.u32 %v4059_v1, %v2924_v0  ;;  %v2852_v9 = vld [vmem:[#allocation2 + $0x110] sm:$0xf]  ;;  %v2865_v10 = vor.u32 %v4042_v3, %v2862_v4  ;;  %v4041_v11 = vld [vmem:[#allocation2 + $0x114] sm:$0xf0] }
  0x2a   : > { %581 = vmatpush.bf16.msra.mxu3 %v2945_v54  ;;  %v2916_v12 = vld [vmem:[#allocation2 + $0x190] sm:$0xf]  ;;  %v4057_v13 = vld [vmem:[#allocation2 + $0x194] sm:$0xf0]  ;;  %v2929_v14 = vor.u32 %v4058_v5, %v2926_v6  ;;  %v4040_v15 = vld [vmem:[#allocation2 + $0x114] sm:$0xf]  ;;  %v2853_v20 = vor.u32 %v4041_v11, %v2852_v9 }
  0x2b   : > { %v2854_v16 = vld [vmem:[#allocation2 + $0x118] sm:$0xf0]  ;;  %s4705_s15 = smov (!%p254_p7, %s4470_s15), 1  ;;  %v4056_v17 = vld [vmem:[#allocation2 + $0x194] sm:$0xf]  ;;  %v2917_v21 = vor.u32 %v4057_v13, %v2916_v12  ;;  %vm2706_vm0 = vcmask 1041408  }
  0x2c   : > { %543 = vmatpush.bf16.msra.mxu0 %v2869_v59  ;;  %v2918_v18 = vld [vmem:[#allocation2 + $0x198] sm:$0xf0]  ;;  %v2844_v19 = vld [vmem:[#allocation2 + $0x100] sm:$0xf]  ;;  %v4039_v22 = vld [vmem:[#allocation2 + $0x104] sm:$0xf0]  ;;  %v2857_v25 = vor.u32 %v4040_v15, %v2854_v16 }
  0x2d   : > { %556 = vmatpush.bf16.msra.mxu1 %v2933_v60  ;;  %569 = vmatpush.bf16.msra.mxu2 %v2873_v62  ;;  %v2908_v23 = vld [vmem:[#allocation2 + $0x180] sm:$0xf]  ;;  %v4055_v24 = vld [vmem:[#allocation2 + $0x184] sm:$0xf0]  ;;  %v4038_v26 = vld [vmem:[#allocation2 + $0x104] sm:$0xf]  ;;  %v2921_v29 = vor.u32 %v4056_v17, %v2918_v18  ;;  %v2845_v36 = vor.u32 %v4039_v22, %v2844_v19 }
  0x2e   : > { %582 = vmatpush.bf16.msra.mxu3 %v2937_v2  ;;  %v2846_v27 = vld [vmem:[#allocation2 + $0x108] sm:$0xf0]  ;;  %v4054_v28 = vld [vmem:[#allocation2 + $0x184] sm:$0xf]  ;;  %v3028_v31 = vld [vmem:[#allocation2 + $0x70] sm:$0xf]  ;;  %v2909_v37 = vor.u32 %v4055_v24, %v2908_v23 }
  0x2f   : > { %v2910_v30 = vld [vmem:[#allocation2 + $0x188] sm:$0xf0]  ;;  %v4021_v32 = vld [vmem:[#allocation2 + $0x74] sm:$0xf0]  ;;  %v3092_v33 = vld [vmem:[#allocation2 + $0xf0] sm:$0xf]  ;;  %v2849_v41 = vor.u32 %v4038_v26, %v2846_v27 }
  0x30   : > { %544 = vmatpush.bf16.msra.mxu0 %v2861_v7  ;;  %v4037_v34 = vld [vmem:[#allocation2 + $0xf4] sm:$0xf0]  ;;  %v4020_v35 = vld [vmem:[#allocation2 + $0x74] sm:$0xf]  ;;  %v3030_v38 = vld [vmem:[#allocation2 + $0x78] sm:$0xf0]  ;;  %v3029_v42 = vor.u32 %v4021_v32, %v3028_v31  ;;  %v2913_v43 = vor.u32 %v4054_v28, %v2910_v30 }
  0x31   : > { %557 = vmatpush.bf16.msra.mxu1 %v2925_v8  ;;  %570 = vmatpush.bf16.msra.mxu2 %v2865_v10  ;;  %v4036_v39 = vld [vmem:[#allocation2 + $0xf4] sm:$0xf]  ;;  %v3094_v40 = vld [vmem:[#allocation2 + $0xf8] sm:$0xf0]  ;;  %v3093_v44 = vor.u32 %v4037_v34, %v3092_v33  ;;  %v3020_v45 = vld [vmem:[#allocation2 + $0x60] sm:$0xf]  ;;  %v3033_v47 = vor.u32 %v4020_v35, %v3030_v38 }
  0x32   : > { %583 = vmatpush.bf16.msra.mxu3 %v2929_v14  ;;  %v4019_v46 = vld [vmem:[#allocation2 + $0x64] sm:$0xf0]  ;;  %s4004_s19 = sshll.u32 %s4705_s15, 4  ;;  %v3097_v48 = vor.u32 %v4036_v39, %v3094_v40  ;;  %v3084_v49 = vld [vmem:[#allocation2 + $0xe0] sm:$0xf]  ;;  %s4005_s23 = sshll.u32 %s4705_s15, 2 }
  0x33   : > { %v4035_v50 = vld [vmem:[#allocation2 + $0xe4] sm:$0xf0]  ;;  %v4018_v51 = vld [vmem:[#allocation2 + $0x64] sm:$0xf]  ;;  %v3022_v52 = vld [vmem:[#allocation2 + $0x68] sm:$0xf0]  ;;  %v3021_v55 = vor.u32 %v4019_v46, %v3020_v45  ;;  %s4586_s22 = scalar_lea.vmem %s4692_s0, %s4004_s19  ;;  %s267_s26 = scalar_lea.vmem %s4696_s4, %s4005_s23 }
  0x34   : > { %545 = vmatpush.bf16.msra.mxu0 %v2853_v20  ;;  %v4034_v53 = vld [vmem:[#allocation2 + $0xe4] sm:$0xf]  ;;  %v3086_v54 = vld [vmem:[#allocation2 + $0xe8] sm:$0xf0]  ;;  %v3085_v56 = vor.u32 %v4035_v50, %v3084_v49  ;;  %v3012_v57 = vld [vmem:[#allocation2 + $0x50] sm:$0xf]  ;;  %v3025_v59 = vor.u32 %v4018_v51, %v3022_v52 }
  0x35   : > { %558 = vmatpush.bf16.msra.mxu1 %v2917_v21  ;;  %571 = vmatpush.bf16.msra.mxu2 %v2857_v25  ;;  %v4017_v58 = vld [vmem:[#allocation2 + $0x54] sm:$0xf0]  ;;  %v3089_v60 = vor.u32 %v4034_v53, %v3086_v54  ;;  %v3076_v61 = vld [vmem:[#allocation2 + $0xd0] sm:$0xf]  ;;  %v4016_v63 = vld [vmem:[#allocation2 + $0x54] sm:$0xf] }
  0x36   : > { %584 = vmatpush.bf16.msra.mxu3 %v2921_v29  ;;  %v4033_v62 = vld [vmem:[#allocation2 + $0xd4] sm:$0xf0]  ;;  %v3014_v0 = vld [vmem:[#allocation2 + $0x58] sm:$0xf0]  ;;  %v4032_v1 = vld [vmem:[#allocation2 + $0xd4] sm:$0xf]  ;;  %v3013_v3 = vor.u32 %v4017_v58, %v3012_v57 }
  0x37   : > { %v3078_v2 = vld [vmem:[#allocation2 + $0xd8] sm:$0xf0]  ;;  %v3004_v4 = vld [vmem:[#allocation2 + $0x40] sm:$0xf]  ;;  %v4015_v5 = vld [vmem:[#allocation2 + $0x44] sm:$0xf0]  ;;  %v3077_v7 = vor.u32 %v4033_v62, %v3076_v61  ;;  %v3017_v11 = vor.u32 %v4016_v63, %v3014_v0 }
  0x38   : > { %546 = vmatpush.bf16.msra.mxu0 %v2845_v36  ;;  %v3068_v6 = vld [vmem:[#allocation2 + $0xc0] sm:$0xf]  ;;  %v4031_v8 = vld [vmem:[#allocation2 + $0xc4] sm:$0xf0]  ;;  %v4014_v9 = vld [vmem:[#allocation2 + $0x44] sm:$0xf]  ;;  %v3081_v12 = vor.u32 %v4032_v1, %v3078_v2  ;;  %v3005_v18 = vor.u32 %v4015_v5, %v3004_v4 }
  0x39   : > { %559 = vmatpush.bf16.msra.mxu1 %v2909_v37  ;;  %572 = vmatpush.bf16.msra.mxu2 %v2849_v41  ;;  %v324_v10 = vld [vmem:[%s4586_s22] sm:$0x77]  ;;  %v3006_v13 = vld [vmem:[#allocation2 + $0x48] sm:$0xf0]  ;;  %v4030_v14 = vld [vmem:[#allocation2 + $0xc4] sm:$0xf]  ;;  %v3069_v23 = vor.u32 %v4031_v8, %v3068_v6 }
  0x3a   : > { %585 = vmatpush.bf16.msra.mxu3 %v2913_v43  ;;  %v3070_v15 = vld [vmem:[#allocation2 + $0xc8] sm:$0xf0]  ;;  %v359_v16 = vunpack.c.l.b16 %v324_v10  ;;  %v360_v17 = vunpack.c.h.b16 %v324_v10  ;;  %v2996_v19 = vld [vmem:[#allocation2 + $0x30] sm:$0xf]  ;;  %v4013_v20 = vld [vmem:[#allocation2 + $0x34] sm:$0xf0]  ;;  %v3009_v24 = vor.u32 %v4014_v9, %v3006_v13 }
  0x3b   : > { %v3073_v25 = vor.u32 %v4030_v14, %v3070_v15  ;;  %v3060_v26 = vld [vmem:[#allocation2 + $0xb0] sm:$0xf]  ;;  %v4029_v27 = vld [vmem:[#allocation2 + $0xb4] sm:$0xf0]  ;;  %v4012_v28 = vld [vmem:[#allocation2 + $0x34] sm:$0xf]  ;;  %v2997_v36 = vor.u32 %v4013_v20, %v2996_v19 }
  0x3c   : > { %751 = vmatpush.bf16.msrb.mxu0 %v3029_v42  ;;  %v361_v21 = vpack.c.b16 %v359_v16, %v359_v16  ;;  %v362_v22 = vpack.c.b16 %v360_v17, %v360_v17  ;;  %v2998_v29 = vld [vmem:[#allocation2 + $0x38] sm:$0xf0]  ;;  %v4028_v34 = vld [vmem:[#allocation2 + $0xb4] sm:$0xf]  ;;  %v3061_v39 = vor.u32 %v4029_v27, %v3060_v26  ;;  %v2988_v41 = vld [vmem:[#allocation2 + $0x20] sm:$0xf] }
  0x3d   : > { %764 = vmatpush.bf16.msrb.mxu1 %v3093_v44  ;;  %777 = vmatpush.bf16.msrb.mxu2 %v3033_v47  ;;  %v3062_v35 = vld [vmem:[#allocation2 + $0xb8] sm:$0xf0]  ;;  %v3001_v40 = vor.u32 %v4012_v28, %v2998_v29  ;;  %v4011_v42 = vld [vmem:[#allocation2 + $0x24] sm:$0xf0]  ;;  %v3052_v44 = vld [vmem:[#allocation2 + $0xa0] sm:$0xf] }
  0x3e   : > { %790 = vmatpush.bf16.msrb.mxu3 %v3097_v48  ;;  %v364_v30 = vshrl.u32 %v361_v21, 16  ;;  %v366_v31 = vshll.u32 %v361_v21, 16  ;;  %v371_v32 = vshrl.u32 %v362_v22, 16  ;;  %v373_v33 = vshll.u32 %v362_v22, 16  ;;  %v4027_v45 = vld [vmem:[#allocation2 + $0xa4] sm:$0xf0] }
  0x3f   : > { %v3065_v43 = vor.u32 %v4028_v34, %v3062_v35  ;;  %v4010_v46 = vld [vmem:[#allocation2 + $0x24] sm:$0xf]  ;;  %v2990_v49 = vld [vmem:[#allocation2 + $0x28] sm:$0xf0]  ;;  %v2989_v52 = vor.u32 %v4011_v42, %v2988_v41  ;;  %v3053_v53 = vor.u32 %v4027_v45, %v3052_v44  ;;  %v2980_v54 = vld [vmem:[#allocation2 + $0x10] sm:$0xf] }
  0x40   : > { %752 = vmatpush.bf16.msrb.mxu0 %v3021_v55  ;;  %v368_v37 = vrot.slane %v366_v31, 1  ;;  %v375_v38 = vrot.slane %v373_v33, 1  ;;  %v4026_v50 = vld [vmem:[#allocation2 + $0xa4] sm:$0xf]  ;;  %v3054_v51 = vld [vmem:[#allocation2 + $0xa8] sm:$0xf0] }
  0x41   : > { %765 = vmatpush.bf16.msrb.mxu1 %v3085_v56  ;;  %778 = vmatpush.bf16.msrb.mxu2 %v3025_v59  ;;  %v4009_v55 = vld [vmem:[#allocation2 + $0x14] sm:$0xf0]  ;;  %v2993_v56 = vor.u32 %v4010_v46, %v2990_v49  ;;  %v3057_v57 = vor.u32 %v4026_v50, %v3054_v51  ;;  %v3044_v58 = vld [vmem:[#allocation2 + $0x90] sm:$0xf]  ;;  %v2982_v61 = vld [vmem:[#allocation2 + $0x18] sm:$0xf0] }
  0x42   : > { %791 = vmatpush.bf16.msrb.mxu3 %v3089_v60  ;;  %v369_v47 = vor.u32 %v368_v37, %v364_v30  ;;  %v376_v48 = vor.u32 %v375_v38, %v371_v32  ;;  %v4025_v59 = vld [vmem:[#allocation2 + $0x94] sm:$0xf0]  ;;  %v4008_v60 = vld [vmem:[#allocation2 + $0x14] sm:$0xf]  ;;  %v3046_v63 = vld [vmem:[#allocation2 + $0x98] sm:$0xf0]  ;;  %v2981_v0 = vor.u32 %v4009_v55, %v2980_v54 }
  0x43   : > { %v4024_v62 = vld [vmem:[#allocation2 + $0x94] sm:$0xf]  ;;  %v2972_v1 = vld [vmem:[#allocation2] sm:$0xf]  ;;  %v4007_v2 = vld [vmem:[#allocation2 + $0x4] sm:$0xf0] }
  0x44   : > { %753 = vmatpush.bf16.msrb.mxu0 %v3013_v3  ;;  %573 = vmatmul.bf16.vlgmr.msra.gmra.mxu2 %v369_v47  ;;  %v3045_v3 = vor.u32 %v4025_v59, %v3044_v58  ;;  %v3036_v4 = vld [vmem:[#allocation2 + $0x80] sm:$0xf]  ;;  %v4023_v5 = vld [vmem:[#allocation2 + $0x84] sm:$0xf0]  ;;  %v4006_v6 = vld [vmem:[#allocation2 + $0x4] sm:$0xf]  ;;  %v3049_v8 = vor.u32 %v4024_v62, %v3046_v63  ;;  %v2973_v15 = vor.u32 %v4007_v2, %v2972_v1 }
  0x45   : > { %766 = vmatpush.bf16.msrb.mxu1 %v3077_v7  ;;  %779 = vmatpush.bf16.msrb.mxu2 %v3017_v11  ;;  %v2985_v7 = vor.u32 %v4008_v60, %v2982_v61  ;;  %v2974_v9 = vld [vmem:[#allocation2 + $0x8] sm:$0xf0]  ;;  %v3156_v10 = vld [vmem:[#allocation2 + $0x270] sm:$0xf]  ;;  %v4085_v11 = vld [vmem:[#allocation2 + $0x274] sm:$0xf0]  ;;  %v3037_v19 = vor.u32 %v4023_v5, %v3036_v4 }
  0x46   : > { %792 = vmatpush.bf16.msrb.mxu3 %v3081_v12  ;;  %547 = vmatmul.bf16.vlgmr.msra.gmra.mxu0 %v369_v47  ;;  %v4022_v12 = vld [vmem:[#allocation2 + $0x84] sm:$0xf]  ;;  %v3038_v13 = vld [vmem:[#allocation2 + $0x88] sm:$0xf0]  ;;  %v3220_v14 = vld [vmem:[#allocation2 + $0x2f0] sm:$0xf]  ;;  %v3157_v20 = vor.u32 %v4085_v11, %v3156_v10 }
  0x47   : > { %586 = vmatmul.bf16.vlgmr.msra.gmra.mxu3 %v376_v48  ;;  %560 = vmatmul.bf16.vlgmr.msra.gmra.mxu1 %v376_v48  ;;  %v4101_v16 = vld [vmem:[#allocation2 + $0x2f4] sm:$0xf0]  ;;  %v4084_v17 = vld [vmem:[#allocation2 + $0x274] sm:$0xf]  ;;  %v3222_v22 = vld [vmem:[#allocation2 + $0x2f8] sm:$0xf0] }
  0x48   : > { %754 = vmatpush.bf16.msrb.mxu0 %v3005_v18  ;;  %v3158_v18 = vld [vmem:[#allocation2 + $0x278] sm:$0xf0]  ;;  %v4100_v21 = vld [vmem:[#allocation2 + $0x2f4] sm:$0xf]  ;;  %v4083_v26 = vld [vmem:[#allocation2 + $0x264] sm:$0xf0]  ;;  %v3221_v27 = vor.u32 %v4101_v16, %v3220_v14 }
  0x49   : > { %767 = vmatpush.bf16.msrb.mxu1 %v3069_v23  ;;  %780 = vmatpush.bf16.msrb.mxu2 %v3009_v24  ;;  %v2977_v23 = vor.u32 %v4006_v6, %v2974_v9  ;;  %v3041_v24 = vor.u32 %v4022_v12, %v3038_v13  ;;  %v3161_v28 = vor.u32 %v4084_v17, %v3158_v18  ;;  %v3212_v29 = vld [vmem:[#allocation2 + $0x2e0] sm:$0xf]  ;;  %v4099_v31 = vld [vmem:[#allocation2 + $0x2e4] sm:$0xf0]  ;;  %v4082_v32 = vld [vmem:[#allocation2 + $0x264] sm:$0xf] }
  0x4a   : > { %793 = vmatpush.bf16.msrb.mxu3 %v3073_v25  ;;  %v3148_v25 = vld [vmem:[#allocation2 + $0x260] sm:$0xf]  ;;  %v3225_v30 = vor.u32 %v4100_v21, %v3222_v22  ;;  %v3150_v33 = vld [vmem:[#allocation2 + $0x268] sm:$0xf0]  ;;  %v4098_v35 = vld [vmem:[#allocation2 + $0x2e4] sm:$0xf] }
  0x4b   : > { %v3149_v34 = vor.u32 %v4083_v26, %v3148_v25  ;;  %v3140_v37 = vld [vmem:[#allocation2 + $0x250] sm:$0xf]  ;;  %v4081_v38 = vld [vmem:[#allocation2 + $0x254] sm:$0xf0]  ;;  %v4080_v44 = vld [vmem:[#allocation2 + $0x254] sm:$0xf] }
  0x4c   : > { %755 = vmatpush.bf16.msrb.mxu0 %v2997_v36  ;;  %v3214_v36 = vld [vmem:[#allocation2 + $0x2e8] sm:$0xf0]  ;;  %v3204_v41 = vld [vmem:[#allocation2 + $0x2d0] sm:$0xf]  ;;  %v3142_v45 = vld [vmem:[#allocation2 + $0x258] sm:$0xf0]  ;;  %v3141_v46 = vor.u32 %v4081_v38, %v3140_v37 }
  0x4d   : > { %768 = vmatpush.bf16.msrb.mxu1 %v3061_v39  ;;  %781 = vmatpush.bf16.msrb.mxu2 %v3001_v40  ;;  %v3213_v39 = vor.u32 %v4099_v31, %v3212_v29  ;;  %v3153_v40 = vor.u32 %v4082_v32, %v3150_v33  ;;  %v3217_v42 = vor.u32 %v4098_v35, %v3214_v36  ;;  %v4096_v47 = vld [vmem:[#allocation2 + $0x2d4] sm:$0xf]  ;;  %v3206_v48 = vld [vmem:[#allocation2 + $0x2d8] sm:$0xf0]  ;;  %v3132_v49 = vld [vmem:[#allocation2 + $0x240] sm:$0xf] }
  0x4e   : > { %794 = vmatpush.bf16.msrb.mxu3 %v3065_v43  ;;  %v4097_v43 = vld [vmem:[#allocation2 + $0x2d4] sm:$0xf0]  ;;  %v4079_v50 = vld [vmem:[#allocation2 + $0x244] sm:$0xf0]  ;;  %v3209_v54 = vor.u32 %v4096_v47, %v3206_v48  ;;  %v4094_v59 = vld [vmem:[#allocation2 + $0x2c4] sm:$0xf] }
  0x4f   : > { %v3205_v51 = vor.u32 %v4097_v43, %v3204_v41  ;;  %v4095_v55 = vld [vmem:[#allocation2 + $0x2c4] sm:$0xf0]  ;;  %v3133_v58 = vor.u32 %v4079_v50, %v3132_v49  ;;  %v3198_v60 = vld [vmem:[#allocation2 + $0x2c8] sm:$0xf0]  ;;  %v4077_v1 = vld [vmem:[#allocation2 + $0x234] sm:$0xf0] }
  0x50   : > { %756 = vmatpush.bf16.msrb.mxu0 %v2989_v52  ;;  %v3145_v52 = vor.u32 %v4080_v44, %v3142_v45  ;;  %v3201_v63 = vor.u32 %v4094_v59, %v3198_v60  ;;  %v3188_v2 = vld [vmem:[#allocation2 + $0x2b0] sm:$0xf]  ;;  %v4093_v4 = vld [vmem:[#allocation2 + $0x2b4] sm:$0xf0]  ;;  %v4076_v5 = vld [vmem:[#allocation2 + $0x234] sm:$0xf] }
  0x51   : > { %769 = vmatpush.bf16.msrb.mxu1 %v3053_v53  ;;  %782 = vmatpush.bf16.msrb.mxu2 %v2993_v56  ;;  %v3196_v53 = vld [vmem:[#allocation2 + $0x2c0] sm:$0xf]  ;;  %v4078_v56 = vld [vmem:[#allocation2 + $0x244] sm:$0xf]  ;;  %v3126_v6 = vld [vmem:[#allocation2 + $0x238] sm:$0xf0] }
  0x52   : > { %795 = vmatpush.bf16.msrb.mxu3 %v3057_v57  ;;  %v3134_v57 = vld [vmem:[#allocation2 + $0x248] sm:$0xf0]  ;;  %v3197_v61 = vor.u32 %v4095_v55, %v3196_v53  ;;  %v4092_v9 = vld [vmem:[#allocation2 + $0x2b4] sm:$0xf]  ;;  %v3190_v10 = vld [vmem:[#allocation2 + $0x2b8] sm:$0xf0] }
  0x53   : > { %v3137_v62 = vor.u32 %v4078_v56, %v3134_v57  ;;  %v3193_v11 = vor.u32 %v4092_v9, %v3190_v10  ;;  %v3116_v12 = vld [vmem:[#allocation2 + $0x220] sm:$0xf]  ;;  %v4075_v13 = vld [vmem:[#allocation2 + $0x224] sm:$0xf0]  ;;  %v4074_v17 = vld [vmem:[#allocation2 + $0x224] sm:$0xf] }
  0x54   : > { %757 = vmatpush.bf16.msrb.mxu0 %v2981_v0  ;;  %v3124_v0 = vld [vmem:[#allocation2 + $0x230] sm:$0xf]  ;;  %v3180_v14 = vld [vmem:[#allocation2 + $0x2a0] sm:$0xf]  ;;  %v4091_v16 = vld [vmem:[#allocation2 + $0x2a4] sm:$0xf0] }
  0x55   : > { %770 = vmatpush.bf16.msrb.mxu1 %v3045_v3  ;;  %783 = vmatpush.bf16.msrb.mxu2 %v2985_v7  ;;  %v3125_v3 = vor.u32 %v4077_v1, %v3124_v0  ;;  %v3189_v7 = vor.u32 %v4093_v4, %v3188_v2  ;;  %v3118_v18 = vld [vmem:[#allocation2 + $0x228] sm:$0xf0]  ;;  %v4090_v21 = vld [vmem:[#allocation2 + $0x2a4] sm:$0xf]  ;;  %v4073_v25 = vld [vmem:[#allocation2 + $0x214] sm:$0xf0] }
  0x56   : > { %796 = vmatpush.bf16.msrb.mxu3 %v3049_v8  ;;  %v3129_v8 = vor.u32 %v4076_v5, %v3126_v6  ;;  %v3182_v22 = vld [vmem:[#allocation2 + $0x2a8] sm:$0xf0]  ;;  %v3172_v26 = vld [vmem:[#allocation2 + $0x290] sm:$0xf]  ;;  %v4072_v29 = vld [vmem:[#allocation2 + $0x214] sm:$0xf] }
  0x57   : > { %v4088_v33 = vld [vmem:[#allocation2 + $0x294] sm:$0xf]  ;;  %v3100_v36 = vld [vmem:[#allocation2 + $0x200] sm:$0xf]  ;;  %v4071_v37 = vld [vmem:[#allocation2 + $0x204] sm:$0xf0] }
  0x58   : > { %758 = vmatpush.bf16.msrb.mxu0 %v2973_v15  ;;  %v3117_v15 = vor.u32 %v4075_v13, %v3116_v12  ;;  %v3164_v38 = vld [vmem:[#allocation2 + $0x280] sm:$0xf]  ;;  %v4070_v41 = vld [vmem:[#allocation2 + $0x204] sm:$0xf]  ;;  %v4488_v48 = vmov 269488144  }
  0x59   : > { %771 = vmatpush.bf16.msrb.mxu1 %v3037_v19  ;;  %784 = vmatpush.bf16.msrb.mxu2 %v2977_v23  ;;  %v3181_v19 = vor.u32 %v4091_v16, %v3180_v14  ;;  %v3185_v23 = vor.u32 %v4090_v21, %v3182_v22  ;;  %v4086_v45 = vld [vmem:[#allocation2 + $0x284] sm:$0xf]  ;;  %v276_v49 = vunpack.c.l.s4 %v4488_v48  ;;  %v3284_v59 = vld [vmem:[#allocation2 + $0x370] sm:$0xf]  ;;  %v4117_v60 = vld [vmem:[#allocation2 + $0x374] sm:$0xf0] }
  0x5a   : > { %797 = vmatpush.bf16.msrb.mxu3 %v3041_v24  ;;  %v3108_v24 = vld [vmem:[#allocation2 + $0x210] sm:$0xf]  ;;  %v4116_v0 = vld [vmem:[#allocation2 + $0x374] sm:$0xf]  ;;  %v3286_v1 = vld [vmem:[#allocation2 + $0x378] sm:$0xf0] }
  0x5b   : > { %v277_v50 = vunpack.c.0.s8 %v276_v49  ;;  %v4132_v6 = vld [vmem:[#allocation2 + $0x3f4] sm:$0xf]  ;;  %v4115_v13 = vld [vmem:[#allocation2 + $0x364] sm:$0xf0]  ;;  %v3340_v14 = vld [vmem:[#allocation2 + $0x3e0] sm:$0xf]  ;;  %v3289_v16 = vor.u32 %v4116_v0, %v3286_v1 }
  0x5c   : > { %1029 = vmatpush.bf16.msra.mxu0 %v3157_v20  ;;  %v3121_v20 = vor.u32 %v4074_v17, %v3118_v18  ;;  %v4114_v18 = vld [vmem:[#allocation2 + $0x364] sm:$0xf]  ;;  %v3342_v22 = vld [vmem:[#allocation2 + $0x3e8] sm:$0xf0]  ;;  %v3324_v49 = vld [vmem:[#allocation2 + $0x3c0] sm:$0xf] }
  0x5d   : > { %1042 = vmatpush.bf16.msra.mxu1 %v3221_v27  ;;  %1055 = vmatpush.bf16.msra.mxu2 %v3161_v28  ;;  %v3109_v27 = vor.u32 %v4073_v25, %v3108_v24  ;;  %v4089_v28 = vld [vmem:[#allocation2 + $0x294] sm:$0xf0]  ;;  %v4130_v21 = vld [vmem:[#allocation2 + $0x3e4] sm:$0xf]  ;;  %v3332_v25 = vld [vmem:[#allocation2 + $0x3d0] sm:$0xf] }
  0x5e   : > { %1068 = vmatpush.bf16.msra.mxu3 %v3225_v30  ;;  %v3110_v30 = vld [vmem:[#allocation2 + $0x218] sm:$0xf0]  ;;  %v3173_v31 = vor.u32 %v4089_v28, %v3172_v26  ;;  %v4113_v24 = vld [vmem:[#allocation2 + $0x354] sm:$0xf0]  ;;  %v4108_v1 = vld [vmem:[#allocation2 + $0x334] sm:$0xf] }
  0x5f   : > { %v3113_v32 = vor.u32 %v4072_v29, %v3110_v30  ;;  %v4129_v26 = vld [vmem:[#allocation2 + $0x3d4] sm:$0xf0]  ;;  %v4112_v29 = vld [vmem:[#allocation2 + $0x354] sm:$0xf]  ;;  %v3270_v30 = vld [vmem:[#allocation2 + $0x358] sm:$0xf0] }
  0x60   : > { %1030 = vmatpush.bf16.msra.mxu0 %v3149_v34  ;;  %v3174_v34 = vld [vmem:[#allocation2 + $0x298] sm:$0xf0]  ;;  %v4125_v0 = vld [vmem:[#allocation2 + $0x3b4] sm:$0xf0] }
  0x61   : > { %1043 = vmatpush.bf16.msra.mxu1 %v3213_v39  ;;  %1056 = vmatpush.bf16.msra.mxu2 %v3153_v40  ;;  %v3177_v35 = vor.u32 %v4088_v33, %v3174_v34  ;;  %v3101_v39 = vor.u32 %v4071_v37, %v3100_v36  ;;  %v4087_v40 = vld [vmem:[#allocation2 + $0x284] sm:$0xf0] }
  0x62   : > { %1069 = vmatpush.bf16.msra.mxu3 %v3217_v42  ;;  %v3102_v42 = vld [vmem:[#allocation2 + $0x208] sm:$0xf0]  ;;  %v3165_v43 = vor.u32 %v4087_v40, %v3164_v38  ;;  %v3334_v38 = vld [vmem:[#allocation2 + $0x3d8] sm:$0xf0] }
  0x63   : > { %v3105_v44 = vor.u32 %v4070_v41, %v3102_v42  ;;  %v3333_v42 = vor.u32 %v4129_v26, %v3332_v25  ;;  %v3236_v26 = vld [vmem:[#allocation2 + $0x310] sm:$0xf] }
  0x64   : > { %1031 = vmatpush.bf16.msra.mxu0 %v3141_v46  ;;  %v3166_v46 = vld [vmem:[#allocation2 + $0x288] sm:$0xf0] }
  0x65   : > { %1044 = vmatpush.bf16.msra.mxu1 %v3205_v51  ;;  %1057 = vmatpush.bf16.msra.mxu2 %v3145_v52  ;;  %v3169_v47 = vor.u32 %v4086_v45, %v3166_v46 }
  0x66   : > { %1070 = vmatpush.bf16.msra.mxu3 %v3209_v54  ;;  %v268_v54 = vld [vmem:[%s4586_s22] sm:$0x33] }
  0x67   : > { %v279_v57 = vunpack.c.l.bf16 %v268_v54 }
  0x68   : > { %1032 = vmatpush.bf16.msra.mxu0 %v3133_v58  ;;  %v280_v58 = vunpack.c.h.bf16 %v268_v54  ;;  %v4126_v54 = vld [vmem:[#allocation2 + $0x3c4] sm:$0xf] }
  0x69   : > { %1045 = vmatpush.bf16.msra.mxu1 %v3197_v61  ;;  %1058 = vmatpush.bf16.msra.mxu2 %v3137_v62  ;;  %v3348_v61 = vld [vmem:[#allocation2 + $0x3f0] sm:$0xf] }
  0x6a   : > { %1071 = vmatpush.bf16.msra.mxu3 %v3201_v63  ;;  %v4133_v63 = vld [vmem:[#allocation2 + $0x3f4] sm:$0xf0] }
  0x6b   : > { %v3349_v12 = vor.u32 %v4133_v63, %v3348_v61 }
  0x6c   : > { %1033 = vmatpush.bf16.msra.mxu0 %v3125_v3 }
  0x6d   : > { %1046 = vmatpush.bf16.msra.mxu1 %v3189_v7  ;;  %1059 = vmatpush.bf16.msra.mxu2 %v3129_v8  ;;  %v3350_v7 = vld [vmem:[#allocation2 + $0x3f8] sm:$0xf0]  ;;  %v3276_v8 = vld [vmem:[#allocation2 + $0x360] sm:$0xf] }
  0x6e   : > { %1072 = vmatpush.bf16.msra.mxu3 %v3193_v11  ;;  %v3285_v11 = vor.u32 %v4117_v60, %v3284_v59  ;;  %v3353_v17 = vor.u32 %v4132_v6, %v3350_v7  ;;  %v3316_v59 = vld [vmem:[#allocation2 + $0x3b0] sm:$0xf]  ;;  %v4124_v7 = vld [vmem:[#allocation2 + $0x3b4] sm:$0xf] }
  0x70   : > { %1034 = vmatpush.bf16.msra.mxu0 %v3117_v15  ;;  %v4131_v15 = vld [vmem:[#allocation2 + $0x3e4] sm:$0xf0] }
  0x71   : > { %1047 = vmatpush.bf16.msra.mxu1 %v3181_v19  ;;  %1060 = vmatpush.bf16.msra.mxu2 %v3121_v20  ;;  %v3278_v19 = vld [vmem:[#allocation2 + $0x368] sm:$0xf0]  ;;  %v4597_v20 = vld [vmem:[%s4586_s22] sm:$0x66]  ;;  %v3341_v28 = vor.u32 %v4131_v15, %v3340_v14  ;;  %v4107_v14 = vld [vmem:[#allocation2 + $0x324] sm:$0xf0] }
  0x72   : > { %1073 = vmatpush.bf16.msra.mxu3 %v3185_v23  ;;  %v3268_v23 = vld [vmem:[#allocation2 + $0x350] sm:$0xf]  ;;  %v816_v33 = vunpack.c.h.bf16 %v4597_v20  ;;  %v3281_v34 = vor.u32 %v4114_v18, %v3278_v19  ;;  %v4123_v18 = vld [vmem:[#allocation2 + $0x3a4] sm:$0xf0]  ;;  %v4106_v19 = vld [vmem:[#allocation2 + $0x324] sm:$0xf] }
  0x73   : > { %v3269_v41 = vor.u32 %v4113_v24, %v3268_v23  ;;  %v3310_v23 = vld [vmem:[#allocation2 + $0x3a8] sm:$0xf0] }
  0x74   : > { %1035 = vmatpush.bf16.msra.mxu0 %v3109_v27  ;;  %v3277_v27 = vor.u32 %v4115_v13, %v3276_v8  ;;  %v3318_v8 = vld [vmem:[#allocation2 + $0x3b8] sm:$0xf0]  ;;  %v3244_v13 = vld [vmem:[#allocation2 + $0x320] sm:$0xf] }
  0x75   : > { %1048 = vmatpush.bf16.msra.mxu1 %v3173_v31  ;;  %1061 = vmatpush.bf16.msra.mxu2 %v3113_v32  ;;  %v4128_v31 = vld [vmem:[#allocation2 + $0x3d4] sm:$0xf]  ;;  %v815_v32 = vunpack.c.l.bf16 %v4597_v20  ;;  %v3245_v24 = vor.u32 %v4107_v14, %v3244_v13  ;;  %v4146_v13 = vld [vmem:[#allocation2 + $0x464] sm:$0xf]  ;;  %v3406_v14 = vld [vmem:[#allocation2 + $0x468] sm:$0xf0] }
  0x76   : > { %1074 = vmatpush.bf16.msra.mxu3 %v3177_v35  ;;  %v3345_v35 = vor.u32 %v4130_v21, %v3342_v22  ;;  %v3337_v48 = vor.u32 %v4128_v31, %v3334_v38  ;;  %v3246_v21 = vld [vmem:[#allocation2 + $0x328] sm:$0xf0]  ;;  %v4122_v22 = vld [vmem:[#allocation2 + $0x3a4] sm:$0xf]  ;;  %v4121_v31 = vld [vmem:[#allocation2 + $0x394] sm:$0xf0] }
  0x78   : > { %1036 = vmatpush.bf16.msra.mxu0 %v3101_v39 }
  0x79   : > { %1049 = vmatpush.bf16.msra.mxu1 %v3165_v43  ;;  %1062 = vmatpush.bf16.msra.mxu2 %v3105_v44  ;;  %v3260_v43 = vld [vmem:[#allocation2 + $0x340] sm:$0xf]  ;;  %v4111_v44 = vld [vmem:[#allocation2 + $0x344] sm:$0xf0] }
  0x7a   : > { %1075 = vmatpush.bf16.msra.mxu3 %v3169_v47  ;;  %v3273_v47 = vor.u32 %v4112_v29, %v3270_v30  ;;  %v3249_v29 = vor.u32 %v4106_v19, %v3246_v21  ;;  %v3313_v30 = vor.u32 %v4122_v22, %v3310_v23  ;;  %v3396_v22 = vld [vmem:[#allocation2 + $0x450] sm:$0xf]  ;;  %v4145_v23 = vld [vmem:[#allocation2 + $0x454] sm:$0xf0] }
  0x8c   : > { %v273_v51 = vpop.permute.xlu0 %272 }
  0x8d   : > { %v278_v52 = vperm.slane %v273_v51, %v277_v50  ;;  %v4110_v51 = vld [vmem:[#allocation2 + $0x344] sm:$0xf] }
  0x8f   : > { %v4589_v53 = vunpack.c.l.bf16 %v278_v52  ;;  %v3262_v52 = vld [vmem:[#allocation2 + $0x348] sm:$0xf0] }
  0x91   : > { %283 = vst [vmem:[#allocation1] ss:$2 sm:$0xff] %v4589_v53 }
  0x94   : > { %v809_v55 = vpop.permute.xlu0 %808 }
  0x95   : > { %v814_v56 = vperm.slane %v809_v55, %v277_v50  ;;  %v4127_v50 = vld [vmem:[#allocation2 + $0x3c4] sm:$0xf0]  ;;  %v3326_v55 = vld [vmem:[#allocation2 + $0x3c8] sm:$0xf0] }
  0x96   : > { %v3325_v60 = vor.u32 %v4127_v50, %v3324_v49  ;;  %v3230_v49 = vld [vmem:[#allocation2 + $0x308] sm:$0xf0]  ;;  %v4118_v50 = vld [vmem:[#allocation2 + $0x384] sm:$0xf] }
  0x97   : > { %v4593_v62 = vunpack.c.l.bf16 %v814_v56  ;;  %v3261_v56 = vor.u32 %v4111_v44, %v3260_v43  ;;  %v4103_v43 = vld [vmem:[#allocation2 + $0x304] sm:$0xf0]  ;;  %v3292_v44 = vld [vmem:[#allocation2 + $0x380] sm:$0xf] }
  0x98   : > { %v284_v2 = vld.sshfl [vmem:[#allocation1] sm:$0xff pattern:$0x75316420]  ;;  %v285_v3 = vld.sshfl [vmem:[#allocation1 + $0x8] sm:$0xff pattern:$0x75316420] }
  0x99   : > { %819 = vst [vmem:[#allocation1] ss:$2 sm:$0xff] %v4593_v62  ;;  %v288_v4 = vmul.f32 %v284_v2, %v279_v57  ;;  %v289_v5 = vmul.f32 %v285_v3, %v280_v58  ;;  %v3252_v57 = vld [vmem:[#allocation2 + $0x330] sm:$0xf]  ;;  %v4109_v58 = vld [vmem:[#allocation2 + $0x334] sm:$0xf0]  ;;  %v3265_v3 = vor.u32 %v4110_v51, %v3262_v52 }
  0x9a   : > { %v3254_v2 = vld [vmem:[#allocation2 + $0x338] sm:$0xf0]  ;;  %v3294_v51 = vld [vmem:[#allocation2 + $0x388] sm:$0xf0]  ;;  %v3412_v52 = vld [vmem:[#allocation2 + $0x470] sm:$0xf] }
  0x9b   : > { %v290_v9 = vpack.c.bf16 %v288_v4, %v288_v4  ;;  %v291_v10 = vpack.c.bf16 %v289_v5, %v289_v5  ;;  %v3329_v4 = vor.u32 %v4126_v54, %v3326_v55  ;;  %v3257_v15 = vor.u32 %v4108_v1, %v3254_v2  ;;  %v4149_v54 = vld [vmem:[#allocation2 + $0x474] sm:$0xf0]  ;;  %v3478_v1 = vld [vmem:[#allocation2 + $0x4f8] sm:$0xf0] }
  0x9d   : > { %759 = vmatmul.bf16.vlgmr.msrb.gmra.mxu0 %v290_v9  ;;  %772 = vmatmul.bf16.vlgmr.msrb.gmra.mxu1 %v291_v10 }
  0x9e   : > { %785 = vmatmul.bf16.vlgmr.msrb.gmra.mxu2 %v290_v9  ;;  %798 = vmatmul.bf16.vlgmr.msrb.gmra.mxu3 %v291_v10 }
  0x9f   : > { %1293 = vmatpush.bf16.msrb.mxu0 %v3285_v11  ;;  %1306 = vmatpush.bf16.msrb.mxu1 %v3349_v12  ;;  %v3253_v11 = vor.u32 %v4109_v58, %v3252_v57  ;;  %v3317_v12 = vor.u32 %v4125_v0, %v3316_v59  ;;  %v3476_v57 = vld [vmem:[#allocation2 + $0x4f0] sm:$0xf]  ;;  %v4165_v58 = vld [vmem:[#allocation2 + $0x4f4] sm:$0xf0]  ;;  %v4148_v59 = vld [vmem:[#allocation2 + $0x474] sm:$0xf] }
  0xa0   : > { %1319 = vmatpush.bf16.msrb.mxu2 %v3289_v16  ;;  %1332 = vmatpush.bf16.msrb.mxu3 %v3353_v17  ;;  %v820_v36 = vld.sshfl [vmem:[#allocation1] sm:$0xff pattern:$0x75316420]  ;;  %v821_v37 = vld.sshfl [vmem:[#allocation1 + $0x8] sm:$0xff pattern:$0x75316420]  ;;  %v3321_v16 = vor.u32 %v4124_v7, %v3318_v8 }
  0xa1   : > { %v822_v39 = vrot.slane %v820_v36, 6  ;;  %v823_v40 = vrot.slane %v821_v37, 6  ;;  %1083 = vst [vmem:[#allocation1] ss:$2 sm:$0xff] %v4589_v53  ;;  %v3308_v17 = vld [vmem:[#allocation2 + $0x3a0] sm:$0xf] }
  0xa2   : > { %v3309_v25 = vor.u32 %v4123_v18, %v3308_v17  ;;  %v4120_v36 = vld [vmem:[#allocation2 + $0x394] sm:$0xf]  ;;  %v3302_v37 = vld [vmem:[#allocation2 + $0x398] sm:$0xf0] }
  0xa3   : > { %1294 = vmatpush.bf16.msrb.mxu0 %v3277_v27  ;;  %1307 = vmatpush.bf16.msrb.mxu1 %v3341_v28  ;;  %v826_v45 = vmul.f32 %v822_v39, %v815_v32  ;;  %v827_v46 = vmul.f32 %v823_v40, %v816_v33  ;;  %v4105_v27 = vld [vmem:[#allocation2 + $0x314] sm:$0xf0]  ;;  %v3300_v28 = vld [vmem:[#allocation2 + $0x390] sm:$0xf]  ;;  %v3228_v40 = vld [vmem:[#allocation2 + $0x300] sm:$0xf] }
  0xa4   : > { %1320 = vmatpush.bf16.msrb.mxu2 %v3281_v34  ;;  %1333 = vmatpush.bf16.msrb.mxu3 %v3345_v35  ;;  %v4104_v34 = vld [vmem:[#allocation2 + $0x314] sm:$0xf]  ;;  %v3238_v35 = vld [vmem:[#allocation2 + $0x318] sm:$0xf0] }
  0xa5   : > { %v828_v61 = vpack.c.bf16 %v826_v45, %v826_v45  ;;  %v829_v63 = vpack.c.bf16 %v827_v46, %v827_v46  ;;  %v4119_v45 = vld [vmem:[#allocation2 + $0x384] sm:$0xf0]  ;;  %v3241_v46 = vor.u32 %v4104_v34, %v3238_v35  ;;  %v4164_v0 = vld [vmem:[#allocation2 + $0x4f4] sm:$0xf]  ;;  %v3397_v35 = vor.u32 %v4145_v23, %v3396_v22  ;;  %v3366_v22 = vld [vmem:[#allocation2 + $0x418] sm:$0xf0] }
  0xa6   : > { %v4143_v34 = vld [vmem:[#allocation2 + $0x444] sm:$0xf0]  ;;  %v4152_v23 = vld [vmem:[#allocation2 + $0x494] sm:$0xf] }
  0xa7   : > { %1295 = vmatpush.bf16.msrb.mxu0 %v3269_v41  ;;  %1308 = vmatpush.bf16.msrb.mxu1 %v3333_v42  ;;  %v865_v9 = vrot.slane %v828_v61, 1  ;;  %v866_v10 = vrot.slane %v829_v63, 1  ;;  %v3237_v41 = vor.u32 %v4105_v27, %v3236_v26  ;;  %v3301_v42 = vor.u32 %v4121_v31, %v3300_v28  ;;  %v3414_v63 = vld [vmem:[#allocation2 + $0x478] sm:$0xf0]  ;;  %v3460_v26 = vld [vmem:[#allocation2 + $0x4d0] sm:$0xf] }
  0xa8   : > { %1321 = vmatpush.bf16.msrb.mxu2 %v3273_v47  ;;  %1334 = vmatpush.bf16.msrb.mxu3 %v3337_v48  ;;  %v4606_v5 = vld.sshfl [vmem:[#allocation1] sm:$0xff pattern:$0x75316420]  ;;  %v4608_v6 = vld.sshfl [vmem:[#allocation1 + $0x8] sm:$0xff pattern:$0x75316420]  ;;  %v3305_v47 = vor.u32 %v4120_v36, %v3302_v37  ;;  %v3293_v61 = vor.u32 %v4119_v45, %v3292_v44 }
  0xa9   : > { %1622 = vst [vmem:[#allocation1 + $0x1] ss:$2 sm:$0xff] %v4593_v62  ;;  %v1086_v38 = vrot.slane %v4606_v5, 6  ;;  %v1087_v39 = vrot.slane %v4608_v6, 6  ;;  %v4102_v48 = vld [vmem:[#allocation2 + $0x304] sm:$0xf]  ;;  %v3477_v6 = vor.u32 %v4165_v58, %v3476_v57 }
  0xaa   : > { %v3233_v2 = vor.u32 %v4102_v48, %v3230_v49  ;;  %v4147_v5 = vld [vmem:[#allocation2 + $0x464] sm:$0xf0]  ;;  %v4161_v27 = vld [vmem:[#allocation2 + $0x4d4] sm:$0xf0]  ;;  %v4144_v28 = vld [vmem:[#allocation2 + $0x454] sm:$0xf] }
  0xab   : > { %1296 = vmatpush.bf16.msrb.mxu0 %v3261_v56  ;;  %1309 = vmatpush.bf16.msrb.mxu1 %v3325_v60  ;;  %v1090_v55 = vmul.f32 %v1086_v38, %v815_v32  ;;  %v1091_v56 = vmul.f32 %v1087_v39, %v816_v33  ;;  %v3229_v60 = vor.u32 %v4103_v43, %v3228_v40  ;;  %v3388_v31 = vld [vmem:[#allocation2 + $0x440] sm:$0xf]  ;;  %v4159_v38 = vld [vmem:[#allocation2 + $0x4c4] sm:$0xf0]  ;;  %v4142_v39 = vld [vmem:[#allocation2 + $0x444] sm:$0xf] }
  0xac   : > { %1322 = vmatpush.bf16.msrb.mxu2 %v3265_v3  ;;  %1335 = vmatpush.bf16.msrb.mxu3 %v3329_v4  ;;  %v3297_v3 = vor.u32 %v4118_v50, %v3294_v51  ;;  %v3404_v4 = vld [vmem:[#allocation2 + $0x460] sm:$0xf]  ;;  %v3413_v32 = vor.u32 %v4149_v54, %v3412_v52  ;;  %v3461_v36 = vor.u32 %v4161_v27, %v3460_v26  ;;  %v4158_v43 = vld [vmem:[#allocation2 + $0x4c4] sm:$0xf]  ;;  %v3454_v44 = vld [vmem:[#allocation2 + $0x4c8] sm:$0xf0] }
  0xad   : > { %1037 = vmatmul.bf16.vlgmr.msra.gmra.mxu0 %v865_v9  ;;  %1050 = vmatmul.bf16.vlgmr.msra.gmra.mxu1 %v866_v10  ;;  %v1092_v20 = vpack.c.bf16 %v1090_v55, %v1090_v55  ;;  %v1093_v33 = vpack.c.bf16 %v1091_v56, %v1091_v56  ;;  %v3405_v19 = vor.u32 %v4147_v5, %v3404_v4  ;;  %v3452_v37 = vld [vmem:[#allocation2 + $0x4c0] sm:$0xf]  ;;  %v3380_v49 = vld [vmem:[#allocation2 + $0x430] sm:$0xf]  ;;  %v4141_v50 = vld [vmem:[#allocation2 + $0x434] sm:$0xf0] }
  0xae   : > { %1063 = vmatmul.bf16.vlgmr.msra.gmra.mxu2 %v865_v9  ;;  %1076 = vmatmul.bf16.vlgmr.msra.gmra.mxu3 %v866_v10  ;;  %v3417_v9 = vor.u32 %v4148_v59, %v3414_v63  ;;  %v3481_v10 = vor.u32 %v4164_v0, %v3478_v1  ;;  %v3453_v48 = vor.u32 %v4159_v38, %v3452_v37  ;;  %v3444_v51 = vld [vmem:[#allocation2 + $0x4b0] sm:$0xf]  ;;  %v4157_v55 = vld [vmem:[#allocation2 + $0x4b4] sm:$0xf0]  ;;  %v4140_v56 = vld [vmem:[#allocation2 + $0x434] sm:$0xf] }
  0xaf   : > { %1297 = vmatpush.bf16.msrb.mxu0 %v3253_v11  ;;  %1310 = vmatpush.bf16.msrb.mxu1 %v3317_v12  ;;  %v3468_v11 = vld [vmem:[#allocation2 + $0x4e0] sm:$0xf]  ;;  %v4163_v12 = vld [vmem:[#allocation2 + $0x4e4] sm:$0xf0]  ;;  %v1129_v17 = vrot.slane %v1092_v20, 1  ;;  %v1130_v18 = vrot.slane %v1093_v33, 1  ;;  %v3457_v54 = vor.u32 %v4158_v43, %v3454_v44 }
  0xb0   : > { %1323 = vmatpush.bf16.msrb.mxu2 %v3257_v15  ;;  %1336 = vmatpush.bf16.msrb.mxu3 %v3321_v16  ;;  %v4617_v7 = vld.sshfl [vmem:[#allocation1] sm:$0xff pattern:$0x75316420]  ;;  %v4619_v8 = vld.sshfl [vmem:[#allocation1 + $0x8] sm:$0xff pattern:$0x75316420]  ;;  %v3469_v21 = vor.u32 %v4163_v12, %v3468_v11 }
  0xb1   : > { %v4162_v15 = vld [vmem:[#allocation2 + $0x4e4] sm:$0xf]  ;;  %v3470_v16 = vld [vmem:[#allocation2 + $0x4e8] sm:$0xf0]  ;;  %1885 = vst [vmem:[#allocation1 + $0x1] ss:$2 sm:$0xff] %v4589_v53 }
  0xb2   : > { %v3462_v53 = vld [vmem:[#allocation2 + $0x4d8] sm:$0xf0]  ;;  %v4156_v59 = vld [vmem:[#allocation2 + $0x4b4] sm:$0xf]  ;;  %v3372_v63 = vld [vmem:[#allocation2 + $0x420] sm:$0xf] }
  0xb3   : > { %1298 = vmatpush.bf16.msrb.mxu0 %v3245_v24  ;;  %1311 = vmatpush.bf16.msrb.mxu1 %v3309_v25  ;;  %v3409_v24 = vor.u32 %v4146_v13, %v3406_v14  ;;  %v3473_v25 = vor.u32 %v4162_v15, %v3470_v16  ;;  %v1347_v57 = vld [vmem:[%s4586_s22] sm:$0xee]  ;;  %v4139_v0 = vld [vmem:[#allocation2 + $0x424] sm:$0xf0]  ;;  %v3436_v5 = vld [vmem:[#allocation2 + $0x4a0] sm:$0xf] }
  0xb4   : > { %1324 = vmatpush.bf16.msrb.mxu2 %v3249_v29  ;;  %1337 = vmatpush.bf16.msrb.mxu3 %v3313_v30  ;;  %v3398_v29 = vld [vmem:[#allocation2 + $0x458] sm:$0xf0]  ;;  %v4160_v30 = vld [vmem:[#allocation2 + $0x4d4] sm:$0xf]  ;;  %v1382_v1 = vunpack.c.l.b16 %v1347_v57  ;;  %v3374_v20 = vld [vmem:[#allocation2 + $0x428] sm:$0xf0] }
  0xb5   : > { %v3401_v40 = vor.u32 %v4144_v28, %v3398_v29  ;;  %v3382_v58 = vld [vmem:[#allocation2 + $0x438] sm:$0xf0]  ;;  %v4154_v33 = vld [vmem:[#allocation2 + $0x4a4] sm:$0xf]  ;;  %v3364_v11 = vld [vmem:[#allocation2 + $0x410] sm:$0xf] }
  0xb6   : > { %v4137_v13 = vld [vmem:[#allocation2 + $0x414] sm:$0xf0]  ;;  %v3428_v14 = vld [vmem:[#allocation2 + $0x490] sm:$0xf]  ;;  %v1384_v16 = vpack.c.b16 %v1382_v1, %v1382_v1  ;;  %v4135_v28 = vld [vmem:[#allocation2 + $0x404] sm:$0xf0] }
  0xb7   : > { %1299 = vmatpush.bf16.msrb.mxu0 %v3237_v41  ;;  %1312 = vmatpush.bf16.msrb.mxu1 %v3301_v42  ;;  %v3465_v41 = vor.u32 %v4160_v30, %v3462_v53  ;;  %v3390_v42 = vld [vmem:[#allocation2 + $0x448] sm:$0xf0]  ;;  %v4153_v15 = vld [vmem:[#allocation2 + $0x494] sm:$0xf0]  ;;  %v3365_v26 = vor.u32 %v4137_v13, %v3364_v11  ;;  %v3420_v29 = vld [vmem:[#allocation2 + $0x480] sm:$0xf] }
  0xb8   : > { %1325 = vmatpush.bf16.msrb.mxu2 %v3241_v46  ;;  %1338 = vmatpush.bf16.msrb.mxu3 %v3305_v47  ;;  %v4622_v45 = vld.sshfl [vmem:[#allocation1] sm:$0xff pattern:$0x75316420]  ;;  %v4624_v46 = vld.sshfl [vmem:[#allocation1 + $0x8] sm:$0xff pattern:$0x75316420]  ;;  %v3389_v47 = vor.u32 %v4143_v34, %v3388_v31  ;;  %v3393_v52 = vor.u32 %v4142_v39, %v3390_v42  ;;  %v3429_v27 = vor.u32 %v4153_v15, %v3428_v14 }
  0xb9   : > { %2427 = vst [vmem:[#allocation1] ss:$2 sm:$0xff] %v4593_v62  ;;  %v3381_v62 = vor.u32 %v4141_v50, %v3380_v49  ;;  %v4151_v30 = vld [vmem:[#allocation2 + $0x484] sm:$0xf0]  ;;  %v4134_v53 = vld [vmem:[#allocation2 + $0x404] sm:$0xf] }
  0xba   : > { %v3358_v31 = vld [vmem:[#allocation2 + $0x408] sm:$0xf0]  ;;  %v1387_v34 = vshrl.u32 %v1384_v16, 16  ;;  %v3540_v42 = vld [vmem:[#allocation2 + $0x570] sm:$0xf]  ;;  %v3421_v49 = vor.u32 %v4151_v30, %v3420_v29 }
  0xbb   : > { %1300 = vmatpush.bf16.msrb.mxu0 %v3229_v60  ;;  %1313 = vmatpush.bf16.msrb.mxu1 %v3293_v61  ;;  %v3446_v60 = vld [vmem:[#allocation2 + $0x4b8] sm:$0xf0]  ;;  %v3445_v61 = vor.u32 %v4157_v55, %v3444_v51  ;;  %v4181_v43 = vld [vmem:[#allocation2 + $0x574] sm:$0xf0]  ;;  %v3604_v44 = vld [vmem:[#allocation2 + $0x5f0] sm:$0xf] }
  0xbc   : > { %1326 = vmatpush.bf16.msrb.mxu2 %v3233_v2  ;;  %1339 = vmatpush.bf16.msrb.mxu3 %v3297_v3  ;;  %v1383_v2 = vunpack.c.h.b16 %v1347_v57  ;;  %v3385_v3 = vor.u32 %v4140_v56, %v3382_v58  ;;  %v3449_v4 = vor.u32 %v4156_v59, %v3446_v60  ;;  %v4180_v50 = vld [vmem:[#allocation2 + $0x574] sm:$0xf]  ;;  %v3542_v51 = vld [vmem:[#allocation2 + $0x578] sm:$0xf0]  ;;  %v1389_v55 = vrot.slane %v1387_v34, 1 }
  0xbd   : > { %v3361_v59 = vor.u32 %v4134_v53, %v3358_v31  ;;  %v3545_v1 = vor.u32 %v4180_v50, %v3542_v51  ;;  %v4177_v13 = vld [vmem:[#allocation2 + $0x554] sm:$0xf0]  ;;  %v3572_v50 = vld [vmem:[#allocation2 + $0x5b0] sm:$0xf] }
  0xbe   : > { %1301 = vmatmul.bf16.vlgmr.msrb.gmra.mxu0 %v1129_v17  ;;  %1314 = vmatmul.bf16.vlgmr.msrb.gmra.mxu1 %v1130_v18  ;;  %v4189_v51 = vld [vmem:[#allocation2 + $0x5b4] sm:$0xf0] }
  0xbf   : > { %1564 = vmatpush.bf16.msra.mxu0 %v3413_v32  ;;  %1577 = vmatpush.bf16.msra.mxu1 %v3477_v6  ;;  %v4155_v32 = vld [vmem:[#allocation2 + $0x4a4] sm:$0xf0]  ;;  %v4138_v6 = vld [vmem:[#allocation2 + $0x424] sm:$0xf] }
  0xc0   : > { %1590 = vmatpush.bf16.msra.mxu2 %v3417_v9  ;;  %1603 = vmatpush.bf16.msra.mxu3 %v3481_v10  ;;  %v3438_v9 = vld [vmem:[#allocation2 + $0x4a8] sm:$0xf0]  ;;  %v3373_v10 = vor.u32 %v4139_v0, %v3372_v63  ;;  %v3437_v12 = vor.u32 %v4155_v32, %v3436_v5  ;;  %v3532_v63 = vld [vmem:[#allocation2 + $0x560] sm:$0xf]  ;;  %v4179_v0 = vld [vmem:[#allocation2 + $0x564] sm:$0xf0] }
  0xc1   : > { %1327 = vmatmul.bf16.vlgmr.msrb.gmra.mxu2 %v1129_v17  ;;  %1340 = vmatmul.bf16.vlgmr.msrb.gmra.mxu3 %v1130_v18  ;;  %v1385_v17 = vpack.c.b16 %v1383_v2, %v1383_v2  ;;  %v3377_v18 = vor.u32 %v4138_v6, %v3374_v20  ;;  %v4178_v5 = vld [vmem:[#allocation2 + $0x564] sm:$0xf]  ;;  %v3534_v20 = vld [vmem:[#allocation2 + $0x568] sm:$0xf0] }
  0xc2   : > { %v3537_v14 = vor.u32 %v4178_v5, %v3534_v20  ;;  %v4170_v5 = vld [vmem:[#allocation2 + $0x524] sm:$0xf]  ;;  %v3566_v20 = vld [vmem:[#allocation2 + $0x5a8] sm:$0xf0] }
  0xc3   : > { %1565 = vmatpush.bf16.msra.mxu0 %v3405_v19  ;;  %1578 = vmatpush.bf16.msra.mxu1 %v3469_v21  ;;  %v3441_v19 = vor.u32 %v4154_v33, %v3438_v9  ;;  %v4136_v21 = vld [vmem:[#allocation2 + $0x414] sm:$0xf]  ;;  %v1398_v37 = vshll.u32 %v1385_v17, 16  ;;  %v4194_v33 = vld [vmem:[#allocation2 + $0x5e4] sm:$0xf] }
  0xc4   : > { %1591 = vmatpush.bf16.msra.mxu2 %v3409_v24  ;;  %1604 = vmatpush.bf16.msra.mxu3 %v3473_v25  ;;  %v3430_v24 = vld [vmem:[#allocation2 + $0x498] sm:$0xf0]  ;;  %v3356_v25 = vld [vmem:[#allocation2 + $0x400] sm:$0xf]  ;;  %v3369_v38 = vor.u32 %v4136_v21, %v3366_v22  ;;  %v3598_v9 = vld [vmem:[#allocation2 + $0x5e8] sm:$0xf0] }
  0xc5   : > { %v3433_v39 = vor.u32 %v4152_v23, %v3430_v24  ;;  %v1400_v58 = vrot.slane %v1398_v37, 2  ;;  %v3601_v15 = vor.u32 %v4194_v33, %v3598_v9  ;;  %v4192_v21 = vld [vmem:[#allocation2 + $0x5d4] sm:$0xf]  ;;  %v3590_v22 = vld [vmem:[#allocation2 + $0x5d8] sm:$0xf0]  ;;  %v548_v23 = vpop.f32.mrf.mxu0  ;;  %v561_v24 = vpop.f32.mrf.mxu1 }
  0xc6   : > { %v4628_v29 = vadd.f32 %v561_v24, %v548_v23  ;;  %v3593_v34 = vor.u32 %v4192_v21, %v3590_v22  ;;  %v4174_v37 = vld [vmem:[#allocation2 + $0x544] sm:$0xf]  ;;  %v4633_v33 = vld [vmem:[%s4586_s22] sm:$0xcc]  ;;  %v3484_v24 = vld [vmem:[#allocation2 + $0x500] sm:$0xf] }
  0xc7   : > { %1566 = vmatpush.bf16.msra.mxu0 %v3397_v35  ;;  %1579 = vmatpush.bf16.msra.mxu1 %v3461_v36  ;;  %v1390_v35 = vshll.u32 %v1384_v16, 16  ;;  %v1395_v36 = vshrl.u32 %v1385_v17, 16  ;;  %v3588_v16 = vld [vmem:[#allocation2 + $0x5d0] sm:$0xf]  ;;  %v4193_v17 = vld [vmem:[#allocation2 + $0x5d4] sm:$0xf0]  ;;  %v574_v30 = vpop.f32.mrf.mxu2  ;;  %v1619_v22 = vunpack.c.l.bf16 %v4633_v33  ;;  %v1620_v23 = vunpack.c.h.bf16 %v4633_v33 }
  0xc8   : > { %1592 = vmatpush.bf16.msra.mxu2 %v3401_v40  ;;  %1605 = vmatpush.bf16.msra.mxu3 %v3465_v41  ;;  %v4150_v40 = vld [vmem:[#allocation2 + $0x484] sm:$0xf]  ;;  %v3422_v41 = vld [vmem:[#allocation2 + $0x488] sm:$0xf0]  ;;  %v3558_v21 = vld [vmem:[#allocation2 + $0x598] sm:$0xf0] }
  0xc9   : > { %v1392_v56 = vrot.slane %v1390_v35, 2  ;;  %v1397_v57 = vrot.slane %v1395_v36, 1  ;;  %v3425_v60 = vor.u32 %v4150_v40, %v3422_v41  ;;  %v3580_v35 = vld [vmem:[#allocation2 + $0x5c0] sm:$0xf]  ;;  %v4191_v36 = vld [vmem:[#allocation2 + $0x5c4] sm:$0xf0] }
  0xca   : > { %v587_v53 = vpop.f32.mrf.mxu3  ;;  %v4190_v40 = vld [vmem:[#allocation2 + $0x5c4] sm:$0xf]  ;;  %v3582_v41 = vld [vmem:[#allocation2 + $0x5c8] sm:$0xf0] }
  0xcb   : > { %1567 = vmatpush.bf16.msra.mxu0 %v3389_v47  ;;  %1580 = vmatpush.bf16.msra.mxu1 %v3453_v48  ;;  %v4197_v47 = vld [vmem:[#allocation2 + $0x5f4] sm:$0xf0]  ;;  %v3357_v48 = vor.u32 %v4135_v28, %v3356_v25  ;;  %v1393_v32 = vor.u32 %v1392_v56, %v1389_v55  ;;  %v1401_v6 = vor.u32 %v1400_v58, %v1397_v57  ;;  %v4175_v28 = vld [vmem:[#allocation2 + $0x544] sm:$0xf0]  ;;  %v4188_v55 = vld [vmem:[#allocation2 + $0x5b4] sm:$0xf] }
  0xcc   : > { %1593 = vmatpush.bf16.msra.mxu2 %v3393_v52  ;;  %1606 = vmatpush.bf16.msra.mxu3 %v3457_v54  ;;  %v4196_v52 = vld [vmem:[#allocation2 + $0x5f4] sm:$0xf]  ;;  %v3606_v54 = vld [vmem:[#allocation2 + $0x5f8] sm:$0xf0] }
  0xcd   : > { %v3609_v2 = vor.u32 %v4196_v52, %v3606_v54  ;;  %v4172_v52 = vld [vmem:[#allocation2 + $0x534] sm:$0xf]  ;;  %v3510_v54 = vld [vmem:[#allocation2 + $0x538] sm:$0xf0]  ;;  %v550_v57 = vpop.f32.mrf.mxu0  ;;  %v563_v58 = vpop.f32.mrf.mxu1 }
  0xce   : > { %v3574_v56 = vld [vmem:[#allocation2 + $0x5b8] sm:$0xf0] }
  0xcf   : > { %1568 = vmatpush.bf16.msra.mxu0 %v3381_v62  ;;  %1581 = vmatpush.bf16.msra.mxu1 %v3445_v61  ;;  %v3541_v62 = vor.u32 %v4181_v43, %v3540_v42  ;;  %v3605_v61 = vor.u32 %v4197_v47, %v3604_v44  ;;  %v3581_v43 = vor.u32 %v4191_v36, %v3580_v35  ;;  %v3508_v44 = vld [vmem:[#allocation2 + $0x530] sm:$0xf]  ;;  %v4173_v47 = vld [vmem:[#allocation2 + $0x534] sm:$0xf0]  ;;  %v3486_v35 = vld [vmem:[#allocation2 + $0x508] sm:$0xf0] }
  0xd0   : > { %1594 = vmatpush.bf16.msra.mxu2 %v3385_v3  ;;  %1607 = vmatpush.bf16.msra.mxu3 %v3449_v4  ;;  %v3596_v3 = vld [vmem:[#allocation2 + $0x5e0] sm:$0xf]  ;;  %v4195_v4 = vld [vmem:[#allocation2 + $0x5e4] sm:$0xf0]  ;;  %v4182_v36 = vld [vmem:[#allocation2 + $0x584] sm:$0xf] }
  0xd1   : > { %v3597_v11 = vor.u32 %v4195_v4, %v3596_v3  ;;  %v3564_v3 = vld [vmem:[#allocation2 + $0x5a0] sm:$0xf]  ;;  %v4187_v4 = vld [vmem:[#allocation2 + $0x5a4] sm:$0xf0] }
  0xd3   : > { %1569 = vmatpush.bf16.msra.mxu0 %v3373_v10  ;;  %1582 = vmatpush.bf16.msra.mxu1 %v3437_v12  ;;  %v3533_v10 = vor.u32 %v4179_v0, %v3532_v63  ;;  %v3524_v12 = vld [vmem:[#allocation2 + $0x550] sm:$0xf]  ;;  %v576_v63 = vpop.f32.mrf.mxu2  ;;  %v589_v0 = vpop.f32.mrf.mxu3 }
  0xd4   : > { %1595 = vmatpush.bf16.msra.mxu2 %v3377_v18  ;;  %1608 = vmatpush.bf16.msra.mxu3 %v3441_v19  ;;  %v4176_v18 = vld [vmem:[#allocation2 + $0x554] sm:$0xf]  ;;  %v3526_v19 = vld [vmem:[#allocation2 + $0x558] sm:$0xf0]  ;;  %v3525_v25 = vor.u32 %v4177_v13, %v3524_v12  ;;  %v4169_v12 = vld [vmem:[#allocation2 + $0x514] sm:$0xf0] }
  0xd5   : > { %v3529_v31 = vor.u32 %v4176_v18, %v3526_v19  ;;  %v3494_v18 = vld [vmem:[#allocation2 + $0x518] sm:$0xf0]  ;;  %v4184_v19 = vld [vmem:[#allocation2 + $0x594] sm:$0xf]  ;;  %v4227_v63 = vld [vmem:[#allocation2 + $0x6e4] sm:$0xf0] }
  0xd6   : > { %v4210_v0 = vld [vmem:[#allocation2 + $0x664] sm:$0xf] }
  0xd7   : > { %1570 = vmatpush.bf16.msra.mxu0 %v3365_v26  ;;  %1583 = vmatpush.bf16.msra.mxu1 %v3429_v27  ;;  %v3589_v26 = vor.u32 %v4193_v17, %v3588_v16  ;;  %v3516_v27 = vld [vmem:[#allocation2 + $0x540] sm:$0xf]  ;;  %v4185_v16 = vld [vmem:[#allocation2 + $0x594] sm:$0xf0]  ;;  %v4168_v17 = vld [vmem:[#allocation2 + $0x514] sm:$0xf] }
  0xd8   : > { %1596 = vmatpush.bf16.msra.mxu2 %v3369_v38  ;;  %1609 = vmatpush.bf16.msra.mxu3 %v3433_v39  ;;  %v4630_v38 = vadd.f32 %v587_v53, %v574_v30  ;;  %v3518_v39 = vld [vmem:[#allocation2 + $0x548] sm:$0xf0]  ;;  %v3517_v42 = vor.u32 %v4175_v28, %v3516_v27  ;;  %v4167_v27 = vld [vmem:[#allocation2 + $0x504] sm:$0xf0]  ;;  %v3548_v28 = vld [vmem:[#allocation2 + $0x580] sm:$0xf]  ;;  %v3497_v53 = vor.u32 %v4168_v17, %v3494_v18 }
  0xd9   : > { %v4183_v30 = vld [vmem:[#allocation2 + $0x584] sm:$0xf0]  ;;  %v3718_v17 = vld [vmem:[#allocation2 + $0x6d8] sm:$0xf0] }
  0xdb   : > { %1571 = vmatpush.bf16.msra.mxu0 %v3357_v48  ;;  %1584 = vmatpush.bf16.msra.mxu1 %v3421_v49  ;;  %v3521_v48 = vor.u32 %v4174_v37, %v3518_v39  ;;  %v3585_v49 = vor.u32 %v4190_v40, %v3582_v41  ;;  %v3550_v37 = vld [vmem:[#allocation2 + $0x588] sm:$0xf0]  ;;  %v3668_v39 = vld [vmem:[#allocation2 + $0x670] sm:$0xf]  ;;  %v4213_v40 = vld [vmem:[#allocation2 + $0x674] sm:$0xf0]  ;;  %v1627_v41 = vmul.f32 %v4617_v7, %v1619_v22 }
  0xdc   : > { %1597 = vmatpush.bf16.msra.mxu2 %v3361_v59  ;;  %1610 = vmatpush.bf16.msra.mxu3 %v3425_v60  ;;  %v3509_v59 = vor.u32 %v4173_v47, %v3508_v44  ;;  %v3573_v60 = vor.u32 %v4189_v51, %v3572_v50  ;;  %v4229_v44 = vld [vmem:[#allocation2 + $0x6f4] sm:$0xf0]  ;;  %v4212_v47 = vld [vmem:[#allocation2 + $0x674] sm:$0xf]  ;;  %v3670_v50 = vld [vmem:[#allocation2 + $0x678] sm:$0xf0] }
  0xdd   : > { %v4228_v51 = vld [vmem:[#allocation2 + $0x6f4] sm:$0xf]  ;;  %v1629_v57 = vpack.c.bf16 %v1627_v41, %v1627_v41 }
  0xde   : > { %1572 = vmatmul.bf16.vlgmr.msra.gmra.mxu0 %v1393_v32  ;;  %1585 = vmatmul.bf16.vlgmr.msra.gmra.mxu1 %v1401_v6 }
  0xdf   : > { %1830 = vmatpush.bf16.msrb.mxu0 %v3541_v62  ;;  %1843 = vmatpush.bf16.msrb.mxu1 %v3605_v61  ;;  %v3500_v62 = vld [vmem:[#allocation2 + $0x520] sm:$0xf]  ;;  %v4171_v61 = vld [vmem:[#allocation2 + $0x524] sm:$0xf0] }
  0xe0   : > { %1856 = vmatpush.bf16.msrb.mxu2 %v3545_v1  ;;  %1869 = vmatpush.bf16.msrb.mxu3 %v3609_v2  ;;  %v3513_v1 = vor.u32 %v4172_v52, %v3510_v54  ;;  %v3577_v2 = vor.u32 %v4188_v55, %v3574_v56  ;;  %v3501_v9 = vor.u32 %v4171_v61, %v3500_v62  ;;  %v3734_v52 = vld [vmem:[#allocation2 + $0x6f8] sm:$0xf0]  ;;  %v3724_v61 = vld [vmem:[#allocation2 + $0x6e0] sm:$0xf] }
  0xe1   : > { %1598 = vmatmul.bf16.vlgmr.msra.gmra.mxu2 %v1393_v32  ;;  %1611 = vmatmul.bf16.vlgmr.msra.gmra.mxu3 %v1401_v6  ;;  %v3502_v32 = vld [vmem:[#allocation2 + $0x528] sm:$0xf0]  ;;  %v4186_v6 = vld [vmem:[#allocation2 + $0x5a4] sm:$0xf]  ;;  %v3553_v55 = vor.u32 %v4182_v36, %v3550_v37  ;;  %v3669_v56 = vor.u32 %v4213_v40, %v3668_v39  ;;  %v3737_v62 = vor.u32 %v4228_v51, %v3734_v52  ;;  %v3636_v37 = vld [vmem:[#allocation2 + $0x630] sm:$0xf] }
  0xe2   : > { %v3505_v13 = vor.u32 %v4170_v5, %v3502_v32  ;;  %v4205_v39 = vld [vmem:[#allocation2 + $0x634] sm:$0xf0]  ;;  %v3628_v52 = vld [vmem:[#allocation2 + $0x620] sm:$0xf] }
  0xe3   : > { %1831 = vmatpush.bf16.msrb.mxu0 %v3533_v10  ;;  %1844 = vmatpush.bf16.msrb.mxu1 %v3597_v11  ;;  %v3565_v10 = vor.u32 %v4187_v4, %v3564_v3  ;;  %v3492_v11 = vld [vmem:[#allocation2 + $0x510] sm:$0xf]  ;;  %v3726_v3 = vld [vmem:[#allocation2 + $0x6e8] sm:$0xf0]  ;;  %v1666_v4 = vrot.slane %v1629_v57, 2 }
  0xe4   : > { %1857 = vmatpush.bf16.msrb.mxu2 %v3537_v14  ;;  %1870 = vmatpush.bf16.msrb.mxu3 %v3601_v15  ;;  %v3569_v14 = vor.u32 %v4186_v6, %v3566_v20  ;;  %v3556_v15 = vld [vmem:[#allocation2 + $0x590] sm:$0xf]  ;;  %v3725_v6 = vor.u32 %v4227_v63, %v3724_v61  ;;  %v4219_v57 = vld [vmem:[#allocation2 + $0x6a4] sm:$0xf0] }
  0xe5   : > { %v3652_v20 = vld [vmem:[#allocation2 + $0x650] sm:$0xf] }
  0xe6   : > { %v3620_v63 = vld [vmem:[#allocation2 + $0x610] sm:$0xf] }
  0xe7   : > { %1832 = vmatpush.bf16.msrb.mxu0 %v3525_v25  ;;  %1845 = vmatpush.bf16.msrb.mxu1 %v3589_v26  ;;  %v3493_v25 = vor.u32 %v4169_v12, %v3492_v11  ;;  %v3557_v26 = vor.u32 %v4185_v16, %v3556_v15  ;;  %v3716_v12 = vld [vmem:[#allocation2 + $0x6d0] sm:$0xf]  ;;  %v3654_v15 = vld [vmem:[#allocation2 + $0x658] sm:$0xf0]  ;;  %v4224_v16 = vld [vmem:[#allocation2 + $0x6d4] sm:$0xf] }
  0xe8   : > { %1858 = vmatpush.bf16.msrb.mxu2 %v3529_v31  ;;  %1871 = vmatpush.bf16.msrb.mxu3 %v3593_v34  ;;  %v3561_v31 = vor.u32 %v4184_v19, %v3558_v21  ;;  %v4166_v34 = vld [vmem:[#allocation2 + $0x504] sm:$0xf]  ;;  %v3644_v21 = vld [vmem:[#allocation2 + $0x640] sm:$0xf] }
  0xe9   : > { %v3489_v54 = vor.u32 %v4166_v34, %v3486_v35  ;;  %v3710_v34 = vld [vmem:[#allocation2 + $0x6c8] sm:$0xf0] }
  0xeb   : > { %1833 = vmatpush.bf16.msrb.mxu0 %v3517_v42  ;;  %1846 = vmatpush.bf16.msrb.mxu1 %v3581_v43  ;;  %v1628_v42 = vmul.f32 %v4619_v8, %v1620_v23  ;;  %v3732_v43 = vld [vmem:[#allocation2 + $0x6f0] sm:$0xf]  ;;  %v4211_v8 = vld [vmem:[#allocation2 + $0x664] sm:$0xf0] }
  0xec   : > { %1859 = vmatpush.bf16.msrb.mxu2 %v3521_v48  ;;  %1872 = vmatpush.bf16.msrb.mxu3 %v3585_v49  ;;  %v3485_v48 = vor.u32 %v4167_v27, %v3484_v24  ;;  %v3549_v49 = vor.u32 %v4183_v30, %v3548_v28  ;;  %v3733_v7 = vor.u32 %v4229_v44, %v3732_v43  ;;  %v4207_v24 = vld [vmem:[#allocation2 + $0x644] sm:$0xf0]  ;;  %v3708_v27 = vld [vmem:[#allocation2 + $0x6c0] sm:$0xf]  ;;  %v4206_v30 = vld [vmem:[#allocation2 + $0x644] sm:$0xf] }
  0xed   : > { %v1630_v58 = vpack.c.bf16 %v1628_v42, %v1628_v42  ;;  %v4223_v28 = vld [vmem:[#allocation2 + $0x6c4] sm:$0xf0]  ;;  %v3645_v35 = vor.u32 %v4207_v24, %v3644_v21  ;;  %v3700_v42 = vld [vmem:[#allocation2 + $0x6b0] sm:$0xf]  ;;  %v4221_v43 = vld [vmem:[#allocation2 + $0x6b4] sm:$0xf0] }
  0xee   : > { %v3709_v36 = vor.u32 %v4223_v28, %v3708_v27  ;;  %v4204_v44 = vld [vmem:[#allocation2 + $0x634] sm:$0xf]  ;;  %v3701_v51 = vor.u32 %v4221_v43, %v3700_v42  ;;  %v3678_v21 = vld [vmem:[#allocation2 + $0x688] sm:$0xf0]  ;;  %v3804_v24 = vld [vmem:[#allocation2 + $0x770] sm:$0xf]  ;;  %v1891_v27 = vmul.f32 %v4624_v46, %v1620_v23 }
  0xef   : > { %1834 = vmatpush.bf16.msrb.mxu0 %v3509_v59  ;;  %1847 = vmatpush.bf16.msrb.mxu1 %v3573_v60  ;;  %v3660_v59 = vld [vmem:[#allocation2 + $0x660] sm:$0xf]  ;;  %v3673_v60 = vor.u32 %v4212_v47, %v3670_v50  ;;  %v1667_v5 = vrot.slane %v1630_v58, 2  ;;  %v3638_v47 = vld [vmem:[#allocation2 + $0x638] sm:$0xf0]  ;;  %v3637_v50 = vor.u32 %v4205_v39, %v3636_v37 }
  0xf0   : > { %1860 = vmatpush.bf16.msrb.mxu2 %v3513_v1  ;;  %1873 = vmatpush.bf16.msrb.mxu3 %v3577_v2  ;;  %v3662_v1 = vld [vmem:[#allocation2 + $0x668] sm:$0xf0]  ;;  %v4226_v2 = vld [vmem:[#allocation2 + $0x6e4] sm:$0xf]  ;;  %v3661_v32 = vor.u32 %v4211_v8, %v3660_v59  ;;  %v3868_v28 = vld [vmem:[#allocation2 + $0x7f0] sm:$0xf]  ;;  %v1893_v33 = vpack.c.bf16 %v1891_v27, %v1891_v27 }
  0xf1   : > { %v3729_v11 = vor.u32 %v4226_v2, %v3726_v3  ;;  %v4202_v58 = vld [vmem:[#allocation2 + $0x624] sm:$0xf]  ;;  %v3630_v59 = vld [vmem:[#allocation2 + $0x628] sm:$0xf0]  ;;  %v3684_v3 = vld [vmem:[#allocation2 + $0x690] sm:$0xf] }
  0xf2   : > { %v4218_v8 = vld [vmem:[#allocation2 + $0x6a4] sm:$0xf]  ;;  %v3870_v37 = vld [vmem:[#allocation2 + $0x7f8] sm:$0xf0]  ;;  %v3796_v42 = vld [vmem:[#allocation2 + $0x760] sm:$0xf] }
  0xf3   : > { %1835 = vmatpush.bf16.msrb.mxu0 %v3501_v9  ;;  %1848 = vmatpush.bf16.msrb.mxu1 %v3565_v10  ;;  %v4209_v9 = vld [vmem:[#allocation2 + $0x654] sm:$0xf0]  ;;  %v3665_v10 = vor.u32 %v4210_v0, %v3662_v1  ;;  %v3633_v1 = vor.u32 %v4202_v58, %v3630_v59  ;;  %v4245_v46 = vld [vmem:[#allocation2 + $0x764] sm:$0xf0]  ;;  %v4238_v27 = vld [vmem:[#allocation2 + $0x734] sm:$0xf] }
  0xf4   : > { %1861 = vmatpush.bf16.msrb.mxu2 %v3505_v13  ;;  %1874 = vmatpush.bf16.msrb.mxu3 %v3569_v14  ;;  %v4225_v13 = vld [vmem:[#allocation2 + $0x6d4] sm:$0xf0]  ;;  %v4208_v14 = vld [vmem:[#allocation2 + $0x654] sm:$0xf]  ;;  %v3653_v18 = vor.u32 %v4209_v9, %v3652_v20  ;;  %v3686_v20 = vld [vmem:[#allocation2 + $0x698] sm:$0xf0] }
  0xf5   : > { %v3717_v19 = vor.u32 %v4225_v13, %v3716_v12  ;;  %v4201_v0 = vld [vmem:[#allocation2 + $0x614] sm:$0xf0]  ;;  %v3612_v9 = vld [vmem:[#allocation2 + $0x600] sm:$0xf]  ;;  %v4199_v12 = vld [vmem:[#allocation2 + $0x604] sm:$0xf0] }
  0xf6   : > { %v3676_v13 = vld [vmem:[#allocation2 + $0x680] sm:$0xf] }
  0xf7   : > { %1836 = vmatpush.bf16.msrb.mxu0 %v3493_v25  ;;  %1849 = vmatpush.bf16.msrb.mxu1 %v3557_v26  ;;  %v3657_v25 = vor.u32 %v4208_v14, %v3654_v15  ;;  %v3721_v26 = vor.u32 %v4224_v16, %v3718_v17  ;;  %v4215_v14 = vld [vmem:[#allocation2 + $0x684] sm:$0xf0]  ;;  %v4198_v17 = vld [vmem:[#allocation2 + $0x604] sm:$0xf] }
  0xf8   : > { %1862 = vmatpush.bf16.msrb.mxu2 %v3497_v53  ;;  %1875 = vmatpush.bf16.msrb.mxu3 %v3561_v31  ;;  %v3646_v53 = vld [vmem:[#allocation2 + $0x648] sm:$0xf0]  ;;  %v4222_v31 = vld [vmem:[#allocation2 + $0x6c4] sm:$0xf] }
  0xf9   : > { %v3649_v40 = vor.u32 %v4206_v30, %v3646_v53  ;;  %v3713_v41 = vor.u32 %v4222_v31, %v3710_v34  ;;  %v4263_v30 = vld [vmem:[#allocation2 + $0x7f4] sm:$0xf0]  ;;  %v4246_v53 = vld [vmem:[#allocation2 + $0x774] sm:$0xf]  ;;  %v3613_v31 = vor.u32 %v4199_v12, %v3612_v9  ;;  %v3677_v34 = vor.u32 %v4215_v14, %v3676_v13  ;;  %v4240_v12 = vld [vmem:[#allocation2 + $0x744] sm:$0xf] }
  0xfa   : > { %v3782_v14 = vld [vmem:[#allocation2 + $0x748] sm:$0xf0] }
  0xfb   : > { %1837 = vmatpush.bf16.msrb.mxu0 %v3485_v48  ;;  %1850 = vmatpush.bf16.msrb.mxu1 %v3549_v49  ;;  %v4220_v48 = vld [vmem:[#allocation2 + $0x6b4] sm:$0xf]  ;;  %v3702_v49 = vld [vmem:[#allocation2 + $0x6b8] sm:$0xf0] }
  0xfc   : > { %1863 = vmatpush.bf16.msrb.mxu2 %v3489_v54  ;;  %1876 = vmatpush.bf16.msrb.mxu3 %v3553_v55  ;;  %v4203_v54 = vld [vmem:[#allocation2 + $0x624] sm:$0xf0]  ;;  %v3641_v55 = vor.u32 %v4204_v44, %v3638_v47  ;;  %v3860_v44 = vld [vmem:[#allocation2 + $0x7e0] sm:$0xf] }
  0xfd   : > { %v4261_v47 = vld [vmem:[#allocation2 + $0x7e4] sm:$0xf0] }
  0xfe   : > { %1838 = vmatmul.bf16.vlgmr.msrb.gmra.mxu0 %v1666_v4  ;;  %1851 = vmatmul.bf16.vlgmr.msrb.gmra.mxu1 %v1667_v5 }
  0xff   : > { %2093 = vmatpush.bf16.msra.mxu0 %v3669_v56  ;;  %2106 = vmatpush.bf16.msra.mxu1 %v3733_v7  ;;  %v3705_v56 = vor.u32 %v4220_v48, %v3702_v49  ;;  %v3692_v7 = vld [vmem:[#allocation2 + $0x6a0] sm:$0xf]  ;;  %v4244_v48 = vld [vmem:[#allocation2 + $0x764] sm:$0xf]  ;;  %v3798_v49 = vld [vmem:[#allocation2 + $0x768] sm:$0xf0] }
 0x100   : > { %2119 = vmatpush.bf16.msra.mxu2 %v3673_v60  ;;  %2132 = vmatpush.bf16.msra.mxu3 %v3737_v62  ;;  %v3694_v60 = vld [vmem:[#allocation2 + $0x6a8] sm:$0xf0]  ;;  %v3629_v62 = vor.u32 %v4203_v54, %v3628_v52  ;;  %v3693_v61 = vor.u32 %v4219_v57, %v3692_v7  ;;  %v1930_v54 = vrot.slane %v1893_v33, 2  ;;  %v3788_v7 = vld [vmem:[#allocation2 + $0x750] sm:$0xf]  ;;  %v3801_v58 = vor.u32 %v4244_v48, %v3798_v49 }
 0x101   : > { %1864 = vmatmul.bf16.vlgmr.msrb.gmra.mxu2 %v1666_v4  ;;  %1877 = vmatmul.bf16.vlgmr.msrb.gmra.mxu3 %v1667_v5  ;;  %v3697_v2 = vor.u32 %v4218_v8, %v3694_v60  ;;  %v4217_v4 = vld [vmem:[#allocation2 + $0x694] sm:$0xf0]  ;;  %v4200_v5 = vld [vmem:[#allocation2 + $0x614] sm:$0xf]  ;;  %v3852_v8 = vld [vmem:[#allocation2 + $0x7d0] sm:$0xf] }
 0x102   : > { %v4243_v57 = vld [vmem:[#allocation2 + $0x754] sm:$0xf0]  ;;  %v4253_v33 = vld [vmem:[#allocation2 + $0x7a4] sm:$0xf0]  ;;  %v3742_v48 = vld [vmem:[%s4586_s22 + $0x8] sm:$0x10] }
 0x103   : > { %2094 = vmatpush.bf16.msra.mxu0 %v3661_v32  ;;  %2107 = vmatpush.bf16.msra.mxu1 %v3725_v6  ;;  %v3622_v32 = vld [vmem:[#allocation2 + $0x618] sm:$0xf0]  ;;  %v4216_v6 = vld [vmem:[#allocation2 + $0x694] sm:$0xf]  ;;  %v4259_v60 = vld [vmem:[#allocation2 + $0x7d4] sm:$0xf0] }
 0x104   : > { %2120 = vmatpush.bf16.msra.mxu2 %v3665_v10  ;;  %2133 = vmatpush.bf16.msra.mxu3 %v3729_v11  ;;  %v3621_v10 = vor.u32 %v4201_v0, %v3620_v63  ;;  %v3685_v11 = vor.u32 %v4217_v4, %v3684_v3  ;;  %v3625_v15 = vor.u32 %v4200_v5, %v3622_v32  ;;  %v4258_v63 = vld [vmem:[#allocation2 + $0x7d4] sm:$0xf]  ;;  %v3854_v0 = vld [vmem:[#allocation2 + $0x7d8] sm:$0xf0]  ;;  %v3780_v32 = vld [vmem:[#allocation2 + $0x740] sm:$0xf] }
 0x105   : > { %v3689_v16 = vor.u32 %v4216_v6, %v3686_v20  ;;  %v3789_v3 = vor.u32 %v4243_v57, %v3788_v7  ;;  %v3853_v4 = vor.u32 %v4259_v60, %v3852_v8  ;;  %v4241_v6 = vld [vmem:[#allocation2 + $0x744] sm:$0xf0]  ;;  %v3857_v9 = vor.u32 %v4258_v63, %v3854_v0  ;;  %v3766_v49 = vld [vmem:[#allocation2 + $0x728] sm:$0xf0]  ;;  %v4235_v7 = vld [vmem:[#allocation2 + $0x714] sm:$0xf0] }
 0x106   : > { %v3820_v57 = vld [vmem:[#allocation2 + $0x790] sm:$0xf]  ;;  %v4250_v63 = vld [vmem:[#allocation2 + $0x794] sm:$0xf] }
 0x107   : > { %2095 = vmatpush.bf16.msra.mxu0 %v3653_v18  ;;  %2108 = vmatpush.bf16.msra.mxu1 %v3717_v19  ;;  %v3614_v18 = vld [vmem:[#allocation2 + $0x608] sm:$0xf0]  ;;  %v4214_v19 = vld [vmem:[#allocation2 + $0x684] sm:$0xf] }
 0x108   : > { %2121 = vmatpush.bf16.msra.mxu2 %v3657_v25  ;;  %2134 = vmatpush.bf16.msra.mxu3 %v3721_v26  ;;  %v4247_v25 = vld [vmem:[#allocation2 + $0x774] sm:$0xf0]  ;;  %v1890_v26 = vmul.f32 %v4622_v45, %v1619_v22  ;;  %v3617_v39 = vor.u32 %v4198_v17, %v3614_v18  ;;  %v3869_v45 = vor.u32 %v4263_v30, %v3868_v28 }
 0x109   : > { %v3781_v17 = vor.u32 %v4241_v6, %v3780_v32 }
 0x10a   : > { %v1892_v22 = vpack.c.bf16 %v1890_v26, %v1890_v26  ;;  %v4255_v26 = vld [vmem:[#allocation2 + $0x7b4] sm:$0xf0] }
 0x10b   : > { %2096 = vmatpush.bf16.msra.mxu0 %v3645_v35  ;;  %2109 = vmatpush.bf16.msra.mxu1 %v3709_v36  ;;  %v3806_v35 = vld [vmem:[#allocation2 + $0x778] sm:$0xf0]  ;;  %v4262_v36 = vld [vmem:[#allocation2 + $0x7f4] sm:$0xf] }
 0x10c   : > { %2122 = vmatpush.bf16.msra.mxu2 %v3649_v40  ;;  %2135 = vmatpush.bf16.msra.mxu3 %v3713_v41  ;;  %v3681_v40 = vor.u32 %v4214_v19, %v3678_v21  ;;  %v3805_v41 = vor.u32 %v4247_v25, %v3804_v24  ;;  %v3809_v23 = vor.u32 %v4246_v53, %v3806_v35  ;;  %v1929_v52 = vrot.slane %v1892_v22, 2  ;;  %v3772_v19 = vld [vmem:[#allocation2 + $0x730] sm:$0xf]  ;;  %v3774_v53 = vld [vmem:[#allocation2 + $0x738] sm:$0xf0] }
 0x10d   : > { %v3873_v43 = vor.u32 %v4262_v36, %v3870_v37  ;;  %v3785_v21 = vor.u32 %v4240_v12, %v3782_v14  ;;  %v3836_v25 = vld [vmem:[#allocation2 + $0x7b0] sm:$0xf]  ;;  %v4232_v14 = vld [vmem:[#allocation2 + $0x704] sm:$0xf] }
 0x10e   : > { %v3837_v22 = vor.u32 %v4255_v26, %v3836_v25  ;;  %v3932_v25 = vld [vmem:[#allocation2 + $0x870] sm:$0xf] }
 0x10f   : > { %2097 = vmatpush.bf16.msra.mxu0 %v3637_v50  ;;  %2110 = vmatpush.bf16.msra.mxu1 %v3701_v51  ;;  %v4260_v50 = vld [vmem:[#allocation2 + $0x7e4] sm:$0xf]  ;;  %v3862_v51 = vld [vmem:[#allocation2 + $0x7e8] sm:$0xf0] }
 0x110   : > { %2123 = vmatpush.bf16.msra.mxu2 %v3641_v55  ;;  %2136 = vmatpush.bf16.msra.mxu3 %v3705_v56  ;;  %v3797_v55 = vor.u32 %v4245_v46, %v3796_v42  ;;  %v3861_v56 = vor.u32 %v4261_v47, %v3860_v44  ;;  %v3865_v59 = vor.u32 %v4260_v50, %v3862_v51  ;;  %v3740_v42 = vld [vmem:[%s4586_s22] sm:$0xc]  ;;  %v4231_v46 = vld [vmem:[%s4586_s22 + $0x4] sm:$0x10]  ;;  %v4236_v44 = vld [vmem:[#allocation2 + $0x724] sm:$0xf] }
 0x111   : > { %v4230_v47 = vld [vmem:[%s4586_s22 + $0x4] sm:$0xc]  ;;  %v4252_v50 = vld [vmem:[#allocation2 + $0x7a4] sm:$0xf]  ;;  %v3830_v51 = vld [vmem:[#allocation2 + $0x7a8] sm:$0xf0]  ;;  %v3769_v8 = vor.u32 %v4236_v44, %v3766_v49 }
 0x112   : > { %v3833_v60 = vor.u32 %v4252_v50, %v3830_v51  ;;  %v4277_v44 = vld [vmem:[#allocation2 + $0x864] sm:$0xf0] }
 0x113   : > { %2098 = vmatpush.bf16.msra.mxu0 %v3629_v62  ;;  %2111 = vmatpush.bf16.msra.mxu1 %v3693_v61  ;;  %v4242_v62 = vld [vmem:[#allocation2 + $0x754] sm:$0xf]  ;;  %v3790_v61 = vld [vmem:[#allocation2 + $0x758] sm:$0xf0] }
 0x114   : > { %2124 = vmatpush.bf16.msra.mxu2 %v3633_v1  ;;  %2137 = vmatpush.bf16.msra.mxu3 %v3697_v2  ;;  %v3793_v20 = vor.u32 %v4242_v62, %v3790_v61  ;;  %v4234_v62 = vld [vmem:[#allocation2 + $0x714] sm:$0xf]  ;;  %v3758_v61 = vld [vmem:[#allocation2 + $0x718] sm:$0xf0] }
 0x117   : > { %2099 = vmatpush.bf16.msra.mxu0 %v3621_v10  ;;  %2112 = vmatpush.bf16.msra.mxu1 %v3685_v11  ;;  %v3844_v10 = vld [vmem:[#allocation2 + $0x7c0] sm:$0xf]  ;;  %v4257_v11 = vld [vmem:[#allocation2 + $0x7c4] sm:$0xf0] }
 0x118   : > { %2125 = vmatpush.bf16.msra.mxu2 %v3625_v15  ;;  %2138 = vmatpush.bf16.msra.mxu3 %v3689_v16  ;;  %v4256_v15 = vld [vmem:[#allocation2 + $0x7c4] sm:$0xf]  ;;  %v3846_v16 = vld [vmem:[#allocation2 + $0x7c8] sm:$0xf0]  ;;  %v3845_v18 = vor.u32 %v4257_v11, %v3844_v10  ;;  %v4249_v10 = vld [vmem:[#allocation2 + $0x784] sm:$0xf0] }
 0x119   : > { %v3849_v24 = vor.u32 %v4256_v15, %v3846_v16  ;;  %v3750_v15 = vld [vmem:[#allocation2 + $0x708] sm:$0xf0] }
 0x11a   : > { %v760_v1 = vpop.f32.mrf.mxu0  ;;  %v773_v2 = vpop.f32.mrf.mxu1 }
 0x11b   : > { %2100 = vmatpush.bf16.msra.mxu0 %v3613_v31  ;;  %2113 = vmatpush.bf16.msra.mxu1 %v3677_v34  ;;  %v761_v5 = vadd.f32 %v760_v1, %v4628_v29  ;;  %v4239_v29 = vld [vmem:[#allocation2 + $0x734] sm:$0xf0]  ;;  %v4254_v31 = vld [vmem:[#allocation2 + $0x7b4] sm:$0xf]  ;;  %v3838_v34 = vld [vmem:[#allocation2 + $0x7b8] sm:$0xf0] }
 0x11c   : > { %2126 = vmatpush.bf16.msra.mxu2 %v3617_v39  ;;  %2139 = vmatpush.bf16.msra.mxu3 %v3681_v40  ;;  %v3764_v39 = vld [vmem:[#allocation2 + $0x720] sm:$0xf]  ;;  %v4237_v40 = vld [vmem:[#allocation2 + $0x724] sm:$0xf0] }
 0x11d   : > { %v4650_v13 = vadd.f32 %v773_v2, %v761_v5  ;;  %v3822_v2 = vld [vmem:[#allocation2 + $0x798] sm:$0xf0] }
 0x11e   : > { %2101 = vmatmul.bf16.vlgmr.msra.gmra.mxu0 %v1929_v52  ;;  %2114 = vmatmul.bf16.vlgmr.msra.gmra.mxu1 %v1930_v54 }
 0x11f   : > { %2368 = vmatpush.bf16.msrb.mxu0 %v3805_v41  ;;  %2381 = vmatpush.bf16.msrb.mxu1 %v3869_v45  ;;  %v3828_v41 = vld [vmem:[#allocation2 + $0x7a0] sm:$0xf]  ;;  %v3773_v45 = vor.u32 %v4239_v29, %v3772_v19  ;;  %v3761_v19 = vor.u32 %v4234_v62, %v3758_v61  ;;  %v3825_v29 = vor.u32 %v4250_v63, %v3822_v2  ;;  %v3916_v61 = vld [vmem:[#allocation2 + $0x850] sm:$0xf]  ;;  %v4275_v63 = vld [vmem:[#allocation2 + $0x854] sm:$0xf0] }
 0x120   : > { %2394 = vmatpush.bf16.msrb.mxu2 %v3809_v23  ;;  %2407 = vmatpush.bf16.msrb.mxu3 %v3873_v43  ;;  %v3777_v43 = vor.u32 %v4238_v27, %v3774_v53  ;;  %v4279_v27 = vld [vmem:[#allocation2 + $0x874] sm:$0xf0]  ;;  %v3980_v2 = vld [vmem:[#allocation2 + $0x8d0] sm:$0xf] }
 0x121   : > { %2127 = vmatmul.bf16.vlgmr.msra.gmra.mxu2 %v1929_v52  ;;  %2140 = vmatmul.bf16.vlgmr.msra.gmra.mxu3 %v1930_v54  ;;  %v786_v28 = vpop.f32.mrf.mxu2  ;;  %v799_v30 = vpop.f32.mrf.mxu3  ;;  %v3756_v52 = vld [vmem:[#allocation2 + $0x710] sm:$0xf]  ;;  %v3741_v54 = vor.u32 %v4231_v46, %v3740_v42 }
 0x122   : > { %v787_v35 = vadd.f32 %v786_v28, %v4630_v38  ;;  %v762_v36 = vpop.f32.mrf.mxu0  ;;  %v775_v37 = vpop.f32.mrf.mxu1  ;;  %v3841_v38 = vor.u32 %v4254_v31, %v3838_v34  ;;  %v3757_v5 = vor.u32 %v4235_v7, %v3756_v52  ;;  %v3996_v28 = vld [vmem:[#allocation2 + $0x8f0] sm:$0xf]  ;;  %v4278_v34 = vld [vmem:[#allocation2 + $0x874] sm:$0xf]  ;;  %v3988_v52 = vld [vmem:[#allocation2 + $0x8e0] sm:$0xf] }
 0x123   : > { %2369 = vmatpush.bf16.msrb.mxu0 %v3797_v55  ;;  %2382 = vmatpush.bf16.msrb.mxu1 %v3861_v56  ;;  %v3765_v55 = vor.u32 %v4237_v40, %v3764_v39  ;;  %v3829_v56 = vor.u32 %v4253_v33, %v3828_v41  ;;  %v2191_v11 = vshrl.u32 %v3741_v54, 16  ;;  %v2194_v16 = vshll.u32 %v3741_v54, 16  ;;  %v4294_v36 = vld [vmem:[#allocation2 + $0x8f4] sm:$0xf]  ;;  %v3998_v37 = vld [vmem:[#allocation2 + $0x8f8] sm:$0xf0] }
 0x124   : > { %2395 = vmatpush.bf16.msrb.mxu2 %v3801_v58  ;;  %2408 = vmatpush.bf16.msrb.mxu3 %v3865_v59  ;;  %v4655_v23 = vadd.f32 %v799_v30, %v787_v35  ;;  %v4251_v58 = vld [vmem:[#allocation2 + $0x794] sm:$0xf0]  ;;  %v3745_v59 = vor.u32 %v4230_v47, %v3742_v48  ;;  %v3934_v35 = vld [vmem:[#allocation2 + $0x878] sm:$0xf0]  ;;  %v3933_v33 = vor.u32 %v4279_v27, %v3932_v25  ;;  %v4293_v54 = vld [vmem:[#allocation2 + $0x8e4] sm:$0xf0] }
 0x125   : > { %v3821_v32 = vor.u32 %v4251_v58, %v3820_v57  ;;  %v4295_v30 = vld [vmem:[#allocation2 + $0x8f4] sm:$0xf0]  ;;  %v2193_v39 = vrot.slane %v2191_v11, 2  ;;  %v2196_v40 = vrot.slane %v2194_v16, 3  ;;  %v3937_v47 = vor.u32 %v4278_v34, %v3934_v35  ;;  %v3926_v57 = vld [vmem:[#allocation2 + $0x868] sm:$0xf0] }
 0x126   : > { %v3997_v42 = vor.u32 %v4295_v30, %v3996_v28  ;;  %v4001_v48 = vor.u32 %v4294_v36, %v3998_v37  ;;  %v4292_v58 = vld [vmem:[#allocation2 + $0x8e4] sm:$0xf]  ;;  %v3989_v62 = vor.u32 %v4293_v54, %v3988_v52  ;;  %v3908_v11 = vld [vmem:[#allocation2 + $0x840] sm:$0xf]  ;;  %v3964_v36 = vld [vmem:[#allocation2 + $0x8b0] sm:$0xf] }
 0x127   : > { %2370 = vmatpush.bf16.msrb.mxu0 %v3789_v3  ;;  %2383 = vmatpush.bf16.msrb.mxu1 %v3853_v4  ;;  %v3748_v3 = vld [vmem:[#allocation2 + $0x700] sm:$0xf]  ;;  %v4233_v4 = vld [vmem:[#allocation2 + $0x704] sm:$0xf0]  ;;  %v4287_v37 = vld [vmem:[#allocation2 + $0x8b4] sm:$0xf0] }
 0x128   : > { %2396 = vmatpush.bf16.msrb.mxu2 %v3793_v20  ;;  %2409 = vmatpush.bf16.msrb.mxu3 %v3857_v9  ;;  %v3812_v9 = vld [vmem:[#allocation2 + $0x780] sm:$0xf]  ;;  %v3749_v53 = vor.u32 %v4233_v4, %v3748_v3  ;;  %v4291_v3 = vld [vmem:[#allocation2 + $0x8d4] sm:$0xf0]  ;;  %v4274_v4 = vld [vmem:[#allocation2 + $0x854] sm:$0xf] }
 0x129   : > { %v788_v0 = vpop.f32.mrf.mxu2  ;;  %v801_v1 = vpop.f32.mrf.mxu3  ;;  %v3813_v31 = vor.u32 %v4249_v10, %v3812_v9  ;;  %v3972_v16 = vld [vmem:[#allocation2 + $0x8c0] sm:$0xf] }
 0x12a   : > { %v1038_v6 = vpop.f32.mrf.mxu0  ;;  %v1051_v20 = vpop.f32.mrf.mxu1 }
 0x12b   : > { %2371 = vmatpush.bf16.msrb.mxu0 %v3781_v17  ;;  %2384 = vmatpush.bf16.msrb.mxu1 %v3845_v18  ;;  %v1052_v12 = vadd.f32 %v1051_v20, %v1038_v6  ;;  %v2199_v17 = vshrl.u32 %v3745_v59, 16  ;;  %v2202_v18 = vshll.u32 %v3745_v59, 16  ;;  %v3990_v59 = vld [vmem:[#allocation2 + $0x8e8] sm:$0xf0]  ;;  %v3982_v6 = vld [vmem:[#allocation2 + $0x8d8] sm:$0xf0]  ;;  %v3981_v20 = vor.u32 %v4291_v3, %v3980_v2 }
 0x12c   : > { %2397 = vmatpush.bf16.msrb.mxu2 %v3785_v21  ;;  %2410 = vmatpush.bf16.msrb.mxu3 %v3849_v24  ;;  %v4248_v21 = vld [vmem:[#allocation2 + $0x784] sm:$0xf]  ;;  %v3814_v24 = vld [vmem:[#allocation2 + $0x788] sm:$0xf0]  ;;  %v3993_v1 = vor.u32 %v4292_v58, %v3990_v59  ;;  %v4267_v2 = vld [vmem:[#allocation2 + $0x814] sm:$0xf0] }
 0x12d   : > { %v4660_v26 = vadd.f32 %v1052_v12, %v4650_v13  ;;  %v2201_v41 = vrot.slane %v2199_v17, 2  ;;  %v3817_v13 = vor.u32 %v4248_v21, %v3814_v24  ;;  %v4273_v12 = vld [vmem:[#allocation2 + $0x844] sm:$0xf0]  ;;  %v3974_v21 = vld [vmem:[#allocation2 + $0x8c8] sm:$0xf0] }
 0x12e   : > { %v4289_v17 = vld [vmem:[#allocation2 + $0x8c4] sm:$0xf0]  ;;  %v3909_v28 = vor.u32 %v4273_v12, %v3908_v11  ;;  %v3886_v11 = vld [vmem:[#allocation2 + $0x818] sm:$0xf0]  ;;  %v4282_v12 = vld [vmem:[#allocation2 + $0x894] sm:$0xf] }
 0x12f   : > { %2372 = vmatpush.bf16.msrb.mxu0 %v3773_v45  ;;  %2385 = vmatpush.bf16.msrb.mxu1 %v3837_v22  ;;  %v2204_v45 = vrot.slane %v2202_v18, 3  ;;  %v3753_v22 = vor.u32 %v4232_v14, %v3750_v15  ;;  %v4272_v18 = vld [vmem:[#allocation2 + $0x844] sm:$0xf]  ;;  %v3973_v30 = vor.u32 %v4289_v17, %v3972_v16 }
 0x130   : > { %2398 = vmatpush.bf16.msrb.mxu2 %v3777_v43  ;;  %2411 = vmatpush.bf16.msrb.mxu3 %v3841_v38  ;;  %v3924_v38 = vld [vmem:[#allocation2 + $0x860] sm:$0xf] }
 0x131   : > { %v1064_v46 = vpop.f32.mrf.mxu2  ;;  %v1077_v43 = vpop.f32.mrf.mxu3  ;;  %v2205_v7 = vor.u32 %v2204_v45, %v2201_v41  ;;  %v3902_v41 = vld [vmem:[#allocation2 + $0x838] sm:$0xf0]  ;;  %v4286_v45 = vld [vmem:[#allocation2 + $0x8b4] sm:$0xf] }
 0x132   : > { %v1078_v49 = vadd.f32 %v1077_v43, %v1064_v46  ;;  %v1040_v50 = vpop.f32.mrf.mxu0  ;;  %v1053_v51 = vpop.f32.mrf.mxu1  ;;  %v3965_v43 = vor.u32 %v4287_v37, %v3964_v36  ;;  %v3942_v36 = vld [vmem:[#allocation2 + $0x888] sm:$0xf0] }
 0x133   : > { %2373 = vmatpush.bf16.msrb.mxu0 %v3765_v55  ;;  %2386 = vmatpush.bf16.msrb.mxu1 %v3829_v56  ;;  %v4276_v55 = vld [vmem:[#allocation2 + $0x864] sm:$0xf]  ;;  %v2197_v56 = vor.u32 %v2196_v40, %v2193_v39  ;;  %v4270_v39 = vld [vmem:[#allocation2 + $0x834] sm:$0xf]  ;;  %v4285_v50 = vld [vmem:[#allocation2 + $0x8a4] sm:$0xf0] }
 0x134   : > { %2399 = vmatpush.bf16.msrb.mxu2 %v3769_v8  ;;  %2412 = vmatpush.bf16.msrb.mxu3 %v3833_v60  ;;  %v4663_v8 = vadd.f32 %v1078_v49, %v4655_v23  ;;  %v3925_v60 = vor.u32 %v4277_v44, %v3924_v38  ;;  %v3929_v0 = vor.u32 %v4276_v55, %v3926_v57  ;;  %v3892_v38 = vld [vmem:[#allocation2 + $0x820] sm:$0xf]  ;;  %v4269_v44 = vld [vmem:[#allocation2 + $0x824] sm:$0xf0]  ;;  %v4268_v51 = vld [vmem:[#allocation2 + $0x824] sm:$0xf] }
 0x135   : > { %v3917_v23 = vor.u32 %v4275_v63, %v3916_v61  ;;  %v3956_v49 = vld [vmem:[#allocation2 + $0x8a0] sm:$0xf]  ;;  %v3894_v55 = vld [vmem:[#allocation2 + $0x828] sm:$0xf0]  ;;  %v3893_v63 = vor.u32 %v4269_v44, %v3892_v38 }
 0x137   : > { %2374 = vmatpush.bf16.msrb.mxu0 %v3757_v5  ;;  %2387 = vmatpush.bf16.msrb.mxu1 %v3821_v32  ;;  %v3918_v5 = vld [vmem:[#allocation2 + $0x858] sm:$0xf0]  ;;  %v4290_v32 = vld [vmem:[#allocation2 + $0x8d4] sm:$0xf] }
 0x138   : > { %2400 = vmatpush.bf16.msrb.mxu2 %v3761_v19  ;;  %2413 = vmatpush.bf16.msrb.mxu3 %v3825_v29  ;;  %v3921_v14 = vor.u32 %v4274_v4, %v3918_v5  ;;  %v3985_v15 = vor.u32 %v4290_v32, %v3982_v6  ;;  %v3910_v19 = vld [vmem:[#allocation2 + $0x848] sm:$0xf0]  ;;  %v4288_v29 = vld [vmem:[#allocation2 + $0x8c4] sm:$0xf]  ;;  %v3897_v32 = vor.u32 %v4268_v51, %v3894_v55 }
 0x139   : > { %v1066_v9 = vpop.f32.mrf.mxu2  ;;  %v1079_v10 = vpop.f32.mrf.mxu3  ;;  %v3913_v34 = vor.u32 %v4272_v18, %v3910_v19  ;;  %v3977_v35 = vor.u32 %v4288_v29, %v3974_v21  ;;  %v3876_v19 = vld [vmem:[#allocation2 + $0x800] sm:$0xf]  ;;  %v4265_v29 = vld [vmem:[#allocation2 + $0x804] sm:$0xf0] }
 0x13a   : > { %v4266_v9 = vld [vmem:[#allocation2 + $0x814] sm:$0xf]  ;;  %v3877_v37 = vor.u32 %v4265_v29, %v3876_v19 }
 0x13b   : > { %2375 = vmatpush.bf16.msrb.mxu0 %v3749_v53  ;;  %2388 = vmatpush.bf16.msrb.mxu1 %v3813_v31  ;;  %v1302_v24 = vpop.f32.mrf.mxu0  ;;  %v1315_v25 = vpop.f32.mrf.mxu1  ;;  %v3900_v53 = vld [vmem:[#allocation2 + $0x830] sm:$0xf]  ;;  %v4271_v31 = vld [vmem:[#allocation2 + $0x834] sm:$0xf0] }
 0x13c   : > { %2401 = vmatpush.bf16.msrb.mxu2 %v3753_v22  ;;  %2414 = vmatpush.bf16.msrb.mxu3 %v3817_v13  ;;  %v1316_v27 = vadd.f32 %v1315_v25, %v1302_v24  ;;  %v3966_v22 = vld [vmem:[#allocation2 + $0x8b8] sm:$0xf0]  ;;  %v4669_v13 = vld [vmem:[%s4586_s22 + $0x8] sm:$0x11]  ;;  %v3901_v46 = vor.u32 %v4271_v31, %v3900_v53 }
 0x13d   : > { %v2426_v10 = vunpack.c.h.bf16 %v4669_v13  ;;  %v3940_v25 = vld [vmem:[#allocation2 + $0x880] sm:$0xf] }
 0x13e   : > { %2376 = vmatmul.bf16.vlgmr.msrb.gmra.mxu0 %v2197_v56  ;;  %2389 = vmatmul.bf16.vlgmr.msrb.gmra.mxu1 %v2205_v7  ;;  %v4666_v40 = vadd.f32 %v1316_v27, %v4660_v26  ;;  %v3969_v26 = vor.u32 %v4286_v45, %v3966_v22  ;;  %v4281_v27 = vld [vmem:[#allocation2 + $0x884] sm:$0xf0] }
 0x13f   : > { %2639 = vmatpush.bf16.msra.mxu0 %v3933_v33  ;;  %2652 = vmatpush.bf16.msra.mxu1 %v3997_v42  ;;  %v2428_v33 = vld.sshfl [vmem:[#allocation1] sm:$0xff pattern:$0x75316420]  ;;  %v4671_v42 = vld.sshfl [vmem:[#allocation1 + $0x8] sm:$0xff pattern:$0x75316420] }
 0x140   : > { %2665 = vmatpush.bf16.msra.mxu2 %v3937_v47  ;;  %2678 = vmatpush.bf16.msra.mxu3 %v4001_v48  ;;  %v2422_v47 = vld [vmem:[%s4586_s22] sm:$0x88]  ;;  %v3905_v48 = vor.u32 %v4270_v39, %v3902_v41  ;;  %v2430_v61 = vrot.slane %v2428_v33, 2  ;;  %v2431_v4 = vrot.slane %v4671_v42, 2  ;;  %v3941_v39 = vor.u32 %v4281_v27, %v3940_v25  ;;  %v2693_v25 = vld [vmem:[#allocation4] sm:$0x3] }
 0x141   : > { %2402 = vmatmul.bf16.vlgmr.msrb.gmra.mxu2 %v2197_v56  ;;  %2415 = vmatmul.bf16.vlgmr.msrb.gmra.mxu3 %v2205_v7  ;;  %v4284_v56 = vld [vmem:[#allocation2 + $0x8a4] sm:$0xf]  ;;  %v3958_v7 = vld [vmem:[#allocation2 + $0x8a8] sm:$0xf0]  ;;  %v2424_v3 = vunpack.c.h.bf16 %v2422_v47 }
 0x142   : > { %v3961_v6 = vor.u32 %v4284_v56, %v3958_v7 }
 0x143   : > { %2640 = vmatpush.bf16.msra.mxu0 %v3925_v60  ;;  %2653 = vmatpush.bf16.msra.mxu1 %v3989_v62  ;;  %v1304_v58 = vpop.f32.mrf.mxu0  ;;  %v1317_v59 = vpop.f32.mrf.mxu1  ;;  %v2423_v60 = vunpack.c.l.bf16 %v2422_v47  ;;  %v2425_v62 = vunpack.c.l.bf16 %v4669_v13  ;;  %v2435_v21 = vmul.f32 %v2431_v4, %v2424_v3 }
 0x144   : > { %2666 = vmatpush.bf16.msra.mxu2 %v3929_v0  ;;  %2679 = vmatpush.bf16.msra.mxu3 %v3993_v1  ;;  %v1328_v52 = vpop.f32.mrf.mxu2  ;;  %v1341_v54 = vpop.f32.mrf.mxu3  ;;  %v3957_v0 = vor.u32 %v4285_v50, %v3956_v49  ;;  %v3884_v1 = vld [vmem:[#allocation2 + $0x810] sm:$0xf] }
 0x145   : > { %v1342_v57 = vadd.f32 %v1341_v54, %v1328_v52  ;;  %v2436_v16 = vmul.f32 %v2430_v61, %v2425_v62  ;;  %v3885_v17 = vor.u32 %v4267_v2, %v3884_v1 }
 0x147   : > { %2641 = vmatpush.bf16.msra.mxu0 %v3917_v23  ;;  %2654 = vmatpush.bf16.msra.mxu1 %v3981_v20  ;;  %v1346_v5 = vadd.f32 %v1342_v57, %v4663_v8  ;;  %v3948_v23 = vld [vmem:[#allocation2 + $0x890] sm:$0xf]  ;;  %v4283_v20 = vld [vmem:[#allocation2 + $0x894] sm:$0xf0]  ;;  %v3889_v8 = vor.u32 %v4266_v9, %v3886_v11 }
 0x148   : > { %2667 = vmatpush.bf16.msra.mxu2 %v3921_v14  ;;  %2680 = vmatpush.bf16.msra.mxu3 %v3985_v15  ;;  %v3950_v14 = vld [vmem:[#allocation2 + $0x898] sm:$0xf0]  ;;  %v2434_v15 = vmul.f32 %v2430_v61, %v2423_v60  ;;  %v3949_v18 = vor.u32 %v4283_v20, %v3948_v23 }
 0x149   : > { %v3953_v24 = vor.u32 %v4282_v12, %v3950_v14 }
 0x14a   : > { %v2438_v41 = vpack.c.bf16 %v2436_v16, %v2434_v15 }
 0x14b   : > { %2642 = vmatpush.bf16.msra.mxu0 %v3909_v28  ;;  %2655 = vmatpush.bf16.msra.mxu1 %v3973_v30  ;;  %v4264_v28 = vld [vmem:[#allocation2 + $0x804] sm:$0xf]  ;;  %v2437_v30 = vmul.f32 %v2431_v4, %v2426_v10 }
 0x14c   : > { %2668 = vmatpush.bf16.msra.mxu2 %v3913_v34  ;;  %2681 = vmatpush.bf16.msra.mxu3 %v3977_v35  ;;  %v1330_v53 = vpop.f32.mrf.mxu2  ;;  %v1343_v31 = vpop.f32.mrf.mxu3  ;;  %v3878_v34 = vld [vmem:[#allocation2 + $0x808] sm:$0xf0]  ;;  %v4280_v35 = vld [vmem:[#allocation2 + $0x884] sm:$0xf]  ;;  %v2475_v33 = vrot.slane %v2438_v41, 3 }
 0x14d   : > { %v3881_v45 = vor.u32 %v4264_v28, %v3878_v34  ;;  %v3945_v22 = vor.u32 %v4280_v35, %v3942_v36  ;;  %v2439_v13 = vpack.c.bf16 %v2437_v30, %v2435_v21  ;;  %v2695_v31 = vperm.slane %v2693_v25, 0 }
 0x14f   : > { %2643 = vmatpush.bf16.msra.mxu0 %v3901_v46  ;;  %2656 = vmatpush.bf16.msra.mxu1 %v3965_v43  ;;  %v2476_v42 = vrot.slane %v2439_v13, 3 }
 0x150   : > { %2669 = vmatpush.bf16.msra.mxu2 %v3905_v48  ;;  %2682 = vmatpush.bf16.msra.mxu3 %v3969_v26 }
 0x153   : > { %2644 = vmatpush.bf16.msra.mxu0 %v3893_v63  ;;  %2657 = vmatpush.bf16.msra.mxu1 %v3957_v0 }
 0x154   : > { %2670 = vmatpush.bf16.msra.mxu2 %v3897_v32  ;;  %2683 = vmatpush.bf16.msra.mxu3 %v3961_v6 }
 0x157   : > { %2645 = vmatpush.bf16.msra.mxu0 %v3885_v17  ;;  %2658 = vmatpush.bf16.msra.mxu1 %v3949_v18 }
 0x158   : > { %2671 = vmatpush.bf16.msra.mxu2 %v3889_v8  ;;  %2684 = vmatpush.bf16.msra.mxu3 %v3953_v24 }
 0x15b   : > { %2646 = vmatpush.bf16.msra.mxu0 %v3877_v37  ;;  %2659 = vmatpush.bf16.msra.mxu1 %v3941_v39  ;;  %v1573_v46 = vpop.f32.mrf.mxu0  ;;  %v1586_v43 = vpop.f32.mrf.mxu1  ;;  %v2696_v39 = vperm.slane %v2693_v25, 1 }
 0x15c   : > { %2672 = vmatpush.bf16.msra.mxu2 %v3881_v45  ;;  %2685 = vmatpush.bf16.msra.mxu3 %v3945_v22  ;;  %v1587_v38 = vadd.f32 %v1586_v43, %v1573_v46 }
 0x15e   : > { %2647 = vmatmul.bf16.vlgmr.msra.gmra.mxu0 %v2475_v33  ;;  %2660 = vmatmul.bf16.vlgmr.msra.gmra.mxu1 %v2476_v42  ;;  %v1616_v44 = vadd.f32 %v1587_v38, %v4666_v40 }
 0x15f   : > { %2673 = vmatmul.bf16.vlgmr.msra.gmra.mxu2 %v2475_v33  ;;  %2686 = vmatmul.bf16.vlgmr.msra.gmra.mxu3 %v2476_v42 }
 0x163   : > { %v1575_v49 = vpop.f32.mrf.mxu0  ;;  %v1588_v50 = vpop.f32.mrf.mxu1 }
 0x164   : > { %v1599_v47 = vpop.f32.mrf.mxu2  ;;  %v1612_v48 = vpop.f32.mrf.mxu3 }
 0x165   : > { %v1613_v26 = vadd.f32 %v1612_v48, %v1599_v47 }
 0x167   : > { %v1617_v51 = vadd.f32 %v1613_v26, %v1346_v5 }
 0x16c   : > { %v1601_v52 = vpop.f32.mrf.mxu2  ;;  %v1614_v54 = vpop.f32.mrf.mxu3 }
 0x17b   : > { %v1839_v55 = vpop.f32.mrf.mxu0  ;;  %v1852_v56 = vpop.f32.mrf.mxu1 }
 0x17c   : > { %v1853_v7 = vadd.f32 %v1852_v56, %v1839_v55 }
 0x17e   : > { %v1882_v57 = vadd.f32 %v1853_v7, %v1616_v44 }
 0x183   : > { %v1841_v62 = vpop.f32.mrf.mxu0  ;;  %v1854_v61 = vpop.f32.mrf.mxu1 }
 0x184   : > { %v1865_v58 = vpop.f32.mrf.mxu2  ;;  %v1878_v59 = vpop.f32.mrf.mxu3 }
 0x185   : > { %v1879_v60 = vadd.f32 %v1878_v59, %v1865_v58 }
 0x187   : > { %v1883_v63 = vadd.f32 %v1879_v60, %v1617_v51 }
 0x18c   : > { %v1867_v0 = vpop.f32.mrf.mxu2  ;;  %v1880_v40 = vpop.f32.mrf.mxu3 }
 0x19b   : > { %v2102_v1 = vpop.f32.mrf.mxu0  ;;  %v2115_v2 = vpop.f32.mrf.mxu1 }
 0x19c   : > { %v2116_v17 = vadd.f32 %v2115_v2, %v2102_v1 }
 0x19e   : > { %v2145_v21 = vadd.f32 %v2116_v17, %v1882_v57 }
 0x1a3   : > { %v2104_v32 = vpop.f32.mrf.mxu0  ;;  %v2117_v5 = vpop.f32.mrf.mxu1 }
 0x1a4   : > { %v2128_v3 = vpop.f32.mrf.mxu2  ;;  %v2141_v4 = vpop.f32.mrf.mxu3 }
 0x1a5   : > { %v2142_v8 = vadd.f32 %v2141_v4, %v2128_v3 }
 0x1a7   : > { %v2146_v30 = vadd.f32 %v2142_v8, %v1883_v63 }
 0x1ac   : > { %v2130_v6 = vpop.f32.mrf.mxu2  ;;  %v2143_v23 = vpop.f32.mrf.mxu3 }
 0x1bb   : > { %v2377_v20 = vpop.f32.mrf.mxu0  ;;  %v2390_v9 = vpop.f32.mrf.mxu1 }
 0x1bc   : > { %v2391_v18 = vadd.f32 %v2390_v9, %v2377_v20 }
 0x1be   : > { %v2420_v27 = vadd.f32 %v2391_v18, %v2145_v21 }
 0x1c3   : > { %v2379_v12 = vpop.f32.mrf.mxu0  ;;  %v2392_v14 = vpop.f32.mrf.mxu1 }
 0x1c4   : > { %v2403_v10 = vpop.f32.mrf.mxu2  ;;  %v2416_v11 = vpop.f32.mrf.mxu3 }
 0x1c5   : > { %v2417_v28 = vadd.f32 %v2416_v11, %v2403_v10 }
 0x1c7   : > { %v2421_v36 = vadd.f32 %v2417_v28, %v2146_v30 }
 0x1cc   : > { %v2405_v15 = vpop.f32.mrf.mxu2  ;;  %v2418_v16 = vpop.f32.mrf.mxu3 }
 0x1db   : > { %v2648_v19 = vpop.f32.mrf.mxu0  ;;  %v2661_v29 = vpop.f32.mrf.mxu1 }
 0x1dc   : > { %v2662_v24 = vadd.f32 %v2661_v29, %v2648_v19 }
 0x1de   : > { %v2691_v53 = vadd.f32 %v2662_v24, %v2420_v27 }
 0x1e0   : > { %v2699_v22 = vadd.f32 %v2695_v31, %v2691_v53 }
 0x1e2   : > { %v2674_v34 = vpop.f32.mrf.mxu2  ;;  %v2687_v35 = vpop.f32.mrf.mxu3  ;;  %v2701_v42 = vmax.f32 %v2699_v22, 0.0 }
 0x1e3   : > { %v2688_v37 = vadd.f32 %v2687_v35, %v2674_v34  ;;  %v2650_v41 = vpop.f32.mrf.mxu0  ;;  %v2663_v45 = vpop.f32.mrf.mxu1 }
 0x1e5   : > { %v2692_v13 = vadd.f32 %v2688_v37, %v2421_v36 }
 0x1e7   : > { %v2700_v33 = vadd.f32 %v2696_v39, %v2692_v13 }
 0x1e9   : > { %v2702_v46 = vmax.f32 %v2700_v33, 0.0 }
 0x1ea   : > { %v2676_v43 = vpop.f32.mrf.mxu2  ;;  %v2689_v38 = vpop.f32.mrf.mxu3 }
 0x1eb   : > { %v2703_v44 = vpack.c.bf16 %v2702_v46, %v2701_v42 }
 0x1ed   : > { %v2705_v47 = vrot.slane %v2703_v44, 2 }
 0x1ef   : > { %v2709_v48 = vsel %vm2706_vm0, %v2703_v44, %v2705_v47 }
 0x1f0   : > { %2711 = vst [vmem:[%s267_s26] sm:$0xf] %v2709_v48 }
 0x1f1 PF: > { %s16_s17 = sadd.s32 1, %s4478_s17   ;;  %s4700_s15 = smov %s4474_s16 }
 0x1f2   : > { %p13_p8 = scmp.ge.s32.totalorder %s16_s17, 4   ;;  %s4701_s16 = smov %s4703_s27 }
 0x1f4   :  { %15 = sbr.rel (!%p13_p8) target bundleno = 3 (0x3), region = 90 }
 0x1f9   :  { %2741 = vsyncpa [#allocation3], 1 }
 0x1fa   :  { %2743 = vsyncpa [#allocation3 + $0x1], 1 }
 0x1fb   :  { %2744 = vsyncpa [#allocation5], 1 }

// kernel: decoder_forward.7
= control target key start
LH: loop header
LB: loop body
LE: loop exit
PB: predicated region body
PF: predicated region fallthrough
CT: control target
= control target key end

     0   :  { %9 = vsyncpa [#allocation3], 0  ;;  %s7488_s0 = inlined_call_operand.vmem [shape: bf16[2,100,128], index: 0, kind: input, shape index: {}]   ;;  %s7489_s1 = inlined_call_operand.hbm [shape: bf16[25,128,128], index: 1, kind: input, shape index: {}]   ;;  %s7490_s2 = inlined_call_operand.hbm [shape: f32[1,128], index: 2, kind: input, shape index: {}]   ;;  %s7491_s3 = inlined_call_operand.hbm [shape: bf16[5,64,1], index: 3, kind: input, shape index: {}]   ;;  %s7492_s4 = inlined_call_operand.vmem [shape: f32[2,64,128], index: 4, kind: output, shape index: {}]  }
   0x1   :  { %10 = vsyncpa [#allocation5], 0  ;;  %s5932_s15 = smov 0   ;;  %s5934_s16 = smov 0  }
   0x2   :  { %s5936_s17 = smov 0  }
   0x3 LB: > { %s176_s20 = sshll.u32 %s7490_s2, 4  ;;  %s4516_s21 = sadd.s32 4294967295, %s5898_s17   ;;  %s5898_s17 = sphi %s5936_s17, %s16_s17   ;;  %s5894_s16 = sphi %s5934_s16, %s7787_s16   ;;  %s5890_s15 = sphi %s5932_s15, %s7786_s15   ;;  %s177_s20 = int_to_ptr.hbm [resolvable:$true] %s176_s20 }
   0x4   : > { %p4518_p0 = scmp.ge.s32.totalorder %s5898_s17, 1  ;;  %p150_p1 = scmp.lt.s32.totalorder %s5898_s17, 3 }
   0x5   : > { %p5953_p2 = scmp.eq.s32.totalorder %s4516_s21, 0  ;;  %s5900_s24 = smov [#allocation4]  }
   0x6   : > { %p5957_p3 = pnand %p4518_p0, %p150_p1  ;;  %s178_s25 = sshll.u32 %s5900_s24, 4  ;;  %s179_s25 = int_to_ptr.vmem [resolvable:$true] %s178_s25 }
   0x7   : > { %s28_s27 = sadd.s32 1, %s5894_s16  ;;  %s161_s30 = sshll.u32 %s7489_s1, 4  ;;  %s162_s30 = int_to_ptr.hbm [resolvable:$true] %s161_s30 }
   0x8   : > { %p5725_p4 = pneg %p5957_p3  ;;  %p30_p6 = scmp.ge.s32.totalorder %s28_s27, 2 }
   0x9   : > { %s5901_s5 = smov [#allocation2]   ;;  %s187_s9 = sshll.u32 %s7491_s3, 4  ;;  %s188_s9 = int_to_ptr.hbm [resolvable:$true] %s187_s9 }
   0xa   : > { %p5965_p5 = pnand %p5953_p2, %p5725_p4  ;;  %s7789_s27 = smov (%p30_p6, %s28_s27), 0 }
   0xb   : > { %s163_s6 = sshll.u32 %s5901_s5, 4  ;;  %s5902_s10 = smov 64   ;;  %s164_s6 = int_to_ptr.vmem [resolvable:$true] %s163_s6 }
   0xc   : > { %5731 = dma.hbm_to_vmem [thread:$0]  (!%p5965_p5), %s177_s20, 16, %s179_s25, [#allocation5]  }
   0xd   : > { %s5903_s11 = smov 4   ;;  %s5904_s12 = smov [#allocation6]  }
   0xe   : > { %5728 = dma.hbm_to_vmem [thread:$0]  (!%p5965_p5), %s162_s30, 25600, %s164_s6, [#allocation3], %s5902_s10, %s5902_s10, %s5903_s11  }
   0xf   : > { %s189_s13 = sshll.u32 %s5904_s12, 4  ;;  %213 = sbr.rel (%p5957_p3) target bundleno = 713 (0x2c9), region = 36  ;;  %s190_s13 = int_to_ptr.vmem [resolvable:$true] %s189_s13 }
  0x10   : > { %5734 = dma.hbm_to_vmem [thread:$0]  (!%p5965_p5), %s188_s9, 2560, %s190_s13, [#allocation5], %s5902_s10, %s5902_s10, %s5903_s11  }
  0x14   : > { %5881 = dma.done.wait (%p5953_p2), [#allocation3], 25600  }
  0x15   : > { %5883 = vsyncadd (%p5953_p2), [#allocation3], 4294941696 }
  0x16   : > { %5885 = dma.done.wait (%p5953_p2), [#allocation5], 2576  }
  0x17   : > { %5887 = vsyncadd (%p5953_p2), [#allocation5], 4294964720  ;;  %v5905_v0 = vmov 0   ;;  %v418_v1 = vld [vmem:[#allocation6 + $0x3c] sm:$0xf]  ;;  %v5439_v14 = vld [vmem:[#allocation2 + $0xb0] sm:$0xff] }
  0x18   : > { %5774 = vset.pattern.permute.xlu2 %v5905_v0  ;;  %5773 = vset.pattern.permute.xlu1 %v5905_v0  ;;  %v416_v2 = vld [vmem:[#allocation6 + $0x34] sm:$0xf]  ;;  %v414_v3 = vld [vmem:[#allocation6 + $0x2c] sm:$0xf]  ;;  %v417_v4 = vld [vmem:[#allocation6 + $0x38] sm:$0xf] }
  0x19   : > { %5772 = vset.pattern.permute.xlu0 %v5905_v0  ;;  %484 = vperm.xlu2 %5774, %v418_v1   ;;  %v411_v5 = vld [vmem:[#allocation6 + $0x20] sm:$0xf]  ;;  %v415_v6 = vld [vmem:[#allocation6 + $0x30] sm:$0xf]  ;;  %v413_v7 = vld [vmem:[#allocation6 + $0x28] sm:$0xf] }
  0x1a   : > { %466 = vperm.xlu1 %5773, %v416_v2   ;;  %448 = vperm.xlu0 %5772, %v414_v3   ;;  %v909_v8 = vld [vmem:[#allocation6 + $0x60] sm:$0xf]  ;;  %v412_v9 = vld [vmem:[#allocation6 + $0x24] sm:$0xf]  ;;  %v5440_v10 = vld [vmem:[#allocation2 + $0xb8] sm:$0xff]  ;;  %p254_p7 = scmp.lt.s32.totalorder %s5890_s15, 1 }
  0x1b   : > { %870 = vmatpush.bf16.msra.mxu2 %v5440_v10  ;;  %v911_v11 = vld [vmem:[#allocation6 + $0x68] sm:$0xf]  ;;  %v912_v12 = vld [vmem:[#allocation6 + $0x6c] sm:$0xf]  ;;  %v910_v13 = vld [vmem:[#allocation6 + $0x64] sm:$0xf] }
  0x1c   : > { %v5438_v15 = vld [vmem:[#allocation2 + $0xa8] sm:$0xff]  ;;  %v913_v16 = vld [vmem:[#allocation6 + $0x70] sm:$0xf]  ;;  %v277_v18 = vld [vmem:[#allocation6] sm:$0xf]  ;;  %s7791_s15 = smov (!%p254_p7, %s5890_s15), 1 }
  0x1d   : > { %v278_v17 = vld [vmem:[#allocation6 + $0x4] sm:$0xf]  ;;  %v5436_v20 = vld [vmem:[#allocation2 + $0x98] sm:$0xff]  ;;  %v280_v21 = vld [vmem:[#allocation6 + $0xc] sm:$0xf]  ;;  %s5712_s14 = smul.u32 52, %s7791_s15 }
  0x1e   : > { %v5437_v19 = vld [vmem:[#allocation2 + $0xa0] sm:$0xff]  ;;  %v279_v22 = vld [vmem:[#allocation6 + $0x8] sm:$0xf]  ;;  %v914_v23 = vld [vmem:[#allocation6 + $0x74] sm:$0xf]  ;;  %vm808_vm0 = vcmask 1046528  }
  0x1f   : > { %871 = vmatpush.bf16.msra.mxu2 %v5439_v14  ;;  %v5435_v24 = vld [vmem:[#allocation2 + $0x90] sm:$0xff]  ;;  %v5434_v25 = vld [vmem:[#allocation2 + $0x88] sm:$0xff]  ;;  %s6002_s20 = scalar_lea.vmem %s7488_s0, %s5712_s14  ;;  %v1199_v28 = vld [vmem:[#allocation6 + $0x80] sm:$0xf]  ;;  %vm516_vm1 = vcmask 1040384   ;;  %vm1007_vm2 = vcmask 1042432  }
  0x20   : > { %v1201_v26 = vld [vmem:[#allocation6 + $0x88] sm:$0xf]  ;;  %v1200_v27 = vld [vmem:[#allocation6 + $0x84] sm:$0xf]  ;;  %v4596_v30 = vld [vmem:[%s6002_s20] sm:$0xe] }
  0x21   : > { %421 = vperm.xlu2 %5774, %v411_v5   ;;  %v5421_v29 = vld [vmem:[%s6002_s20] sm:$0xf0]  ;;  %v5422_v32 = vld [vmem:[%s6002_s20 + $0x8] sm:$0xff]  ;;  %v916_v36 = vld [vmem:[#allocation6 + $0x7c] sm:$0xf]  ;;  %vm1296_vm5 = vcmask 1043456  }
  0x22   : > { %475 = vperm.xlu1 %5773, %v417_v4   ;;  %457 = vperm.xlu0 %5772, %v415_v6   ;;  %v5433_v31 = vld [vmem:[#allocation2 + $0x80] sm:$0xff]  ;;  %v4597_v33 = vor.u32 %v5421_v29, %v4596_v30  ;;  %v810_v35 = vrot.slane %v5422_v32, 1  ;;  %v915_v37 = vld [vmem:[#allocation6 + $0x78] sm:$0xf]  ;;  %v1202_v39 = vld [vmem:[#allocation6 + $0x8c] sm:$0xf] }
  0x23   : > { %872 = vmatpush.bf16.msra.mxu2 %v5438_v15  ;;  %v1203_v40 = vld [vmem:[#allocation6 + $0x90] sm:$0xf]  ;;  %v282_v41 = vld [vmem:[#allocation6 + $0x14] sm:$0xf]  ;;  %v284_v45 = vld [vmem:[#allocation6 + $0x1c] sm:$0xf] }
  0x24   : > { %v809_v34 = vrot.slane %v4597_v33, 1  ;;  %v281_v42 = vld [vmem:[#allocation6 + $0x10] sm:$0xf]  ;;  %v283_v46 = vld [vmem:[#allocation6 + $0x18] sm:$0xf]  ;;  %v5430_v56 = vld [vmem:[#allocation2 + $0x68] sm:$0xff] }
  0x25   : > { %v5423_v43 = vld [vmem:[%s6002_s20 + $0x10] sm:$0xff]  ;;  %v1206_v49 = vld [vmem:[#allocation6 + $0x9c] sm:$0xf]  ;;  %v1205_v51 = vld [vmem:[#allocation6 + $0x98] sm:$0xf]  ;;  %vm1357_vm6 = vcmask 1045504  }
  0x26   : > { %v811_v38 = vsel %vm808_vm0, %v809_v34, %v810_v35  ;;  %v812_v44 = vrot.slane %v5423_v43, 1  ;;  %v1204_v48 = vld [vmem:[#allocation6 + $0x94] sm:$0xf]  ;;  %v5429_v58 = vld [vmem:[#allocation2 + $0x60] sm:$0xff]  ;;  %v5474_v62 = vld [vmem:[#allocation2 + $0x1a8] sm:$0xff]  ;;  %s5412_s21 = sshll.u32 %s7791_s15, 6 }
  0x27   : > { %873 = vmatpush.bf16.msra.mxu2 %v5437_v19  ;;  %v5432_v50 = vld [vmem:[#allocation2 + $0x78] sm:$0xff]  ;;  %v5431_v52 = vld [vmem:[#allocation2 + $0x70] sm:$0xff]  ;;  %v6013_v63 = vld [vmem:[%s6002_s20 + $0x20] sm:$0x1]  ;;  %v5906_v15 = vmov 839922192   ;;  %s7443_s24 = scalar_lea.vmem %s7492_s4, %s5412_s21 }
  0x28   : > { %v813_v47 = vsel %vm808_vm0, %v810_v35, %v812_v44  ;;  %5696 = vmatpush.bf16.msra.mxu1 %v5432_v50  ;;  %661 = vmatpush.bf16.msra.mxu0 %v5432_v50  ;;  %v5424_v53 = vld [vmem:[%s6002_s20 + $0x18] sm:$0xff]  ;;  %v5475_v59 = vld [vmem:[#allocation2 + $0x1b0] sm:$0xff]  ;;  %v802_v1 = vunpack.c.l.b16 %v6013_v63  ;;  %v5473_v4 = vld [vmem:[#allocation2 + $0x1a0] sm:$0xff]  ;;  %vm572_vm3 = vsmask.f32 7424 }
  0x29   : > { %919 = vperm.xlu2 %5774, %v909_v8   ;;  %v814_v54 = vrot.slane %v5424_v53, 1  ;;  %v5476_v57 = vld [vmem:[#allocation2 + $0x1b8] sm:$0xff]  ;;  %v5427_v2 = vld [vmem:[#allocation2 + $0x50] sm:$0xff]  ;;  %v5426_v8 = vld [vmem:[#allocation2 + $0x48] sm:$0xff]  ;;  %vm1063_vm4 = vsmask.f32 6400 }
  0x2a   : > { %439 = vperm.xlu1 %5773, %v413_v7   ;;  %430 = vperm.xlu0 %5772, %v412_v9   ;;  %v5428_v60 = vld [vmem:[#allocation2 + $0x58] sm:$0xff]  ;;  %v5447_v3 = vld [vmem:[#allocation2 + $0xf0] sm:$0xff]  ;;  %v807_v5 = vpack.c.b16 %v802_v1, %v802_v1  ;;  %v5446_v9 = vld [vmem:[#allocation2 + $0xe8] sm:$0xff] }
  0x2b   : > { %874 = vmatpush.bf16.msra.mxu2 %v5436_v20  ;;  %v815_v55 = vsel %vm808_vm0, %v812_v44, %v814_v54  ;;  %v5448_v61 = vld [vmem:[#allocation2 + $0xf8] sm:$0xff]  ;;  %v5471_v14 = vld [vmem:[#allocation2 + $0x190] sm:$0xff]  ;;  %v5470_v19 = vld [vmem:[#allocation2 + $0x188] sm:$0xff] }
  0x2c   : > { %5697 = vmatpush.bf16.msra.mxu1 %v5431_v52  ;;  %662 = vmatpush.bf16.msra.mxu0 %v5431_v52  ;;  %v816_v6 = vrot.slane %v807_v5, 1  ;;  %v5472_v10 = vld [vmem:[#allocation2 + $0x198] sm:$0xff]  ;;  %v5418_v44 = vld [vmem:[#allocation2 + $0x28] sm:$0xff]  ;;  %v5417_v1 = vld [vmem:[#allocation2 + $0x20] sm:$0xff] }
  0x2d   : > { %1160 = vmatpush.bf16.msra.mxu3 %v5448_v61 }
  0x2e   : > { %v817_v7 = vsel %vm808_vm0, %v814_v54, %v816_v6 }
  0x2f   : > { %875 = vmatpush.bf16.msra.mxu2 %v5435_v24 }
  0x30   : > { %5698 = vmatpush.bf16.msra.mxu1 %v5430_v56  ;;  %663 = vmatpush.bf16.msra.mxu0 %v5430_v56 }
  0x31   : > { %946 = vperm.xlu2 %5774, %v912_v12   ;;  %1161 = vmatpush.bf16.msra.mxu3 %v5447_v3  ;;  %v5425_v12 = vld [vmem:[#allocation2 + $0x40] sm:$0xff]  ;;  %v6068_v3 = vld [vmem:[%s6002_s20 + $0x10] sm:$0xff]  }
  0x32   : > { %937 = vperm.xlu1 %5773, %v911_v11   ;;  %928 = vperm.xlu0 %5772, %v910_v13   ;;  %v5445_v13 = vld [vmem:[#allocation2 + $0xe0] sm:$0xff] }
  0x33   : > { %876 = vmatpush.bf16.msra.mxu2 %v5434_v25  ;;  %v5419_v25 = vld [vmem:[#allocation2 + $0x30] sm:$0xff] }
  0x34   : > { %5699 = vmatpush.bf16.msra.mxu1 %v5429_v58  ;;  %664 = vmatpush.bf16.msra.mxu0 %v5429_v58 }
  0x35   : > { %1162 = vmatpush.bf16.msra.mxu3 %v5446_v9 }
  0x37   : > { %877 = vmatpush.bf16.msra.mxu2 %v5433_v31 }
  0x38   : > { %5700 = vmatpush.bf16.msra.mxu1 %v5428_v60  ;;  %665 = vmatpush.bf16.msra.mxu0 %v5428_v60  ;;  %v6062_v60 = vld [vmem:[%s6002_s20 + $0x18] sm:$0xff]  }
  0x39   : > { %955 = vperm.xlu2 %5774, %v913_v16   ;;  %1163 = vmatpush.bf16.msra.mxu3 %v5445_v13  ;;  %v291_v16 = vunpack.c.l.s4 %v5906_v15  ;;  %v5416_v13 = vld [vmem:[#allocation2 + $0x18] sm:$0xff] }
  0x3a   : > { %296 = vperm.xlu1 %5773, %v278_v17   ;;  %287 = vperm.xlu0 %5772, %v277_v18   ;;  %v5420_v17 = vld [vmem:[#allocation2 + $0x38] sm:$0xff] }
  0x3b   : > { %878 = vmatmul.bf16.vlgmr.msra.gmra.mxu2 %v811_v38  ;;  %v5444_v18 = vld [vmem:[#allocation2 + $0xd8] sm:$0xff]  ;;  %v405_v38 = vld [vmem:[%s6002_s20 + $0x10] sm:$0xf] }
  0x3c   : > { %1709 = vmatpush.bf16.msrb.mxu2 %v5476_v57  ;;  %5701 = vmatpush.bf16.msra.mxu1 %v5427_v2 }
  0x3d   : > { %666 = vmatpush.bf16.msra.mxu0 %v5427_v2  ;;  %1164 = vmatpush.bf16.msra.mxu3 %v5444_v18  ;;  %v5456_v2 = vld [vmem:[#allocation2 + $0x138] sm:$0xff]  ;;  %v6085_v18 = vld [vmem:[%s6002_s20] sm:$0xff]  }
  0x40   : > { %1710 = vmatpush.bf16.msrb.mxu2 %v5475_v59  ;;  %5702 = vmatpush.bf16.msra.mxu1 %v5426_v8  ;;  %v5442_v59 = vld [vmem:[#allocation2 + $0xc8] sm:$0xff] }
  0x41   : > { %314 = vperm.xlu2 %5774, %v280_v21   ;;  %667 = vmatpush.bf16.msra.mxu0 %v5426_v8  ;;  %v6019_v21 = vunpack.c.0.s8 %v291_v16  ;;  %v5441_v8 = vld [vmem:[#allocation2 + $0xc0] sm:$0xff] }
  0x42   : > { %305 = vperm.xlu1 %5773, %v279_v22   ;;  %964 = vperm.xlu0 %5772, %v914_v23  }
  0x44   : > { %1711 = vmatpush.bf16.msrb.mxu2 %v5474_v62  ;;  %5703 = vmatpush.bf16.msra.mxu1 %v5425_v12 }
  0x45   : > { %668 = vmatpush.bf16.msra.mxu0 %v5425_v12 }
  0x48   : > { %1712 = vmatpush.bf16.msrb.mxu2 %v5473_v4  ;;  %738 = vmatpush.bf16.msrb.mxu1 %v5420_v17 }
  0x49   : > { %1227 = vperm.xlu2 %5774, %v1201_v26   ;;  %v5443_v26 = vld [vmem:[#allocation2 + $0xd0] sm:$0xff]  ;;  %1419 = vmatpush.bf16.msrb.mxu0 %v5456_v2 }
  0x4a   : > { %1218 = vperm.xlu1 %5773, %v1200_v27   ;;  %1209 = vperm.xlu0 %5772, %v1199_v28   ;;  %v5469_v27 = vld [vmem:[#allocation2 + $0x180] sm:$0xff] }
  0x4b   : > { %883 = vmatmul.bf16.gmra.mxu2 %v813_v47  ;;  %1165 = vmatpush.bf16.msra.mxu3 %v5443_v26  ;;  %v6037_v47 = vunpack.c.l.bf16 %v405_v38 }
  0x4c   : > { %1713 = vmatpush.bf16.msrb.mxu2 %v5472_v10  ;;  %739 = vmatpush.bf16.msrb.mxu1 %v5419_v25  ;;  %v2308_v10 = vld [vmem:[%s6002_s20 + $0x18] sm:$0xff]   ;;  %v403_v25 = vld [vmem:[%s6002_s20 + $0x8] sm:$0xff]  }
  0x4d   : > { %7605 = vst [vmem:[#allocation10_spill] sm:$0xff] %v6037_v47  ;;  %v6082_v15 = vunpack.c.h.bf16 %v2308_v10  ;;  %v6117_v38 = vunpack.c.l.bf16 %v403_v25 }
  0x4f   : > { %1166 = vmatpush.bf16.msra.mxu3 %v5442_v59 }
  0x50   : > { %1714 = vmatpush.bf16.msrb.mxu2 %v5471_v14  ;;  %740 = vmatpush.bf16.msrb.mxu1 %v5418_v44  ;;  %v6080_v14 = vunpack.c.l.bf16 %v6062_v60  ;;  %v6127_v44 = vunpack.c.h.bf16 %v403_v25 }
  0x51   : > { %982 = vperm.xlu2 %5774, %v916_v36  }
  0x52   : > { %973 = vperm.xlu1 %5773, %v915_v37   ;;  %1236 = vperm.xlu0 %5772, %v1202_v39   ;;  %v2306_v37 = vld [vmem:[%s6002_s20 + $0x10] sm:$0xff]   ;;  %7611 = vst [vmem:[#allocation16_spill] sm:$0xff] %v6080_v14 }
  0x53   : > { %1167 = vmatpush.bf16.msra.mxu3 %v5441_v8 }
  0x54   : > { %1715 = vmatpush.bf16.msrb.mxu2 %v5470_v19  ;;  %741 = vmatpush.bf16.msrb.mxu1 %v5417_v1  ;;  %v5454_v1 = vld [vmem:[#allocation2 + $0x128] sm:$0xff] }
  0x58   : > { %1716 = vmatpush.bf16.msrb.mxu2 %v5469_v27  ;;  %742 = vmatpush.bf16.msrb.mxu1 %v5416_v13  ;;  %v5691_v13 = vld [vmem:[%s6002_s20 + $0x8] sm:$0xff]  }
  0x59   : > { %1245 = vperm.xlu2 %5774, %v1203_v40   ;;  %v6165_v25 = vunpack.c.l.bf16 %v5691_v13 }
  0x5a   : > { %332 = vperm.xlu1 %5773, %v282_v41   ;;  %323 = vperm.xlu0 %5772, %v281_v42   ;;  %v407_v41 = vld [vmem:[%s6002_s20 + $0x18] sm:$0xff]  }
  0x5b   : > { %888 = vmatmul.bf16.gmra.mxu2 %v815_v55  ;;  %v6044_v52 = vunpack.c.h.bf16 %v407_v41  ;;  %7620 = vst [vmem:[#allocation25_spill] sm:$0xff] %v6165_v25 }
  0x61   : > { %350 = vperm.xlu2 %5774, %v284_v45  }
  0x62   : > { %341 = vperm.xlu1 %5773, %v283_v46   ;;  %1254 = vperm.xlu0 %5772, %v1204_v48   ;;  %v6039_v48 = vunpack.c.h.bf16 %v2306_v37 }
  0x64   : > { %7606 = vst [vmem:[#allocation11_spill] sm:$0xff] %v6039_v48 }
  0x6a   : > { %1272 = vperm.xlu1 %5773, %v1206_v49   ;;  %1263 = vperm.xlu0 %5772, %v1205_v51   ;;  %v6042_v51 = vunpack.c.l.bf16 %v407_v41 }
  0x6b   : > { %893 = vmatmul.bf16.gmra.mxu2 %v817_v7 }
  0x73   : > { %v485_v0 = vpop.permute.xlu2 %484 }
  0x74   : > { %v490_v24 = vperm.slane %v485_v0, %v6019_v21 }
  0x76   : > { %v507_v30 = vunpack.c.l.bf16 %v490_v24 }
  0x78   : > { %v6032_v39 = vrot.slane %v507_v30, 7 }
  0x7a   : > { %7604 = vst [vmem:[#allocation9_spill] sm:$0xff] %v6032_v39 }
  0x7b   : > { %v6017_v11 = vpop.permute.xlu2 %421 }
  0x7c   : > { %v427_v53 = vperm.slane %v6017_v11, %v6019_v21  ;;  %v2307_v11 = vld [vmem:[%s6002_s20 + $0x14] sm:$0xff]  }
  0x7e   : > { %v500_v9 = vunpack.c.l.bf16 %v427_v53 }
  0x83   : > { %v6021_v23 = vpop.permute.xlu2 %919 }
  0x84   : > { %v925_v2 = vperm.slane %v6021_v23, %v6019_v21 }
  0x8b   : > { %v6035_v42 = vpop.permute.xlu2 %946 }
  0x8c   : > { %v467_v20 = vpop.permute.xlu1 %466  ;;  %v449_v22 = vpop.permute.xlu0 %448  ;;  %v952_v26 = vperm.slane %v6035_v42, %v6019_v21 }
  0x8d   : > { %v472_v28 = vperm.slane %v467_v20, %v6019_v21  ;;  %v454_v29 = vperm.slane %v449_v22, %v6019_v21  ;;  %v6088_v20 = vunpack.c.h.bf16 %v6068_v3  ;;  %v499_v22 = vunpack.c.l.bf16 %v6013_v63 }
  0x8f   : > { %v505_v32 = vunpack.c.l.bf16 %v472_v28  ;;  %v6027_v35 = vunpack.c.l.bf16 %v454_v29  ;;  %7612 = vst [vmem:[#allocation17_spill] sm:$0xff] %v6088_v20  ;;  %v6098_v28 = vunpack.c.l.bf16 %v2306_v37  ;;  %v6100_v29 = vunpack.c.h.bf16 %v2307_v11 }
  0x90   : > { %v6115_v37 = vunpack.c.h.bf16 %v6085_v18  ;;  %v549_v10 = vmul.f32 %v6032_v39, %v499_v22 }
  0x91   : > { %v526_v45 = vrot.slane %v505_v32, 7  ;;  %v522_v49 = vrot.slane %v6027_v35, 7 }
  0x93   : > { %v6096_v27 = vpop.permute.xlu2 %955 }
  0x94   : > { %v476_v31 = vpop.permute.xlu1 %475  ;;  %v458_v34 = vpop.permute.xlu0 %457 }
  0x95   : > { %v481_v33 = vperm.slane %v476_v31, %v6019_v21  ;;  %v463_v36 = vperm.slane %v458_v34, %v6019_v21  ;;  %v6102_v31 = vrot.slane %v500_v9, 7  ;;  %v6108_v34 = vunpack.c.l.bf16 %v2307_v11  ;;  %v1572_v9 = vld [vmem:[%s6002_s20 + $0x4] sm:$0xf]  ;;  %v5414_v11 = vld [vmem:[#allocation2 + $0x8] sm:$0xff] }
  0x97   : > { %v506_v40 = vunpack.c.l.bf16 %v481_v33  ;;  %v504_v43 = vunpack.c.l.bf16 %v463_v36  ;;  %7613 = vst [vmem:[#allocation18_spill] sm:$0xff] %v6102_v31  ;;  %v7493_v33 = vunpack.c.l.bf16 %v6085_v18 }
  0x98   : > { %7614 = vst [vmem:[#allocation19_spill] sm:$0xff] %v6108_v34 }
  0x99   : > { %v528_v46 = vrot.slane %v506_v40, 7  ;;  %v524_v50 = vrot.slane %v504_v43, 7 }
  0x9b   : > { %v6049_v54 = vsel %vm516_vm1, %v526_v45, %v528_v46  ;;  %v6053_v55 = vsel %vm516_vm1, %v528_v46, %v6032_v39  ;;  %v6056_v56 = vsel %vm516_vm1, %v522_v49, %v524_v50  ;;  %v6059_v57 = vsel %vm516_vm1, %v524_v50, %v526_v45  ;;  %v5455_v45 = vld [vmem:[#allocation2 + $0x130] sm:$0xff] }
  0x9c   : > { %7607 = vst [vmem:[#allocation12_spill] sm:$0xff] %v6049_v54  ;;  %v440_v58 = vpop.permute.xlu1 %439  ;;  %v431_v62 = vpop.permute.xlu0 %430  ;;  %v545_v0 = vmul.f32 %v6056_v56, %v6037_v47  ;;  %v546_v5 = vmul.f32 %v6059_v57, %v6039_v48  ;;  %v547_v6 = vmul.f32 %v6049_v54, %v6042_v51  ;;  %v548_v7 = vmul.f32 %v6053_v55, %v6044_v52  ;;  %v5415_v46 = vld [vmem:[#allocation2 + $0x10] sm:$0xff] }
  0x9d   : > { %7608 = vst [vmem:[#allocation13_spill] sm:$0xff] %v6053_v55  ;;  %v445_v61 = vperm.slane %v440_v58, %v6019_v21  ;;  %v436_v4 = vperm.slane %v431_v62, %v6019_v21  ;;  %1420 = vmatpush.bf16.msrb.mxu0 %v5455_v45  ;;  %743 = vmatpush.bf16.msrb.mxu1 %v5415_v46  ;;  %v1581_v45 = vunpack.c.l.bf16 %v1572_v9  ;;  %v991_v46 = vunpack.c.l.bf16 %v925_v2  ;;  %v5484_v9 = vld [vmem:[#allocation2 + $0x1f8] sm:$0xff] }
  0x9e   : > { %7609 = vst [vmem:[#allocation14_spill] sm:$0xff] %v6056_v56  ;;  %v552_v17 = vpack.c.bf16 %v546_v5, %v545_v0  ;;  %v6091_v24 = vpack.c.bf16 %v548_v7, %v547_v6  ;;  %v541_v0 = vmul.f32 %v7493_v33, %v6102_v31  ;;  %1848 = vmatpush.bf16.msrb.mxu3 %v5484_v9 }
  0x9f   : > { %7610 = vst [vmem:[#allocation15_spill] sm:$0xff] %v6059_v57  ;;  %v502_v12 = vunpack.c.l.bf16 %v445_v61  ;;  %v501_v16 = vunpack.c.l.bf16 %v436_v4  ;;  %v6209_v33 = vrot.slane %v991_v46, 5 }
  0xa0   : > { %v589_v63 = vshll.u32 %v552_v17, 16  ;;  %v597_v43 = vshll.u32 %v6091_v24, 16  ;;  %v593_v62 = vshrl.u32 %v552_v17, 16 }
  0xa1   : > { %v520_v19 = vrot.slane %v502_v12, 7  ;;  %v518_v30 = vrot.slane %v501_v16, 7  ;;  %1421 = vmatpush.bf16.msrb.mxu0 %v5454_v1  ;;  %744 = vmatpush.bf16.msrb.mxu1 %v5414_v11  ;;  %v5453_v1 = vld [vmem:[#allocation2 + $0x120] sm:$0xff]  ;;  %v961_v11 = vperm.slane %v6096_v27, %v6019_v21 }
  0xa2   : > { %v6141_v61 = vrot.slane %v589_v63, 1  ;;  %v6153_v8 = vrot.slane %v597_v43, 1  ;;  %v6173_v63 = vpop.permute.xlu2 %314 }
  0xa3   : > { %v6105_v32 = vsel %vm516_vm1, %v520_v19, %v522_v49  ;;  %v6121_v40 = vsel %vm516_vm1, %v6102_v31, %v518_v30  ;;  %v6124_v41 = vsel %vm516_vm1, %v518_v30, %v520_v19  ;;  %v6129_v49 = vunpack.c.l.bf16 %v952_v26 }
  0xa4   : > { %v6112_v35 = vmul.f32 %v6082_v15, %v6105_v32  ;;  %v938_v36 = vpop.permute.xlu1 %937  ;;  %7616 = vst [vmem:[#allocation21_spill] sm:$0xff] %v6121_v40  ;;  %v929_v42 = vpop.permute.xlu0 %928  ;;  %v6133_v50 = vmul.f32 %v6098_v28, %v6124_v41  ;;  %v6137_v53 = vmul.f32 %v6100_v29, %v6124_v41  ;;  %v542_v5 = vmul.f32 %v6115_v37, %v6121_v40 }
  0xa5   : > { %7617 = vst [vmem:[#allocation22_spill] sm:$0xff] %v6124_v41  ;;  %v943_v58 = vperm.slane %v938_v36, %v6019_v21  ;;  %v934_v59 = vperm.slane %v929_v42, %v6019_v21  ;;  %v595_v7 = vor.u32 %v593_v62, %v6141_v61  ;;  %v7494_v12 = vrot.slane %v6129_v49, 5  ;;  %1422 = vmatpush.bf16.msrb.mxu0 %v5453_v1 }
  0xa6   : > { %7615 = vst [vmem:[#allocation20_spill] sm:$0xff] %v6112_v35  ;;  %v543_v23 = vmul.f32 %v6124_v41, %v6117_v38  ;;  %v544_v17 = vmul.f32 %v6105_v32, %v6127_v44  ;;  %v6163_v19 = vunpack.c.h.bf16 %v5691_v13  ;;  %v6171_v30 = vunpack.c.l.bf16 %v6068_v3 }
  0xa7   : > { %7618 = vst [vmem:[#allocation23_spill] sm:$0xff] %v6133_v50  ;;  %v993_v4 = vunpack.c.l.bf16 %v943_v58  ;;  %v6150_v6 = vunpack.c.l.bf16 %v934_v59  ;;  %v600_v22 = vsel %vm572_vm3, %v595_v7, %v6153_v8  ;;  %v550_v43 = vpack.c.bf16 %v542_v5, %v541_v0  ;;  %v767_v5 = vld [vmem:[%s6002_s20] sm:$0xe] }
  0xa8   : > { %7619 = vst [vmem:[#allocation24_spill] sm:$0xff] %v6137_v53  ;;  %679 = vmatmul.bf16.vlgmr.msra.gmra.mxu1 %v600_v22  ;;  %v554_v62 = vpack.c.bf16 %v549_v10, %v549_v10  ;;  %v6192_v2 = vpack.c.bf16 %v544_v17, %v543_v23  ;;  %v1591_v13 = vmul.f32 %v6165_v25, %v6121_v40  ;;  %v989_v53 = vunpack.c.l.bf16 %v767_v5 }
  0xa9   : > { %v1011_v16 = vrot.slane %v993_v4, 5  ;;  %v1009_v26 = vrot.slane %v6150_v6, 5  ;;  %7621 = vst [vmem:[#allocation26_spill] sm:$0xff] %v6171_v30  ;;  %v5413_v4 = vld [vmem:[#allocation2] sm:$0xff]  ;;  %v1592_v22 = vmul.f32 %v6163_v19, %v6124_v41  ;;  %v1593_v27 = vmul.f32 %v6171_v30, %v6105_v32 }
  0xaa   : > { %745 = vmatpush.bf16.msrb.mxu1 %v5413_v4  ;;  %v581_v50 = vshll.u32 %v6192_v2, 16  ;;  %v1590_v40 = vmul.f32 %v1581_v45, %v6102_v31  ;;  %v574_v4 = vshrl.u32 %v550_v43, 16 }
  0xab   : > { %v6178_v36 = vsel %vm1007_vm2, %v1011_v16, %v7494_v12  ;;  %v6189_v7 = vsel %vm1007_vm2, %v1009_v26, %v1011_v16  ;;  %v5452_v16 = vld [vmem:[#allocation2 + $0x118] sm:$0xff]  ;;  %v6227_v9 = vpack.c.bf16 %v1593_v27, %v1592_v22  ;;  %v5483_v22 = vld [vmem:[#allocation2 + $0x1f0] sm:$0xff] }
  0xac   : > { %v297_v42 = vpop.permute.xlu1 %296  ;;  %v2623_v58 = vmul.f32 %v6108_v34, %v6178_v36  ;;  %v4087_v3 = vmul.f32 %v6082_v15, %v6178_v36  ;;  %v6184_v59 = vpop.permute.xlu0 %287  ;;  %v3355_v6 = vmul.f32 %v6080_v14, %v6178_v36  ;;  %v2622_v10 = vmul.f32 %v6098_v28, %v6189_v7  ;;  %1423 = vmatpush.bf16.msrb.mxu0 %v5452_v16 }
  0xad   : > { %v302_v0 = vperm.slane %v297_v42, %v6019_v21  ;;  %v3354_v23 = vmul.f32 %v6088_v20, %v6189_v7  ;;  %v4086_v17 = vmul.f32 %v6100_v29, %v6189_v7  ;;  %v576_v42 = vshll.u32 %v550_v43, 16  ;;  %1849 = vmatpush.bf16.msrb.mxu3 %v5483_v22 }
  0xae   : > { %v6211_v12 = vpack.c.bf16 %v2623_v58, %v2622_v10  ;;  %v6221_v34 = vunpack.c.l.bf16 %v961_v11  ;;  %v605_v58 = vshll.u32 %v554_v62, 16  ;;  %v1599_v5 = vpack.c.bf16 %v1591_v13, %v1590_v40  ;;  %v1228_v62 = vpop.permute.xlu2 %1227 }
  0xaf   : > { %v6213_v35 = vunpack.c.l.bf16 %v302_v0  ;;  %v6215_v1 = vpack.c.bf16 %v3355_v6, %v3354_v23  ;;  %v6217_v41 = vpack.c.bf16 %v4087_v3, %v4086_v17  ;;  %v578_v0 = vrot.slane %v576_v42, 1  ;;  %v5464_v23 = vld [vmem:[#allocation2 + $0x178] sm:$0xff]  ;;  %v5451_v17 = vld [vmem:[#allocation2 + $0x110] sm:$0xff] }
  0xb0   : > { %7622 = vst [vmem:[#allocation27_spill] sm:$0xff] %v6211_v12  ;;  %v6233_v3 = vsel %vm1007_vm2, %v6209_v33, %v1009_v26  ;;  %v601_v11 = vshrl.u32 %v6091_v24, 16  ;;  %v1032_v10 = vmul.f32 %v6209_v33, %v989_v53  ;;  %v6237_v43 = vrot.slane %v581_v50, 1  ;;  %1535 = vmatpush.bf16.msra.mxu1 %v5464_v23  ;;  %1424 = vmatpush.bf16.msrb.mxu0 %v5451_v17  ;;  %v5450_v53 = vld [vmem:[#allocation2 + $0x108] sm:$0xff] }
  0xb1   : > { %7623 = vst [vmem:[#allocation28_spill] sm:$0xff] %v6215_v1  ;;  %v6225_v46 = vmul.f32 %v6098_v28, %v6213_v35  ;;  %v579_v16 = vor.u32 %v578_v0, %v574_v4  ;;  %v1624_v40 = vshll.u32 %v1599_v5, 16  ;;  %v1629_v13 = vshll.u32 %v6227_v9, 16 }
  0xb2   : > { %7624 = vst [vmem:[#allocation29_spill] sm:$0xff] %v6217_v41  ;;  %v1015_v42 = vrot.slane %v6221_v34, 5  ;;  %v603_v26 = vor.u32 %v601_v11, %v6153_v8  ;;  %v607_v27 = vrot.slane %v605_v58, 1  ;;  %v1594_v24 = vmul.f32 %v6088_v20, %v6056_v56  ;;  %v5463_v41 = vld [vmem:[#allocation2 + $0x170] sm:$0xff] }
  0xb3   : > { %7625 = vst [vmem:[#allocation30_spill] sm:$0xff] %v6225_v46  ;;  %v584_v50 = vsel %vm572_vm3, %v579_v16, %v6237_v43  ;;  %v1622_v4 = vshrl.u32 %v1599_v5, 16  ;;  %v1626_v0 = vrot.slane %v1624_v40, 1  ;;  %v1233_v34 = vperm.slane %v1228_v62, %v6019_v21 }
  0xb4   : > { %v6229_v6 = vpop.permute.xlu1 %305  ;;  %v965_v45 = vpop.permute.xlu0 %964  ;;  %669 = vmatmul.bf16.vlgmr.msra.gmra.mxu0 %v584_v50  ;;  %v1033_v8 = vmul.f32 %v6115_v37, %v6233_v3  ;;  %v1034_v58 = vmul.f32 %v6189_v7, %v6117_v38  ;;  %v1595_v11 = vmul.f32 %v6080_v14, %v6059_v57  ;;  %v6254_v17 = vrot.slane %v1629_v13, 1  ;;  %1536 = vmatpush.bf16.msra.mxu1 %v5463_v41  ;;  %v5449_v41 = vld [vmem:[#allocation2 + $0x100] sm:$0xff] }
  0xb5   : > { %v970_v12 = vperm.slane %v965_v45, %v6019_v21  ;;  %v1627_v23 = vor.u32 %v1626_v0, %v1622_v4  ;;  %v1035_v45 = vmul.f32 %v6178_v36, %v6127_v44  ;;  %v293_v62 = vperm.slane %v6184_v59, %v6019_v21  ;;  %1425 = vmatpush.bf16.msrb.mxu0 %v5450_v53 }
  0xb6   : > { %v608_v16 = vsel %vm572_vm3, %v603_v26, %v607_v27  ;;  %v1041_v40 = vpack.c.bf16 %v1033_v8, %v1032_v10  ;;  %v6264_v22 = vunpack.c.h.bf16 %v6062_v60  ;;  %v6269_v0 = vunpack.c.l.bf16 %v1233_v34  ;;  %v5508_v27 = vld [vmem:[#allocation2 + $0x2b8] sm:$0xff] }
  0xb7   : > { %v6256_v5 = vunpack.c.l.bf16 %v970_v12  ;;  %v1632_v13 = vsel %vm572_vm3, %v1627_v23, %v6254_v17  ;;  %v1042_v50 = vpack.c.bf16 %v1035_v45, %v1034_v58  ;;  %v7626_v60 = vrot.slane %v6129_v49, 5  ;;  %v5482_v45 = vld [vmem:[#allocation2 + $0x1e8] sm:$0xff]  ;;  %2267 = vmatpush.bf16.msra.mxu2 %v5508_v27 }
  0xb8   : > { %684 = vmatmul.bf16.gmra.mxu1 %v608_v16  ;;  %1717 = vmatmul.bf16.vlgmr.msrb.gmra.mxu2 %v1632_v13  ;;  %v1065_v59 = vshrl.u32 %v1041_v40, 16  ;;  %v1068_v57 = vshll.u32 %v1041_v40, 16  ;;  %v6278_v34 = vunpack.c.l.bf16 %v293_v62  ;;  %v6280_v40 = vpack.c.bf16 %v1595_v11, %v1594_v24  ;;  %v5507_v13 = vld [vmem:[#allocation2 + $0x2b0] sm:$0xff] }
  0xb9   : > { %v7507_v12 = vrot.slane %v6256_v5, 5  ;;  %v6275_v53 = vsel %vm1007_vm2, %v7626_v60, %v1015_v42  ;;  %v1073_v8 = vshrl.u32 %v1042_v50, 16  ;;  %v1076_v23 = vshll.u32 %v1042_v50, 16  ;;  %1426 = vmatpush.bf16.msrb.mxu0 %v5449_v41  ;;  %1850 = vmatpush.bf16.msrb.mxu3 %v5482_v45 }
  0xba   : > { %v1067_v16 = vrot.slane %v1065_v59, 1  ;;  %v1070_v60 = vrot.slane %v1068_v57, 2  ;;  %v7508_v62 = vrot.slane %v6269_v0, 4  ;;  %v1036_v24 = vmul.f32 %v6275_v53, %v6037_v47 }
  0xbb   : > { %v6285_v49 = vsel %vm1007_vm2, %v1015_v42, %v7507_v12  ;;  %v1075_v50 = vrot.slane %v1073_v8, 1  ;;  %v1078_v56 = vrot.slane %v1076_v23, 2  ;;  %v585_v41 = vshrl.u32 %v6192_v2, 16  ;;  %2268 = vmatpush.bf16.msra.mxu2 %v5507_v13  ;;  %v5492_v12 = vld [vmem:[#allocation2 + $0x238] sm:$0xff] }
  0xbc   : > { %v1219_v4 = vpop.permute.xlu1 %1218  ;;  %v1210_v26 = vpop.permute.xlu0 %1209  ;;  %v1071_v11 = vor.u32 %v1070_v60, %v1067_v16  ;;  %v1637_v27 = vshll.u32 %v6280_v40, 16  ;;  %v1037_v8 = vmul.f32 %v6285_v49, %v6039_v48  ;;  %v374_v45 = vmul.f32 %v6115_v37, %v6213_v35 }
  0xbd   : > { %v1224_v10 = vperm.slane %v1219_v4, %v6019_v21  ;;  %v1215_v58 = vperm.slane %v1210_v26, %v6019_v21  ;;  %v983_v4 = vpop.permute.xlu2 %982  ;;  %v6290_v59 = vor.u32 %v1078_v56, %v1075_v50  ;;  %v587_v23 = vor.u32 %v585_v41, %v6237_v43  ;;  %v1197_v50 = vld [vmem:[%s6002_s20] sm:$0xc]  ;;  %2015 = vmatpush.bf16.msra.mxu0 %v5492_v12 }
  0xbe   : > { %v988_v42 = vperm.slane %v983_v4, %v6019_v21  ;;  %v1043_v60 = vpack.c.bf16 %v1037_v8, %v1036_v24  ;;  %v6332_v31 = vrot.slane %v1637_v27, 1 }
  0xbf   : > { %v1281_v26 = vunpack.c.l.bf16 %v1224_v10  ;;  %v1280_v46 = vunpack.c.l.bf16 %v1215_v58  ;;  %v1080_v10 = vsel %vm1063_vm4, %v1071_v11, %v6290_v59  ;;  %v7627_v58 = vunpack.c.l.bf16 %v6085_v18  ;;  %v5506_v18 = vld [vmem:[#allocation2 + $0x2a8] sm:$0xff] }
  0xc0   : > { %1168 = vmatmul.bf16.vlgmr.msra.gmra.mxu3 %v1080_v10  ;;  %v1633_v10 = vshrl.u32 %v6227_v9, 16  ;;  %v998_v24 = vunpack.c.l.bf16 %v988_v42  ;;  %v1085_v1 = vshll.u32 %v1043_v60, 16  ;;  %2269 = vmatpush.bf16.msra.mxu2 %v5506_v18 }
  0xc1   : > { %v1298_v57 = vrot.slane %v1281_v26, 4  ;;  %v373_v2 = vmul.f32 %v7627_v58, %v6278_v34  ;;  %v6310_v13 = vrot.slane %v1280_v46, 4  ;;  %v5462_v26 = vld [vmem:[#allocation2 + $0x168] sm:$0xff]  ;;  %v6325_v58 = vld [vmem:[%s6002_s20 + $0x20] sm:$0xff]  }
  0xc2   : > { %7631 = vst [vmem:[#allocation34_spill] sm:$0xff] %v6325_v58  ;;  %1537 = vmatpush.bf16.msra.mxu1 %v5462_v26 }
  0xc3   : > { %v6308_v16 = vsel %vm1296_vm5, %v1298_v57, %v7508_v62  ;;  %7628 = vst [vmem:[#allocation31_spill] sm:$0xff] %v6310_v13  ;;  %v1082_v62 = vshrl.u32 %v1043_v60, 16  ;;  %v381_v42 = vpack.c.bf16 %v374_v45, %v373_v2  ;;  %v6339_v60 = vsel %vm1296_vm5, %v6310_v13, %v1298_v57 }
  0xc4   : > { %v974_v56 = vpop.permute.xlu1 %973  ;;  %v1237_v43 = vpop.permute.xlu0 %1236  ;;  %v6316_v11 = vmul.f32 %v6098_v28, %v6308_v16  ;;  %v6320_v41 = vmul.f32 %v6100_v29, %v6308_v16  ;;  %v5505_v28 = vld [vmem:[#allocation2 + $0x2a0] sm:$0xff]  ;;  %v592_v29 = vsel %vm572_vm3, %v587_v23, %v6141_v61  ;;  %7632 = vst [vmem:[#allocation35_spill] sm:$0xff] %v6339_v60  ;;  %v1087_v23 = vrot.slane %v1085_v1, 2 }
  0xc5   : > { %v979_v4 = vperm.slane %v974_v56, %v6019_v21  ;;  %v1242_v46 = vperm.slane %v1237_v43, %v6019_v21  ;;  %v5481_v56 = vld [vmem:[#allocation2 + $0x1e0] sm:$0xff]  ;;  %v1279_v43 = vunpack.c.l.bf16 %v1197_v50  ;;  %674 = vmatmul.bf16.gmra.mxu0 %v592_v29  ;;  %2270 = vmatpush.bf16.msra.mxu2 %v5505_v28  ;;  %v6342_v50 = vrot.slane %v998_v24, 5  ;;  %v1246_v12 = vpop.permute.xlu2 %1245  ;;  %v5491_v28 = vld [vmem:[#allocation2 + $0x230] sm:$0xff] }
  0xc6   : > { %7629 = vst [vmem:[#allocation32_spill] sm:$0xff] %v6316_v11  ;;  %v5461_v11 = vld [vmem:[#allocation2 + $0x160] sm:$0xff]  ;;  %1851 = vmatpush.bf16.msrb.mxu3 %v5481_v56  ;;  %v1322_v57 = vmul.f32 %v6115_v37, %v6339_v60  ;;  %v7634_v1 = vrot.slane %v6269_v0, 4  ;;  %v5480_v56 = vld [vmem:[#allocation2 + $0x1d8] sm:$0xff]  ;;  %v320_v29 = vperm.slane %v6173_v63, %v6019_v21  ;;  %2016 = vmatpush.bf16.msra.mxu0 %v5491_v28 }
  0xc7   : > { %7630 = vst [vmem:[#allocation33_spill] sm:$0xff] %v6320_v41  ;;  %v997_v8 = vunpack.c.l.bf16 %v979_v4  ;;  %v1635_v41 = vor.u32 %v1633_v10, %v6254_v17  ;;  %v6330_v9 = vunpack.c.l.bf16 %v1242_v46  ;;  %v6335_v4 = vunpack.c.l.bf16 %v6325_v58  ;;  %1538 = vmatpush.bf16.msra.mxu1 %v5461_v11  ;;  %v5504_v46 = vld [vmem:[#allocation2 + $0x298] sm:$0xff] }
  0xc8   : > { %v1084_v17 = vrot.slane %v1082_v62, 1  ;;  %7633 = vst [vmem:[#allocation36_spill] sm:$0xff] %v6342_v50  ;;  %746 = vmatmul.bf16.vlgmr.msrb.gmra.mxu1 %v381_v42  ;;  %v1321_v45 = vmul.f32 %v6310_v13, %v1279_v43  ;;  %v311_v62 = vperm.slane %v6229_v6, %v6019_v21  ;;  %v7635_v6 = vrot.slane %v6256_v5, 5  ;;  %v5503_v5 = vld [vmem:[#allocation2 + $0x290] sm:$0xff] }
  0xc9   : > { %v1019_v26 = vrot.slane %v997_v8, 5  ;;  %v7514_v61 = vrot.slane %v6330_v9, 4  ;;  %v1640_v27 = vsel %vm572_vm3, %v1635_v41, %v6332_v31  ;;  %v1596_v41 = vmul.f32 %v6264_v22, %v6049_v54  ;;  %2271 = vmatpush.bf16.msra.mxu2 %v5504_v46  ;;  %v5501_v54 = vld [vmem:[#allocation2 + $0x280] sm:$0xff] }
  0xca   : > { %1722 = vmatmul.bf16.gmra.mxu2 %v1640_v27  ;;  %v1597_v10 = vmul.f32 %v6335_v4, %v6053_v55  ;;  %v6375_v8 = vor.u32 %v1087_v23, %v1084_v17  ;;  %v1251_v43 = vperm.slane %v1246_v12, %v6019_v21  ;;  %v1323_v27 = vmul.f32 %v6308_v16, %v6117_v38 }
  0xcb   : > { %v6358_v18 = vsel %vm1296_vm5, %v7634_v1, %v7514_v61  ;;  %v6369_v24 = vsel %vm1007_vm2, %v7635_v6, %v1019_v26  ;;  %v6382_v42 = vsel %vm1007_vm2, %v1019_v26, %v6342_v50  ;;  %v1330_v17 = vpack.c.bf16 %v1322_v57, %v1321_v45  ;;  %1852 = vmatpush.bf16.msrb.mxu3 %v5480_v56  ;;  %v6400_v6 = vld [vmem:[%s6002_s20 + $0x24] sm:$0x1]  ;;  %v5502_v61 = vld [vmem:[#allocation2 + $0x288] sm:$0xff] }
  0xcc   : > { %v6346_v2 = vpop.permute.xlu1 %332  ;;  %v6360_v11 = vpop.permute.xlu0 %323  ;;  %v6373_v0 = vmul.f32 %v6082_v15, %v6358_v18  ;;  %v1324_v15 = vmul.f32 %v6358_v18, %v6127_v44  ;;  %v6388_v23 = vunpack.c.l.bf16 %v311_v62  ;;  %v6390_v63 = vpack.c.bf16 %v1597_v10, %v1596_v41  ;;  %7637 = vst [vmem:[#allocation38_spill] sm:$0xff] %v6400_v6 }
  0xcd   : > { %v1038_v12 = vmul.f32 %v6369_v24, %v6042_v51  ;;  %v1089_v26 = vsel %vm1063_vm4, %v6290_v59, %v6375_v8  ;;  %v1039_v46 = vmul.f32 %v6382_v42, %v6044_v52  ;;  %v6402_v45 = vunpack.c.l.bf16 %v320_v29  ;;  %2272 = vmatpush.bf16.msra.mxu2 %v5503_v5  ;;  %v5479_v5 = vld [vmem:[#allocation2 + $0x1d0] sm:$0xff] }
  0xce   : > { %7636 = vst [vmem:[#allocation37_spill] sm:$0xff] %v6373_v0  ;;  %v1331_v1 = vpack.c.bf16 %v1324_v15, %v1323_v27  ;;  %v1284_v57 = vunpack.c.l.bf16 %v1251_v43  ;;  %v1358_v62 = vrot.slane %v1330_v17, 2  ;;  %v1641_v59 = vshrl.u32 %v6280_v40, 16  ;;  %v5460_v43 = vld [vmem:[#allocation2 + $0x158] sm:$0xff]  ;;  %v5459_v0 = vld [vmem:[#allocation2 + $0x150] sm:$0xff] }
  0xcf   : > { %v1044_v56 = vpack.c.bf16 %v1039_v46, %v1038_v12  ;;  %v1645_v28 = vshll.u32 %v6390_v63, 16  ;;  %v375_v15 = vmul.f32 %v6165_v25, %v6388_v23  ;;  %v1589_v29 = vunpack.c.l.bf16 %v6400_v6  ;;  %v5490_v46 = vld [vmem:[#allocation2 + $0x228] sm:$0xff]  ;;  %1539 = vmatpush.bf16.msra.mxu1 %v5460_v43  ;;  %1853 = vmatpush.bf16.msrb.mxu3 %v5479_v5 }
  0xd0   : > { %v6404_v41 = vrot.slane %v1331_v1, 2  ;;  %1173 = vmatmul.bf16.gmra.mxu3 %v1089_v26  ;;  %v1304_v40 = vrot.slane %v1284_v57, 4  ;;  %v376_v55 = vmul.f32 %v6163_v19, %v6402_v45  ;;  %v1643_v60 = vor.u32 %v1641_v59, %v6332_v31  ;;  %2017 = vmatpush.bf16.msra.mxu0 %v5490_v46  ;;  %v6431_v31 = vld [vmem:[%s6002_s20 + $0x20] sm:$0x3]  ;;  %v5478_v5 = vld [vmem:[#allocation2 + $0x1c8] sm:$0xff] }
  0xd1   : > { %v1091_v12 = vshrl.u32 %v1044_v56, 16  ;;  %v1094_v26 = vshll.u32 %v1044_v56, 16  ;;  %2273 = vmatpush.bf16.msra.mxu2 %v5502_v61  ;;  %v6426_v57 = vrot.slane %v1645_v28, 1  ;;  %v1598_v58 = vmul.f32 %v1589_v29, %v6032_v39 }
  0xd2   : > { %v1360_v17 = vsel %vm1357_vm6, %v1358_v62, %v6404_v41  ;;  %v7638_v62 = vrot.slane %v6330_v9, 4  ;;  %v1891_v59 = vmul.f32 %v6171_v30, %v6178_v36  ;;  %v338_v9 = vperm.slane %v6346_v2, %v6019_v21 }
  0xd3   : > { %v1093_v61 = vrot.slane %v1091_v12, 1  ;;  %v1096_v6 = vrot.slane %v1094_v26, 2  ;;  %1540 = vmatpush.bf16.msra.mxu1 %v5459_v0  ;;  %v1648_v28 = vsel %vm572_vm3, %v1643_v60, %v6426_v57  ;;  %v5686_v0 = vld [vmem:[%s6002_s20 + $0x10] sm:$0xff]   ;;  %v7526_v60 = vunpack.c.l.bf16 %v6431_v31  ;;  %1854 = vmatpush.bf16.msrb.mxu3 %v5478_v5 }
  0xd4   : > { %v6406_v10 = vpop.permute.xlu1 %341  ;;  %v1255_v27 = vpop.permute.xlu0 %1254  ;;  %v6424_v56 = vsel %vm1296_vm5, %v7638_v62, %v1304_v40  ;;  %v1603_v46 = vpack.c.bf16 %v1598_v58, %v1598_v58  ;;  %v1746_v58 = vld [vmem:[%s6002_s20 + $0x4] sm:$0xe]  ;;  %v1649_v39 = vshrl.u32 %v6390_v63, 16 }
  0xd5   : > { %v1260_v1 = vperm.slane %v1255_v27, %v6019_v21  ;;  %7639 = vst [vmem:[#allocation39_spill] sm:$0xff] %v6424_v56  ;;  %1427 = vmatmul.bf16.vlgmr.msrb.gmra.mxu0 %v1360_v17  ;;  %v382_v27 = vpack.c.bf16 %v376_v55, %v375_v15  ;;  %2274 = vmatpush.bf16.msra.mxu2 %v5501_v54  ;;  %v5489_v17 = vld [vmem:[#allocation2 + $0x220] sm:$0xff] }
  0xd6   : > { %v329_v55 = vperm.slane %v6360_v11, %v6019_v21  ;;  %v1325_v2 = vmul.f32 %v6424_v56, %v6037_v47  ;;  %v6455_v12 = vor.u32 %v1096_v6, %v1093_v61  ;;  %2018 = vmatpush.bf16.msra.mxu0 %v5489_v17  ;;  %v1040_v5 = vmul.f32 %v6342_v50, %v7526_v60 }
  0xd7   : > { %v6419_v13 = vunpack.c.l.bf16 %v1260_v1  ;;  %v1890_v1 = vmul.f32 %v6163_v19, %v6189_v7  ;;  %v6466_v7 = vunpack.c.l.bf16 %v338_v9  ;;  %v1651_v63 = vor.u32 %v1649_v39, %v6426_v57 }
  0xd8   : > { %751 = vmatmul.bf16.gmra.mxu1 %v382_v27  ;;  %v5477_v27 = vld [vmem:[#allocation2 + $0x1c0] sm:$0xff]  ;;  %v6468_v6 = vunpack.c.l.bf16 %v329_v55  ;;  %v7643_v55 = vld [vmem:[#allocation19_spill] sm:$0xff] }
  0xd9   : > { %v7527_v43 = vrot.slane %v6419_v13, 4  ;;  %7641 = vst [vmem:[#allocation41_spill] sm:$0xff] %v6466_v7  ;;  %v6483_v17 = vmul.f32 %v7643_v55, %v6105_v32  ;;  %1855 = vmatpush.bf16.msrb.mxu3 %v5477_v27  ;;  %v5488_v27 = vld [vmem:[#allocation2 + $0x218] sm:$0xff] }
  0xda   : > { %1727 = vmatmul.bf16.gmra.mxu2 %v1648_v28  ;;  %v6460_v28 = vmul.f32 %v6115_v37, %v6278_v34  ;;  %7642 = vst [vmem:[#allocation42_spill] sm:$0xff] %v6468_v6  ;;  %v1889_v37 = vmul.f32 %v6165_v25, %v6233_v3  ;;  %2019 = vmatpush.bf16.msra.mxu0 %v5488_v27 }
  0xdb   : > { %v6444_v15 = vsel %vm1296_vm5, %v1304_v40, %v7527_v43  ;;  %v5458_v40 = vld [vmem:[#allocation2 + $0x148] sm:$0xff] }
  0xdc   : > { %7640 = vst [vmem:[#allocation40_spill] sm:$0xff] %v6444_v15  ;;  %v1273_v29 = vpop.permute.xlu1 %1272  ;;  %v1264_v36 = vpop.permute.xlu0 %1263  ;;  %v1326_v11 = vmul.f32 %v6444_v15, %v6039_v48  ;;  %1541 = vmatpush.bf16.msra.mxu1 %v5458_v40  ;;  %v7644_v40 = vld [vmem:[#allocation21_spill] sm:$0xff] }
  0xdd   : > { %v1278_v54 = vperm.slane %v1273_v29, %v6019_v21  ;;  %v1269_v26 = vperm.slane %v1264_v36, %v6019_v21  ;;  %v6464_v29 = vmul.f32 %v6117_v38, %v6213_v35  ;;  %v5643_v36 = vunpack.c.l.bf16 %v5686_v0 }
  0xde   : > { %v1332_v62 = vpack.c.bf16 %v1326_v11, %v1325_v2  ;;  %v5644_v11 = vunpack.c.h.bf16 %v5686_v0  ;;  %v1098_v38 = vsel %vm1063_vm4, %v6375_v8, %v6455_v12  ;;  %v1898_v0 = vpack.c.bf16 %v1891_v59, %v1890_v1 }
  0xdf   : > { %v1286_v61 = vunpack.c.l.bf16 %v1269_v26  ;;  %v1287_v2 = vunpack.c.l.bf16 %v1278_v54  ;;  %v1653_v26 = vshll.u32 %v1603_v46, 16  ;;  %v1886_v54 = vunpack.c.l.bf16 %v1746_v58  ;;  %v5457_v58 = vld [vmem:[#allocation2 + $0x140] sm:$0xff] }
  0xe0   : > { %v6479_v9 = vrot.slane %v1332_v62, 2  ;;  %v2323_v60 = vmul.f32 %v6163_v19, %v7644_v40  ;;  %1178 = vmatmul.bf16.gmra.mxu3 %v1098_v38  ;;  %v377_v62 = vmul.f32 %v5643_v36, %v6468_v6  ;;  %v378_v56 = vmul.f32 %v5644_v11, %v6466_v7  ;;  %1542 = vmatpush.bf16.msra.mxu1 %v5457_v58 }
  0xe1   : > { %v1308_v43 = vrot.slane %v1286_v61, 4  ;;  %v6490_v8 = vrot.slane %v1287_v2, 4  ;;  %v1045_v46 = vpack.c.bf16 %v1040_v5, %v1040_v5  ;;  %v1888_v1 = vmul.f32 %v1886_v54, %v6209_v33 }
  0xe2   : > { %v1362_v59 = vsel %vm1357_vm6, %v6404_v41, %v6479_v9  ;;  %v1928_v15 = vshrl.u32 %v1898_v0, 16  ;;  %v1931_v61 = vshll.u32 %v1898_v0, 16  ;;  %v1655_v38 = vrot.slane %v1653_v26, 1 }
  0xe3   : > { %7645 = vst [vmem:[#allocation21_spill] sm:$0xff] %v6490_v8  ;;  %v1892_v36 = vmul.f32 %v6088_v20, %v6275_v53  ;;  %v1893_v2 = vmul.f32 %v6080_v14, %v6285_v49  ;;  %v7646_v11 = vrot.slane %v6419_v13, 4  ;;  %v1897_v41 = vpack.c.bf16 %v1889_v37, %v1888_v1 }
  0xe4   : > { %v1930_v54 = vrot.slane %v1928_v15, 1  ;;  %v1933_v48 = vrot.slane %v1931_v61, 2  ;;  %v6510_v39 = vsel %vm1296_vm5, %v1308_v43, %v6490_v8  ;;  %v383_v57 = vpack.c.bf16 %v378_v56, %v377_v62  ;;  %v351_v15 = vpop.permute.xlu2 %350  ;;  %v5520_v61 = vld [vmem:[#allocation2 + $0x2f8] sm:$0xff] }
  0xe5   : > { %v6506_v5 = vsel %vm1296_vm5, %v7646_v11, %v1308_v43  ;;  %7648 = vst [vmem:[#allocation44_spill] sm:$0xff] %v6510_v39  ;;  %1432 = vmatmul.bf16.gmra.mxu0 %v1362_v59  ;;  %v1899_v26 = vpack.c.bf16 %v1893_v2, %v1892_v36  ;;  %v1100_v0 = vshrl.u32 %v1045_v46, 16  ;;  %v1103_v27 = vshll.u32 %v1045_v46, 16  ;;  %v5487_v46 = vld [vmem:[#allocation2 + $0x210] sm:$0xff]  ;;  %2441 = vmatpush.bf16.msra.mxu3 %v5520_v61 }
  0xe6   : > { %7647 = vst [vmem:[#allocation43_spill] sm:$0xff] %v6506_v5  ;;  %v1920_v58 = vshrl.u32 %v1897_v41, 16  ;;  %v1923_v50 = vshll.u32 %v1897_v41, 16  ;;  %v1656_v47 = vsel %vm572_vm3, %v1651_v63, %v1655_v38  ;;  %v1327_v13 = vmul.f32 %v6506_v5, %v6042_v51  ;;  %v7649_v36 = vld [vmem:[#allocation18_spill] sm:$0xff]  ;;  %2020 = vmatpush.bf16.msra.mxu0 %v5487_v46 }
  0xe7   : > { %v1937_v11 = vshrl.u32 %v1899_v26, 16  ;;  %v1940_v37 = vshll.u32 %v1899_v26, 16  ;;  %v1328_v43 = vmul.f32 %v6510_v39, %v6044_v52  ;;  %v1934_v56 = vor.u32 %v1933_v48, %v1930_v54  ;;  %v5687_v39 = vld [vmem:[%s6002_s20 + $0x18] sm:$0xff]  }
  0xe8   : > { %756 = vmatmul.bf16.gmra.mxu1 %v383_v57  ;;  %v1922_v1 = vrot.slane %v1920_v58, 1  ;;  %v1925_v59 = vrot.slane %v1923_v50, 2  ;;  %v347_v62 = vperm.slane %v6406_v10, %v6019_v21  ;;  %v2322_v2 = vmul.f32 %v6165_v25, %v7649_v36  ;;  %v3210_v10 = vld [vmem:[%s6002_s20 + $0xc] sm:$0xe] }
  0xe9   : > { %v1939_v63 = vrot.slane %v1937_v11, 1  ;;  %v1942_v38 = vrot.slane %v1940_v37, 2  ;;  %v1102_v41 = vrot.slane %v1100_v0, 1  ;;  %v1105_v57 = vrot.slane %v1103_v27, 2  ;;  %v7651_v37 = vld [vmem:[#allocation23_spill] sm:$0xff] }
  0xea   : > { %1732 = vmatmul.bf16.gmra.mxu2 %v1656_v47  ;;  %v1926_v26 = vor.u32 %v1925_v59, %v1922_v1  ;;  %v356_v58 = vperm.slane %v351_v15, %v6019_v21  ;;  %v2331_v50 = vpack.c.bf16 %v2323_v60, %v2322_v2  ;;  %v6525_v47 = vpop.f32.mrf.mxu2  ;;  %v1333_v54 = vpack.c.bf16 %v1328_v43, %v1327_v13  ;;  %v5500_v2 = vld [vmem:[#allocation2 + $0x278] sm:$0xff] }
  0xeb   : > { %v6522_v48 = vor.u32 %v1942_v38, %v1939_v63  ;;  %7650 = vst [vmem:[#allocation18_spill] sm:$0xff] %v6525_v47  ;;  %v6533_v0 = vpack.c.bf16 %v6483_v17, %v7651_v37  ;;  %v6535_v27 = vunpack.c.l.bf16 %v347_v62  ;;  %v1106_v15 = vor.u32 %v1105_v57, %v1102_v41  ;;  %v5486_v41 = vld [vmem:[#allocation2 + $0x208] sm:$0xff]  ;;  %v5519_v57 = vld [vmem:[#allocation2 + $0x2f0] sm:$0xff]  ;;  %2151 = vmatpush.bf16.msrb.mxu1 %v5500_v2 }
  0xec   : > { %v6529_v11 = vsel %vm1063_vm4, %v1926_v26, %v1934_v56  ;;  %v5647_v60 = vunpack.c.l.bf16 %v5687_v39  ;;  %v2356_v1 = vshll.u32 %v2331_v50, 16  ;;  %v3350_v13 = vunpack.c.l.bf16 %v3210_v10  ;;  %v5465_v37 = vld [vmem:[%s6002_s20 + $0x4] sm:$0xf0]  ;;  %2021 = vmatpush.bf16.msra.mxu0 %v5486_v41  ;;  %2442 = vmatpush.bf16.msra.mxu3 %v5519_v57  ;;  %v6588_v57 = vld [vmem:[%s6002_s20 + $0xc] sm:$0xff] }
  0xed   : > { %7652 = vst [vmem:[#allocation23_spill] sm:$0xff] %v6533_v0  ;;  %v6539_v21 = vsel %vm1063_vm4, %v1934_v56, %v6522_v48  ;;  %v2361_v59 = vshll.u32 %v6533_v0, 16  ;;  %v6542_v43 = vunpack.c.l.bf16 %v356_v58  ;;  %v6546_v46 = vmul.f32 %v7643_v55, %v6358_v18 }
  0xee   : > { %7653 = vst [vmem:[#allocation45_spill] sm:$0xff] %v6535_v27  ;;  %v5648_v17 = vunpack.c.h.bf16 %v5687_v39  ;;  %v1107_v62 = vsel %vm1063_vm4, %v6455_v12, %v1106_v15  ;;  %v6550_v61 = vrot.slane %v1333_v54, 2  ;;  %v2354_v56 = vshrl.u32 %v2331_v50, 16  ;;  %v4772_v15 = vld [vmem:[%s6002_s20 + $0x4] sm:$0xe] }
  0xef   : > { %7654 = vst [vmem:[#allocation46_spill] sm:$0xff] %v6542_v43  ;;  %v2358_v63 = vrot.slane %v2356_v1, 1  ;;  %v3353_v38 = vmul.f32 %v6171_v30, %v6233_v3  ;;  %v1894_v26 = vmul.f32 %v6264_v22, %v6369_v24  ;;  %v1895_v39 = vmul.f32 %v6335_v4, %v6382_v42  ;;  %v5499_v1 = vld [vmem:[#allocation2 + $0x270] sm:$0xff] }
  0xf0   : > { %1183 = vmatmul.bf16.gmra.mxu3 %v1107_v62  ;;  %v2190_v12 = vmul.f32 %v6165_v25, %v6278_v34  ;;  %v379_v58 = vmul.f32 %v5647_v60, %v6535_v27  ;;  %v6561_v10 = vrot.slane %v2361_v59, 1  ;;  %v2191_v54 = vmul.f32 %v6163_v19, %v6213_v35  ;;  %2152 = vmatpush.bf16.msrb.mxu1 %v5499_v1  ;;  %v5518_v1 = vld [vmem:[#allocation2 + $0x2e8] sm:$0xff]  ;;  %v5776_v62 = vld [vmem:[%s6002_s20 + $0x18] sm:$0xff]  }
  0xf1   : > { %v2359_v50 = vor.u32 %v2358_v63, %v2354_v56  ;;  %v1900_v5 = vpack.c.bf16 %v1895_v39, %v1894_v26  ;;  %v3352_v0 = vmul.f32 %v3350_v13, %v6209_v33  ;;  %v1364_v60 = vsel %vm1357_vm6, %v6479_v9, %v6550_v61  ;;  %v2478_v63 = vld [vmem:[%s6002_s20 + $0x8] sm:$0xe]  ;;  %2443 = vmatpush.bf16.msra.mxu3 %v5518_v1 }
  0xf2   : > { %7655 = vst [vmem:[#allocation47_spill] sm:$0xff] %v6561_v10  ;;  %v380_v59 = vmul.f32 %v5648_v17, %v6542_v43  ;;  %v6581_v26 = vmul.f32 %v6163_v19, %v6308_v16  ;;  %v6585_v13 = vmul.f32 %v6171_v30, %v6358_v18  ;;  %v4773_v39 = vor.u32 %v5465_v37, %v4772_v15 }
  0xf3   : > { %v6576_v56 = vsel %vm572_vm3, %v2359_v50, %v6561_v10  ;;  %v1946_v2 = vshrl.u32 %v1900_v5, 16  ;;  %v1949_v41 = vshll.u32 %v1900_v5, 16  ;;  %v3361_v9 = vpack.c.bf16 %v3353_v38, %v3352_v0  ;;  %v6590_v50 = vpop.f32.mrf.mxu2  ;;  %v6600_v38 = vld [vmem:[%s6002_s20 + $0x20] sm:$0xff]  }
  0xf4   : > { %7657 = vst [vmem:[#allocation48_spill] sm:$0xff] %v6576_v56  ;;  %v384_v17 = vpack.c.bf16 %v380_v59, %v379_v58  ;;  %v2198_v55 = vpack.c.bf16 %v2191_v54, %v2190_v12  ;;  %v2618_v47 = vunpack.c.l.bf16 %v2478_v63  ;;  %v7661_v56 = vunpack.c.l.bf16 %v6431_v31  ;;  %v5485_v58 = vld [vmem:[#allocation2 + $0x200] sm:$0xff]  ;;  %v5544_v12 = vld [vmem:[#allocation2 + $0x3b8] sm:$0xff]  ;;  %v5543_v31 = vld [vmem:[#allocation2 + $0x3b0] sm:$0xff] }
  0xf5   : > { %1437 = vmatmul.bf16.gmra.mxu0 %v1364_v60  ;;  %7658 = vst [vmem:[#allocation49_spill] sm:$0xff] %v6581_v26  ;;  %v1948_v60 = vrot.slane %v1946_v2, 1  ;;  %v1951_v5 = vrot.slane %v1949_v41, 2  ;;  %v2621_v0 = vmul.f32 %v6163_v19, %v6233_v3  ;;  %v1787_v37 = vrot.slane %v4773_v39, 1  ;;  %2883 = vmatpush.bf16.msrb.mxu2 %v5544_v12  ;;  %v7669_v26 = vld [vmem:[#allocation22_spill] sm:$0xff] }
  0xf6   : > { %7659 = vst [vmem:[#allocation50_spill] sm:$0xff] %v6585_v13  ;;  %v1329_v25 = vmul.f32 %v6490_v8, %v7661_v56  ;;  %v7548_v15 = vrot.slane %v6588_v57, 1  ;;  %v3384_v59 = vshrl.u32 %v3361_v9, 16  ;;  %v3387_v63 = vshll.u32 %v3361_v9, 16  ;;  %2022 = vmatpush.bf16.msra.mxu0 %v5485_v58  ;;  %v5528_v8 = vld [vmem:[#allocation2 + $0x338] sm:$0xff] }
  0xf7   : > { %7660 = vst [vmem:[#allocation51_spill] sm:$0xff] %v6590_v50  ;;  %v6602_v54 = vor.u32 %v1951_v5, %v1948_v60  ;;  %v6612_v2 = vunpack.c.l.bf16 %v6600_v38  ;;  %v6617_v9 = vmul.f32 %v6163_v19, %v6278_v34 }
  0xf8   : > { %761 = vmatmul.bf16.gmra.mxu1 %v384_v17  ;;  %v1334_v41 = vpack.c.bf16 %v1329_v25, %v1329_v25  ;;  %v7665_v17 = vld [vmem:[#allocation28_spill] sm:$0xff]  ;;  %v3386_v60 = vrot.slane %v3384_v59, 1  ;;  %v3389_v5 = vrot.slane %v3387_v63, 2  ;;  %v3356_v25 = vmul.f32 %v6264_v22, %v6275_v53  ;;  %v5498_v63 = vld [vmem:[#allocation2 + $0x268] sm:$0xff] }
  0xf9   : > { %7662 = vst [vmem:[#allocation52_spill] sm:$0xff] %v6602_v54  ;;  %v6608_v56 = vsel %vm1063_vm4, %v6522_v48, %v6602_v54  ;;  %v3392_v39 = vshrl.u32 %v7665_v17, 16  ;;  %v3357_v48 = vmul.f32 %v6612_v2, %v6285_v49  ;;  %2884 = vmatpush.bf16.msrb.mxu2 %v5543_v31  ;;  %v3395_v59 = vshll.u32 %v7665_v17, 16  ;;  %v6636_v17 = vld [vmem:[%s6002_s20 + $0x1c] sm:$0xff]   ;;  %2153 = vmatpush.bf16.msrb.mxu1 %v5498_v63 }
  0xfa   : > { %2275 = vmatmul.bf16.vlgmr.msra.gmra.mxu2 %v2198_v55  ;;  %7663 = vst [vmem:[#allocation53_spill] sm:$0xff] %v6608_v56  ;;  %v2620_v55 = vmul.f32 %v2618_v47, %v6209_v33  ;;  %v1789_v47 = vsel %vm808_vm0, %v1787_v37, %v7548_v15  ;;  %v1365_v1 = vrot.slane %v1334_v41, 2  ;;  %v5517_v15 = vld [vmem:[#allocation2 + $0x2e0] sm:$0xff]  ;;  %2580 = vmatpush.bf16.msrb.mxu0 %v5528_v8  ;;  %v3036_v56 = vld [vmem:[%s6002_s20 + $0xc] sm:$0xf] }
  0xfb   : > { %7664 = vst [vmem:[#allocation54_spill] sm:$0xff] %v6612_v2  ;;  %v6626_v12 = vpop.f32.mrf.mxu2  ;;  %v3394_v10 = vrot.slane %v3392_v39, 1  ;;  %v3390_v2 = vor.u32 %v3389_v5, %v3386_v60  ;;  %v3397_v50 = vrot.slane %v3395_v59, 2  ;;  %v3363_v54 = vpack.c.bf16 %v3357_v48, %v3356_v25  ;;  %v5541_v60 = vld [vmem:[#allocation2 + $0x3a0] sm:$0xff]  ;;  %2444 = vmatpush.bf16.msra.mxu3 %v5517_v15 }
  0xfc   : > { %7666 = vst [vmem:[#allocation28_spill] sm:$0xff] %v6617_v9  ;;  %v2629_v58 = vpack.c.bf16 %v2621_v0, %v2620_v55  ;;  %v3057_v0 = vmul.f32 %v6080_v14, %v6105_v32  ;;  %v5542_v55 = vld [vmem:[#allocation2 + $0x3a8] sm:$0xff]  ;;  %v3056_v39 = vmul.f32 %v6088_v20, %v7669_v26  ;;  %v2192_v32 = vmul.f32 %v6171_v30, %v6388_v23  ;;  %v5497_v5 = vld [vmem:[#allocation2 + $0x260] sm:$0xff] }
  0xfd   : > { %7667 = vst [vmem:[#allocation55_spill] sm:$0xff] %v6626_v12  ;;  %2885 = vmatpush.bf16.msrb.mxu2 %v5542_v55  ;;  %v3398_v26 = vor.u32 %v3397_v50, %v3394_v10  ;;  %v3401_v25 = vshrl.u32 %v3363_v54, 16  ;;  %v3404_v31 = vshll.u32 %v3363_v54, 16  ;;  %v2193_v63 = vmul.f32 %v6088_v20, %v6402_v45  ;;  %v6647_v55 = vld [vmem:[%s6002_s20 + $0x14] sm:$0xff]  ;;  %2154 = vmatpush.bf16.msrb.mxu1 %v5497_v5 }
  0xfe   : > { %v2652_v12 = vshrl.u32 %v2629_v58, 16  ;;  %v2655_v41 = vshll.u32 %v2629_v58, 16  ;;  %v1366_v58 = vsel %vm1357_vm6, %v6550_v61, %v1365_v1  ;;  %v6654_v61 = vunpack.c.l.bf16 %v6636_v17 }
  0xff   : > { %v6657_v8 = vsel %vm1063_vm4, %v3390_v2, %v3398_v26  ;;  %v3403_v10 = vrot.slane %v3401_v25, 1  ;;  %v2199_v50 = vpack.c.bf16 %v2193_v63, %v2192_v32  ;;  %v3406_v54 = vrot.slane %v3404_v31, 2  ;;  %v5516_v31 = vld [vmem:[#allocation2 + $0x2d8] sm:$0xff] }
 0x100   : > { %1856 = vmatmul.bf16.vlgmr.msrb.gmra.mxu3 %v1789_v47  ;;  %v7670_v47 = vld [vmem:[#allocation27_spill] sm:$0xff]  ;;  %v2654_v9 = vrot.slane %v2652_v12, 1  ;;  %v2657_v37 = vrot.slane %v2655_v41, 2  ;;  %7671 = vst [vmem:[#allocation22_spill] sm:$0xff] %v6654_v61  ;;  %v3055_v1 = vmul.f32 %v6171_v30, %v7644_v40  ;;  %v7672_v41 = vpack.c.bf16 %v6464_v29, %v6460_v28 }
 0x101   : > { %v2660_v59 = vshrl.u32 %v7670_v47, 16  ;;  %v2663_v48 = vshll.u32 %v7670_v47, 16  ;;  %v6651_v47 = vunpack.c.l.bf16 %v5776_v62  ;;  %2886 = vmatpush.bf16.msrb.mxu2 %v5541_v60  ;;  %v2625_v62 = vmul.f32 %v6654_v61, %v6285_v49  ;;  %v5540_v60 = vld [vmem:[#allocation2 + $0x398] sm:$0xff]  ;;  %v5527_v28 = vld [vmem:[#allocation2 + $0x330] sm:$0xff]  ;;  %2445 = vmatpush.bf16.msra.mxu3 %v5516_v31 }
 0x102   : > { %v2658_v15 = vor.u32 %v2657_v37, %v2654_v9  ;;  %v3045_v2 = vunpack.c.l.bf16 %v3036_v56  ;;  %v7555_v32 = vrot.slane %v6647_v55, 1  ;;  %v6669_v9 = vor.u32 %v3406_v54, %v3403_v10  ;;  %v5539_v56 = vld [vmem:[#allocation2 + $0x390] sm:$0xff]  ;;  %2581 = vmatpush.bf16.msrb.mxu0 %v5527_v28 }
 0x103   : > { %v2662_v13 = vrot.slane %v2660_v59, 1  ;;  %v2665_v12 = vrot.slane %v2663_v48, 2  ;;  %v6666_v59 = vpack.c.bf16 %v3057_v0, %v3056_v39  ;;  %v2624_v5 = vmul.f32 %v6651_v47, %v6275_v53  ;;  %v6674_v48 = vld [vmem:[%s6002_s20 + $0x24] sm:$0xff]  }
 0x104   : > { %v3054_v29 = vmul.f32 %v3045_v2, %v7649_v36  ;;  %v6681_v0 = vsel %vm1063_vm4, %v3398_v26, %v6669_v9  ;;  %v6687_v63 = vunpack.c.h.bf16 %v6600_v38  ;;  %v6690_v10 = vunpack.c.h.bf16 %v6674_v48 }
 0x105   : > { %1442 = vmatmul.bf16.gmra.mxu0 %v1366_v58  ;;  %7673 = vst [vmem:[#allocation27_spill] sm:$0xff] %v6666_v59  ;;  %v2666_v37 = vor.u32 %v2665_v12, %v2662_v13  ;;  %v6676_v58 = vpop.f32.mrf.mxu2  ;;  %2887 = vmatpush.bf16.msrb.mxu2 %v5540_v60  ;;  %v2631_v25 = vpack.c.bf16 %v2625_v62, %v2624_v5  ;;  %v3093_v12 = vshll.u32 %v6666_v59, 16  ;;  %v5538_v5 = vld [vmem:[#allocation2 + $0x388] sm:$0xff] }
 0x106   : > { %v3063_v13 = vpack.c.bf16 %v3055_v1, %v3054_v29  ;;  %7674 = vst [vmem:[#allocation56_spill] sm:$0xff] %v6687_v63  ;;  %v3358_v1 = vmul.f32 %v6687_v63, %v6369_v24  ;;  %v3359_v38 = vmul.f32 %v6690_v10, %v6382_v42  ;;  %v1460_v28 = vmul.f32 %v6127_v44, %v6388_v23  ;;  %v5515_v29 = vld [vmem:[#allocation2 + $0x2d0] sm:$0xff]  ;;  %v5537_v44 = vld [vmem:[#allocation2 + $0x380] sm:$0xff] }
 0x107   : > { %v6684_v39 = vsel %vm1063_vm4, %v2658_v15, %v2666_v37  ;;  %7675 = vst [vmem:[#allocation57_spill] sm:$0xff] %v6690_v10  ;;  %v2669_v15 = vshrl.u32 %v2631_v25, 16  ;;  %2446 = vmatpush.bf16.msra.mxu3 %v5515_v29  ;;  %v7691_v59 = vld [vmem:[#allocation29_spill] sm:$0xff] }
 0x108   : > { %1543 = vmatmul.bf16.vlgmr.msra.gmra.mxu1 %v7672_v41  ;;  %v3088_v26 = vshll.u32 %v3063_v13, 16  ;;  %v2672_v41 = vshll.u32 %v2631_v25, 16  ;;  %v3086_v62 = vshrl.u32 %v3063_v13, 16  ;;  %v5526_v25 = vld [vmem:[#allocation2 + $0x328] sm:$0xff]  ;;  %v2195_v13 = vmul.f32 %v6264_v22, %v6466_v7 }
 0x109   : > { %2888 = vmatpush.bf16.msrb.mxu2 %v5539_v56  ;;  %v2671_v60 = vrot.slane %v2669_v15, 1  ;;  %v2194_v56 = vmul.f32 %v6080_v14, %v6468_v6  ;;  %v5495_v15 = vld [vmem:[#allocation2 + $0x250] sm:$0xff]  ;;  %2582 = vmatpush.bf16.msrb.mxu0 %v5526_v25 }
 0x10a   : > { %2280 = vmatmul.bf16.gmra.mxu2 %v2199_v50  ;;  %v7676_v50 = vrot.slane %v6588_v57, 1  ;;  %v3090_v2 = vrot.slane %v3088_v26, 1  ;;  %v2674_v31 = vrot.slane %v2672_v41, 2  ;;  %v5496_v57 = vld [vmem:[#allocation2 + $0x258] sm:$0xff]  ;;  %v3942_v41 = vld [vmem:[%s6002_s20 + $0x10] sm:$0xe] }
 0x10b   : > { %2155 = vmatpush.bf16.msrb.mxu1 %v5496_v57  ;;  %v6730_v57 = vmul.f32 %v6088_v20, %v6213_v35 }
 0x10c   : > { %v1791_v54 = vsel %vm808_vm0, %v7676_v50, %v7555_v32  ;;  %v3091_v50 = vor.u32 %v3090_v2, %v3086_v62  ;;  %v6704_v32 = vrot.slane %v3093_v12, 1  ;;  %v6706_v63 = vor.u32 %v2674_v31, %v2671_v60  ;;  %v6718_v12 = vld [vmem:[%s6002_s20 + $0x28] sm:$0x3] }
 0x10d   : > { %2889 = vmatpush.bf16.msrb.mxu2 %v5538_v5  ;;  %v6715_v62 = vpop.f32.mrf.mxu2  ;;  %v3364_v2 = vpack.c.bf16 %v3359_v38, %v3358_v1  ;;  %v6735_v5 = vmul.f32 %v6171_v30, %v6278_v34  ;;  %v6738_v1 = vld [vmem:[%s6002_s20 + $0x1c] sm:$0xff]  ;;  %v6744_v34 = vunpack.c.h.bf16 %v6636_v17 }
 0x10e   : > { %7677 = vst [vmem:[#allocation58_spill] sm:$0xff] %v6704_v32  ;;  %v6722_v60 = vsel %vm572_vm3, %v3091_v50, %v6704_v32  ;;  %v6726_v31 = vsel %vm1063_vm4, %v2666_v37, %v6706_v63  ;;  %v4082_v50 = vunpack.c.l.bf16 %v3942_v41  ;;  %v7560_v37 = vunpack.c.l.bf16 %v6718_v12  ;;  %v7698_v32 = vld [vmem:[#allocation35_spill] sm:$0xff] }
 0x10f   : > { %7680 = vst [vmem:[#allocation59_spill] sm:$0xff] %v6735_v5  ;;  %v3410_v38 = vshrl.u32 %v3364_v2, 16  ;;  %v3413_v25 = vshll.u32 %v3364_v2, 16  ;;  %2156 = vmatpush.bf16.msrb.mxu1 %v5495_v15  ;;  %v5513_v2 = vld [vmem:[#allocation2 + $0x2c0] sm:$0xff]  ;;  %v5524_v5 = vld [vmem:[#allocation2 + $0x318] sm:$0xff] }
 0x110   : > { %1861 = vmatmul.bf16.gmra.mxu3 %v1791_v54  ;;  %v7678_v54 = vld [vmem:[#allocation10_spill] sm:$0xff]  ;;  %v4084_v15 = vmul.f32 %v4082_v50, %v6209_v33 }
 0x111   : > { %v1461_v26 = vmul.f32 %v7678_v54, %v6402_v45  ;;  %7679 = vst [vmem:[#allocation10_spill] sm:$0xff] %v6730_v57  ;;  %v2200_v54 = vpack.c.bf16 %v2195_v13, %v2194_v56  ;;  %2890 = vmatpush.bf16.msrb.mxu2 %v5537_v44  ;;  %v3412_v35 = vrot.slane %v3410_v38, 1  ;;  %v3415_v10 = vrot.slane %v3413_v25, 2  ;;  %v5493_v57 = vld [vmem:[#allocation2 + $0x240] sm:$0xff] }
 0x112   : > { %v7561_v56 = vrot.slane %v6738_v1, 1  ;;  %v7684_v25 = vrot.slane %v6647_v55, 1  ;;  %v6776_v44 = vmul.f32 %v6080_v14, %v6358_v18 }
 0x113   : > { %v1467_v29 = vpack.c.bf16 %v1461_v26, %v1460_v28  ;;  %v6747_v28 = vunpack.c.l.bf16 %v6674_v48  ;;  %v5514_v26 = vld [vmem:[#allocation2 + $0x2c8] sm:$0xff]  ;;  %v6750_v13 = vor.u32 %v3415_v10, %v3412_v35  ;;  %v7682_v48 = vld [vmem:[#allocation36_spill] sm:$0xff] }
 0x114   : > { %2447 = vmatpush.bf16.msra.mxu3 %v5514_v26  ;;  %v2628_v41 = vmul.f32 %v7560_v37, %v7682_v48  ;;  %v5525_v10 = vld [vmem:[#allocation2 + $0x320] sm:$0xff]  ;;  %v1793_v50 = vsel %vm808_vm0, %v7684_v25, %v7561_v56  ;;  %7685 = vst [vmem:[#allocation61_spill] sm:$0xff] %v6776_v44  ;;  %v1463_v25 = vmul.f32 %v6042_v51, %v6466_v7  ;;  %v7717_v44 = vld [vmem:[#allocation15_spill] sm:$0xff] }
 0x115   : > { %2023 = vmatmul.bf16.vlgmr.msra.gmra.mxu0 %v6529_v11  ;;  %v4085_v11 = vmul.f32 %v6088_v20, %v6233_v3  ;;  %7681 = vst [vmem:[#allocation60_spill] sm:$0xff] %v6750_v13  ;;  %v2626_v3 = vmul.f32 %v6744_v34, %v6369_v24  ;;  %v2627_v17 = vmul.f32 %v6747_v28, %v6382_v42 }
 0x116   : > { %v6765_v38 = vsel %vm1063_vm4, %v6669_v9, %v6750_v13  ;;  %2583 = vmatpush.bf16.msrb.mxu0 %v5525_v10  ;;  %v2633_v26 = vpack.c.bf16 %v2628_v41, %v2628_v41  ;;  %v7686_v9 = vld [vmem:[#allocation34_spill] sm:$0xff] }
 0x117   : > { %7683 = vst [vmem:[#allocation36_spill] sm:$0xff] %v6765_v38  ;;  %v4093_v33 = vpack.c.bf16 %v4085_v11, %v4084_v15  ;;  %v2632_v35 = vpack.c.bf16 %v2627_v17, %v2626_v3  ;;  %v2189_v37 = vunpack.c.h.bf16 %v7686_v9  ;;  %v3772_v11 = vld [vmem:[%s6002_s20 + $0x20] sm:$0xff]   ;;  %v7687_v15 = vld [vmem:[#allocation11_spill] sm:$0xff]  ;;  %v6786_v3 = vmul.f32 %v6088_v20, %v6308_v16  ;;  %v7689_v17 = vld [vmem:[#allocation38_spill] sm:$0xff] }
 0x118   : > { %1548 = vmatmul.bf16.gmra.mxu1 %v1467_v29  ;;  %v5494_v29 = vld [vmem:[#allocation2 + $0x248] sm:$0xff]  ;;  %2448 = vmatpush.bf16.msra.mxu3 %v5513_v2  ;;  %v1462_v55 = vmul.f32 %v7687_v15, %v6468_v6  ;;  %v1781_v18 = vunpack.c.l.b16 %v7689_v17  ;;  %v2196_v2 = vmul.f32 %v6335_v4, %v6535_v27  ;;  %v2690_v9 = vshll.u32 %v2633_v26, 16 }
 0x119   : > { %2157 = vmatpush.bf16.msrb.mxu1 %v5494_v29  ;;  %v2678_v56 = vshrl.u32 %v2632_v35, 16  ;;  %v4116_v10 = vshrl.u32 %v4093_v33, 16  ;;  %7688 = vst [vmem:[#allocation34_spill] sm:$0xff] %v6786_v3  ;;  %v2681_v41 = vshll.u32 %v2632_v35, 16  ;;  %v6791_v15 = vunpack.c.h.bf16 %v3772_v11  ;;  %v2784_v35 = vld [vmem:[%s6002_s20 + $0x8] sm:$0xc] }
 0x11a   : > { %2285 = vmatmul.bf16.gmra.mxu2 %v2200_v54  ;;  %v6772_v54 = vpop.f32.mrf.mxu2  ;;  %v2197_v51 = vmul.f32 %v2189_v37, %v6542_v43  ;;  %v4119_v13 = vshll.u32 %v4093_v33, 16  ;;  %v1468_v17 = vpack.c.bf16 %v1463_v25, %v1462_v55  ;;  %v1786_v7 = vpack.c.b16 %v1781_v18, %v1781_v18  ;;  %2584 = vmatpush.bf16.msrb.mxu0 %v5524_v5 }
 0x11b   : > { %v2680_v29 = vrot.slane %v2678_v56, 1  ;;  %7690 = vst [vmem:[#allocation11_spill] sm:$0xff] %v6791_v15  ;;  %v2683_v30 = vrot.slane %v2681_v41, 2  ;;  %v4118_v56 = vrot.slane %v4116_v10, 1  ;;  %v4127_v33 = vshll.u32 %v7691_v59, 16 }
 0x11c   : > { %v4121_v6 = vrot.slane %v4119_v13, 2  ;;  %v6802_v41 = vunpack.c.l.bf16 %v3772_v11  ;;  %v2692_v55 = vrot.slane %v2690_v9, 2  ;;  %v4089_v25 = vmul.f32 %v6791_v15, %v6285_v49  ;;  %v5777_v11 = vld [vmem:[%s6002_s20 + $0x10] sm:$0xff]   ;;  %v7695_v9 = vld [vmem:[#allocation20_spill] sm:$0xff] }
 0x11d   : > { %2158 = vmatpush.bf16.msrb.mxu1 %v5493_v57  ;;  %v2684_v37 = vor.u32 %v2683_v30, %v2680_v29  ;;  %v2785_v18 = vunpack.c.l.bf16 %v2784_v35  ;;  %v4129_v13 = vrot.slane %v4127_v33, 2  ;;  %v1794_v29 = vrot.slane %v1786_v7, 1  ;;  %v5552_v33 = vld [vmem:[#allocation2 + $0x3f8] sm:$0xff]  ;;  %v1456_v7 = vld [vmem:[%s6002_s20 + $0x20] sm:$0xf] }
 0x11e   : > { %7692 = vst [vmem:[#allocation38_spill] sm:$0xff] %v6802_v41  ;;  %v4122_v5 = vor.u32 %v4121_v6, %v4118_v56  ;;  %v4088_v49 = vmul.f32 %v6802_v41, %v6275_v53  ;;  %v5523_v56 = vld [vmem:[#allocation2 + $0x310] sm:$0xff]  ;;  %v2787_v53 = vmul.f32 %v6163_v19, %v7698_v32  ;;  %2999 = vmatpush.bf16.msrb.mxu3 %v5552_v33 }
 0x11f   : > { %v6810_v30 = vsel %vm1063_vm4, %v6706_v63, %v2684_v37  ;;  %v6822_v63 = vld [vmem:[%s6002_s20 + $0x24] sm:$0x3]  ;;  %2585 = vmatpush.bf16.msrb.mxu0 %v5523_v56  ;;  %v1464_v56 = vmul.f32 %v6044_v52, %v6535_v27  ;;  %v5522_v52 = vld [vmem:[#allocation2 + $0x308] sm:$0xff] }
 0x120   : > { %1866 = vmatmul.bf16.gmra.mxu3 %v1793_v50  ;;  %v2687_v50 = vshrl.u32 %v2633_v26, 16  ;;  %v4124_v26 = vshrl.u32 %v7691_v59, 16  ;;  %7693 = vst [vmem:[#allocation29_spill] sm:$0xff] %v6810_v30  ;;  %v3787_v59 = vmul.f32 %v6088_v20, %v7644_v40  ;;  %v5532_v30 = vld [vmem:[#allocation2 + $0x358] sm:$0xff] }
 0x122   : > { %v2689_v38 = vrot.slane %v2687_v50, 1  ;;  %v6806_v10 = vpop.f32.mrf.mxu2  ;;  %v4126_v57 = vrot.slane %v4124_v26, 1  ;;  %v7694_v50 = vld [vmem:[#allocation24_spill] sm:$0xff]  ;;  %v7697_v26 = vld [vmem:[#allocation31_spill] sm:$0xff] }
 0x123   : > { %v2786_v6 = vmul.f32 %v2785_v18, %v7697_v26  ;;  %v7572_v18 = vunpack.c.l.bf16 %v6822_v63  ;;  %2586 = vmatpush.bf16.msrb.mxu0 %v5522_v52 }
 0x124   : > { %v4130_v35 = vor.u32 %v4129_v13, %v4126_v57 }
 0x125   : > { %2028 = vmatmul.bf16.gmra.mxu0 %v6539_v21  ;;  %v6795_v16 = vpop.f32.mrf.mxu1  ;;  %v2201_v21 = vpack.c.bf16 %v2197_v51, %v2196_v2  ;;  %v5683_v2 = vunpack.c.l.bf16 %v5777_v11  ;;  %v6819_v51 = vpack.c.bf16 %v7695_v9, %v7694_v50  ;;  %v1896_v33 = vmul.f32 %v7572_v18, %v7682_v48 }
 0x126   : > { %v6835_v9 = vsel %vm1063_vm4, %v4122_v5, %v4130_v35  ;;  %v5536_v5 = vld [vmem:[#allocation2 + $0x378] sm:$0xff] }
 0x127   : > { %7696 = vst [vmem:[#allocation24_spill] sm:$0xff] %v6819_v51  ;;  %v3786_v40 = vmul.f32 %v5683_v2, %v7649_v36  ;;  %v7701_v36 = vrot.slane %v6738_v1, 1  ;;  %v3825_v13 = vshll.u32 %v6819_v51, 16  ;;  %2747 = vmatpush.bf16.msra.mxu1 %v5536_v5  ;;  %v5579_v51 = vld [vmem:[#allocation2 + $0x4b0] sm:$0xff] }
 0x128   : > { %1553 = vmatmul.bf16.gmra.mxu1 %v1468_v17  ;;  %v2693_v17 = vor.u32 %v2692_v55, %v2689_v38  ;;  %7700 = vst [vmem:[#allocation62_spill] sm:$0xff] %v6835_v9 }
 0x129   : > { %v3795_v38 = vpack.c.bf16 %v3787_v59, %v3786_v40  ;;  %v1795_v55 = vsel %vm808_vm0, %v7701_v36, %v1794_v29  ;;  %v2795_v40 = vpack.c.bf16 %v2787_v53, %v2786_v6  ;;  %v5551_v53 = vld [vmem:[#allocation2 + $0x3f0] sm:$0xff] }
 0x12a   : > { %2290 = vmatmul.bf16.gmra.mxu2 %v2201_v21  ;;  %v4095_v21 = vpack.c.bf16 %v4089_v25, %v4088_v49  ;;  %v6832_v50 = vsel %vm1063_vm4, %v2684_v37, %v2693_v17  ;;  %v1457_v37 = vunpack.c.l.bf16 %v1456_v7  ;;  %v6842_v1 = vpop.f32.mrf.mxu2  ;;  %v3774_v7 = vld [vmem:[%s6002_s20 + $0x28] sm:$0xff]   ;;  %3000 = vmatpush.bf16.msrb.mxu3 %v5551_v53 }
 0x12b   : > { %7699 = vst [vmem:[#allocation20_spill] sm:$0xff] %v6832_v50  ;;  %v3820_v19 = vshll.u32 %v3795_v38, 16  ;;  %v3818_v59 = vshrl.u32 %v3795_v38, 16  ;;  %v6854_v38 = vrot.slane %v3825_v13, 1 }
 0x12c   : > { %v4133_v25 = vshrl.u32 %v4095_v21, 16  ;;  %v4136_v57 = vshll.u32 %v4095_v21, 16  ;;  %v1465_v6 = vmul.f32 %v1457_v37, %v6542_v43  ;;  %v6874_v37 = vunpack.c.l.bf16 %v3774_v7 }
 0x12d   : > { %v6826_v11 = vpop.f32.mrf.mxu1  ;;  %v3822_v17 = vrot.slane %v3820_v19, 1  ;;  %7702 = vst [vmem:[#allocation63_spill] sm:$0xff] %v6854_v38  ;;  %v5535_v19 = vld [vmem:[#allocation2 + $0x370] sm:$0xff] }
 0x12e   : > { %v4135_v2 = vrot.slane %v4133_v25, 1  ;;  %v4138_v49 = vrot.slane %v4136_v57, 2  ;;  %7708 = vst [vmem:[#allocation64_spill] sm:$0xff] %v6874_v37  ;;  %2748 = vmatpush.bf16.msra.mxu1 %v5535_v19  ;;  %v7710_v19 = vld [vmem:[#allocation40_spill] sm:$0xff] }
 0x12f   : > { %v3823_v36 = vor.u32 %v3822_v17, %v3818_v59  ;;  %v1469_v59 = vpack.c.bf16 %v1465_v6, %v1464_v56  ;;  %v1901_v17 = vpack.c.bf16 %v1896_v33, %v1896_v33  ;;  %v5521_v33 = vld [vmem:[#allocation2 + $0x300] sm:$0xff] }
 0x130   : > { %1871 = vmatmul.bf16.gmra.mxu3 %v1795_v55  ;;  %v6851_v21 = vor.u32 %v4138_v49, %v4135_v2  ;;  %v7703_v55 = vld [vmem:[#allocation32_spill] sm:$0xff]  ;;  %v7706_v49 = vld [vmem:[#allocation53_spill] sm:$0xff]  ;;  %2587 = vmatpush.bf16.msrb.mxu0 %v5521_v33  ;;  %v7714_v33 = vld [vmem:[#allocation39_spill] sm:$0xff] }
 0x131   : > { %v6844_v29 = vpop.f32.mrf.mxu0  ;;  %v7704_v25 = vpack.c.bf16 %v6546_v46, %v7703_v55  ;;  %v6871_v13 = vsel %vm572_vm3, %v3823_v36, %v6854_v38  ;;  %v2822_v46 = vrot.slane %v2795_v40, 2  ;;  %v2052_v55 = vld [vmem:[%s6002_s20 + $0x4] sm:$0xc]  ;;  %v5580_v36 = vld [vmem:[#allocation2 + $0x4b8] sm:$0xff]  ;;  %v1955_v52 = vshrl.u32 %v1901_v17, 16 }
 0x132   : > { %v6864_v2 = vsel %vm1063_vm4, %v4130_v35, %v6851_v21  ;;  %7707 = vst [vmem:[#allocation53_spill] sm:$0xff] %v6871_v13  ;;  %v2053_v56 = vunpack.c.l.bf16 %v2052_v55  ;;  %3479 = vmatpush.bf16.msra.mxu2 %v5580_v36  ;;  %v7713_v55 = vld [vmem:[#allocation25_spill] sm:$0xff]  ;;  %v2790_v36 = vmul.f32 %v6651_v47, %v7714_v33 }
 0x133   : > { %v6859_v57 = vrot.slane %v7704_v25, 2  ;;  %7705 = vst [vmem:[#allocation32_spill] sm:$0xff] %v6864_v2  ;;  %v6876_v25 = vunpack.c.h.bf16 %v3774_v7  ;;  %v1958_v7 = vshll.u32 %v1901_v17, 16  ;;  %v5550_v2 = vld [vmem:[#allocation2 + $0x3e8] sm:$0xff]  ;;  %v1957_v15 = vrot.slane %v1955_v52, 1 }
 0x134   : > { %3001 = vmatpush.bf16.msrb.mxu3 %v5550_v2  ;;  %v2327_v52 = vmul.f32 %v6654_v61, %v7717_v44  ;;  %v7718_v2 = vld [vmem:[#allocation50_spill] sm:$0xff] }
 0x135   : > { %2033 = vmatmul.bf16.gmra.mxu0 %v7706_v49  ;;  %v6867_v5 = vpop.f32.mrf.mxu1  ;;  %7709 = vst [vmem:[#allocation65_spill] sm:$0xff] %v6876_v25  ;;  %v2824_v35 = vsel %vm1357_vm6, %v2822_v46, %v6859_v57  ;;  %v4090_v49 = vmul.f32 %v6874_v37, %v6369_v24  ;;  %v4091_v40 = vmul.f32 %v6876_v25, %v6382_v42  ;;  %v1960_v41 = vrot.slane %v1958_v7, 2  ;;  %v5578_v25 = vld [vmem:[#allocation2 + $0x4a8] sm:$0xff] }
 0x136   : > { %v2791_v46 = vmul.f32 %v6654_v61, %v7710_v19  ;;  %v2054_v42 = vmul.f32 %v2053_v56, %v7697_v26  ;;  %3480 = vmatpush.bf16.msra.mxu2 %v5579_v51  ;;  %v5534_v56 = vld [vmem:[#allocation2 + $0x368] sm:$0xff]  ;;  %v7729_v26 = vld [vmem:[#allocation51_spill] sm:$0xff] }
 0x137   : > { %v4096_v17 = vpack.c.bf16 %v4091_v40, %v4090_v49  ;;  %v1961_v3 = vor.u32 %v1960_v41, %v1957_v15  ;;  %v7716_v49 = vld [vmem:[#allocation14_spill] sm:$0xff]  ;;  %v7719_v7 = vld [vmem:[#allocation49_spill] sm:$0xff]  ;;  %2749 = vmatpush.bf16.msra.mxu1 %v5534_v56  ;;  %v7721_v15 = vld [vmem:[#allocation52_spill] sm:$0xff] }
 0x138   : > { %1558 = vmatmul.bf16.gmra.mxu1 %v1469_v59  ;;  %v2797_v9 = vpack.c.bf16 %v2791_v46, %v2790_v36  ;;  %v7715_v59 = vld [vmem:[#allocation48_spill] sm:$0xff]  ;;  %v2326_v40 = vmul.f32 %v6651_v47, %v7716_v49  ;;  %v7720_v46 = vpack.c.bf16 %v7718_v2, %v7719_v7  ;;  %v5574_v61 = vld [vmem:[#allocation2 + $0x488] sm:$0xff] }
 0x139   : > { %v6884_v6 = vpop.f32.mrf.mxu0  ;;  %v4142_v13 = vshrl.u32 %v4096_v17, 16  ;;  %v4145_v18 = vshll.u32 %v4096_v17, 16  ;;  %v1962_v41 = vsel %vm1063_vm4, %v7721_v15, %v1961_v3  ;;  %v5549_v36 = vld [vmem:[#allocation2 + $0x3e0] sm:$0xff]  ;;  %v5509_v3 = vld [vmem:[%s6002_s20 + $0x8] sm:$0xf0] }
 0x13a   : > { %2891 = vmatmul.bf16.vlgmr.msrb.gmra.mxu2 %v2824_v35  ;;  %v2055_v35 = vmul.f32 %v7713_v55, %v7698_v32  ;;  %v6909_v17 = vrot.slane %v7720_v46, 2  ;;  %v5533_v56 = vld [vmem:[#allocation2 + $0x360] sm:$0xff]  ;;  %v6920_v46 = vpack.c.bf16 %v2327_v52, %v2326_v40  ;;  %3002 = vmatpush.bf16.msrb.mxu3 %v5549_v36  ;;  %v4948_v15 = vld [vmem:[%s6002_s20 + $0x8] sm:$0xe]  ;;  %v5576_v52 = vld [vmem:[#allocation2 + $0x498] sm:$0xff] }
 0x13b   : > { %v6886_v53 = vpop.f32.mrf.mxu2  ;;  %v4144_v37 = vrot.slane %v4142_v13, 1  ;;  %v4147_v51 = vrot.slane %v4145_v18, 2  ;;  %3481 = vmatpush.bf16.msra.mxu2 %v5578_v25  ;;  %v6913_v13 = vrot.slane %v2797_v9, 2  ;;  %v5564_v18 = vld [vmem:[#allocation2 + $0x438] sm:$0xff]  ;;  %2750 = vmatpush.bf16.msra.mxu1 %v5533_v56 }
 0x13c   : > { %v2063_v24 = vpack.c.bf16 %v2055_v35, %v2054_v42  ;;  %v5577_v35 = vld [vmem:[#allocation2 + $0x4a0] sm:$0xff]  ;;  %3173 = vmatpush.bf16.msra.mxu0 %v5564_v18 }
 0x13d   : > { %v6892_v38 = vpop.f32.mrf.mxu1  ;;  %v6917_v50 = vor.u32 %v4147_v51, %v4144_v37 }
 0x13e   : > { %v2090_v7 = vrot.slane %v2063_v24, 2  ;;  %v7724_v24 = vld [vmem:[#allocation18_spill] sm:$0xff] }
 0x13f   : > { %7722 = vst [vmem:[#allocation25_spill] sm:$0xff] %v6917_v50  ;;  %3482 = vmatpush.bf16.msra.mxu2 %v5577_v35  ;;  %v6929_v37 = vsel %vm1063_vm4, %v6851_v21, %v6917_v50  ;;  %v2369_v35 = vshll.u32 %v6920_v46, 16  ;;  %v4949_v21 = vor.u32 %v5509_v3, %v4948_v15  ;;  %v7728_v50 = vld [vmem:[#allocation44_spill] sm:$0xff]  ;;  %v2058_v3 = vmul.f32 %v6088_v20, %v7714_v33  ;;  %v5563_v15 = vld [vmem:[#allocation2 + $0x430] sm:$0xff] }
 0x140   : > { %2449 = vmatmul.bf16.vlgmr.msra.gmra.mxu3 %v7715_v59  ;;  %v2092_v9 = vsel %vm1357_vm6, %v2090_v7, %v6909_v17  ;;  %7723 = vst [vmem:[#allocation48_spill] sm:$0xff] %v6929_v37  ;;  %v2059_v7 = vmul.f32 %v6080_v14, %v7710_v19  ;;  %v5575_v37 = vld [vmem:[#allocation2 + $0x490] sm:$0xff]  ;;  %3174 = vmatpush.bf16.msra.mxu0 %v5563_v15  ;;  %v5562_v15 = vld [vmem:[#allocation2 + $0x428] sm:$0xff] }
 0x141   : > { %v2371_v14 = vrot.slane %v2369_v35, 1  ;;  %v2519_v19 = vrot.slane %v4949_v21, 1  ;;  %v7730_v35 = vld [vmem:[#allocation12_spill] sm:$0xff]  ;;  %2751 = vmatpush.bf16.msra.mxu1 %v5532_v30  ;;  %v7732_v30 = vld [vmem:[#allocation55_spill] sm:$0xff] }
 0x142   : > { %v6900_v55 = vpop.f32.mrf.mxu0  ;;  %v2328_v21 = vmul.f32 %v6744_v34, %v7730_v35 }
 0x143   : > { %v1169_v59 = vpop.f32.mrf.mxu3  ;;  %v6911_v42 = vpop.f32.mrf.mxu2  ;;  %3483 = vmatpush.bf16.msra.mxu2 %v5576_v52 }
 0x144   : > { %3175 = vmatpush.bf16.msra.mxu0 %v5562_v15 }
 0x145   : > { %2038 = vmatmul.bf16.gmra.mxu0 %v1962_v41  ;;  %v747_v2 = vpop.f32.mrf.mxu1  ;;  %v7725_v41 = vld [vmem:[#allocation23_spill] sm:$0xff] }
 0x146   : > { %v748_v25 = vadd.f32 %v747_v2, %v6844_v29  ;;  %v2826_v29 = vsel %vm1357_vm6, %v6859_v57, %v6913_v13  ;;  %v2365_v36 = vshrl.u32 %v7725_v41, 16  ;;  %v6940_v2 = vld [vmem:[%s6002_s20 + $0x10] sm:$0xff]  ;;  %v2793_v41 = vmul.f32 %v6747_v28, %v7728_v50 }
 0x147   : > { %v7596_v32 = vrot.slane %v6940_v2, 1  ;;  %3484 = vmatpush.bf16.msra.mxu2 %v5575_v37  ;;  %v7736_v33 = vrot.slane %v6940_v2, 1 }
 0x148   : > { %v899_v40 = vadd.f32 %v7724_v24, %v748_v25  ;;  %2159 = vmatmul.bf16.vlgmr.msrb.gmra.mxu1 %v2092_v9  ;;  %v7726_v25 = vld [vmem:[#allocation47_spill] sm:$0xff] }
 0x149   : > { %v2367_v9 = vor.u32 %v2365_v36, %v7726_v25  ;;  %v2065_v36 = vpack.c.bf16 %v2059_v7, %v2058_v3  ;;  %v5547_v3 = vld [vmem:[#allocation2 + $0x3d0] sm:$0xff] }
 0x14a   : > { %2896 = vmatmul.bf16.gmra.mxu2 %v2826_v29  ;;  %v6935_v51 = vpop.f32.mrf.mxu0  ;;  %v1189_v18 = vadd.f32 %v1169_v59, %v899_v40  ;;  %v7727_v29 = vld [vmem:[#allocation43_spill] sm:$0xff] }
 0x14b   : > { %v1171_v57 = vpop.f32.mrf.mxu3  ;;  %v2792_v24 = vmul.f32 %v6744_v34, %v7727_v29  ;;  %v5548_v59 = vld [vmem:[#allocation2 + $0x3d8] sm:$0xff]  ;;  %v2372_v25 = vsel %vm572_vm3, %v2367_v9, %v2371_v14  ;;  %v6966_v9 = vrot.slane %v2065_v36, 2  ;;  %3485 = vmatpush.bf16.msra.mxu2 %v5574_v61  ;;  %v2373_v36 = vshrl.u32 %v6920_v46, 16  ;;  %v7733_v46 = vld [vmem:[#allocation21_spill] sm:$0xff] }
 0x14c   : > { %3003 = vmatpush.bf16.msrb.mxu3 %v5548_v59  ;;  %v7731_v59 = vld [vmem:[#allocation13_spill] sm:$0xff] }
 0x14d   : > { %v6944_v56 = vpop.f32.mrf.mxu2  ;;  %v749_v40 = vpop.f32.mrf.mxu1  ;;  %v2798_v27 = vpack.c.bf16 %v2793_v41, %v2792_v24  ;;  %v2329_v37 = vmul.f32 %v6747_v28, %v7731_v59  ;;  %v2094_v61 = vsel %vm1357_vm6, %v6909_v17, %v6966_v9  ;;  %v6988_v17 = vld [vmem:[%s6002_s20 + $0x18] sm:$0xff] }
 0x14e   : > { %v750_v52 = vadd.f32 %v749_v40, %v6884_v6  ;;  %v2521_v6 = vsel %vm808_vm0, %v2519_v19, %v7596_v32  ;;  %v5573_v19 = vld [vmem:[#allocation2 + $0x480] sm:$0xff] }
 0x14f   : > { %v6970_v41 = vrot.slane %v2798_v27, 2  ;;  %3486 = vmatpush.bf16.msra.mxu2 %v5573_v19  ;;  %v2061_v19 = vmul.f32 %v6335_v4, %v7728_v50  ;;  %v2522_v4 = vrot.slane %v6988_v17, 1 }
 0x150   : > { %v900_v43 = vadd.f32 %v7729_v26, %v750_v52  ;;  %2454 = vmatmul.bf16.gmra.mxu3 %v2372_v25  ;;  %v5531_v25 = vld [vmem:[#allocation2 + $0x350] sm:$0xff] }
 0x151   : > { %3004 = vmatpush.bf16.msrb.mxu3 %v5547_v3  ;;  %2752 = vmatpush.bf16.msra.mxu1 %v5531_v25  ;;  %v2828_v27 = vsel %vm1357_vm6, %v6913_v13, %v6970_v41  ;;  %v2060_v13 = vmul.f32 %v6264_v22, %v7727_v29  ;;  %v2375_v25 = vor.u32 %v2373_v36, %v2371_v14 }
 0x152   : > { %v1428_v20 = vpop.f32.mrf.mxu0  ;;  %v1190_v7 = vadd.f32 %v1171_v57, %v900_v43  ;;  %v5546_v57 = vld [vmem:[#allocation2 + $0x3c8] sm:$0xff] }
 0x153   : > { %v6964_v40 = vadd.f32 %v1428_v20, %v1189_v18  ;;  %v1174_v26 = vpop.f32.mrf.mxu3  ;;  %v6973_v20 = vpack.c.bf16 %v2329_v37, %v2328_v21 }
 0x155   : > { %v6968_v24 = vpop.f32.mrf.mxu2  ;;  %2588 = vmatmul.bf16.vlgmr.msrb.gmra.mxu0 %v2521_v6  ;;  %v752_v52 = vpop.f32.mrf.mxu1  ;;  %v2377_v6 = vshll.u32 %v6973_v20, 16  ;;  %3005 = vmatpush.bf16.msrb.mxu3 %v5546_v57  ;;  %v2066_v57 = vpack.c.bf16 %v2061_v19, %v2060_v13 }
 0x156   : > { %v753_v43 = vadd.f32 %v752_v52, %v6900_v55  ;;  %v6983_v55 = vld [vmem:[%s6002_s20 + $0x28] sm:$0x1] }
 0x157   : > { %v2095_v17 = vrot.slane %v2066_v57, 2  ;;  %v7737_v57 = vunpack.c.l.bf16 %v6822_v63 }
 0x158   : > { %v901_v18 = vadd.f32 %v7732_v30, %v753_v43  ;;  %2164 = vmatmul.bf16.gmra.mxu1 %v2094_v61  ;;  %v7734_v43 = vunpack.c.l.bf16 %v6718_v12 }
 0x15a   : > { %2901 = vmatmul.bf16.gmra.mxu2 %v2828_v27  ;;  %v1430_v21 = vpop.f32.mrf.mxu0  ;;  %v1191_v37 = vadd.f32 %v1174_v26, %v901_v18  ;;  %v2794_v61 = vmul.f32 %v7734_v43, %v7733_v46  ;;  %v2321_v26 = vunpack.c.l.bf16 %v6983_v55  ;;  %v5545_v27 = vld [vmem:[#allocation2 + $0x3c0] sm:$0xff]  ;;  %v5530_v18 = vld [vmem:[#allocation2 + $0x348] sm:$0xff] }
 0x15b   : > { %v6990_v3 = vadd.f32 %v1430_v21, %v1190_v7  ;;  %v1176_v15 = vpop.f32.mrf.mxu3  ;;  %v5561_v7 = vld [vmem:[#allocation2 + $0x420] sm:$0xff]  ;;  %v2379_v21 = vrot.slane %v2377_v6, 1  ;;  %3006 = vmatpush.bf16.msrb.mxu3 %v5545_v27  ;;  %2753 = vmatpush.bf16.msra.mxu1 %v5530_v18  ;;  %v2523_v6 = vsel %vm808_vm0, %v7736_v33, %v2522_v4  ;;  %v2096_v33 = vsel %vm1357_vm6, %v6966_v9, %v2095_v17 }
 0x15c   : > { %3176 = vmatpush.bf16.msra.mxu0 %v5561_v7  ;;  %v2799_v36 = vpack.c.bf16 %v2794_v61, %v2794_v61  ;;  %v7735_v43 = vld [vmem:[#allocation9_spill] sm:$0xff]  ;;  %v5560_v7 = vld [vmem:[#allocation2 + $0x418] sm:$0xff]  ;;  %v2062_v9 = vmul.f32 %v7737_v57, %v7733_v46 }
 0x15d   : > { %v6996_v52 = vpop.f32.mrf.mxu2  ;;  %v754_v30 = vpop.f32.mrf.mxu1  ;;  %v2380_v14 = vsel %vm572_vm3, %v2375_v25, %v2379_v21  ;;  %v2330_v50 = vmul.f32 %v2321_v26, %v7735_v43  ;;  %v7022_v18 = vld [vmem:[%s6002_s20 + $0x20] sm:$0xff] }
 0x15e   : > { %v755_v32 = vadd.f32 %v754_v30, %v6935_v51  ;;  %v2829_v27 = vrot.slane %v2799_v36, 2  ;;  %v5559_v36 = vld [vmem:[#allocation2 + $0x410] sm:$0xff]  ;;  %v5557_v57 = vld [vmem:[#allocation2 + $0x400] sm:$0xff] }
 0x15f   : > { %v2335_v25 = vpack.c.bf16 %v2330_v50, %v2330_v50  ;;  %v2381_v50 = vshrl.u32 %v6973_v20, 16 }
 0x160   : > { %v902_v12 = vadd.f32 %v6676_v58, %v755_v32  ;;  %2459 = vmatmul.bf16.gmra.mxu3 %v2380_v14  ;;  %v5529_v32 = vld [vmem:[#allocation2 + $0x340] sm:$0xff]  ;;  %3177 = vmatpush.bf16.msra.mxu0 %v5560_v7  ;;  %v2830_v2 = vsel %vm1357_vm6, %v6970_v41, %v2829_v27  ;;  %v5572_v7 = vld [vmem:[#allocation2 + $0x478] sm:$0xff] }
 0x161   : > { %2754 = vmatpush.bf16.msra.mxu1 %v5529_v32  ;;  %v2383_v41 = vor.u32 %v2381_v50, %v2379_v21  ;;  %v5571_v50 = vld [vmem:[#allocation2 + $0x470] sm:$0xff] }
 0x162   : > { %v1433_v29 = vpop.f32.mrf.mxu0  ;;  %v1192_v51 = vadd.f32 %v1176_v15, %v902_v12 }
 0x163   : > { %v7010_v30 = vadd.f32 %v1433_v29, %v1191_v37  ;;  %v1179_v13 = vpop.f32.mrf.mxu3  ;;  %v2385_v37 = vshll.u32 %v2335_v25, 16 }
 0x164   : > { %3178 = vmatpush.bf16.msra.mxu0 %v5559_v36 }
 0x165   : > { %v7012_v19 = vpop.f32.mrf.mxu2  ;;  %2593 = vmatmul.bf16.gmra.mxu0 %v2523_v6  ;;  %v757_v58 = vpop.f32.mrf.mxu1  ;;  %v5588_v6 = vld [vmem:[#allocation2 + $0x4f8] sm:$0xff]  ;;  %3312 = vmatpush.bf16.msrb.mxu1 %v5572_v7  ;;  %v5570_v7 = vld [vmem:[#allocation2 + $0x468] sm:$0xff] }
 0x166   : > { %v758_v61 = vadd.f32 %v757_v58, %v6795_v16  ;;  %3615 = vmatpush.bf16.msra.mxu3 %v5588_v6  ;;  %v5615_v6 = vld [vmem:[#allocation2 + $0x5b0] sm:$0xff] }
 0x168   : > { %v903_v29 = vadd.f32 %v6715_v62, %v758_v61  ;;  %2169 = vmatmul.bf16.gmra.mxu1 %v2096_v33  ;;  %v2387_v62 = vrot.slane %v2385_v37, 1  ;;  %v5587_v37 = vld [vmem:[#allocation2 + $0x4f0] sm:$0xff] }
 0x169   : > { %3313 = vmatpush.bf16.msrb.mxu1 %v5571_v50  ;;  %v5585_v50 = vld [vmem:[#allocation2 + $0x4e0] sm:$0xff] }
 0x16a   : > { %2906 = vmatmul.bf16.gmra.mxu2 %v2830_v2  ;;  %v1435_v15 = vpop.f32.mrf.mxu0  ;;  %v1193_v26 = vadd.f32 %v1179_v13, %v903_v29  ;;  %v2524_v13 = vrot.slane %v7022_v18, 1  ;;  %v2388_v25 = vsel %vm572_vm3, %v2383_v41, %v2387_v62  ;;  %v5558_v29 = vld [vmem:[#allocation2 + $0x408] sm:$0xff]  ;;  %v2513_v18 = vunpack.c.l.b16 %v6983_v55  ;;  %3616 = vmatpush.bf16.msra.mxu3 %v5587_v37  ;;  %v5613_v37 = vld [vmem:[#allocation2 + $0x5a0] sm:$0xff] }
 0x16b   : > { %v7024_v16 = vadd.f32 %v1435_v15, %v1192_v51  ;;  %v1181_v14 = vpop.f32.mrf.mxu3  ;;  %v2067_v51 = vpack.c.bf16 %v2062_v9, %v2062_v9  ;;  %3179 = vmatpush.bf16.msra.mxu0 %v5558_v29  ;;  %v5616_v9 = vld [vmem:[#allocation2 + $0x5b8] sm:$0xff] }
 0x16c   : > { %v2525_v21 = vsel %vm808_vm0, %v2522_v4, %v2524_v13  ;;  %v2518_v62 = vpack.c.b16 %v2513_v18, %v2513_v18  ;;  %4044 = vmatpush.bf16.msrb.mxu2 %v5616_v9  ;;  %v7741_v9 = vld [vmem:[#allocation19_spill] sm:$0xff] }
 0x16d   : > { %v7029_v12 = vpop.f32.mrf.mxu2  ;;  %v759_v27 = vpop.f32.mrf.mxu1  ;;  %v2097_v33 = vrot.slane %v2067_v51, 2  ;;  %v7738_v51 = vld [vmem:[#allocation30_spill] sm:$0xff]  ;;  %3314 = vmatpush.bf16.msrb.mxu1 %v5570_v7 }
 0x16e   : > { %v760_v20 = vadd.f32 %v759_v27, %v6826_v11 }
 0x16f   : > { %v2098_v4 = vsel %vm1357_vm6, %v2095_v17, %v2097_v33  ;;  %3180 = vmatpush.bf16.msra.mxu0 %v5557_v57  ;;  %v5586_v17 = vld [vmem:[#allocation2 + $0x4e8] sm:$0xff] }
 0x170   : > { %v904_v63 = vadd.f32 %v6772_v54, %v760_v20  ;;  %2464 = vmatmul.bf16.gmra.mxu3 %v2388_v25  ;;  %v2526_v20 = vrot.slane %v2518_v62, 1  ;;  %4045 = vmatpush.bf16.msrb.mxu2 %v5615_v6  ;;  %v7739_v25 = vld [vmem:[#allocation28_spill] sm:$0xff]  ;;  %v5611_v62 = vld [vmem:[#allocation2 + $0x590] sm:$0xff] }
 0x171   : > { %3617 = vmatpush.bf16.msra.mxu3 %v5586_v17  ;;  %v5595_v6 = vld [vmem:[#allocation2 + $0x530] sm:$0xff] }
 0x172   : > { %v1438_v32 = vpop.f32.mrf.mxu0  ;;  %v1194_v58 = vadd.f32 %v1181_v14, %v904_v63  ;;  %v7740_v63 = vpack.c.bf16 %v7738_v51, %v7739_v25  ;;  %v5568_v51 = vld [vmem:[#allocation2 + $0x458] sm:$0xff]  ;;  %v5610_v25 = vld [vmem:[#allocation2 + $0x588] sm:$0xff] }
 0x173   : > { %v7036_v61 = vadd.f32 %v1438_v32, %v1193_v26  ;;  %v1184_v11 = vpop.f32.mrf.mxu3  ;;  %v5614_v32 = vld [vmem:[#allocation2 + $0x5a8] sm:$0xff] }
 0x174   : > { %4046 = vmatpush.bf16.msrb.mxu2 %v5614_v32 }
 0x175   : > { %v7038_v2 = vpop.f32.mrf.mxu2  ;;  %2598 = vmatmul.bf16.gmra.mxu0 %v2525_v21  ;;  %v762_v15 = vpop.f32.mrf.mxu1  ;;  %3618 = vmatpush.bf16.msra.mxu3 %v5585_v50  ;;  %v3058_v50 = vmul.f32 %v6264_v22, %v7716_v49 }
 0x176   : > { %v763_v54 = vadd.f32 %v762_v15, %v6867_v5 }
 0x178   : > { %v905_v26 = vadd.f32 %v6806_v10, %v763_v54  ;;  %2174 = vmatmul.bf16.gmra.mxu1 %v2098_v4  ;;  %v5569_v54 = vld [vmem:[#allocation2 + $0x460] sm:$0xff]  ;;  %4047 = vmatpush.bf16.msrb.mxu2 %v5613_v37  ;;  %v5612_v4 = vld [vmem:[#allocation2 + $0x598] sm:$0xff] }
 0x179   : > { %3315 = vmatpush.bf16.msrb.mxu1 %v5569_v54 }
 0x17a   : > { %3487 = vmatmul.bf16.vlgmr.msra.gmra.mxu2 %v6657_v8  ;;  %v1440_v14 = vpop.f32.mrf.mxu0  ;;  %v1195_v41 = vadd.f32 %v1184_v11, %v905_v26 }
 0x17b   : > { %v7045_v36 = vadd.f32 %v1440_v14, %v1194_v58  ;;  %v1186_v5 = vpop.f32.mrf.mxu3  ;;  %v2527_v58 = vsel %vm808_vm0, %v2524_v13, %v2526_v20  ;;  %v2924_v14 = vmul.f32 %v7741_v9, %v6388_v23  ;;  %v7744_v9 = vld [vmem:[#allocation42_spill] sm:$0xff] }
 0x17c   : > { %4048 = vmatpush.bf16.msrb.mxu2 %v5612_v4 }
 0x17d   : > { %v7047_v55 = vpop.f32.mrf.mxu2  ;;  %v764_v27 = vpop.f32.mrf.mxu1  ;;  %3316 = vmatpush.bf16.msrb.mxu1 %v5568_v51 }
 0x17e   : > { %v765_v10 = vadd.f32 %v764_v27, %v6892_v38  ;;  %v7073_v27 = vld [vmem:[%s6002_s20 + $0x2c] sm:$0x3] }
 0x180   : > { %v906_v8 = vadd.f32 %v6842_v1, %v765_v10  ;;  %3007 = vmatmul.bf16.vlgmr.msrb.gmra.mxu3 %v7740_v63  ;;  %v5596_v1 = vld [vmem:[#allocation2 + $0x538] sm:$0xff]  ;;  %4049 = vmatpush.bf16.msrb.mxu2 %v5611_v62  ;;  %v7746_v62 = vld [vmem:[#allocation41_spill] sm:$0xff] }
 0x181   : > { %3731 = vmatpush.bf16.msrb.mxu0 %v5596_v1  ;;  %v7742_v1 = vld [vmem:[#allocation54_spill] sm:$0xff] }
 0x182   : > { %v1443_v21 = vpop.f32.mrf.mxu0  ;;  %v1196_v33 = vadd.f32 %v1186_v5, %v906_v8  ;;  %v5584_v5 = vld [vmem:[#allocation2 + $0x4d8] sm:$0xff]  ;;  %v7600_v8 = vunpack.c.l.bf16 %v7073_v27 }
 0x183   : > { %v7055_v11 = vadd.f32 %v1443_v21, %v1195_v41  ;;  %v1857_v38 = vpop.f32.mrf.mxu3  ;;  %3619 = vmatpush.bf16.msra.mxu3 %v5584_v5  ;;  %v5609_v21 = vld [vmem:[#allocation2 + $0x580] sm:$0xff]  ;;  %v2927_v5 = vmul.f32 %v6744_v34, %v7746_v62 }
 0x184   : > { %4050 = vmatpush.bf16.msrb.mxu2 %v5610_v25 }
 0x185   : > { %v7057_v29 = vpop.f32.mrf.mxu2  ;;  %2603 = vmatmul.bf16.gmra.mxu0 %v2527_v58  ;;  %v1544_v15 = vpop.f32.mrf.mxu1  ;;  %v5594_v58 = vld [vmem:[#allocation2 + $0x528] sm:$0xff] }
 0x186   : > { %v1564_v18 = vadd.f32 %v1544_v15, %v6964_v40  ;;  %3732 = vmatpush.bf16.msrb.mxu0 %v5595_v6  ;;  %v3059_v15 = vmul.f32 %v7742_v1, %v7717_v44 }
 0x188   : > { %v1738_v13 = vadd.f32 %v6886_v53, %v1564_v18  ;;  %2755 = vmatmul.bf16.vlgmr.msra.gmra.mxu1 %v6684_v39  ;;  %v2925_v39 = vmul.f32 %v6651_v47, %v6402_v45  ;;  %4051 = vmatpush.bf16.msrb.mxu2 %v5609_v21  ;;  %v7743_v18 = vld [vmem:[#allocation36_spill] sm:$0xff] }
 0x18a   : > { %3492 = vmatmul.bf16.gmra.mxu2 %v6681_v0  ;;  %v1445_v26 = vpop.f32.mrf.mxu0  ;;  %v1877_v57 = vadd.f32 %v1857_v38, %v1738_v13  ;;  %v2931_v10 = vpack.c.bf16 %v2925_v39, %v2924_v14  ;;  %v5567_v38 = vld [vmem:[#allocation2 + $0x450] sm:$0xff]  ;;  %3733 = vmatpush.bf16.msrb.mxu0 %v5594_v58  ;;  %v5582_v13 = vld [vmem:[#allocation2 + $0x4c8] sm:$0xff]  ;;  %v5581_v39 = vld [vmem:[#allocation2 + $0x4c0] sm:$0xff] }
 0x18b   : > { %v7065_v41 = vadd.f32 %v1445_v26, %v1196_v33  ;;  %v1859_v40 = vpop.f32.mrf.mxu3  ;;  %3317 = vmatpush.bf16.msrb.mxu1 %v5567_v38  ;;  %v7745_v14 = vld [vmem:[#allocation22_spill] sm:$0xff] }
 0x18d   : > { %v7067_v17 = vpop.f32.mrf.mxu2  ;;  %v1546_v53 = vpop.f32.mrf.mxu1 }
 0x18e   : > { %v1565_v0 = vadd.f32 %v1546_v53, %v6990_v3  ;;  %v5583_v3 = vld [vmem:[#allocation2 + $0x4d0] sm:$0xff]  ;;  %v5566_v53 = vld [vmem:[#allocation2 + $0x448] sm:$0xff] }
 0x18f   : > { %3620 = vmatpush.bf16.msra.mxu3 %v5583_v3  ;;  %3318 = vmatpush.bf16.msrb.mxu1 %v5566_v53 }
 0x190   : > { %v1739_v20 = vadd.f32 %v6911_v42, %v1565_v0  ;;  %3012 = vmatmul.bf16.gmra.mxu3 %v2931_v10  ;;  %v3360_v42 = vmul.f32 %v7600_v8, %v7682_v48  ;;  %v7747_v10 = vld [vmem:[#allocation27_spill] sm:$0xff] }
 0x192   : > { %v2024_v63 = vpop.f32.mrf.mxu0  ;;  %v1878_v7 = vadd.f32 %v1859_v40, %v1739_v20  ;;  %v3365_v4 = vpack.c.bf16 %v3360_v42, %v3360_v42  ;;  %v2926_v40 = vmul.f32 %v7745_v14, %v7744_v9  ;;  %v3097_v20 = vshrl.u32 %v7747_v10, 16 }
 0x193   : > { %v7077_v32 = vadd.f32 %v2024_v63, %v1877_v57  ;;  %v1862_v47 = vpop.f32.mrf.mxu3  ;;  %v7093_v57 = vpack.c.bf16 %v3059_v15, %v3058_v50  ;;  %3621 = vmatpush.bf16.msra.mxu3 %v5582_v13  ;;  %v5565_v13 = vld [vmem:[#allocation2 + $0x440] sm:$0xff] }
 0x194   : > { %v3419_v25 = vshrl.u32 %v3365_v4, 16  ;;  %v3422_v63 = vshll.u32 %v3365_v4, 16  ;;  %v2932_v3 = vpack.c.bf16 %v2927_v5, %v2926_v40  ;;  %v2920_v5 = vld [vmem:[%s6002_s20 + $0x28] sm:$0xf]  ;;  %3319 = vmatpush.bf16.msrb.mxu1 %v5565_v13  ;;  %v7137_v13 = vld [vmem:[%s6002_s20 + $0x18] sm:$0xff] }
 0x195   : > { %3181 = vmatmul.bf16.vlgmr.msra.gmra.mxu0 %v6722_v60  ;;  %v1549_v33 = vpop.f32.mrf.mxu1  ;;  %v7088_v54 = vpop.f32.mrf.mxu2  ;;  %v2921_v10 = vunpack.c.l.bf16 %v2920_v5 }
 0x196   : > { %v1566_v37 = vadd.f32 %v1549_v33, %v7010_v30  ;;  %v3421_v33 = vrot.slane %v3419_v25, 1  ;;  %v3424_v42 = vrot.slane %v3422_v63, 2  ;;  %v7753_v63 = vld [vmem:[#allocation45_spill] sm:$0xff] }
 0x197   : > { %3622 = vmatpush.bf16.msra.mxu3 %v5581_v39  ;;  %v7750_v39 = vld [vmem:[#allocation57_spill] sm:$0xff] }
 0x198   : > { %v1740_v60 = vadd.f32 %v6944_v56, %v1566_v37  ;;  %2760 = vmatmul.bf16.gmra.mxu1 %v6726_v31  ;;  %v5593_v31 = vld [vmem:[#allocation2 + $0x520] sm:$0xff]  ;;  %v3425_v14 = vor.u32 %v3424_v42, %v3421_v33  ;;  %v5624_v33 = vld [vmem:[#allocation2 + $0x5f8] sm:$0xff]  ;;  %v7754_v42 = vld [vmem:[#allocation46_spill] sm:$0xff] }
 0x199   : > { %3734 = vmatpush.bf16.msrb.mxu0 %v5593_v31 }
 0x19a   : > { %3497 = vmatmul.bf16.gmra.mxu2 %v7743_v18  ;;  %v2026_v30 = vpop.f32.mrf.mxu0  ;;  %v1879_v26 = vadd.f32 %v1862_v47, %v1740_v60  ;;  %v3101_v47 = vshll.u32 %v7093_v57, 16  ;;  %v5592_v18 = vld [vmem:[#allocation2 + $0x518] sm:$0xff] }
 0x19b   : > { %v7099_v6 = vadd.f32 %v2026_v30, %v1878_v7  ;;  %v1864_v56 = vpop.f32.mrf.mxu3  ;;  %v7748_v7 = vld [vmem:[#allocation58_spill] sm:$0xff]  ;;  %v7749_v30 = vld [vmem:[#allocation56_spill] sm:$0xff]  ;;  %4211 = vmatpush.bf16.msrb.mxu3 %v5624_v33 }
 0x19c   : > { %v3099_v21 = vor.u32 %v3097_v20, %v7748_v7  ;;  %v3060_v4 = vmul.f32 %v7749_v30, %v7730_v35 }
 0x19d   : > { %v1551_v0 = vpop.f32.mrf.mxu1  ;;  %v7106_v58 = vpop.f32.mrf.mxu2  ;;  %3735 = vmatpush.bf16.msrb.mxu0 %v5592_v18  ;;  %v7133_v18 = vld [vmem:[%s6002_s20 + $0x2c] sm:$0x1] }
 0x19e   : > { %v1567_v51 = vadd.f32 %v1551_v0, %v7024_v16  ;;  %v3103_v16 = vrot.slane %v3101_v47, 1  ;;  %v7752_v0 = vld [vmem:[#allocation29_spill] sm:$0xff]  ;;  %v2928_v47 = vmul.f32 %v6747_v28, %v7753_v63 }
 0x1a0   : > { %v1741_v34 = vadd.f32 %v6968_v24, %v1567_v51  ;;  %3017 = vmatmul.bf16.gmra.mxu3 %v2932_v3  ;;  %v3104_v60 = vsel %vm572_vm3, %v3099_v21, %v3103_v16  ;;  %v5591_v21 = vld [vmem:[#allocation2 + $0x510] sm:$0xff] }
 0x1a1   : > { %3736 = vmatpush.bf16.msrb.mxu0 %v5591_v21  ;;  %v5607_v21 = vld [vmem:[#allocation2 + $0x570] sm:$0xff] }
 0x1a2   : > { %v2029_v38 = vpop.f32.mrf.mxu0  ;;  %v1880_v37 = vadd.f32 %v1864_v56, %v1741_v34  ;;  %v7751_v56 = vld [vmem:[#allocation60_spill] sm:$0xff]  ;;  %v5597_v34 = vld [vmem:[%s6002_s20 + $0x10] sm:$0xf0] }
 0x1a3   : > { %v7108_v50 = vadd.f32 %v2029_v38, %v1879_v26  ;;  %v1867_v15 = vpop.f32.mrf.mxu3  ;;  %v3061_v26 = vmul.f32 %v7750_v39, %v7731_v59  ;;  %v3426_v31 = vsel %vm1063_vm4, %v7751_v56, %v3425_v14  ;;  %v2929_v38 = vmul.f32 %v2921_v10, %v7754_v42 }
 0x1a5   : > { %3186 = vmatmul.bf16.gmra.mxu0 %v3104_v60  ;;  %v1554_v24 = vpop.f32.mrf.mxu1  ;;  %v7121_v51 = vpack.c.bf16 %v3061_v26, %v3060_v4  ;;  %v7123_v25 = vpop.f32.mrf.mxu2  ;;  %v3105_v4 = vshrl.u32 %v7093_v57, 16  ;;  %v2933_v14 = vpack.c.bf16 %v2929_v38, %v2928_v47  ;;  %v3053_v26 = vunpack.c.l.bf16 %v7133_v18 }
 0x1a6   : > { %v1568_v40 = vadd.f32 %v1554_v24, %v7036_v61 }
 0x1a7   : > { %v3109_v28 = vshll.u32 %v7121_v51, 16  ;;  %v3107_v5 = vor.u32 %v3105_v4, %v3103_v16  ;;  %v5590_v16 = vld [vmem:[#allocation2 + $0x508] sm:$0xff] }
 0x1a8   : > { %v1742_v53 = vadd.f32 %v6996_v52, %v1568_v40  ;;  %2765 = vmatmul.bf16.gmra.mxu1 %v7752_v0  ;;  %v5300_v52 = vld [vmem:[%s6002_s20 + $0x10] sm:$0xe]  ;;  %3737 = vmatpush.bf16.msrb.mxu0 %v5590_v16 }
 0x1a9   : > { %v5301_v24 = vor.u32 %v5597_v34, %v5300_v52  ;;  %v3111_v10 = vrot.slane %v3109_v28, 1  ;;  %v5623_v52 = vld [vmem:[#allocation2 + $0x5f0] sm:$0xff] }
 0x1aa   : > { %3502 = vmatmul.bf16.gmra.mxu2 %v3426_v31  ;;  %v2031_v61 = vpop.f32.mrf.mxu0  ;;  %v1881_v20 = vadd.f32 %v1867_v15, %v1742_v53  ;;  %v5608_v31 = vld [vmem:[#allocation2 + $0x578] sm:$0xff]  ;;  %v3984_v53 = vrot.slane %v7137_v13, 1  ;;  %v7757_v4 = vld [vmem:[#allocation26_spill] sm:$0xff]  ;;  %4212 = vmatpush.bf16.msrb.mxu3 %v5623_v52  ;;  %v7759_v52 = vld [vmem:[#allocation61_spill] sm:$0xff] }
 0x1ab   : > { %v7127_v3 = vadd.f32 %v2031_v61, %v1880_v37  ;;  %v1869_v7 = vpop.f32.mrf.mxu3  ;;  %v3516_v37 = vld [vmem:[%s6002_s20 + $0xc] sm:$0xc]  ;;  %3905 = vmatpush.bf16.msra.mxu1 %v5608_v31  ;;  %v3112_v47 = vsel %vm572_vm3, %v3107_v5, %v3111_v10  ;;  %v5589_v5 = vld [vmem:[#allocation2 + $0x500] sm:$0xff]  ;;  %v5628_v13 = vld [vmem:[#allocation2 + $0x618] sm:$0xff] }
 0x1ac   : > { %v3517_v56 = vunpack.c.l.bf16 %v3516_v37  ;;  %3738 = vmatpush.bf16.msrb.mxu0 %v5589_v5 }
 0x1ad   : > { %v1556_v60 = vpop.f32.mrf.mxu1  ;;  %v7149_v33 = vpop.f32.mrf.mxu2 }
 0x1ae   : > { %v1569_v15 = vadd.f32 %v1556_v60, %v7045_v36  ;;  %v3983_v36 = vrot.slane %v5301_v24, 1  ;;  %v7755_v60 = vld [vmem:[#allocation31_spill] sm:$0xff] }
 0x1af   : > { %v7756_v24 = vld [vmem:[#allocation35_spill] sm:$0xff]  ;;  %3906 = vmatpush.bf16.msra.mxu1 %v5607_v21 }
 0x1b0   : > { %v1743_v40 = vadd.f32 %v7012_v19, %v1569_v15  ;;  %3022 = vmatmul.bf16.gmra.mxu3 %v2933_v14  ;;  %v3062_v19 = vmul.f32 %v3053_v26, %v7735_v43  ;;  %v3518_v15 = vmul.f32 %v3517_v56, %v7755_v60  ;;  %v3519_v28 = vmul.f32 %v7757_v4, %v7756_v24  ;;  %v7758_v14 = vld [vmem:[#allocation20_spill] sm:$0xff] }
 0x1b1   : > { %v5632_v26 = vld [vmem:[#allocation2 + $0x638] sm:$0xff] }
 0x1b2   : > { %v2034_v0 = vpop.f32.mrf.mxu0  ;;  %v1882_v57 = vadd.f32 %v1869_v7, %v1743_v40  ;;  %v3067_v40 = vpack.c.bf16 %v3062_v19, %v3062_v19  ;;  %v3527_v56 = vpack.c.bf16 %v3519_v28, %v3518_v15  ;;  %5704 = vmatpush.bf16.msra.mxu2 %v5632_v26  ;;  %4347 = vmatpush.bf16.msra.mxu0 %v5632_v26  ;;  %v7170_v4 = vld [vmem:[%s6002_s20 + $0x14] sm:$0xff] }
 0x1b3   : > { %v7145_v61 = vadd.f32 %v2034_v0, %v1881_v20  ;;  %v1872_v34 = vpop.f32.mrf.mxu3  ;;  %v3985_v20 = vsel %vm808_vm0, %v3983_v36, %v3984_v53  ;;  %v5553_v0 = vld [vmem:[%s6002_s20 + $0xc] sm:$0xf0] }
 0x1b4   : > { %v3117_v19 = vshll.u32 %v3067_v40, 16  ;;  %v3554_v28 = vrot.slane %v3527_v56, 2 }
 0x1b5   : > { %3191 = vmatmul.bf16.gmra.mxu0 %v3112_v47  ;;  %v1559_v38 = vpop.f32.mrf.mxu1  ;;  %v7177_v5 = vpop.f32.mrf.mxu2 }
 0x1b6   : > { %v1570_v7 = vadd.f32 %v1559_v38, %v7055_v11  ;;  %v5124_v11 = vld [vmem:[%s6002_s20 + $0xc] sm:$0xe] }
 0x1b8   : > { %v1744_v37 = vadd.f32 %v7029_v12, %v1570_v7  ;;  %2770 = vmatmul.bf16.gmra.mxu1 %v7758_v14  ;;  %v7760_v12 = vld [vmem:[#allocation34_spill] sm:$0xff]  ;;  %v3113_v14 = vshrl.u32 %v7121_v51, 16 }
 0x1b9   : > { %v7761_v21 = vpack.c.bf16 %v7759_v52, %v7760_v12  ;;  %v5622_v7 = vld [vmem:[#allocation2 + $0x5e8] sm:$0xff]  ;;  %v3119_v52 = vrot.slane %v3117_v19, 1 }
 0x1ba   : > { %4052 = vmatmul.bf16.vlgmr.msrb.gmra.mxu2 %v3985_v20  ;;  %v2036_v31 = vpop.f32.mrf.mxu0  ;;  %v1883_v36 = vadd.f32 %v1872_v34, %v1744_v37  ;;  %v5631_v20 = vld [vmem:[#allocation2 + $0x630] sm:$0xff]  ;;  %v5125_v34 = vor.u32 %v5553_v0, %v5124_v11  ;;  %v7174_v37 = vld [vmem:[%s6002_s20 + $0x20] sm:$0xff]  ;;  %4213 = vmatpush.bf16.msrb.mxu3 %v5622_v7  ;;  %v5606_v0 = vld [vmem:[#allocation2 + $0x568] sm:$0xff] }
 0x1bb   : > { %v7162_v47 = vadd.f32 %v2036_v31, %v1882_v57  ;;  %v1874_v16 = vpop.f32.mrf.mxu3  ;;  %v7167_v38 = vrot.slane %v7761_v21, 2  ;;  %5705 = vmatpush.bf16.msra.mxu2 %v5631_v20  ;;  %v3115_v31 = vor.u32 %v3113_v14, %v3111_v10  ;;  %4348 = vmatpush.bf16.msra.mxu0 %v5631_v20  ;;  %v5630_v11 = vld [vmem:[#allocation2 + $0x628] sm:$0xff]  ;;  %v3986_v51 = vrot.slane %v7174_v37, 1  ;;  %v7762_v10 = vld [vmem:[#allocation40_spill] sm:$0xff] }
 0x1bc   : > { %v3251_v56 = vrot.slane %v5125_v34, 1  ;;  %3907 = vmatpush.bf16.msra.mxu1 %v5606_v0  ;;  %v3523_v19 = vmul.f32 %v7742_v1, %v7762_v10  ;;  %v5629_v20 = vld [vmem:[#allocation2 + $0x620] sm:$0xff] }
 0x1bd   : > { %v1561_v15 = vpop.f32.mrf.mxu1  ;;  %v3556_v40 = vsel %vm1357_vm6, %v3554_v28, %v7167_v38  ;;  %v5621_v34 = vld [vmem:[#allocation2 + $0x5e0] sm:$0xff] }
 0x1be   : > { %v1571_v57 = vadd.f32 %v1561_v15, %v7065_v41  ;;  %v3252_v41 = vrot.slane %v7170_v4, 1  ;;  %v5605_v28 = vld [vmem:[#allocation2 + $0x560] sm:$0xff]  ;;  %4214 = vmatpush.bf16.msrb.mxu3 %v5621_v34  ;;  %v5620_v34 = vld [vmem:[#allocation2 + $0x5d8] sm:$0xff]  ;;  %v7244_v4 = vld [vmem:[%s6002_s20 + $0x30] sm:$0x1] }
 0x1bf   : > { %5706 = vmatpush.bf16.msra.mxu2 %v5630_v11  ;;  %4349 = vmatpush.bf16.msra.mxu0 %v5630_v11  ;;  %v3977_v37 = vunpack.c.l.b16 %v7244_v4 }
 0x1c0   : > { %v1745_v26 = vadd.f32 %v7038_v2, %v1571_v57  ;;  %3623 = vmatmul.bf16.vlgmr.msra.gmra.mxu3 %v3556_v40  ;;  %v3120_v2 = vsel %vm572_vm3, %v3115_v31, %v3119_v52  ;;  %v7763_v40 = vld [vmem:[#allocation39_spill] sm:$0xff]  ;;  %3908 = vmatpush.bf16.msra.mxu1 %v5605_v28  ;;  %v7208_v28 = vld [vmem:[%s6002_s20 + $0x1c] sm:$0xff] }
 0x1c2   : > { %v2039_v12 = vpop.f32.mrf.mxu0  ;;  %v1884_v21 = vadd.f32 %v1874_v16, %v1745_v26  ;;  %v3253_v16 = vsel %vm808_vm0, %v3251_v56, %v3252_v41  ;;  %v3522_v26 = vmul.f32 %v6264_v22, %v7763_v40  ;;  %v7201_v56 = vpop.f32.mrf.mxu2  ;;  %4215 = vmatpush.bf16.msrb.mxu3 %v5620_v34  ;;  %v5619_v34 = vld [vmem:[#allocation2 + $0x5d0] sm:$0xff] }
 0x1c3   : > { %v7184_v7 = vadd.f32 %v2039_v12, %v1883_v36  ;;  %v2450_v15 = vpop.f32.mrf.mxu3  ;;  %v3987_v36 = vsel %vm808_vm0, %v3984_v53, %v3986_v51  ;;  %5707 = vmatpush.bf16.msra.mxu2 %v5629_v20  ;;  %4350 = vmatpush.bf16.msra.mxu0 %v5629_v20  ;;  %v7212_v20 = vld [vmem:[%s6002_s20 + $0x28] sm:$0xff] }
 0x1c4   : > { %v3529_v52 = vpack.c.bf16 %v3523_v19, %v3522_v26 }
 0x1c5   : > { %3196 = vmatmul.bf16.gmra.mxu0 %v3120_v2  ;;  %v2160_v57 = vpop.f32.mrf.mxu1  ;;  %v5627_v2 = vld [vmem:[#allocation2 + $0x610] sm:$0xff] }
 0x1c6   : > { %v2180_v14 = vadd.f32 %v2160_v57, %v7077_v32  ;;  %v7205_v12 = vrot.slane %v3529_v52, 2  ;;  %v3254_v57 = vrot.slane %v7208_v28, 1  ;;  %4216 = vmatpush.bf16.msrb.mxu3 %v5619_v34  ;;  %v3245_v28 = vunpack.c.l.b16 %v7133_v18 }
 0x1c7   : > { %5708 = vmatpush.bf16.msra.mxu2 %v5628_v13  ;;  %4351 = vmatpush.bf16.msra.mxu0 %v5628_v13 }
 0x1c8   : > { %v2296_v31 = vadd.f32 %v7047_v55, %v2180_v14  ;;  %3320 = vmatmul.bf16.vlgmr.msrb.gmra.mxu1 %v3253_v16  ;;  %v5604_v16 = vld [vmem:[#allocation2 + $0x558] sm:$0xff]  ;;  %v3988_v14 = vrot.slane %v7212_v20, 1  ;;  %v3250_v18 = vpack.c.b16 %v3245_v28, %v3245_v28  ;;  %v3652_v28 = vld [vmem:[%s6002_s20 + $0x2c] sm:$0xf] }
 0x1c9   : > { %3909 = vmatpush.bf16.msra.mxu1 %v5604_v16  ;;  %v3255_v16 = vsel %vm808_vm0, %v3252_v41, %v3254_v57  ;;  %v5618_v41 = vld [vmem:[#allocation2 + $0x5c8] sm:$0xff] }
 0x1ca   : > { %4057 = vmatmul.bf16.gmra.mxu2 %v3987_v36  ;;  %v2041_v53 = vpop.f32.mrf.mxu0  ;;  %v2470_v0 = vadd.f32 %v2450_v15, %v2296_v31  ;;  %v5626_v36 = vld [vmem:[#allocation2 + $0x608] sm:$0xff]  ;;  %v7220_v31 = vpop.f32.mrf.mxu2  ;;  %4217 = vmatpush.bf16.msrb.mxu3 %v5618_v41 }
 0x1cb   : > { %v7203_v32 = vadd.f32 %v2041_v53, %v1884_v21  ;;  %v2452_v11 = vpop.f32.mrf.mxu3  ;;  %5709 = vmatpush.bf16.msra.mxu2 %v5627_v2  ;;  %v3558_v21 = vsel %vm1357_vm6, %v7167_v38, %v7205_v12  ;;  %4352 = vmatpush.bf16.msra.mxu0 %v5627_v2  ;;  %v7764_v38 = vld [vmem:[#allocation43_spill] sm:$0xff]  ;;  %v7765_v53 = vld [vmem:[#allocation44_spill] sm:$0xff] }
 0x1cc   : > { %v3525_v2 = vmul.f32 %v7750_v39, %v7765_v53 }
 0x1cd   : > { %v2162_v55 = vpop.f32.mrf.mxu1 }
 0x1ce   : > { %v2181_v19 = vadd.f32 %v2162_v55, %v7099_v6  ;;  %v5625_v55 = vld [vmem:[#allocation2 + $0x600] sm:$0xff] }
 0x1cf   : > { %5710 = vmatpush.bf16.msra.mxu2 %v5626_v36  ;;  %4353 = vmatpush.bf16.msra.mxu0 %v5626_v36 }
 0x1d0   : > { %v2297_v15 = vadd.f32 %v7057_v29, %v2181_v19  ;;  %3628 = vmatmul.bf16.gmra.mxu3 %v3558_v21  ;;  %v3524_v29 = vmul.f32 %v7749_v30, %v7764_v38  ;;  %v5603_v19 = vld [vmem:[#allocation2 + $0x550] sm:$0xff] }
 0x1d1   : > { %v7766_v21 = vld [vmem:[#allocation10_spill] sm:$0xff]  ;;  %3910 = vmatpush.bf16.msra.mxu1 %v5603_v19  ;;  %v5617_v19 = vld [vmem:[#allocation2 + $0x5c0] sm:$0xff] }
 0x1d2   : > { %v2589_v26 = vpop.f32.mrf.mxu0  ;;  %v2471_v6 = vadd.f32 %v2452_v11, %v2297_v15  ;;  %v7767_v11 = vld [vmem:[#allocation59_spill] sm:$0xff]  ;;  %4218 = vmatpush.bf16.msrb.mxu3 %v5617_v19  ;;  %v7770_v19 = vunpack.c.l.bf16 %v7073_v27 }
 0x1d3   : > { %v7222_v52 = vadd.f32 %v2589_v26, %v2470_v0  ;;  %v2455_v13 = vpop.f32.mrf.mxu3  ;;  %v7768_v15 = vpack.c.bf16 %v7766_v21, %v7767_v11  ;;  %v3989_v26 = vsel %vm808_vm0, %v3986_v51, %v3988_v14  ;;  %5711 = vmatpush.bf16.msra.mxu2 %v5625_v55  ;;  %v3530_v21 = vpack.c.bf16 %v3525_v2, %v3524_v29  ;;  %v7252_v29 = vld [vmem:[%s6002_s20 + $0x24] sm:$0xff] }
 0x1d4   : > { %4354 = vmatpush.bf16.msra.mxu0 %v5625_v55  ;;  %v3982_v55 = vpack.c.b16 %v3977_v37, %v3977_v37 }
 0x1d5   : > { %3739 = vmatmul.bf16.vlgmr.msrb.gmra.mxu0 %v7768_v15  ;;  %v2165_v0 = vpop.f32.mrf.mxu1  ;;  %v3559_v34 = vrot.slane %v3530_v21, 2  ;;  %v3256_v21 = vrot.slane %v7252_v29, 1  ;;  %v7278_v29 = vld [vmem:[%s6002_s20 + $0x30] sm:$0x3] }
 0x1d6   : > { %v2182_v8 = vadd.f32 %v2165_v0, %v7108_v50  ;;  %v5602_v0 = vld [vmem:[#allocation2 + $0x548] sm:$0xff]  ;;  %v3990_v41 = vrot.slane %v3982_v55, 1 }
 0x1d7   : > { %3911 = vmatpush.bf16.msra.mxu1 %v5602_v0 }
 0x1d8   : > { %v2298_v36 = vadd.f32 %v7067_v17, %v2182_v8  ;;  %3325 = vmatmul.bf16.gmra.mxu1 %v3255_v16  ;;  %v7249_v17 = vpop.f32.mrf.mxu2  ;;  %v7769_v16 = vld [vmem:[#allocation16_spill] sm:$0xff] }
 0x1da   : > { %4062 = vmatmul.bf16.gmra.mxu2 %v3989_v26  ;;  %v2591_v11 = vpop.f32.mrf.mxu0  ;;  %v2472_v15 = vadd.f32 %v2455_v13, %v2298_v36  ;;  %v3656_v26 = vmul.f32 %v7769_v16, %v6388_v23  ;;  %v3657_v36 = vmul.f32 %v6264_v22, %v6402_v45  ;;  %v3257_v22 = vsel %vm808_vm0, %v3254_v57, %v3256_v21 }
 0x1db   : > { %v7247_v51 = vadd.f32 %v2591_v11, %v2471_v6  ;;  %v2457_v50 = vpop.f32.mrf.mxu3  ;;  %v3560_v6 = vsel %vm1357_vm6, %v7205_v12, %v3559_v34  ;;  %v3526_v12 = vmul.f32 %v7770_v19, %v7733_v46  ;;  %v3991_v45 = vsel %vm808_vm0, %v3988_v14, %v3990_v41 }
 0x1dc   : > { %v3663_v0 = vpack.c.bf16 %v3657_v36, %v3656_v26  ;;  %v4083_v57 = vunpack.c.l.bf16 %v7278_v29  ;;  %v7772_v26 = vld [vmem:[#allocation65_spill] sm:$0xff] }
 0x1dd   : > { %v2167_v8 = vpop.f32.mrf.mxu1 }
 0x1de   : > { %v2183_v2 = vadd.f32 %v2167_v8, %v7127_v3  ;;  %v5601_v8 = vld [vmem:[#allocation2 + $0x540] sm:$0xff] }
 0x1df   : > { %3912 = vmatpush.bf16.msra.mxu1 %v5601_v8 }
 0x1e0   : > { %v2299_v13 = vadd.f32 %v7088_v54, %v2183_v2  ;;  %3633 = vmatmul.bf16.gmra.mxu3 %v3560_v6  ;;  %v3531_v2 = vpack.c.bf16 %v3526_v12, %v3526_v12  ;;  %v4257_v6 = vmul.f32 %v7772_v26, %v7765_v53 }
 0x1e2   : > { %v2594_v3 = vpop.f32.mrf.mxu0  ;;  %v2473_v11 = vadd.f32 %v2457_v50, %v2299_v13  ;;  %v7275_v50 = vpop.f32.mrf.mxu2  ;;  %v3561_v36 = vrot.slane %v3531_v2, 2 }
 0x1e3   : > { %v7263_v37 = vadd.f32 %v2594_v3, %v2472_v15  ;;  %v2460_v23 = vpop.f32.mrf.mxu3 }
 0x1e5   : > { %3744 = vmatmul.bf16.gmra.mxu0 %v3663_v0  ;;  %v2170_v54 = vpop.f32.mrf.mxu1  ;;  %v3659_v0 = vmul.f32 %v7749_v30, %v7746_v62 }
 0x1e6   : > { %v2184_v15 = vadd.f32 %v2170_v54, %v7145_v61  ;;  %v7771_v61 = vld [vmem:[#allocation64_spill] sm:$0xff] }
 0x1e7   : > { %v4256_v14 = vmul.f32 %v7771_v61, %v7764_v38  ;;  %v3562_v38 = vsel %vm1357_vm6, %v3559_v34, %v3561_v36  ;;  %v7773_v36 = vld [vmem:[#allocation62_spill] sm:$0xff] }
 0x1e8   : > { %v2300_v27 = vadd.f32 %v7106_v58, %v2184_v15  ;;  %3330 = vmatmul.bf16.gmra.mxu1 %v3257_v22  ;;  %v4258_v58 = vmul.f32 %v4083_v57, %v7733_v46  ;;  %v3258_v46 = vrot.slane %v3250_v18, 1 }
 0x1ea   : > { %4067 = vmatmul.bf16.gmra.mxu2 %v3991_v45  ;;  %v2596_v55 = vpop.f32.mrf.mxu0  ;;  %v2474_v20 = vadd.f32 %v2460_v23, %v2300_v27  ;;  %v4262_v23 = vpack.c.bf16 %v4257_v6, %v4256_v14  ;;  %v4263_v19 = vpack.c.bf16 %v4258_v58, %v4258_v58  ;;  %v7299_v12 = vpop.f32.mrf.mxu2 }
 0x1eb   : > { %v7283_v16 = vadd.f32 %v2596_v55, %v2473_v11  ;;  %v2462_v13 = vpop.f32.mrf.mxu3  ;;  %v3658_v11 = vmul.f32 %v7742_v1, %v7744_v9 }
 0x1ec   : > { %v7303_v9 = vrot.slane %v4262_v23, 2  ;;  %v4293_v62 = vrot.slane %v4263_v19, 2 }
 0x1ed   : > { %v2172_v41 = vpop.f32.mrf.mxu1  ;;  %v3664_v22 = vpack.c.bf16 %v3659_v0, %v3658_v11  ;;  %v4248_v0 = vld [vmem:[%s6002_s20 + $0x10] sm:$0xc] }
 0x1ee   : > { %v2185_v3 = vadd.f32 %v2172_v41, %v7162_v47  ;;  %v4294_v45 = vsel %vm1357_vm6, %v7303_v9, %v4293_v62  ;;  %v7777_v62 = vld [vmem:[#allocation17_spill] sm:$0xff] }
 0x1f0   : > { %v2301_v53 = vadd.f32 %v7123_v25, %v2185_v3  ;;  %3638 = vmatmul.bf16.gmra.mxu3 %v3562_v38  ;;  %v3259_v25 = vsel %vm808_vm0, %v3256_v21, %v3258_v46  ;;  %v3653_v21 = vunpack.c.l.bf16 %v3652_v28  ;;  %v7776_v46 = vld [vmem:[#allocation11_spill] sm:$0xff] }
 0x1f2   : > { %v2599_v8 = vpop.f32.mrf.mxu0  ;;  %v2475_v54 = vadd.f32 %v2462_v13, %v2301_v53  ;;  %v7311_v55 = vpop.f32.mrf.mxu2  ;;  %v3660_v13 = vmul.f32 %v7750_v39, %v7753_v63  ;;  %v3661_v58 = vmul.f32 %v3653_v21, %v7754_v42  ;;  %v4249_v39 = vunpack.c.l.bf16 %v4248_v0  ;;  %v7775_v42 = vld [vmem:[#allocation38_spill] sm:$0xff] }
 0x1f3   : > { %v7301_v47 = vadd.f32 %v2599_v8, %v2474_v20  ;;  %v2465_v1 = vpop.f32.mrf.mxu3  ;;  %v3790_v19 = vmul.f32 %v7775_v42, %v7716_v49  ;;  %v3791_v8 = vmul.f32 %v7776_v46, %v7717_v44  ;;  %v7778_v44 = vld [vmem:[#allocation37_spill] sm:$0xff] }
 0x1f4   : > { %v3665_v11 = vpack.c.bf16 %v3661_v58, %v3660_v13 }
 0x1f5   : > { %3749 = vmatmul.bf16.gmra.mxu0 %v3664_v22  ;;  %v2175_v30 = vpop.f32.mrf.mxu1 }
 0x1f6   : > { %v2186_v34 = vadd.f32 %v2175_v30, %v7184_v7  ;;  %v4251_v30 = vmul.f32 %v7777_v62, %v7756_v24 }
 0x1f8   : > { %v2302_v15 = vadd.f32 %v7149_v33, %v2186_v34  ;;  %3335 = vmatmul.bf16.gmra.mxu1 %v3259_v25 }
 0x1fa   : > { %4370 = vmatmul.bf16.vlgmr.msra.gmra.mxu2 %v4294_v45  ;;  %v2601_v27 = vpop.f32.mrf.mxu0  ;;  %v2476_v2 = vadd.f32 %v2465_v1, %v2302_v15  ;;  %v7324_v53 = vpop.f32.mrf.mxu2  ;;  %v4250_v1 = vmul.f32 %v4249_v39, %v7755_v60  ;;  %v7781_v60 = vld [vmem:[#allocation32_spill] sm:$0xff] }
 0x1fb   : > { %v7313_v20 = vadd.f32 %v2601_v27, %v2475_v54  ;;  %v2467_v14 = vpop.f32.mrf.mxu3 }
 0x1fc   : > { %v4259_v15 = vpack.c.bf16 %v4251_v30, %v4250_v1 }
 0x1fd   : > { %v2177_v6 = vpop.f32.mrf.mxu1 }
 0x1fe   : > { %v2187_v7 = vadd.f32 %v2177_v6, %v7203_v32  ;;  %v7782_v6 = vld [vmem:[#allocation24_spill] sm:$0xff]  ;;  %v4286_v13 = vrot.slane %v4259_v15, 2 }
 0x1ff   : > { %v3829_v24 = vshrl.u32 %v7782_v6, 16 }
 0x200   : > { %v2303_v33 = vadd.f32 %v7177_v5, %v2187_v7  ;;  %4219 = vmatmul.bf16.vlgmr.msrb.gmra.mxu3 %v7773_v36  ;;  %v7774_v5 = vld [vmem:[#allocation53_spill] sm:$0xff] }
 0x202   : > { %v2604_v41 = vpop.f32.mrf.mxu0  ;;  %v2477_v18 = vadd.f32 %v2467_v14, %v2303_v33  ;;  %v7339_v27 = vpop.f32.mrf.mxu2 }
 0x203   : > { %v7321_v3 = vadd.f32 %v2604_v41, %v2476_v2  ;;  %v3008_v38 = vpop.f32.mrf.mxu3  ;;  %v7779_v2 = vld [vmem:[#allocation33_spill] sm:$0xff] }
 0x204   : > { %v7780_v28 = vpack.c.bf16 %v7778_v44, %v7779_v2 }
 0x205   : > { %3754 = vmatmul.bf16.gmra.mxu0 %v3665_v11  ;;  %v2756_v32 = vpop.f32.mrf.mxu1 }
 0x206   : > { %v2776_v23 = vadd.f32 %v2756_v32, %v7222_v52  ;;  %v4287_v14 = vrot.slane %v7780_v28, 2 }
 0x208   : > { %v2912_v63 = vadd.f32 %v7201_v56, %v2776_v23  ;;  %3913 = vmatmul.bf16.vlgmr.msra.gmra.mxu1 %v7774_v5  ;;  %v3797_v56 = vpack.c.bf16 %v3791_v8, %v3790_v19  ;;  %v4255_v23 = vmul.f32 %v7776_v46, %v7762_v10  ;;  %v3793_v5 = vmul.f32 %v7772_v26, %v7731_v59  ;;  %v7784_v26 = vld [vmem:[#allocation48_spill] sm:$0xff] }
 0x20a   : > { %v2606_v54 = vpop.f32.mrf.mxu0  ;;  %v3028_v22 = vadd.f32 %v3008_v38, %v2912_v63  ;;  %v3833_v21 = vshll.u32 %v3797_v56, 16  ;;  %v7356_v39 = vpop.f32.mrf.mxu2  ;;  %v3792_v63 = vmul.f32 %v7771_v61, %v7730_v35  ;;  %v4092_v35 = vmul.f32 %v4083_v57, %v7682_v48 }
 0x20b   : > { %v7336_v25 = vadd.f32 %v2606_v54, %v2477_v18  ;;  %v3010_v52 = vpop.f32.mrf.mxu3  ;;  %v4288_v18 = vsel %vm1357_vm6, %v4286_v13, %v4287_v14  ;;  %v3837_v46 = vshrl.u32 %v3797_v56, 16 }
 0x20c   : > { %v3835_v11 = vrot.slane %v3833_v21, 1  ;;  %v3798_v62 = vpack.c.bf16 %v3793_v5, %v3792_v63 }
 0x20d   : > { %v2758_v34 = vpop.f32.mrf.mxu1 }
 0x20e   : > { %v2777_v45 = vadd.f32 %v2758_v34, %v7247_v51  ;;  %v7783_v51 = vld [vmem:[#allocation63_spill] sm:$0xff]  ;;  %v3841_v30 = vshll.u32 %v3798_v62, 16  ;;  %v3785_v34 = vunpack.c.l.bf16 %v7244_v4 }
 0x20f   : > { %v3831_v58 = vor.u32 %v3829_v24, %v7783_v51 }
 0x210   : > { %v2913_v49 = vadd.f32 %v7220_v31, %v2777_v45  ;;  %4224 = vmatmul.bf16.gmra.mxu3 %v7781_v60  ;;  %v3843_v29 = vrot.slane %v3841_v30, 1  ;;  %v3794_v28 = vmul.f32 %v3785_v34, %v7735_v43 }
 0x211   : > { %v3836_v38 = vsel %vm572_vm3, %v3831_v58, %v3835_v11 }
 0x212   : > { %v3182_v7 = vpop.f32.mrf.mxu0  ;;  %v3029_v33 = vadd.f32 %v3010_v52, %v2913_v49  ;;  %v7373_v45 = vpop.f32.mrf.mxu2 }
 0x213   : > { %v7347_v36 = vadd.f32 %v3182_v7, %v3028_v22  ;;  %v3013_v41 = vpop.f32.mrf.mxu3 }
 0x215   : > { %4355 = vmatmul.bf16.vlgmr.msra.gmra.mxu0 %v4288_v18  ;;  %v2761_v31 = vpop.f32.mrf.mxu1  ;;  %v7785_v18 = vld [vmem:[#allocation25_spill] sm:$0xff] }
 0x216   : > { %v2778_v0 = vadd.f32 %v2761_v31, %v7263_v37  ;;  %v4254_v37 = vmul.f32 %v7775_v42, %v7763_v40  ;;  %v4097_v42 = vpack.c.bf16 %v4092_v35, %v4092_v35  ;;  %v3845_v31 = vshrl.u32 %v3798_v62, 16 }
 0x218   : > { %v2914_v32 = vadd.f32 %v7249_v17, %v2778_v0  ;;  %3918 = vmatmul.bf16.gmra.mxu1 %v3836_v38  ;;  %v4261_v22 = vpack.c.bf16 %v4255_v23, %v4254_v37  ;;  %v4151_v56 = vshrl.u32 %v4097_v42, 16  ;;  %v4154_v44 = vshll.u32 %v4097_v42, 16 }
 0x21a   : > { %v3184_v19 = vpop.f32.mrf.mxu0  ;;  %v3030_v8 = vadd.f32 %v3013_v41, %v2914_v32  ;;  %v4289_v59 = vrot.slane %v4261_v22, 2  ;;  %v4153_v60 = vrot.slane %v4151_v56, 1  ;;  %v4156_v6 = vrot.slane %v4154_v44, 2 }
 0x21b   : > { %v7364_v54 = vadd.f32 %v3184_v19, %v3029_v33  ;;  %v3015_v17 = vpop.f32.mrf.mxu3  ;;  %v7384_v33 = vpop.f32.mrf.mxu2  ;;  %v3847_v32 = vor.u32 %v3845_v31, %v3843_v29 }
 0x21c   : > { %v4290_v48 = vsel %vm1357_vm6, %v4287_v14, %v4289_v59  ;;  %v3799_v14 = vpack.c.bf16 %v3794_v28, %v3794_v28  ;;  %v4157_v51 = vor.u32 %v4156_v6, %v4153_v60  ;;  %v4292_v5 = vsel %vm1357_vm6, %v4289_v59, %v7303_v9 }
 0x21d   : > { %v2763_v1 = vpop.f32.mrf.mxu1 }
 0x21e   : > { %v2779_v10 = vadd.f32 %v2763_v1, %v7283_v16  ;;  %v3839_v16 = vor.u32 %v3837_v46, %v3835_v11  ;;  %v3849_v41 = vshll.u32 %v3799_v14, 16  ;;  %v4158_v43 = vsel %vm1063_vm4, %v7785_v18, %v4157_v51 }
 0x220   : > { %v2915_v61 = vadd.f32 %v7275_v50, %v2779_v10  ;;  %4229 = vmatmul.bf16.gmra.mxu3 %v7784_v26  ;;  %v3844_v2 = vsel %vm572_vm3, %v3839_v16, %v3843_v29  ;;  %v3851_v23 = vrot.slane %v3849_v41, 1 }
 0x222   : > { %v3187_v40 = vpop.f32.mrf.mxu0  ;;  %v3031_v52 = vadd.f32 %v3015_v17, %v2915_v61 }
 0x223   : > { %v7375_v15 = vadd.f32 %v3187_v40, %v3030_v8  ;;  %v3018_v49 = vpop.f32.mrf.mxu3  ;;  %v7395_v8 = vpop.f32.mrf.mxu2 }
 0x225   : > { %4360 = vmatmul.bf16.gmra.mxu0 %v4290_v48  ;;  %v2766_v50 = vpop.f32.mrf.mxu1 }
 0x226   : > { %v2780_v57 = vadd.f32 %v2766_v50, %v7301_v47 }
 0x228   : > { %v2916_v4 = vadd.f32 %v7299_v12, %v2780_v57  ;;  %3923 = vmatmul.bf16.gmra.mxu1 %v3844_v2 }
 0x22a   : > { %v3189_v24 = vpop.f32.mrf.mxu0  ;;  %v3032_v21 = vadd.f32 %v3018_v49, %v2916_v4 }
 0x22b   : > { %v7382_v7 = vadd.f32 %v3189_v24, %v3031_v52  ;;  %v3020_v13 = vpop.f32.mrf.mxu3  ;;  %v7403_v61 = vpop.f32.mrf.mxu2 }
 0x22d   : > { %v2768_v47 = vpop.f32.mrf.mxu1 }
 0x22e   : > { %v2781_v58 = vadd.f32 %v2768_v47, %v7313_v20 }
 0x230   : > { %v2917_v12 = vadd.f32 %v7311_v55, %v2781_v58  ;;  %4234 = vmatmul.bf16.gmra.mxu3 %v4158_v43  ;;  %v3852_v55 = vsel %vm572_vm3, %v3847_v32, %v3851_v23 }
 0x232   : > { %v3192_v11 = vpop.f32.mrf.mxu0  ;;  %v3033_v0 = vadd.f32 %v3020_v13, %v2917_v12 }
 0x233   : > { %v7390_v38 = vadd.f32 %v3192_v11, %v3032_v21  ;;  %v3023_v63 = vpop.f32.mrf.mxu3 }
 0x235   : > { %4365 = vmatmul.bf16.gmra.mxu0 %v4292_v5  ;;  %v2771_v20 = vpop.f32.mrf.mxu1 }
 0x236   : > { %v2782_v19 = vadd.f32 %v2771_v20, %v7321_v3 }
 0x238   : > { %v2918_v37 = vadd.f32 %v7324_v53, %v2782_v19  ;;  %3928 = vmatmul.bf16.gmra.mxu1 %v3852_v55  ;;  %v7405_v53 = vpop.f32.mrf.mxu2 }
 0x23a   : > { %v3194_v17 = vpop.f32.mrf.mxu0  ;;  %v3034_v22 = vadd.f32 %v3023_v63, %v2918_v37 }
 0x23b   : > { %v7399_v1 = vadd.f32 %v3194_v17, %v3033_v0  ;;  %v3025_v62 = vpop.f32.mrf.mxu3 }
 0x23d   : > { %v2773_v10 = vpop.f32.mrf.mxu1 }
 0x23e   : > { %v2783_v35 = vadd.f32 %v2773_v10, %v7336_v25 }
 0x240   : > { %v2919_v9 = vadd.f32 %v7339_v27, %v2783_v35  ;;  %v3503_v48 = vpop.f32.mrf.mxu2 }
 0x242   : > { %v3197_v3 = vpop.f32.mrf.mxu0  ;;  %v3035_v59 = vadd.f32 %v3025_v62, %v2919_v9 }
 0x243   : > { %v3208_v26 = vadd.f32 %v3197_v3, %v3034_v22  ;;  %v3624_v46 = vpop.f32.mrf.mxu3 }
 0x245   : > { %v3321_v30 = vpop.f32.mrf.mxu1 }
 0x246   : > { %v3341_v43 = vadd.f32 %v3321_v30, %v7347_v36 }
 0x248   : > { %v3505_v57 = vpop.f32.mrf.mxu2  ;;  %v3508_v0 = vadd.f32 %v7356_v39, %v3341_v43 }
 0x24a   : > { %v3199_v40 = vpop.f32.mrf.mxu0  ;;  %v3644_v5 = vadd.f32 %v3624_v46, %v3508_v0  ;;  %v7438_v46 = vld [vmem:[#allocation4] ss:$0 sm:$0xff] }
 0x24b   : > { %v3209_v42 = vadd.f32 %v3199_v40, %v3035_v59  ;;  %v3626_v52 = vpop.f32.mrf.mxu3 }
 0x24d   : > { %v3323_v34 = vpop.f32.mrf.mxu1 }
 0x24e   : > { %v3342_v63 = vadd.f32 %v3323_v34, %v7364_v54 }
 0x250   : > { %v4053_v28 = vpop.f32.mrf.mxu2  ;;  %v3509_v37 = vadd.f32 %v7373_v45, %v3342_v63 }
 0x252   : > { %v3740_v16 = vpop.f32.mrf.mxu0  ;;  %v3645_v10 = vadd.f32 %v3626_v52, %v3509_v37 }
 0x253   : > { %v3629_v49 = vpop.f32.mrf.mxu3  ;;  %v3760_v55 = vadd.f32 %v3740_v16, %v3644_v5 }
 0x255   : > { %v3326_v50 = vpop.f32.mrf.mxu1 }
 0x256   : > { %v3343_v62 = vadd.f32 %v3326_v50, %v7375_v15 }
 0x258   : > { %v4055_v21 = vpop.f32.mrf.mxu2  ;;  %v3510_v54 = vadd.f32 %v7384_v33, %v3343_v62 }
 0x25a   : > { %v3742_v25 = vpop.f32.mrf.mxu0 }
 0x25b   : > { %v7407_v29 = vpop.f32.mrf.mxu3  ;;  %v3761_v9 = vadd.f32 %v3742_v25, %v3645_v10 }
 0x25d   : > { %v3328_v27 = vpop.f32.mrf.mxu1 }
 0x25e   : > { %v3344_v15 = vadd.f32 %v3328_v27, %v7382_v7 }
 0x260   : > { %v4058_v18 = vpop.f32.mrf.mxu2 }
 0x262   : > { %v3745_v56 = vpop.f32.mrf.mxu0 }
 0x263   : > { %v7409_v44 = vpop.f32.mrf.mxu3 }
 0x265   : > { %v3331_v2 = vpop.f32.mrf.mxu1 }
 0x266   : > { %v3345_v43 = vadd.f32 %v3331_v2, %v7390_v38 }
 0x268   : > { %v4060_v19 = vpop.f32.mrf.mxu2 }
 0x26a   : > { %v3747_v4 = vpop.f32.mrf.mxu0 }
 0x26b   : > { %v7411_v60 = vpop.f32.mrf.mxu3 }
 0x26d   : > { %v7413_v6 = vpop.f32.mrf.mxu1 }
 0x26e   : > { %v3346_v38 = vadd.f32 %v7413_v6, %v7399_v1 }
 0x270   : > { %v4063_v3 = vpop.f32.mrf.mxu2 }
 0x272   : > { %v7415_v24 = vpop.f32.mrf.mxu0 }
 0x273   : > { %v7417_v14 = vpop.f32.mrf.mxu3 }
 0x275   : > { %v3336_v13 = vpop.f32.mrf.mxu1 }
 0x276   : > { %v3347_v47 = vadd.f32 %v3336_v13, %v3208_v26 }
 0x278   : > { %v7419_v51 = vadd.f32 %v3503_v48, %v3347_v47  ;;  %v3511_v48 = vadd.f32 %v7395_v8, %v3344_v15 }
 0x27a   : > { %v7421_v58 = vpop.f32.mrf.mxu0  ;;  %v3647_v7 = vadd.f32 %v7407_v29, %v3511_v48 }
 0x27b   : > { %v7423_v41 = vpop.f32.mrf.mxu3 }
 0x27d   : > { %v3338_v12 = vpop.f32.mrf.mxu1 }
 0x27e   : > { %v3348_v31 = vadd.f32 %v3338_v12, %v3209_v42  ;;  %v3646_v42 = vadd.f32 %v3629_v49, %v3510_v54  ;;  %v3763_v12 = vadd.f32 %v3747_v4, %v3647_v7 }
 0x280   : > { %v7426_v11 = vadd.f32 %v3505_v57, %v3348_v31  ;;  %v3762_v16 = vadd.f32 %v3745_v56, %v3646_v42  ;;  %v3512_v56 = vadd.f32 %v7403_v61, %v3345_v43  ;;  %v3513_v61 = vadd.f32 %v7405_v53, %v3346_v38 }
 0x281   : > { %v3650_v53 = vadd.f32 %v7417_v14, %v7419_v51 }
 0x282   : > { %v7429_v32 = vpop.f32.mrf.mxu0  ;;  %v3648_v29 = vadd.f32 %v7409_v44, %v3512_v56  ;;  %v3649_v62 = vadd.f32 %v7411_v60, %v3513_v61  ;;  %v3651_v42 = vadd.f32 %v7423_v41, %v7426_v11 }
 0x283   : > { %v4220_v23 = vpop.f32.mrf.mxu3 }
 0x284   : > { %v3764_v4 = vadd.f32 %v7415_v24, %v3648_v29 }
 0x285   : > { %v3914_v20 = vpop.f32.mrf.mxu1 }
 0x286   : > { %v3934_v17 = vadd.f32 %v3914_v20, %v3760_v55 }
 0x288   : > { %v4073_v39 = vadd.f32 %v4053_v28, %v3934_v17  ;;  %v4065_v28 = vpop.f32.mrf.mxu2 }
 0x28a   : > { %v7433_v36 = vpop.f32.mrf.mxu0  ;;  %v4240_v26 = vadd.f32 %v4220_v23, %v4073_v39  ;;  %v3765_v39 = vadd.f32 %v7421_v58, %v3649_v62 }
 0x28b   : > { %v4222_v22 = vpop.f32.mrf.mxu3 }
 0x28d   : > { %v3916_v35 = vpop.f32.mrf.mxu1 }
 0x28e   : > { %v3935_v59 = vadd.f32 %v3916_v35, %v3761_v9 }
 0x290   : > { %v4074_v52 = vadd.f32 %v4055_v21, %v3935_v59  ;;  %v4068_v5 = vpop.f32.mrf.mxu2  ;;  %v3766_v59 = vadd.f32 %v7429_v32, %v3650_v53  ;;  %v3767_v32 = vadd.f32 %v7433_v36, %v3651_v42 }
 0x292   : > { %v4356_v30 = vpop.f32.mrf.mxu0  ;;  %v4241_v25 = vadd.f32 %v4222_v22, %v4074_v52 }
 0x293   : > { %v4376_v45 = vadd.f32 %v4356_v30, %v4240_v26  ;;  %v4225_v40 = vpop.f32.mrf.mxu3 }
 0x295   : > { %v4388_v33 = vadd.f32 %v7438_v46, %v4376_v45  ;;  %v3919_v34 = vpop.f32.mrf.mxu1 }
 0x296   : > { %v3936_v50 = vadd.f32 %v3919_v34, %v3762_v16 }
 0x297   : > { %4396 = vst [vmem:[%s7443_s24] sm:$0xff] %v4388_v33 }
 0x298   : > { %v4075_v49 = vadd.f32 %v4058_v18, %v3936_v50 }
 0x29a   : > { %v4358_v57 = vpop.f32.mrf.mxu0  ;;  %v4242_v31 = vadd.f32 %v4225_v40, %v4075_v49 }
 0x29b   : > { %v4377_v13 = vadd.f32 %v4358_v57, %v4241_v25  ;;  %v4227_v47 = vpop.f32.mrf.mxu3 }
 0x29d   : > { %v4389_v27 = vadd.f32 %v7438_v46, %v4377_v13  ;;  %v3921_v21 = vpop.f32.mrf.mxu1 }
 0x29e   : > { %v3937_v8 = vadd.f32 %v3921_v21, %v3763_v12 }
 0x29f   : > { %4397 = vst [vmem:[%s7443_s24 + $0x8] sm:$0xff] %v4389_v27 }
 0x2a0   : > { %v4076_v2 = vadd.f32 %v4060_v19, %v3937_v8  ;;  %v4070_v19 = vpop.f32.mrf.mxu2 }
 0x2a2   : > { %v4361_v0 = vpop.f32.mrf.mxu0  ;;  %v4243_v37 = vadd.f32 %v4227_v47, %v4076_v2 }
 0x2a3   : > { %v4378_v23 = vadd.f32 %v4361_v0, %v4242_v31  ;;  %v4230_v63 = vpop.f32.mrf.mxu3 }
 0x2a5   : > { %v4390_v18 = vadd.f32 %v7438_v46, %v4378_v23  ;;  %v3924_v20 = vpop.f32.mrf.mxu1 }
 0x2a6   : > { %v3938_v55 = vadd.f32 %v3924_v20, %v3764_v4 }
 0x2a7   : > { %4398 = vst [vmem:[%s7443_s24 + $0x10] sm:$0xff] %v4390_v18 }
 0x2a8   : > { %v4077_v1 = vadd.f32 %v4063_v3, %v3938_v55  ;;  %v4371_v40 = vpop.f32.mrf.mxu2 }
 0x2aa   : > { %v4363_v17 = vpop.f32.mrf.mxu0  ;;  %v4244_v35 = vadd.f32 %v4230_v63, %v4077_v1 }
 0x2ab   : > { %v4379_v22 = vadd.f32 %v4363_v17, %v4243_v37  ;;  %v4232_v10 = vpop.f32.mrf.mxu3 }
 0x2ad   : > { %v4391_v44 = vadd.f32 %v7438_v46, %v4379_v22  ;;  %v3926_v6 = vpop.f32.mrf.mxu1 }
 0x2ae   : > { %v3939_v24 = vadd.f32 %v3926_v6, %v3765_v39 }
 0x2af   : > { %4399 = vst [vmem:[%s7443_s24 + $0x18] sm:$0xff] %v4391_v44 }
 0x2b0   : > { %v4078_v60 = vadd.f32 %v4065_v28, %v3939_v24  ;;  %v4373_v13 = vpop.f32.mrf.mxu2 }
 0x2b2   : > { %v4366_v9 = vpop.f32.mrf.mxu0  ;;  %v4245_v15 = vadd.f32 %v4232_v10, %v4078_v60 }
 0x2b3   : > { %v4380_v54 = vadd.f32 %v4366_v9, %v4244_v35  ;;  %v4235_v45 = vpop.f32.mrf.mxu3 }
 0x2b5   : > { %v4392_v3 = vadd.f32 %v7438_v46, %v4380_v54  ;;  %v3929_v26 = vpop.f32.mrf.mxu1 }
 0x2b6   : > { %v3940_v30 = vadd.f32 %v3929_v26, %v3766_v59 }
 0x2b7   : > { %4400 = vst [vmem:[%s7443_s24 + $0x20] sm:$0xff] %v4392_v3 }
 0x2b8   : > { %v4079_v58 = vadd.f32 %v4068_v5, %v3940_v30 }
 0x2ba   : > { %v4246_v14 = vadd.f32 %v4235_v45, %v4079_v58  ;;  %v4368_v51 = vpop.f32.mrf.mxu0 }
 0x2bb   : > { %v4381_v52 = vadd.f32 %v4368_v51, %v4245_v15  ;;  %v4237_v57 = vpop.f32.mrf.mxu3 }
 0x2bc   : > { %v4382_v33 = vadd.f32 %v4371_v40, %v4246_v14 }
 0x2bd   : > { %v4393_v34 = vadd.f32 %v7438_v46, %v4381_v52  ;;  %v3931_v16 = vpop.f32.mrf.mxu1 }
 0x2be   : > { %v4394_v48 = vadd.f32 %v7438_v46, %v4382_v33  ;;  %v3941_v50 = vadd.f32 %v3931_v16, %v3767_v32 }
 0x2bf   : > { %4401 = vst [vmem:[%s7443_s24 + $0x28] sm:$0xff] %v4393_v34 }
 0x2c0   : > { %4402 = vst [vmem:[%s7443_s24 + $0x30] sm:$0xff] %v4394_v48  ;;  %v4080_v25 = vadd.f32 %v4070_v19, %v3941_v50 }
 0x2c2   : > { %v4247_v28 = vadd.f32 %v4237_v57, %v4080_v25 }
 0x2c4   : > { %v4383_v41 = vadd.f32 %v4373_v13, %v4247_v28 }
 0x2c6   : > { %v4395_v11 = vadd.f32 %v7438_v46, %v4383_v41 }
 0x2c8   : > { %4403 = vst [vmem:[%s7443_s24 + $0x38] sm:$0xff] %v4395_v11 }
 0x2c9 PF: > { %s16_s17 = sadd.s32 1, %s5898_s17   ;;  %s7786_s15 = smov %s5894_s16 }
 0x2ca   : > { %p13_p8 = scmp.ge.s32.totalorder %s16_s17, 4   ;;  %s7787_s16 = smov %s7789_s27 }
 0x2cc   :  { %15 = sbr.rel (!%p13_p8) target bundleno = 3 (0x3), region = 106 }
 0x2d1   :  { %4434 = vsyncpa [#allocation3], 1 }
 0x2d2   :  { %4436 = vsyncpa [#allocation3 + $0x1], 1 }
 0x2d3   :  { %4437 = vsyncpa [#allocation5], 1 }

// kernel: decoder_forward.6
= control target key start
LH: loop header
LB: loop body
LE: loop exit
PB: predicated region body
PF: predicated region fallthrough
CT: control target
= control target key end

     0   :  { %9 = vsyncpa [#allocation3], 0  ;;  %s8132_s0 = inlined_call_operand.vmem [shape: bf16[2,36,256], index: 0, kind: input, shape index: {}]   ;;  %s8133_s1 = inlined_call_operand.hbm [shape: bf16[25,256,128], index: 1, kind: input, shape index: {}]   ;;  %s8134_s2 = inlined_call_operand.hbm [shape: f32[1,128], index: 2, kind: input, shape index: {}]   ;;  %s8135_s3 = inlined_call_operand.hbm [shape: bf16[5,16,1], index: 3, kind: input, shape index: {}]   ;;  %s8136_s4 = inlined_call_operand.vmem [shape: bf16[2,16,128], index: 4, kind: output, shape index: {}]  }
   0x1   :  { %10 = vsyncpa [#allocation5], 0  ;;  %s7509_s15 = smov 0   ;;  %s7511_s16 = smov 0  }
   0x2   :  { %s7513_s17 = smov 0  }
   0x3 LB: > { %s176_s20 = sshll.u32 %s8134_s2, 4  ;;  %s5257_s21 = sadd.s32 4294967295, %s7475_s17   ;;  %s7475_s17 = sphi %s7513_s17, %s16_s17   ;;  %s7471_s16 = sphi %s7511_s16, %s8141_s16   ;;  %s7467_s15 = sphi %s7509_s15, %s8140_s15   ;;  %s177_s20 = int_to_ptr.hbm [resolvable:$true] %s176_s20 }
   0x4   : > { %p5259_p0 = scmp.ge.s32.totalorder %s7475_s17, 1  ;;  %p150_p1 = scmp.lt.s32.totalorder %s7475_s17, 3 }
   0x5   : > { %p7530_p2 = scmp.eq.s32.totalorder %s5257_s21, 0  ;;  %s7477_s24 = smov [#allocation4]  }
   0x6   : > { %p7534_p3 = pnand %p5259_p0, %p150_p1  ;;  %s178_s25 = sshll.u32 %s7477_s24, 4  ;;  %s179_s25 = int_to_ptr.vmem [resolvable:$true] %s178_s25 }
   0x7   : > { %s28_s27 = sadd.s32 1, %s7471_s16  ;;  %s161_s30 = sshll.u32 %s8133_s1, 4  ;;  %s162_s30 = int_to_ptr.hbm [resolvable:$true] %s161_s30 }
   0x8   : > { %p7302_p4 = pneg %p7534_p3  ;;  %p30_p6 = scmp.ge.s32.totalorder %s28_s27, 2 }
   0x9   : > { %s7478_s5 = smov [#allocation2]   ;;  %s187_s9 = sshll.u32 %s8135_s3, 4  ;;  %s188_s9 = int_to_ptr.hbm [resolvable:$true] %s187_s9 }
   0xa   : > { %p7542_p5 = pnand %p7530_p2, %p7302_p4  ;;  %s8143_s27 = smov (%p30_p6, %s28_s27), 0 }
   0xb   : > { %s163_s6 = sshll.u32 %s7478_s5, 4  ;;  %s7479_s10 = smov 64   ;;  %s164_s6 = int_to_ptr.vmem [resolvable:$true] %s163_s6 }
   0xc   : > { %7308 = dma.hbm_to_vmem [thread:$0]  (!%p7542_p5), %s177_s20, 16, %s179_s25, [#allocation5]  }
   0xd   : > { %s7480_s11 = smov 4   ;;  %s7481_s12 = smov [#allocation6]  }
   0xe   : > { %7305 = dma.hbm_to_vmem [thread:$0]  (!%p7542_p5), %s162_s30, 51200, %s164_s6, [#allocation3], %s7479_s10, %s7479_s10, %s7480_s11  }
   0xf   : > { %s189_s13 = sshll.u32 %s7481_s12, 4  ;;  %213 = sbr.rel (%p7534_p3) target bundleno = 664 (0x298), region = 36  ;;  %s190_s13 = int_to_ptr.vmem [resolvable:$true] %s189_s13 }
  0x10   : > { %7311 = dma.hbm_to_vmem [thread:$0]  (!%p7542_p5), %s188_s9, 640, %s190_s13, [#allocation5], %s7479_s10, %s7479_s10, %s7480_s11  }
  0x14   : > { %7458 = dma.done.wait (%p7530_p2), [#allocation3], 51200  }
  0x15   : > { %7460 = vsyncadd (%p7530_p2), [#allocation3], 4294916096 }
  0x16   : > { %7462 = dma.done.wait (%p7530_p2), [#allocation5], 656  }
  0x17   : > { %7464 = vsyncadd (%p7530_p2), [#allocation5], 4294966640  ;;  %v7482_v0 = vmov 0   ;;  %v339_v1 = vld [vmem:[#allocation6 + $0x8] sm:$0xf]  ;;  %v6889_v4 = vld [vmem:[#allocation2 + $0x38] sm:$0xff] }
  0x18   : > { %7350 = vset.pattern.permute.xlu1 %v7482_v0  ;;  %7349 = vset.pattern.permute.xlu0 %v7482_v0  ;;  %v271_v2 = vld [vmem:[#allocation6] sm:$0xf]  ;;  %v878_v3 = vld [vmem:[#allocation6 + $0x18] sm:$0xf]  ;;  %v6888_v6 = vld [vmem:[#allocation2 + $0x30] sm:$0xff]  ;;  %p254_p7 = scmp.lt.s32.totalorder %s7467_s15, 1 }
  0x19   : > { %7351 = vset.pattern.permute.xlu2 %v7482_v0  ;;  %343 = vperm.xlu0 %7349, %v339_v1   ;;  %v6897_v5 = vld [vmem:[#allocation2 + $0x78] sm:$0xff]  ;;  %v340_v8 = vld [vmem:[#allocation6 + $0xc] sm:$0xf]  ;;  %v272_v10 = vld [vmem:[#allocation6 + $0x4] sm:$0xf]  ;;  %vm906_vm0 = vcmask 1042432  }
  0x1a   : > { %275 = vperm.xlu1 %7350, %v271_v2   ;;  %882 = vperm.xlu2 %7351, %v878_v3   ;;  %v6905_v7 = vld [vmem:[#allocation2 + $0xb8] sm:$0xff]  ;;  %v6896_v11 = vld [vmem:[#allocation2 + $0x70] sm:$0xff]  ;;  %v6887_v15 = vld [vmem:[#allocation2 + $0x28] sm:$0xff]  ;;  %s8145_s15 = smov (!%p254_p7, %s7467_s15), 1  ;;  %vm369_vm1 = vcmask 1040384   ;;  %vm1147_vm4 = vcmask 1043456  }
  0x1b   : > { %666 = vmatpush.bf16.msra.mxu2 %v6889_v4  ;;  %680 = vmatpush.bf16.msra.mxu3 %v6897_v5  ;;  %v6913_v9 = vld [vmem:[#allocation2 + $0xf8] sm:$0xff]  ;;  %v6904_v12 = vld [vmem:[#allocation2 + $0xb0] sm:$0xff]  ;;  %v6895_v16 = vld [vmem:[#allocation2 + $0x68] sm:$0xff]  ;;  %v7483_v4 = vmov 839922192   ;;  %s7289_s14 = smul.u32 40, %s8145_s15 }
  0x1c   : > { %542 = vmatpush.bf16.msra.mxu0 %v6905_v7  ;;  %556 = vmatpush.bf16.msra.mxu1 %v6913_v9  ;;  %v6912_v13 = vld [vmem:[#allocation2 + $0xf0] sm:$0xff]  ;;  %v879_v14 = vld [vmem:[#allocation6 + $0x1c] sm:$0xf]  ;;  %v6903_v17 = vld [vmem:[#allocation2 + $0xa8] sm:$0xff]  ;;  %v279_v5 = vunpack.c.l.s4 %v7483_v4  ;;  %vm419_vm2 = vsmask.f32 7424 }
  0x1d   : > { %v6911_v18 = vld [vmem:[#allocation2 + $0xe8] sm:$0xff]  ;;  %v6886_v19 = vld [vmem:[#allocation2 + $0x20] sm:$0xff]  ;;  %v6885_v25 = vld [vmem:[#allocation2 + $0x18] sm:$0xff]  ;;  %s7587_s20 = scalar_lea.vmem %s8132_s0, %s7289_s14  ;;  %vm956_vm3 = vsmask.f32 6400  ;;  %vm741_vm5 = vcmask 1046528  }
  0x1e   : > { %v1121_v20 = vld [vmem:[#allocation6 + $0x20] sm:$0xf]  ;;  %v1122_v21 = vld [vmem:[#allocation6 + $0x24] sm:$0xf]  ;;  %v6893_v26 = vld [vmem:[#allocation2 + $0x58] sm:$0xff]  ;;  %v7575_v9 = vunpack.c.0.s8 %v279_v5  ;;  %vm1201_vm6 = vcmask 1045504  }
  0x1f   : > { %667 = vmatpush.bf16.msra.mxu2 %v6888_v6  ;;  %681 = vmatpush.bf16.msra.mxu3 %v6896_v11  ;;  %v6894_v22 = vld [vmem:[#allocation2 + $0x60] sm:$0xff]  ;;  %v6901_v27 = vld [vmem:[#allocation2 + $0x98] sm:$0xff]  ;;  %v6884_v29 = vld [vmem:[#allocation2 + $0x10] sm:$0xff]  ;;  %vm1975_vm7 = vsmask.f32 4352  ;;  %vm1528_vm8 = vcmask 1044480  }
  0x20   : > { %543 = vmatpush.bf16.msra.mxu0 %v6904_v12  ;;  %557 = vmatpush.bf16.msra.mxu1 %v6912_v13  ;;  %v6902_v23 = vld [vmem:[#allocation2 + $0xa0] sm:$0xff]  ;;  %v6909_v28 = vld [vmem:[#allocation2 + $0xd8] sm:$0xff]  ;;  %v6892_v30 = vld [vmem:[#allocation2 + $0x50] sm:$0xff]  ;;  %vm1578_vm9 = vsmask.f32 5376  ;;  %s6881_s21 = sshll.u32 %s8145_s15, 3 }
  0x21   : > { %352 = vperm.xlu0 %7349, %v340_v8   ;;  %v6910_v24 = vld [vmem:[#allocation2 + $0xe0] sm:$0xff]  ;;  %v6900_v31 = vld [vmem:[#allocation2 + $0x90] sm:$0xff]  ;;  %v6883_v33 = vld [vmem:[#allocation2 + $0x8] sm:$0xff]  ;;  %s267_s24 = scalar_lea.vmem %s8136_s4, %s6881_s21 }
  0x22   : > { %284 = vperm.xlu1 %7350, %v272_v10   ;;  %891 = vperm.xlu2 %7351, %v879_v14   ;;  %v6908_v32 = vld [vmem:[#allocation2 + $0xd0] sm:$0xff]  ;;  %v6891_v34 = vld [vmem:[#allocation2 + $0x48] sm:$0xff]  ;;  %v6882_v37 = vld [vmem:[#allocation2] sm:$0xff] }
  0x23   : > { %668 = vmatpush.bf16.msra.mxu2 %v6887_v15  ;;  %682 = vmatpush.bf16.msra.mxu3 %v6895_v16  ;;  %v6899_v35 = vld [vmem:[#allocation2 + $0x88] sm:$0xff]  ;;  %v6937_v38 = vld [vmem:[#allocation2 + $0x1b8] sm:$0xff]  ;;  %v6890_v39 = vld [vmem:[#allocation2 + $0x40] sm:$0xff] }
  0x24   : > { %544 = vmatpush.bf16.msra.mxu0 %v6903_v17  ;;  %558 = vmatpush.bf16.msra.mxu1 %v6911_v18  ;;  %v6907_v36 = vld [vmem:[#allocation2 + $0xc8] sm:$0xff]  ;;  %v6898_v40 = vld [vmem:[#allocation2 + $0x80] sm:$0xff]  ;;  %v6945_v41 = vld [vmem:[#allocation2 + $0x1f8] sm:$0xff] }
  0x25   : > { %v6906_v42 = vld [vmem:[#allocation2 + $0xc0] sm:$0xff]  ;;  %v6921_v43 = vld [vmem:[#allocation2 + $0x138] sm:$0xff]  ;;  %v6936_v45 = vld [vmem:[#allocation2 + $0x1b0] sm:$0xff] }
  0x26   : > { %v6929_v44 = vld [vmem:[#allocation2 + $0x178] sm:$0xff]  ;;  %v6944_v46 = vld [vmem:[#allocation2 + $0x1f0] sm:$0xff]  ;;  %v6935_v47 = vld [vmem:[#allocation2 + $0x1a8] sm:$0xff] }
  0x27   : > { %669 = vmatpush.bf16.msra.mxu2 %v6886_v19  ;;  %683 = vmatpush.bf16.msra.mxu3 %v6894_v22  ;;  %v6943_v48 = vld [vmem:[#allocation2 + $0x1e8] sm:$0xff]  ;;  %v6934_v49 = vld [vmem:[#allocation2 + $0x1a0] sm:$0xff]  ;;  %v6920_v51 = vld [vmem:[#allocation2 + $0x130] sm:$0xff] }
  0x28   : > { %545 = vmatpush.bf16.msra.mxu0 %v6902_v23  ;;  %559 = vmatpush.bf16.msra.mxu1 %v6910_v24  ;;  %v6942_v50 = vld [vmem:[#allocation2 + $0x1e0] sm:$0xff]  ;;  %v6928_v52 = vld [vmem:[#allocation2 + $0x170] sm:$0xff]  ;;  %v6933_v53 = vld [vmem:[#allocation2 + $0x198] sm:$0xff] }
  0x29   : > { %1125 = vperm.xlu0 %7349, %v1121_v20   ;;  %v6941_v54 = vld [vmem:[#allocation2 + $0x1d8] sm:$0xff]  ;;  %v6919_v55 = vld [vmem:[#allocation2 + $0x128] sm:$0xff]  ;;  %v6932_v57 = vld [vmem:[#allocation2 + $0x190] sm:$0xff] }
  0x2a   : > { %1134 = vperm.xlu1 %7350, %v1122_v21   ;;  %v6927_v56 = vld [vmem:[#allocation2 + $0x168] sm:$0xff]  ;;  %v6940_v58 = vld [vmem:[#allocation2 + $0x1d0] sm:$0xff]  ;;  %v6918_v59 = vld [vmem:[#allocation2 + $0x120] sm:$0xff] }
  0x2b   : > { %670 = vmatpush.bf16.msra.mxu2 %v6885_v25  ;;  %684 = vmatpush.bf16.msra.mxu3 %v6893_v26  ;;  %v6926_v60 = vld [vmem:[#allocation2 + $0x160] sm:$0xff]  ;;  %v6931_v62 = vld [vmem:[#allocation2 + $0x188] sm:$0xff]  ;;  %v6917_v0 = vld [vmem:[#allocation2 + $0x118] sm:$0xff] }
  0x2c   : > { %546 = vmatpush.bf16.msra.mxu0 %v6901_v27  ;;  %560 = vmatpush.bf16.msra.mxu1 %v6909_v28  ;;  %v6939_v63 = vld [vmem:[#allocation2 + $0x1c8] sm:$0xff]  ;;  %v6925_v1 = vld [vmem:[#allocation2 + $0x158] sm:$0xff]  ;;  %v6930_v2 = vld [vmem:[#allocation2 + $0x180] sm:$0xff] }
  0x2d   : > { %v6938_v3 = vld [vmem:[#allocation2 + $0x1c0] sm:$0xff]  ;;  %v6916_v6 = vld [vmem:[#allocation2 + $0x110] sm:$0xff]  ;;  %v6915_v10 = vld [vmem:[#allocation2 + $0x108] sm:$0xff] }
  0x2e   : > { %v6924_v7 = vld [vmem:[#allocation2 + $0x150] sm:$0xff]  ;;  %v6923_v11 = vld [vmem:[#allocation2 + $0x148] sm:$0xff]  ;;  %v6914_v14 = vld [vmem:[#allocation2 + $0x100] sm:$0xff] }
  0x2f   : > { %671 = vmatpush.bf16.msra.mxu2 %v6884_v29  ;;  %685 = vmatpush.bf16.msra.mxu3 %v6892_v30  ;;  %v6922_v15 = vld [vmem:[#allocation2 + $0x140] sm:$0xff]  ;;  %v876_v18 = vld [vmem:[%s7587_s20 + $0x10] sm:$0x33]  ;;  %v7602_v25 = vld [vmem:[%s7587_s20 + $0x8] sm:$0xff] }
  0x30   : > { %547 = vmatpush.bf16.msra.mxu0 %v6900_v31  ;;  %561 = vmatpush.bf16.msra.mxu1 %v6908_v32  ;;  %v7597_v21 = vld [vmem:[%s7587_s20] sm:$0xee]  ;;  %v7599_v24 = vunpack.c.l.bf16 %v876_v18  ;;  %v7606_v28 = vunpack.c.h.bf16 %v876_v18  ;;  %v7614_v31 = vunpack.c.l.bf16 %v7602_v25 }
  0x31   : > { %v898_v27 = vunpack.c.l.bf16 %v7597_v21 }
  0x33   : > { %672 = vmatpush.bf16.msra.mxu2 %v6883_v33  ;;  %686 = vmatpush.bf16.msra.mxu3 %v6891_v34  ;;  %v899_v33 = vunpack.c.h.bf16 %v7597_v21  ;;  %v7620_v34 = vunpack.c.h.bf16 %v7602_v25 }
  0x34   : > { %548 = vmatpush.bf16.msra.mxu0 %v6899_v35  ;;  %562 = vmatpush.bf16.msra.mxu1 %v6907_v36  ;;  %v269_v36 = vld [vmem:[%s7587_s20] sm:$0xff] }
  0x37   : > { %673 = vmatpush.bf16.msra.mxu2 %v6882_v37  ;;  %687 = vmatpush.bf16.msra.mxu3 %v6890_v39 }
  0x38   : > { %549 = vmatpush.bf16.msra.mxu0 %v6898_v40  ;;  %563 = vmatpush.bf16.msra.mxu1 %v6906_v42 }
  0x3b   : > { %1089 = vmatpush.bf16.msrb.mxu2 %v6937_v38  ;;  %1103 = vmatpush.bf16.msrb.mxu3 %v6945_v41  ;;  %v7633_v41 = vld [vmem:[%s7587_s20 + $0x10] sm:$0x11] }
  0x3c   : > { %846 = vmatpush.bf16.msrb.mxu0 %v6921_v43  ;;  %860 = vmatpush.bf16.msrb.mxu1 %v6929_v44 }
  0x3f   : > { %1090 = vmatpush.bf16.msrb.mxu2 %v6936_v45  ;;  %1104 = vmatpush.bf16.msrb.mxu3 %v6944_v46 }
  0x40   : > { %847 = vmatpush.bf16.msrb.mxu0 %v6920_v51  ;;  %861 = vmatpush.bf16.msrb.mxu1 %v6928_v52  ;;  %v363_v52 = vunpack.c.l.bf16 %v7633_v41 }
  0x43   : > { %1091 = vmatpush.bf16.msrb.mxu2 %v6935_v47  ;;  %1105 = vmatpush.bf16.msrb.mxu3 %v6943_v48 }
  0x44   : > { %848 = vmatpush.bf16.msrb.mxu0 %v6919_v55  ;;  %862 = vmatpush.bf16.msrb.mxu1 %v6927_v56 }
  0x47   : > { %1092 = vmatpush.bf16.msrb.mxu2 %v6934_v49  ;;  %1106 = vmatpush.bf16.msrb.mxu3 %v6942_v50  ;;  %v291_v49 = vunpack.c.l.bf16 %v269_v36  ;;  %v292_v50 = vunpack.c.h.bf16 %v269_v36 }
  0x48   : > { %849 = vmatpush.bf16.msrb.mxu0 %v6918_v59  ;;  %863 = vmatpush.bf16.msrb.mxu1 %v6926_v60  ;;  %v364_v59 = vunpack.c.h.bf16 %v7633_v41 }
  0x4b   : > { %1093 = vmatpush.bf16.msrb.mxu2 %v6933_v53  ;;  %1107 = vmatpush.bf16.msrb.mxu3 %v6941_v54 }
  0x4c   : > { %850 = vmatpush.bf16.msrb.mxu0 %v6917_v0  ;;  %864 = vmatpush.bf16.msrb.mxu1 %v6925_v1 }
  0x4f   : > { %1094 = vmatpush.bf16.msrb.mxu2 %v6932_v57  ;;  %1108 = vmatpush.bf16.msrb.mxu3 %v6940_v58 }
  0x50   : > { %851 = vmatpush.bf16.msrb.mxu0 %v6916_v6  ;;  %865 = vmatpush.bf16.msrb.mxu1 %v6924_v7 }
  0x53   : > { %1095 = vmatpush.bf16.msrb.mxu2 %v6931_v62  ;;  %1109 = vmatpush.bf16.msrb.mxu3 %v6939_v63 }
  0x54   : > { %852 = vmatpush.bf16.msrb.mxu0 %v6915_v10  ;;  %866 = vmatpush.bf16.msrb.mxu1 %v6923_v11 }
  0x57   : > { %1096 = vmatpush.bf16.msrb.mxu2 %v6930_v2  ;;  %1110 = vmatpush.bf16.msrb.mxu3 %v6938_v3  ;;  %v6969_v2 = vld [vmem:[#allocation2 + $0x2b8] sm:$0xff] }
  0x58   : > { %853 = vmatpush.bf16.msrb.mxu0 %v6914_v14  ;;  %867 = vmatpush.bf16.msrb.mxu1 %v6922_v15  ;;  %v6977_v3 = vld [vmem:[#allocation2 + $0x2f8] sm:$0xff] }
  0x74   : > { %v883_v61 = vpop.permute.xlu2 %882 }
  0x75   : > { %v888_v12 = vperm.slane %v883_v61, %v7575_v9 }
  0x77   : > { %v7580_v16 = vunpack.c.l.bf16 %v888_v12 }
  0x79   : > { %v7591_v19 = vrot.slane %v7580_v16, 5 }
  0x7b   : > { %v913_v37 = vmul.f32 %v7591_v19, %v898_v27  ;;  %v914_v45 = vmul.f32 %v7591_v19, %v899_v33 }
  0x7c   : > { %v892_v8 = vpop.permute.xlu2 %891 }
  0x7d   : > { %v897_v13 = vperm.slane %v892_v8, %v7575_v9 }
  0x7f   : > { %v7582_v17 = vunpack.c.l.bf16 %v897_v13 }
  0x81   : > { %v7594_v20 = vrot.slane %v7582_v17, 5 }
  0x83   : > { %v7611_v30 = vsel %vm906_vm0, %v7591_v19, %v7594_v20  ;;  %v917_v32 = vmul.f32 %v7594_v20, %v7599_v24  ;;  %v918_v39 = vmul.f32 %v7594_v20, %v7606_v28 }
  0x84   : > { %v915_v38 = vmul.f32 %v7611_v30, %v7614_v31  ;;  %v916_v46 = vmul.f32 %v7611_v30, %v7620_v34 }
  0x85   : > { %v921_v44 = vpack.c.bf16 %v917_v32, %v917_v32  ;;  %v922_v54 = vpack.c.bf16 %v918_v39, %v918_v39  ;;  %v6976_v32 = vld [vmem:[#allocation2 + $0x2f0] sm:$0xff] }
  0x86   : > { %v919_v53 = vpack.c.bf16 %v915_v38, %v913_v37  ;;  %v920_v61 = vpack.c.bf16 %v916_v46, %v914_v45 }
  0x87   : > { %v966_v60 = vshrl.u32 %v921_v44, 16  ;;  %v969_v1 = vshll.u32 %v921_v44, 16  ;;  %v983_v6 = vshrl.u32 %v922_v54, 16  ;;  %v986_v7 = vshll.u32 %v922_v54, 16  ;;  %v6975_v54 = vld [vmem:[#allocation2 + $0x2e8] sm:$0xff] }
  0x88   : > { %v958_v5 = vshrl.u32 %v919_v53, 16  ;;  %v978_v27 = vshll.u32 %v920_v61, 16 }
  0x89   : > { %v968_v38 = vrot.slane %v966_v60, 1  ;;  %v971_v39 = vrot.slane %v969_v1, 2 }
  0x8b   : > { %v344_v22 = vpop.permute.xlu0 %343  ;;  %v972_v60 = vor.u32 %v971_v39, %v968_v38  ;;  %v6960_v38 = vld [vmem:[#allocation2 + $0x270] sm:$0xff]  ;;  %v736_v39 = vunpack.c.h.b16 %v7633_v41 }
  0x8c   : > { %v276_v23 = vpop.permute.xlu1 %275  ;;  %v349_v26 = vperm.slane %v344_v22, %v7575_v9 }
  0x8d   : > { %v281_v29 = vperm.slane %v276_v23, %v7575_v9  ;;  %v961_v23 = vshll.u32 %v919_v53, 16  ;;  %v6967_v53 = vld [vmem:[#allocation2 + $0x2a8] sm:$0xff] }
  0x8e   : > { %v7622_v35 = vunpack.c.l.bf16 %v349_v26  ;;  %v975_v26 = vshrl.u32 %v920_v61, 16 }
  0x8f   : > { %v7630_v40 = vunpack.c.l.bf16 %v281_v29  ;;  %v6968_v29 = vld [vmem:[#allocation2 + $0x2b0] sm:$0xff] }
  0x90   : > { %v7641_v51 = vrot.slane %v7622_v35, 7 }
  0x91   : > { %v297_v57 = vmul.f32 %v7630_v40, %v291_v49  ;;  %v298_v58 = vmul.f32 %v7630_v40, %v292_v50 }
  0x92   : > { %v376_v4 = vmul.f32 %v7641_v51, %v291_v49  ;;  %v377_v14 = vmul.f32 %v7641_v51, %v292_v50  ;;  %v963_v49 = vrot.slane %v961_v23, 2  ;;  %v977_v50 = vrot.slane %v975_v26, 1 }
  0x93   : > { %v353_v42 = vpop.permute.xlu0 %352  ;;  %v735_v23 = vunpack.c.l.b16 %v7633_v41  ;;  %v732_v26 = vunpack.c.h.b16 %v7597_v21 }
  0x94   : > { %v285_v43 = vpop.permute.xlu1 %284  ;;  %v358_v47 = vperm.slane %v353_v42, %v7575_v9  ;;  %v985_v42 = vrot.slane %v983_v6, 1 }
  0x95   : > { %v290_v48 = vperm.slane %v285_v43, %v7575_v9  ;;  %v988_v43 = vrot.slane %v986_v7, 2 }
  0x96   : > { %v7644_v55 = vunpack.c.l.bf16 %v358_v47  ;;  %v960_v47 = vrot.slane %v958_v5, 1 }
  0x97   : > { %v7646_v56 = vunpack.c.l.bf16 %v290_v48 }
  0x98   : > { %v7652_v62 = vrot.slane %v7644_v55, 7  ;;  %v964_v7 = vor.u32 %v963_v49, %v960_v47 }
  0x99   : > { %v299_v63 = vmul.f32 %v7646_v56, %v7614_v31  ;;  %v300_v0 = vmul.f32 %v7646_v56, %v7620_v34 }
  0x9a   : > { %v7662_v11 = vsel %vm369_vm1, %v7641_v51, %v7652_v62  ;;  %v380_v12 = vmul.f32 %v7652_v62, %v363_v52  ;;  %v381_v18 = vmul.f32 %v7652_v62, %v364_v59  ;;  %v980_v52 = vrot.slane %v978_v27, 2 }
  0x9b   : > { %v301_v8 = vpack.c.bf16 %v299_v63, %v297_v57  ;;  %v302_v10 = vpack.c.bf16 %v300_v0, %v298_v58  ;;  %v378_v13 = vmul.f32 %v7662_v11, %v7614_v31  ;;  %v379_v15 = vmul.f32 %v7662_v11, %v7620_v34  ;;  %v1126_v5 = vpop.permute.xlu0 %1125 }
  0x9c   : > { %v384_v22 = vpack.c.bf16 %v380_v12, %v380_v12  ;;  %v385_v37 = vpack.c.bf16 %v381_v18, %v381_v18  ;;  %v1135_v6 = vpop.permute.xlu1 %1134  ;;  %v731_v12 = vunpack.c.l.b16 %v7597_v21  ;;  %v6974_v18 = vld [vmem:[#allocation2 + $0x2e0] sm:$0xff]  ;;  %v734_v27 = vunpack.c.h.b16 %v7602_v25 }
  0x9d   : > { %674 = vmatmul.bf16.vlgmr.msra.gmra.mxu2 %v301_v8  ;;  %688 = vmatmul.bf16.vlgmr.msra.gmra.mxu3 %v302_v10  ;;  %v382_v33 = vpack.c.bf16 %v378_v13, %v376_v4  ;;  %v383_v36 = vpack.c.bf16 %v379_v15, %v377_v14  ;;  %v6961_v4 = vld [vmem:[#allocation2 + $0x278] sm:$0xff]  ;;  %v981_v8 = vor.u32 %v980_v52, %v977_v50  ;;  %v6966_v15 = vld [vmem:[#allocation2 + $0x2a0] sm:$0xff]  ;;  %v6951_v50 = vld [vmem:[#allocation2 + $0x228] sm:$0xff] }
  0x9e   : > { %1495 = vmatpush.bf16.msra.mxu2 %v6969_v2  ;;  %1509 = vmatpush.bf16.msra.mxu3 %v6977_v3  ;;  %v428_v45 = vshll.u32 %v384_v22, 16  ;;  %v440_v48 = vshll.u32 %v385_v37, 16  ;;  %v6953_v3 = vld [vmem:[#allocation2 + $0x238] sm:$0xff]  ;;  %v989_v10 = vor.u32 %v988_v43, %v985_v42  ;;  %v733_v22 = vunpack.c.l.b16 %v7602_v25  ;;  %v6952_v37 = vld [vmem:[#allocation2 + $0x230] sm:$0xff]  ;;  %v1119_v42 = vld [vmem:[%s7587_s20] sm:$0xcc] }
  0x9f   : > { %v423_v44 = vshll.u32 %v382_v33, 16  ;;  %v435_v46 = vshll.u32 %v383_v36, 16  ;;  %v421_v57 = vshrl.u32 %v382_v33, 16  ;;  %v433_v59 = vshrl.u32 %v383_v36, 16  ;;  %v6959_v52 = vld [vmem:[#allocation2 + $0x268] sm:$0xff]  ;;  %v6994_v25 = vld [vmem:[#allocation2 + $0x380] sm:$0xff] }
  0xa0   : > { %v430_v0 = vrot.slane %v428_v45, 1  ;;  %v442_v2 = vrot.slane %v440_v48, 1  ;;  %v1131_v33 = vperm.slane %v1126_v5, %v7575_v9  ;;  %v1140_v36 = vperm.slane %v1135_v6, %v7575_v9  ;;  %v6973_v45 = vld [vmem:[#allocation2 + $0x2d8] sm:$0xff] }
  0xa1   : > { %v425_v58 = vrot.slane %v423_v44, 1  ;;  %v437_v61 = vrot.slane %v435_v46, 1  ;;  %v973_v21 = vsel %vm956_vm3, %v964_v7, %v972_v60  ;;  %v990_v43 = vsel %vm956_vm3, %v981_v8, %v989_v10  ;;  %v6965_v44 = vld [vmem:[#allocation2 + $0x298] sm:$0xff]  ;;  %v6950_v7 = vld [vmem:[#allocation2 + $0x220] sm:$0xff] }
  0xa2   : > { %1496 = vmatpush.bf16.msra.mxu2 %v6968_v29  ;;  %1510 = vmatpush.bf16.msra.mxu3 %v6976_v32  ;;  %v7679_v29 = vrot.slane %v7630_v40, 4  ;;  %v7682_v32 = vrot.slane %v7646_v56, 4  ;;  %v737_v46 = vpack.c.b16 %v733_v22, %v731_v12  ;;  %v739_v9 = vpack.c.b16 %v735_v23, %v735_v23  ;;  %v6958_v8 = vld [vmem:[#allocation2 + $0x260] sm:$0xff]  ;;  %v6971_v23 = vld [vmem:[#allocation2 + $0x2c8] sm:$0xff] }
  0xa3   : > { %v426_v63 = vor.u32 %v425_v58, %v421_v57  ;;  %v438_v1 = vor.u32 %v437_v61, %v433_v59  ;;  %v738_v47 = vpack.c.b16 %v734_v27, %v732_v26  ;;  %v7699_v48 = vunpack.c.l.bf16 %v1131_v33  ;;  %v6964_v58 = vld [vmem:[#allocation2 + $0x290] sm:$0xff] }
  0xa4   : > { %v7697_v41 = vsel %vm1147_vm4, %v7679_v29, %v7682_v32  ;;  %v7701_v49 = vunpack.c.l.bf16 %v1140_v36  ;;  %v7705_v57 = vunpack.c.h.bf16 %v1119_v42  ;;  %v6972_v59 = vld [vmem:[#allocation2 + $0x2d0] sm:$0xff]  ;;  %v742_v61 = vrot.slane %v737_v46, 1  ;;  %v7733_v36 = vld [vmem:[%s7587_s20] sm:$0x88] }
  0xa5   : > { %v431_v13 = vsel %vm419_vm2, %v426_v63, %v430_v0  ;;  %v443_v14 = vsel %vm419_vm2, %v438_v1, %v442_v2  ;;  %v1346_v63 = vmul.f32 %v7697_v41, %v7614_v31  ;;  %v1348_v0 = vmul.f32 %v7682_v32, %v7599_v24 }
  0xa6   : > { %1497 = vmatpush.bf16.msra.mxu2 %v6967_v53  ;;  %1511 = vmatpush.bf16.msra.mxu3 %v6975_v54  ;;  %v740_v53 = vpack.c.b16 %v736_v39, %v736_v39  ;;  %v7703_v54 = vunpack.c.l.bf16 %v1119_v42  ;;  %v743_v1 = vrot.slane %v739_v9, 1  ;;  %v745_v2 = vrot.slane %v738_v47, 1  ;;  %v6957_v42 = vld [vmem:[#allocation2 + $0x258] sm:$0xff]  ;;  %v6962_v9 = vld [vmem:[#allocation2 + $0x280] sm:$0xff] }
  0xa7   : > { %550 = vmatmul.bf16.vlgmr.msra.gmra.mxu0 %v431_v13  ;;  %564 = vmatmul.bf16.vlgmr.msra.gmra.mxu1 %v443_v14  ;;  %v7718_v5 = vrot.slane %v7699_v48, 4  ;;  %v7721_v6 = vrot.slane %v7701_v49, 4  ;;  %v1349_v12 = vmul.f32 %v7682_v32, %v7606_v28  ;;  %v1920_v13 = vld [vmem:[%s7587_s20 + $0x10] sm:$0xff]  ;;  %v7727_v14 = vrot.slane %v7580_v16, 1  ;;  %v6949_v16 = vld [vmem:[#allocation2 + $0x218] sm:$0xff]  ;;  %v6970_v47 = vld [vmem:[#allocation2 + $0x2c0] sm:$0xff] }
  0xa8   : > { %1306 = vmatpush.bf16.msra.mxu0 %v6953_v3  ;;  %1320 = vmatpush.bf16.msra.mxu1 %v6961_v4  ;;  %v1344_v60 = vmul.f32 %v7679_v29, %v7703_v54  ;;  %v1345_v3 = vmul.f32 %v7679_v29, %v7705_v57  ;;  %v1347_v4 = vmul.f32 %v7697_v41, %v7620_v34  ;;  %v746_v10 = vrot.slane %v740_v53, 1 }
  0xa9   : > { %v1352_v33 = vpack.c.bf16 %v1348_v0, %v1348_v0  ;;  %v1922_v46 = vunpack.c.h.bf16 %v7733_v36  ;;  %v7750_v53 = vmul.f32 %v7718_v5, %v7703_v54 }
  0xaa   : > { %1498 = vmatpush.bf16.msra.mxu2 %v6966_v15  ;;  %1512 = vmatpush.bf16.msra.mxu3 %v6974_v18  ;;  %v7730_v15 = vrot.slane %v7582_v17, 1  ;;  %v6963_v18 = vld [vmem:[#allocation2 + $0x288] sm:$0xff]  ;;  %v1350_v26 = vpack.c.bf16 %v1346_v63, %v1344_v60  ;;  %v747_v39 = vsel %vm741_vm5, %v745_v2, %v746_v10  ;;  %v7740_v17 = vsel %vm1147_vm4, %v7718_v5, %v7721_v6  ;;  %v6948_v2 = vld [vmem:[#allocation2 + $0x210] sm:$0xff] }
  0xab   : > { %v7759_v63 = vmul.f32 %v7740_v17, %v7614_v31 }
  0xac   : > { %1307 = vmatpush.bf16.msra.mxu0 %v6952_v37  ;;  %1321 = vmatpush.bf16.msra.mxu1 %v6960_v38  ;;  %v744_v37 = vsel %vm741_vm5, %v742_v61, %v743_v1  ;;  %v1351_v38 = vpack.c.bf16 %v1347_v4, %v1345_v3  ;;  %v7009_v61 = vld [vmem:[#allocation2 + $0x3f8] sm:$0xff]  ;;  %v6956_v3 = vld [vmem:[#allocation2 + $0x250] sm:$0xff] }
  0xad   : > { %1097 = vmatmul.bf16.vlgmr.msrb.gmra.mxu2 %v973_v21  ;;  %1111 = vmatmul.bf16.vlgmr.msrb.gmra.mxu3 %v990_v43  ;;  %v1353_v21 = vpack.c.bf16 %v1349_v12, %v1349_v12  ;;  %v7742_v43 = vunpack.c.l.bf16 %v1920_v13  ;;  %v7771_v12 = vmul.f32 %v7721_v6, %v7599_v24  ;;  %v1157_v24 = vmul.f32 %v7740_v17, %v7620_v34 }
  0xae   : > { %1499 = vmatpush.bf16.msra.mxu2 %v6965_v44  ;;  %1513 = vmatpush.bf16.msra.mxu3 %v6973_v45  ;;  %v7744_v44 = vunpack.c.h.bf16 %v1920_v13  ;;  %v1921_v45 = vunpack.c.l.bf16 %v7733_v36  ;;  %v1394_v60 = vrot.slane %v1351_v38, 2  ;;  %v7775_v13 = vmul.f32 %v7718_v5, %v7705_v57  ;;  %v7000_v38 = vld [vmem:[#allocation2 + $0x3b0] sm:$0xff] }
  0xaf   : > { %v1395_v4 = vrot.slane %v1353_v21, 2 }
  0xb0   : > { %1308 = vmatpush.bf16.msra.mxu0 %v6951_v50  ;;  %1322 = vmatpush.bf16.msra.mxu1 %v6959_v52  ;;  %v1391_v50 = vrot.slane %v1350_v26, 2  ;;  %v1392_v52 = vrot.slane %v1352_v33, 2  ;;  %v1932_v0 = vmul.f32 %v7727_v14, %v1921_v45 }
  0xb1   : > { %v1396_v45 = vsel %vm1201_vm6, %v1394_v60, %v1395_v4  ;;  %v6999_v60 = vld [vmem:[#allocation2 + $0x3a8] sm:$0xff]  ;;  %v1161_v4 = vpack.c.bf16 %v1157_v24, %v7775_v13 }
  0xb2   : > { %1500 = vmatpush.bf16.msra.mxu2 %v6964_v58  ;;  %1514 = vmatpush.bf16.msra.mxu3 %v6972_v59  ;;  %v7755_v58 = vsel %vm741_vm5, %v7727_v14, %v7730_v15  ;;  %v7001_v59 = vld [vmem:[#allocation2 + $0x3b8] sm:$0xff]  ;;  %v1393_v26 = vsel %vm1201_vm6, %v1391_v50, %v1392_v52 }
  0xb3   : > { %v1934_v1 = vmul.f32 %v7755_v58, %v7614_v31  ;;  %v1935_v10 = vmul.f32 %v7755_v58, %v7620_v34 }
  0xb4   : > { %1309 = vmatpush.bf16.msra.mxu0 %v6950_v7  ;;  %1323 = vmatpush.bf16.msra.mxu1 %v6958_v8  ;;  %v1936_v7 = vmul.f32 %v7730_v15, %v7742_v43  ;;  %v1933_v8 = vmul.f32 %v7727_v14, %v1922_v46  ;;  %v6947_v46 = vld [vmem:[#allocation2 + $0x208] sm:$0xff] }
  0xb6   : > { %1501 = vmatpush.bf16.msra.mxu2 %v6963_v18  ;;  %1515 = vmatpush.bf16.msra.mxu3 %v6971_v23  ;;  %v1938_v18 = vpack.c.bf16 %v1934_v1, %v1932_v0  ;;  %v1937_v23 = vmul.f32 %v7730_v15, %v7744_v44  ;;  %v1940_v33 = vpack.c.bf16 %v1936_v7, %v1936_v7 }
  0xb7   : > { %854 = vmatmul.bf16.vlgmr.msrb.gmra.mxu0 %v744_v37  ;;  %868 = vmatmul.bf16.vlgmr.msrb.gmra.mxu1 %v747_v39  ;;  %v1939_v37 = vpack.c.bf16 %v1935_v10, %v1933_v8  ;;  %v7008_v39 = vld [vmem:[#allocation2 + $0x3f0] sm:$0xff] }
  0xb8   : > { %1310 = vmatpush.bf16.msra.mxu0 %v6949_v16  ;;  %1324 = vmatpush.bf16.msra.mxu1 %v6957_v42  ;;  %v1159_v16 = vmul.f32 %v7721_v6, %v7606_v28  ;;  %v1977_v42 = vshrl.u32 %v1938_v18, 16  ;;  %v1980_v21 = vshll.u32 %v1938_v18, 16  ;;  %v1988_v50 = vshll.u32 %v1940_v33, 16 }
  0xb9   : > { %v1994_v52 = vshrl.u32 %v1939_v37, 16  ;;  %v1997_v0 = vshll.u32 %v1939_v37, 16  ;;  %v6993_v37 = vld [vmem:[#allocation2 + $0x378] sm:$0xff] }
  0xba   : > { %1502 = vmatpush.bf16.msra.mxu2 %v6962_v9  ;;  %1516 = vmatpush.bf16.msra.mxu3 %v6970_v47  ;;  %v6955_v9 = vld [vmem:[#allocation2 + $0x248] sm:$0xff]  ;;  %v1985_v47 = vshrl.u32 %v1940_v33, 16  ;;  %v1979_v1 = vrot.slane %v1977_v42, 3  ;;  %v1982_v28 = vrot.slane %v1980_v21, 4  ;;  %v1990_v8 = vrot.slane %v1988_v50, 4  ;;  %v6985_v33 = vld [vmem:[#allocation2 + $0x338] sm:$0xff] }
  0xbb   : > { %v1163_v10 = vpack.c.bf16 %v1159_v16, %v1159_v16  ;;  %v3063_v42 = vld [vmem:[%s7587_s20 + $0x8] sm:$0xcc]  ;;  %v6998_v21 = vld [vmem:[#allocation2 + $0x3a0] sm:$0xff] }
  0xbc   : > { %1311 = vmatpush.bf16.msra.mxu0 %v6948_v2  ;;  %1325 = vmatpush.bf16.msra.mxu1 %v6956_v3  ;;  %v1987_v7 = vrot.slane %v1985_v47, 3  ;;  %v7007_v2 = vld [vmem:[#allocation2 + $0x3e8] sm:$0xff]  ;;  %v1162_v3 = vpack.c.bf16 %v7771_v12, %v7771_v12  ;;  %v1983_v18 = vor.u32 %v1982_v28, %v1979_v1  ;;  %v7794_v12 = vrot.slane %v7644_v55, 3  ;;  %v2853_v28 = vld [vmem:[%s7587_s20 + $0x18] sm:$0x33] }
  0xbd   : > { %1503 = vmatmul.bf16.vlgmr.msra.gmra.mxu2 %v1393_v26  ;;  %1517 = vmatmul.bf16.vlgmr.msra.gmra.mxu3 %v1396_v45  ;;  %v1996_v26 = vrot.slane %v1994_v52, 3  ;;  %v7006_v45 = vld [vmem:[#allocation2 + $0x3e0] sm:$0xff]  ;;  %v1205_v47 = vrot.slane %v1161_v4, 2  ;;  %v1206_v50 = vrot.slane %v1163_v10, 2  ;;  %v7801_v52 = vrot.slane %v7622_v35, 3  ;;  %v6997_v10 = vld [vmem:[#allocation2 + $0x398] sm:$0xff] }
  0xbe   : > { %1890 = vmatpush.bf16.msrb.mxu2 %v7001_v59  ;;  %1904 = vmatpush.bf16.msrb.mxu3 %v7009_v61  ;;  %v1160_v59 = vpack.c.bf16 %v7759_v63, %v7750_v53  ;;  %v1941_v61 = vpack.c.bf16 %v1937_v23, %v1937_v23  ;;  %v6946_v53 = vld [vmem:[#allocation2 + $0x200] sm:$0xff]  ;;  %v1991_v23 = vor.u32 %v1990_v8, %v1987_v7  ;;  %v6992_v7 = vld [vmem:[#allocation2 + $0x370] sm:$0xff]  ;;  %v7804_v8 = vunpack.c.l.bf16 %v3063_v42 }
  0xbf   : > { %v6954_v63 = vld [vmem:[#allocation2 + $0x240] sm:$0xff]  ;;  %v1207_v4 = vsel %vm1201_vm6, %v1205_v47, %v1206_v50  ;;  %v6996_v50 = vld [vmem:[#allocation2 + $0x390] sm:$0xff] }
  0xc0   : > { %1312 = vmatpush.bf16.msra.mxu0 %v6947_v46  ;;  %1326 = vmatpush.bf16.msra.mxu1 %v6955_v9  ;;  %v7797_v13 = vsel %vm1975_vm7, %v1983_v18, %v1991_v23  ;;  %v2002_v24 = vshrl.u32 %v1941_v61, 16  ;;  %v2005_v16 = vshll.u32 %v1941_v61, 16  ;;  %v1202_v46 = vrot.slane %v1160_v59, 2  ;;  %v6984_v61 = vld [vmem:[#allocation2 + $0x330] sm:$0xff] }
  0xc1   : > { %v1203_v9 = vrot.slane %v1162_v3, 2  ;;  %v7809_v59 = vsel %vm1528_vm8, %v7801_v52, %v7794_v12  ;;  %v3247_v18 = vmul.f32 %v7804_v8, %v7679_v29  ;;  %v1535_v23 = vmul.f32 %v7801_v52, %v7703_v54 }
  0xc2   : > { %1891 = vmatpush.bf16.msrb.mxu2 %v7000_v38  ;;  %1905 = vmatpush.bf16.msrb.mxu3 %v7008_v39  ;;  %v7791_v38 = vld [vmem:[%s7587_s20 + $0x10] sm:$0x77]  ;;  %v1999_v39 = vrot.slane %v1997_v0, 4  ;;  %v2004_v0 = vrot.slane %v2002_v24, 3  ;;  %v2007_v1 = vrot.slane %v2005_v16, 4  ;;  %v6991_v24 = vld [vmem:[#allocation2 + $0x368] sm:$0xff]  ;;  %v1777_v16 = vunpack.c.l.b16 %v7733_v36 }
  0xc3   : > { %v1526_v35 = vunpack.c.l.bf16 %v7791_v38  ;;  %v1204_v3 = vsel %vm1201_vm6, %v1202_v46, %v1203_v9  ;;  %v1779_v46 = vunpack.c.l.b16 %v7791_v38  ;;  %v3250_v9 = vmul.f32 %v7744_v44, %v7697_v41 }
  0xc4   : > { %1313 = vmatpush.bf16.msra.mxu0 %v6946_v53  ;;  %1327 = vmatpush.bf16.msra.mxu1 %v6954_v63  ;;  %v2000_v55 = vor.u32 %v1999_v39, %v1996_v26  ;;  %v7005_v53 = vld [vmem:[#allocation2 + $0x3d8] sm:$0xff]  ;;  %v7815_v63 = vunpack.c.l.bf16 %v2853_v28  ;;  %v6983_v39 = vld [vmem:[#allocation2 + $0x328] sm:$0xff] }
  0xc6   : > { %1892 = vmatpush.bf16.msrb.mxu2 %v6999_v60  ;;  %1906 = vmatpush.bf16.msrb.mxu3 %v7007_v2  ;;  %v1527_v60 = vunpack.c.h.bf16 %v7791_v38  ;;  %v2008_v2 = vor.u32 %v2007_v1, %v2004_v0  ;;  %v3251_v54 = vmul.f32 %v7815_v63, %v7682_v32  ;;  %v1778_v0 = vunpack.c.h.b16 %v7733_v36 }
  0xc7   : > { %1314 = vmatmul.bf16.vlgmr.msra.gmra.mxu0 %v1204_v3  ;;  %1328 = vmatmul.bf16.vlgmr.msra.gmra.mxu1 %v1207_v4  ;;  %v1780_v1 = vunpack.c.h.b16 %v7791_v38  ;;  %v6990_v3 = vld [vmem:[#allocation2 + $0x360] sm:$0xff]  ;;  %v1538_v4 = vmul.f32 %v7809_v59, %v7620_v34 }
  0xc8   : > { %1711 = vmatpush.bf16.msrb.mxu0 %v6985_v33  ;;  %1725 = vmatpush.bf16.msrb.mxu1 %v6993_v37  ;;  %v7822_v26 = vsel %vm1975_vm7, %v2000_v55, %v2008_v2  ;;  %v7824_v33 = vunpack.c.h.bf16 %v2853_v28  ;;  %v7826_v37 = vunpack.c.h.bf16 %v3063_v42  ;;  %v7004_v55 = vld [vmem:[#allocation2 + $0x3d0] sm:$0xff]  ;;  %v1540_v36 = vmul.f32 %v7794_v12, %v1527_v60  ;;  %v6981_v60 = vld [vmem:[#allocation2 + $0x318] sm:$0xff] }
  0xca   : > { %1893 = vmatpush.bf16.msrb.mxu2 %v6998_v21  ;;  %1907 = vmatpush.bf16.msrb.mxu3 %v7006_v45  ;;  %v1537_v21 = vmul.f32 %v7809_v59, %v7614_v31  ;;  %v3249_v45 = vmul.f32 %v7742_v43, %v7697_v41  ;;  %v3248_v42 = vmul.f32 %v7826_v37, %v7679_v29 }
  0xcb   : > { %v3252_v47 = vmul.f32 %v7824_v33, %v7682_v32  ;;  %v1536_v29 = vmul.f32 %v7801_v52, %v7705_v57  ;;  %v6982_v32 = vld [vmem:[#allocation2 + $0x320] sm:$0xff]  ;;  %v6995_v57 = vld [vmem:[#allocation2 + $0x388] sm:$0xff] }
  0xcc   : > { %1712 = vmatpush.bf16.msrb.mxu0 %v6984_v61  ;;  %1726 = vmatpush.bf16.msrb.mxu1 %v6992_v7  ;;  %v3253_v28 = vpack.c.bf16 %v3249_v45, %v3247_v18  ;;  %v3255_v61 = vpack.c.bf16 %v3251_v54, %v3251_v54  ;;  %v1539_v7 = vmul.f32 %v7794_v12, %v1526_v35 }
  0xcd   : > { %v3254_v2 = vpack.c.bf16 %v3250_v9, %v3248_v42  ;;  %v3256_v41 = vpack.c.bf16 %v3252_v47, %v3252_v47  ;;  %v1541_v35 = vpack.c.bf16 %v1537_v21, %v1535_v23  ;;  %v1782_v54 = vpack.c.b16 %v734_v27, %v1778_v0  ;;  %v6989_v47 = vld [vmem:[#allocation2 + $0x358] sm:$0xff]  ;;  %v7002_v27 = vld [vmem:[#allocation2 + $0x3c0] sm:$0xff] }
  0xce   : > { %1894 = vmatpush.bf16.msrb.mxu2 %v6997_v10  ;;  %1908 = vmatpush.bf16.msrb.mxu3 %v7005_v53  ;;  %v3294_v10 = vrot.slane %v3253_v28, 2  ;;  %v3295_v38 = vrot.slane %v3255_v61, 2  ;;  %v1781_v53 = vpack.c.b16 %v733_v22, %v1777_v16  ;;  %v1784_v42 = vpack.c.b16 %v1780_v1, %v1780_v1  ;;  %v7033_v61 = vld [vmem:[#allocation2 + $0x4b8] sm:$0xff] }
  0xcf   : > { %v3297_v18 = vrot.slane %v3254_v2, 2  ;;  %v3298_v45 = vrot.slane %v3256_v41, 2  ;;  %v1543_v22 = vpack.c.bf16 %v1539_v7, %v1539_v7  ;;  %v1542_v23 = vpack.c.bf16 %v1538_v4, %v1536_v29  ;;  %v7041_v2 = vld [vmem:[#allocation2 + $0x4f8] sm:$0xff]  ;;  %v6980_v7 = vld [vmem:[#allocation2 + $0x310] sm:$0xff] }
  0xd0   : > { %1713 = vmatpush.bf16.msrb.mxu0 %v6983_v39  ;;  %1727 = vmatpush.bf16.msrb.mxu1 %v6991_v24  ;;  %v7003_v39 = vld [vmem:[#allocation2 + $0x3c8] sm:$0xff]  ;;  %v1783_v24 = vpack.c.b16 %v1779_v46, %v1779_v46  ;;  %v7855_v9 = vsel %vm1201_vm6, %v3294_v10, %v3295_v38  ;;  %v1580_v21 = vshrl.u32 %v1541_v35, 16  ;;  %v1544_v46 = vpack.c.bf16 %v1540_v36, %v1540_v36  ;;  %v3428_v41 = vld [vmem:[%s7587_s20 + $0x18] sm:$0x77]  ;;  %v6988_v29 = vld [vmem:[#allocation2 + $0x350] sm:$0xff] }
  0xd1   : > { %v7858_v16 = vsel %vm1201_vm6, %v3297_v18, %v3298_v45  ;;  %v1789_v1 = vrot.slane %v1782_v54, 3  ;;  %v1790_v28 = vrot.slane %v1784_v42, 3  ;;  %v1597_v4 = vshrl.u32 %v1542_v23, 16  ;;  %v6979_v42 = vld [vmem:[#allocation2 + $0x308] sm:$0xff] }
  0xd2   : > { %1895 = vmatpush.bf16.msrb.mxu2 %v6996_v50  ;;  %1909 = vmatpush.bf16.msrb.mxu3 %v7004_v55  ;;  %v1583_v50 = vshll.u32 %v1541_v35, 16  ;;  %v1786_v55 = vrot.slane %v1781_v53, 3  ;;  %v1787_v0 = vrot.slane %v1783_v24, 3  ;;  %v7861_v10 = vrot.slane %v1580_v21, 2  ;;  %v7040_v24 = vld [vmem:[#allocation2 + $0x4f0] sm:$0xff] }
  0xd3   : > { %v1600_v36 = vshll.u32 %v1542_v23, 16  ;;  %v1605_v38 = vshrl.u32 %v1544_v46, 16  ;;  %v1608_v35 = vshll.u32 %v1544_v46, 16  ;;  %v1791_v18 = vsel %vm1528_vm8, %v1789_v1, %v1790_v28  ;;  %v7031_v1 = vld [vmem:[#allocation2 + $0x4a8] sm:$0xff] }
  0xd4   : > { %1714 = vmatpush.bf16.msrb.mxu0 %v6982_v32  ;;  %1728 = vmatpush.bf16.msrb.mxu1 %v6990_v3  ;;  %v1588_v32 = vshrl.u32 %v1543_v22, 16  ;;  %v1591_v3 = vshll.u32 %v1543_v22, 16  ;;  %v1788_v53 = vsel %vm1528_vm8, %v1786_v55, %v1787_v0  ;;  %v7865_v45 = vrot.slane %v1583_v50, 3  ;;  %v7039_v28 = vld [vmem:[#allocation2 + $0x4e8] sm:$0xff] }
  0xd5   : > { %v3430_v54 = vunpack.c.h.bf16 %v3428_v41  ;;  %v1599_v23 = vrot.slane %v1597_v4, 2  ;;  %v1602_v21 = vrot.slane %v1600_v36, 3  ;;  %v1607_v46 = vrot.slane %v1605_v38, 2  ;;  %v7025_v36 = vld [vmem:[#allocation2 + $0x478] sm:$0xff] }
  0xd6   : > { %1896 = vmatpush.bf16.msrb.mxu2 %v6995_v57  ;;  %1910 = vmatpush.bf16.msrb.mxu3 %v7003_v39  ;;  %v3429_v57 = vunpack.c.l.bf16 %v3428_v41  ;;  %v7032_v39 = vld [vmem:[#allocation2 + $0x4b0] sm:$0xff]  ;;  %v1593_v22 = vrot.slane %v1591_v3, 3  ;;  %v1586_v50 = vor.u32 %v7865_v45, %v7861_v10  ;;  %v3433_v55 = vmul.f32 %v7742_v43, %v7809_v59  ;;  %v7017_v10 = vld [vmem:[#allocation2 + $0x438] sm:$0xff] }
  0xd7   : > { %v3436_v41 = vmul.f32 %v3430_v54, %v7794_v12  ;;  %v1603_v38 = vor.u32 %v1602_v21, %v1599_v23  ;;  %v7030_v54 = vld [vmem:[#allocation2 + $0x4a0] sm:$0xff]  ;;  %v7016_v21 = vld [vmem:[#allocation2 + $0x430] sm:$0xff] }
  0xd8   : > { %1715 = vmatpush.bf16.msrb.mxu0 %v6981_v60  ;;  %1729 = vmatpush.bf16.msrb.mxu1 %v6989_v47  ;;  %v6987_v60 = vld [vmem:[#allocation2 + $0x348] sm:$0xff]  ;;  %v1590_v47 = vrot.slane %v1588_v32, 2  ;;  %v3435_v0 = vmul.f32 %v3429_v57, %v7794_v12 }
  0xda   : > { %1897 = vmatpush.bf16.msrb.mxu2 %v6994_v25  ;;  %1911 = vmatpush.bf16.msrb.mxu3 %v7002_v27  ;;  %v1610_v25 = vrot.slane %v1608_v35, 3  ;;  %v3431_v27 = vmul.f32 %v7804_v8, %v7801_v52  ;;  %v1594_v32 = vor.u32 %v1593_v22, %v1590_v47  ;;  %v3439_v4 = vpack.c.bf16 %v3435_v0, %v3435_v0 }
  0xdc   : > { %1716 = vmatpush.bf16.msrb.mxu0 %v6980_v7  ;;  %1730 = vmatpush.bf16.msrb.mxu1 %v6988_v29  ;;  %v6978_v7 = vld [vmem:[#allocation2 + $0x300] sm:$0xff]  ;;  %v3437_v3 = vpack.c.bf16 %v3433_v55, %v3431_v27  ;;  %v1611_v35 = vor.u32 %v1610_v25, %v1607_v46  ;;  %v3483_v57 = vshrl.u32 %v3439_v4, 16  ;;  %v7024_v46 = vld [vmem:[#allocation2 + $0x470] sm:$0xff] }
  0xdd   : > { %1898 = vmatmul.bf16.vlgmr.msrb.gmra.mxu2 %v1788_v53  ;;  %1912 = vmatmul.bf16.vlgmr.msrb.gmra.mxu3 %v1791_v18  ;;  %v6986_v29 = vld [vmem:[#allocation2 + $0x340] sm:$0xff]  ;;  %v3440_v18 = vpack.c.bf16 %v3436_v41, %v3436_v41 }
  0xde   : > { %2273 = vmatpush.bf16.msra.mxu2 %v7033_v61  ;;  %2287 = vmatpush.bf16.msra.mxu3 %v7041_v2  ;;  %v3432_v61 = vmul.f32 %v7826_v37, %v7801_v52  ;;  %v3434_v2 = vmul.f32 %v7744_v44, %v7809_v59  ;;  %v3475_v45 = vshrl.u32 %v3437_v3, 16  ;;  %v3478_v52 = vshll.u32 %v3437_v3, 16  ;;  %v7037_v3 = vld [vmem:[#allocation2 + $0x4d8] sm:$0xff] }
  0xdf   : > { %v3485_v22 = vrot.slane %v3483_v57, 2  ;;  %v3503_v0 = vshll.u32 %v3440_v18, 16 }
  0xe0   : > { %1717 = vmatpush.bf16.msrb.mxu0 %v6979_v42  ;;  %1731 = vmatpush.bf16.msrb.mxu1 %v6987_v60  ;;  %v3438_v53 = vpack.c.bf16 %v3434_v2, %v3432_v61  ;;  %v7038_v42 = vld [vmem:[#allocation2 + $0x4e0] sm:$0xff]  ;;  %v3477_v60 = vrot.slane %v3475_v45, 2  ;;  %v3480_v47 = vrot.slane %v3478_v52, 3 }
  0xe1   : > { %v7014_v45 = vld [vmem:[#allocation2 + $0x420] sm:$0xff] }
  0xe2   : > { %2274 = vmatpush.bf16.msra.mxu2 %v7032_v39  ;;  %2288 = vmatpush.bf16.msra.mxu3 %v7040_v24  ;;  %v3486_v39 = vshll.u32 %v3439_v4, 16  ;;  %v3492_v12 = vshrl.u32 %v3438_v53, 16  ;;  %v3495_v59 = vshll.u32 %v3438_v53, 16  ;;  %v3500_v24 = vshrl.u32 %v3440_v18, 16  ;;  %v7028_v53 = vld [vmem:[#allocation2 + $0x490] sm:$0xff]  ;;  %v7022_v52 = vld [vmem:[#allocation2 + $0x460] sm:$0xff] }
  0xe3   : > { %v3481_v61 = vor.u32 %v3480_v47, %v3477_v60  ;;  %v7036_v18 = vld [vmem:[#allocation2 + $0x4d0] sm:$0xff]  ;;  %v3821_v60 = vmul.f32 %v7755_v58, %v7742_v43 }
  0xe4   : > { %1718 = vmatpush.bf16.msrb.mxu0 %v6978_v7  ;;  %1732 = vmatpush.bf16.msrb.mxu1 %v6986_v29  ;;  %v3488_v23 = vrot.slane %v3486_v39, 3  ;;  %v3494_v25 = vrot.slane %v3492_v12, 2  ;;  %v3497_v27 = vrot.slane %v3495_v59, 3  ;;  %v3502_v55 = vrot.slane %v3500_v24, 2  ;;  %v7029_v29 = vld [vmem:[#allocation2 + $0x498] sm:$0xff]  ;;  %v7027_v24 = vld [vmem:[#allocation2 + $0x488] sm:$0xff] }
  0xe5   : > { %v3505_v7 = vrot.slane %v3503_v0, 3 }
  0xe6   : > { %2275 = vmatpush.bf16.msra.mxu2 %v7031_v1  ;;  %2289 = vmatpush.bf16.msra.mxu3 %v7039_v28  ;;  %v1595_v1 = vsel %vm1578_vm9, %v1586_v50, %v1594_v32  ;;  %v1612_v28 = vsel %vm1578_vm9, %v1603_v38, %v1611_v35  ;;  %v3489_v2 = vor.u32 %v3488_v23, %v3485_v22  ;;  %v7015_v50 = vld [vmem:[#allocation2 + $0x428] sm:$0xff]  ;;  %v3814_v35 = vld [vmem:[%s7587_s20 + $0x18] sm:$0xff] }
  0xe7   : > { %1719 = vmatmul.bf16.vlgmr.msrb.gmra.mxu0 %v1595_v1  ;;  %1733 = vmatmul.bf16.vlgmr.msrb.gmra.mxu1 %v1612_v28  ;;  %v3498_v41 = vor.u32 %v3497_v27, %v3494_v25  ;;  %v7023_v32 = vld [vmem:[#allocation2 + $0x468] sm:$0xff]  ;;  %v7891_v57 = vunpack.c.l.bf16 %v3814_v35  ;;  %v7895_v59 = vunpack.c.h.bf16 %v3814_v35  ;;  %v7013_v22 = vld [vmem:[#allocation2 + $0x418] sm:$0xff]  ;;  %v2138_v27 = vmul.f32 %v7699_v48, %v7614_v31 }
  0xe8   : > { %2108 = vmatpush.bf16.msra.mxu0 %v7017_v10  ;;  %2122 = vmatpush.bf16.msra.mxu1 %v7025_v36  ;;  %v7882_v4 = vsel %vm1578_vm9, %v3481_v61, %v3489_v2  ;;  %v3506_v10 = vor.u32 %v3505_v7, %v3502_v55  ;;  %v7885_v36 = vld [vmem:[%s7587_s20 + $0x8] sm:$0x88]  ;;  %v7021_v23 = vld [vmem:[#allocation2 + $0x458] sm:$0xff]  ;;  %v2140_v55 = vmul.f32 %v7742_v43, %v7701_v49 }
  0xe9   : > { %v3815_v39 = vunpack.c.l.bf16 %v7885_v36  ;;  %v3816_v12 = vunpack.c.h.bf16 %v7885_v36  ;;  %v3823_v47 = vmul.f32 %v7891_v57, %v7730_v15  ;;  %v3824_v25 = vmul.f32 %v7895_v59, %v7730_v15  ;;  %v7034_v15 = vld [vmem:[#allocation2 + $0x4c0] sm:$0xff] }
  0xea   : > { %2276 = vmatpush.bf16.msra.mxu2 %v7030_v54  ;;  %2290 = vmatpush.bf16.msra.mxu3 %v7038_v42  ;;  %v7888_v38 = vsel %vm1578_vm9, %v3498_v41, %v3506_v10  ;;  %v7035_v54 = vld [vmem:[#allocation2 + $0x4c8] sm:$0xff]  ;;  %v2139_v28 = vmul.f32 %v7699_v48, %v7620_v34 }
  0xeb   : > { %v3819_v42 = vmul.f32 %v3815_v39, %v7727_v14  ;;  %v3827_v1 = vpack.c.bf16 %v3823_v47, %v3823_v47  ;;  %v3828_v2 = vpack.c.bf16 %v3824_v25, %v3824_v25 }
  0xec   : > { %2109 = vmatpush.bf16.msra.mxu0 %v7016_v21  ;;  %2123 = vmatpush.bf16.msra.mxu1 %v7024_v46  ;;  %v3820_v21 = vmul.f32 %v3816_v12, %v7727_v14  ;;  %v3822_v46 = vmul.f32 %v7755_v58, %v7744_v44  ;;  %v2141_v14 = vmul.f32 %v7744_v44, %v7701_v49  ;;  %v7026_v58 = vld [vmem:[#allocation2 + $0x480] sm:$0xff] }
  0xed   : > { %v3825_v0 = vpack.c.bf16 %v3821_v60, %v3819_v42 }
  0xee   : > { %2277 = vmatpush.bf16.msra.mxu2 %v7029_v29  ;;  %2291 = vmatpush.bf16.msra.mxu3 %v7037_v3  ;;  %v3826_v61 = vpack.c.bf16 %v3822_v46, %v3820_v21  ;;  %v3871_v29 = vshrl.u32 %v3827_v1, 16  ;;  %v3874_v3 = vshll.u32 %v3827_v1, 16  ;;  %v2143_v25 = vpack.c.bf16 %v2141_v14, %v2139_v28  ;;  %v7072_v1 = vld [vmem:[#allocation2 + $0x5f0] sm:$0xff]  ;;  %v7071_v28 = vld [vmem:[#allocation2 + $0x5e8] sm:$0xff]  ;;  %v7010_v14 = vld [vmem:[#allocation2 + $0x400] sm:$0xff] }
  0xef   : > { %v3863_v41 = vshrl.u32 %v3825_v0, 16  ;;  %v3866_v7 = vshll.u32 %v3825_v0, 16  ;;  %v7064_v0 = vld [vmem:[#allocation2 + $0x5b0] sm:$0xff] }
  0xf0   : > { %2110 = vmatpush.bf16.msra.mxu0 %v7015_v50  ;;  %2124 = vmatpush.bf16.msra.mxu1 %v7023_v32  ;;  %v7065_v50 = vld [vmem:[#allocation2 + $0x5b8] sm:$0xff]  ;;  %v3880_v10 = vshrl.u32 %v3826_v61, 16  ;;  %v3883_v35 = vshll.u32 %v3826_v61, 16 }
  0xf1   : > { %v7073_v32 = vld [vmem:[#allocation2 + $0x5f8] sm:$0xff]  ;;  %v3865_v39 = vrot.slane %v3863_v41, 3  ;;  %v3868_v12 = vrot.slane %v3866_v7, 4  ;;  %v7011_v41 = vld [vmem:[#allocation2 + $0x408] sm:$0xff] }
  0xf2   : > { %2278 = vmatpush.bf16.msra.mxu2 %v7028_v53  ;;  %2292 = vmatpush.bf16.msra.mxu3 %v7036_v18  ;;  %v3888_v53 = vshrl.u32 %v3828_v2, 16  ;;  %v3891_v18 = vshll.u32 %v3828_v2, 16  ;;  %v3882_v42 = vrot.slane %v3880_v10, 3  ;;  %v3885_v60 = vrot.slane %v3883_v35, 4  ;;  %v7019_v7 = vld [vmem:[#allocation2 + $0x448] sm:$0xff]  ;;  %v7070_v10 = vld [vmem:[#allocation2 + $0x5e0] sm:$0xff] }
  0xf4   : > { %2111 = vmatpush.bf16.msra.mxu0 %v7014_v45  ;;  %2125 = vmatpush.bf16.msra.mxu1 %v7022_v52  ;;  %v7012_v45 = vld [vmem:[#allocation2 + $0x410] sm:$0xff]  ;;  %v3890_v47 = vrot.slane %v3888_v53, 3  ;;  %v3893_v21 = vrot.slane %v3891_v18, 4  ;;  %v3886_v61 = vor.u32 %v3885_v60, %v3882_v42 }
  0xf5   : > { %v7020_v52 = vld [vmem:[#allocation2 + $0x450] sm:$0xff] }
  0xf6   : > { %2279 = vmatpush.bf16.msra.mxu2 %v7027_v24  ;;  %2293 = vmatpush.bf16.msra.mxu3 %v7035_v54  ;;  %v3873_v24 = vrot.slane %v3871_v29, 3  ;;  %v3876_v54 = vrot.slane %v3874_v3, 4  ;;  %v3894_v2 = vor.u32 %v3893_v21, %v3890_v47  ;;  %v7057_v3 = vld [vmem:[#allocation2 + $0x578] sm:$0xff]  ;;  %v7048_v18 = vld [vmem:[#allocation2 + $0x530] sm:$0xff] }
  0xf8   : > { %2112 = vmatpush.bf16.msra.mxu0 %v7013_v22  ;;  %2126 = vmatpush.bf16.msra.mxu1 %v7021_v23  ;;  %v2142_v22 = vpack.c.bf16 %v2140_v55, %v2138_v27  ;;  %v3869_v23 = vor.u32 %v3868_v12, %v3865_v39  ;;  %v3877_v46 = vor.u32 %v3876_v54, %v3873_v24  ;;  %v7063_v55 = vld [vmem:[#allocation2 + $0x5a8] sm:$0xff]  ;;  %v7061_v24 = vld [vmem:[#allocation2 + $0x598] sm:$0xff] }
  0xf9   : > { %v7919_v27 = vsel %vm1975_vm7, %v3886_v61, %v3894_v2  ;;  %v2479_v39 = vmul.f32 %v7742_v43, %v7662_v11  ;;  %v2480_v12 = vmul.f32 %v7744_v44, %v7662_v11  ;;  %v7069_v54 = vld [vmem:[#allocation2 + $0x5d8] sm:$0xff]  ;;  %v7046_v61 = vld [vmem:[#allocation2 + $0x520] sm:$0xff] }
  0xfa   : > { %2280 = vmatpush.bf16.msra.mxu2 %v7026_v58  ;;  %2294 = vmatpush.bf16.msra.mxu3 %v7034_v15  ;;  %v7916_v29 = vsel %vm1975_vm7, %v3869_v23, %v3877_v46  ;;  %v7018_v58 = vld [vmem:[#allocation2 + $0x440] sm:$0xff]  ;;  %v7049_v15 = vld [vmem:[#allocation2 + $0x538] sm:$0xff]  ;;  %v7055_v23 = vld [vmem:[#allocation2 + $0x568] sm:$0xff] }
  0xfb   : > { %v7054_v2 = vld [vmem:[#allocation2 + $0x560] sm:$0xff] }
  0xfc   : > { %2113 = vmatpush.bf16.msra.mxu0 %v7012_v45  ;;  %2127 = vmatpush.bf16.msra.mxu1 %v7020_v52  ;;  %v7056_v45 = vld [vmem:[#allocation2 + $0x570] sm:$0xff]  ;;  %v7923_v52 = vld [vmem:[%s7587_s20 + $0x18] sm:$0x11] }
  0xfd   : > { %2281 = vmatmul.bf16.vlgmr.msra.gmra.mxu2 %v2142_v22  ;;  %2295 = vmatmul.bf16.vlgmr.msra.gmra.mxu3 %v2143_v25  ;;  %v2475_v42 = vunpack.c.l.bf16 %v7923_v52  ;;  %v2476_v47 = vunpack.c.h.bf16 %v7923_v52  ;;  %v7047_v22 = vld [vmem:[#allocation2 + $0x528] sm:$0xff]  ;;  %v7068_v25 = vld [vmem:[#allocation2 + $0x5d0] sm:$0xff] }
  0xfe   : > { %2642 = vmatpush.bf16.msrb.mxu2 %v7065_v50  ;;  %2656 = vmatpush.bf16.msrb.mxu3 %v7073_v32  ;;  %v2468_v50 = vld [vmem:[%s7587_s20 + $0x8] sm:$0xff]  ;;  %v7062_v32 = vld [vmem:[#allocation2 + $0x5a0] sm:$0xff] }
  0xff   : > { %v2471_v35 = vunpack.c.l.bf16 %v2468_v50  ;;  %v2472_v53 = vunpack.c.h.bf16 %v2468_v50 }
 0x100   : > { %2114 = vmatpush.bf16.msra.mxu0 %v7011_v41  ;;  %2128 = vmatpush.bf16.msra.mxu1 %v7019_v7 }
 0x101   : > { %v2477_v60 = vmul.f32 %v2471_v35, %v7641_v51  ;;  %v2478_v21 = vmul.f32 %v2472_v53, %v7641_v51  ;;  %v7066_v35 = vld [vmem:[#allocation2 + $0x5c0] sm:$0xff] }
 0x102   : > { %2643 = vmatpush.bf16.msrb.mxu2 %v7064_v0  ;;  %2657 = vmatpush.bf16.msrb.mxu3 %v7072_v1  ;;  %v2481_v0 = vmul.f32 %v2475_v42, %v7652_v62  ;;  %v2482_v1 = vmul.f32 %v2476_v47, %v7652_v62  ;;  %v7052_v42 = vld [vmem:[#allocation2 + $0x550] sm:$0xff] }
 0x103   : > { %v2483_v46 = vpack.c.bf16 %v2479_v39, %v2477_v60 }
 0x104   : > { %2115 = vmatpush.bf16.msra.mxu0 %v7010_v14  ;;  %2129 = vmatpush.bf16.msra.mxu1 %v7018_v58  ;;  %v2485_v14 = vpack.c.bf16 %v2481_v0, %v2481_v0  ;;  %v2486_v58 = vpack.c.bf16 %v2482_v1, %v2482_v1  ;;  %v7051_v0 = vld [vmem:[#allocation2 + $0x548] sm:$0xff] }
 0x105   : > { %v2523_v41 = vshll.u32 %v2483_v46, 16  ;;  %v2521_v53 = vshrl.u32 %v2483_v46, 16  ;;  %v7104_v46 = vld [vmem:[#allocation2 + $0x6f0] sm:$0xff]  ;;  %v7940_v1 = vld [vmem:[%s7587_s20 + $0x8] sm:$0xee] }
 0x106   : > { %2644 = vmatpush.bf16.msrb.mxu2 %v7063_v55  ;;  %2658 = vmatpush.bf16.msrb.mxu3 %v7071_v28  ;;  %v7059_v55 = vld [vmem:[#allocation2 + $0x588] sm:$0xff]  ;;  %v2540_v39 = vshll.u32 %v2486_v58, 16  ;;  %v7089_v58 = vld [vmem:[#allocation2 + $0x678] sm:$0xff] }
 0x107   : > { %2116 = vmatmul.bf16.vlgmr.msra.gmra.mxu0 %v7797_v13  ;;  %2130 = vmatmul.bf16.vlgmr.msra.gmra.mxu1 %v7822_v26  ;;  %v2484_v13 = vpack.c.bf16 %v2480_v12, %v2478_v21  ;;  %v7060_v26 = vld [vmem:[#allocation2 + $0x590] sm:$0xff]  ;;  %v7067_v28 = vld [vmem:[#allocation2 + $0x5c8] sm:$0xff]  ;;  %v2525_v50 = vrot.slane %v2523_v41, 1  ;;  %v7097_v12 = vld [vmem:[#allocation2 + $0x6b8] sm:$0xff]  ;;  %v2854_v41 = vunpack.c.l.bf16 %v7940_v1 }
 0x108   : > { %2438 = vmatpush.bf16.msrb.mxu0 %v7049_v15  ;;  %2452 = vmatpush.bf16.msrb.mxu1 %v7057_v3  ;;  %v7045_v15 = vld [vmem:[#allocation2 + $0x518] sm:$0xff] }
 0x109   : > { %v2535_v7 = vshll.u32 %v2484_v13, 16  ;;  %v7053_v3 = vld [vmem:[#allocation2 + $0x558] sm:$0xff]  ;;  %v2526_v60 = vor.u32 %v2525_v50, %v2521_v53  ;;  %v2304_v50 = vmul.f32 %v7630_v40, %v7620_v34  ;;  %v2862_v53 = vmul.f32 %v7815_v63, %v7594_v20 }
 0x10a   : > { %2645 = vmatpush.bf16.msrb.mxu2 %v7062_v32  ;;  %2659 = vmatpush.bf16.msrb.mxu3 %v7070_v10  ;;  %v7058_v10 = vld [vmem:[#allocation2 + $0x580] sm:$0xff]  ;;  %v2861_v34 = vmul.f32 %v7744_v44, %v7611_v30 }
 0x10b   : > { %v2537_v32 = vrot.slane %v2535_v7, 1  ;;  %v7042_v7 = vld [vmem:[#allocation2 + $0x500] sm:$0xff] }
 0x10c   : > { %2439 = vmatpush.bf16.msrb.mxu0 %v7048_v18  ;;  %2453 = vmatpush.bf16.msrb.mxu1 %v7056_v45  ;;  %v2528_v18 = vshll.u32 %v2485_v14, 16  ;;  %v2533_v45 = vshrl.u32 %v2484_v13, 16  ;;  %v7081_v14 = vld [vmem:[#allocation2 + $0x638] sm:$0xff] }
 0x10e   : > { %2646 = vmatpush.bf16.msrb.mxu2 %v7061_v24  ;;  %2660 = vmatpush.bf16.msrb.mxu3 %v7069_v54  ;;  %v7105_v24 = vld [vmem:[#allocation2 + $0x6f8] sm:$0xff]  ;;  %v7044_v54 = vld [vmem:[#allocation2 + $0x510] sm:$0xff]  ;;  %v2538_v47 = vor.u32 %v2537_v32, %v2533_v45  ;;  %v2530_v21 = vrot.slane %v2528_v18, 1  ;;  %v2306_v32 = vmul.f32 %v7744_v44, %v7646_v56  ;;  %v7102_v18 = vld [vmem:[#allocation2 + $0x6e0] sm:$0xff] }
 0x110   : > { %2440 = vmatpush.bf16.msrb.mxu0 %v7047_v22  ;;  %2454 = vmatpush.bf16.msrb.mxu1 %v7055_v23  ;;  %v2542_v22 = vrot.slane %v2540_v39, 1  ;;  %v7096_v23 = vld [vmem:[#allocation2 + $0x6b0] sm:$0xff]  ;;  %v2531_v13 = vsel %vm419_vm2, %v2526_v60, %v2530_v21 }
 0x112   : > { %2647 = vmatpush.bf16.msrb.mxu2 %v7060_v26  ;;  %2661 = vmatpush.bf16.msrb.mxu3 %v7068_v25  ;;  %v2543_v26 = vsel %vm419_vm2, %v2538_v47, %v2542_v22  ;;  %v7043_v25 = vld [vmem:[#allocation2 + $0x508] sm:$0xff]  ;;  %v2866_v22 = vpack.c.bf16 %v2862_v53, %v2862_v53 }
 0x114   : > { %2441 = vmatpush.bf16.msrb.mxu0 %v7046_v61  ;;  %2455 = vmatpush.bf16.msrb.mxu1 %v7054_v2  ;;  %v7095_v61 = vld [vmem:[#allocation2 + $0x6a8] sm:$0xff] }
 0x115   : > { %v7103_v2 = vld [vmem:[#allocation2 + $0x6e8] sm:$0xff] }
 0x116   : > { %2648 = vmatpush.bf16.msrb.mxu2 %v7059_v55  ;;  %2662 = vmatpush.bf16.msrb.mxu3 %v7067_v28  ;;  %v7050_v55 = vld [vmem:[#allocation2 + $0x540] sm:$0xff]  ;;  %v2855_v28 = vunpack.c.h.bf16 %v7940_v1 }
 0x118   : > { %2442 = vmatpush.bf16.msrb.mxu0 %v7045_v15  ;;  %2456 = vmatpush.bf16.msrb.mxu1 %v7053_v3  ;;  %v2303_v15 = vmul.f32 %v7630_v40, %v7614_v31  ;;  %v2305_v3 = vmul.f32 %v7742_v43, %v7646_v56  ;;  %v7094_v31 = vld [vmem:[#allocation2 + $0x6a0] sm:$0xff]  ;;  %v2859_v45 = vmul.f32 %v2855_v28, %v7591_v19 }
 0x11a   : > { %2649 = vmatpush.bf16.msrb.mxu2 %v7058_v10  ;;  %2663 = vmatpush.bf16.msrb.mxu3 %v7066_v35  ;;  %v2858_v10 = vmul.f32 %v2854_v41, %v7591_v19  ;;  %v2860_v35 = vmul.f32 %v7742_v43, %v7611_v30  ;;  %v2307_v39 = vpack.c.bf16 %v2305_v3, %v2303_v15  ;;  %v2913_v15 = vshll.u32 %v2866_v22, 16 }
 0x11c   : > { %2443 = vmatpush.bf16.msrb.mxu0 %v7044_v54  ;;  %2457 = vmatpush.bf16.msrb.mxu1 %v7052_v42  ;;  %v7088_v54 = vld [vmem:[#allocation2 + $0x670] sm:$0xff]  ;;  %v2863_v42 = vmul.f32 %v7824_v33, %v7594_v20  ;;  %v2864_v21 = vpack.c.bf16 %v2860_v35, %v2858_v10  ;;  %v7086_v10 = vld [vmem:[#allocation2 + $0x660] sm:$0xff] }
 0x11d   : > { %2650 = vmatmul.bf16.vlgmr.msrb.gmra.mxu2 %v2531_v13  ;;  %2664 = vmatmul.bf16.vlgmr.msrb.gmra.mxu3 %v2543_v26  ;;  %v2865_v13 = vpack.c.bf16 %v2861_v34, %v2859_v45  ;;  %v7079_v26 = vld [vmem:[#allocation2 + $0x628] sm:$0xff] }
 0x11e   : > { %3033 = vmatpush.bf16.msra.mxu2 %v7097_v12  ;;  %3047 = vmatpush.bf16.msra.mxu3 %v7105_v24  ;;  %v2308_v12 = vpack.c.bf16 %v2306_v32, %v2304_v50  ;;  %v7080_v24 = vld [vmem:[#allocation2 + $0x630] sm:$0xff]  ;;  %v2902_v41 = vshrl.u32 %v2864_v21, 16  ;;  %v7078_v32 = vld [vmem:[#allocation2 + $0x620] sm:$0xff] }
 0x11f   : > { %v2919_v3 = vshrl.u32 %v2865_v13, 16  ;;  %v2922_v50 = vshll.u32 %v2865_v13, 16  ;;  %v7085_v13 = vld [vmem:[#allocation2 + $0x658] sm:$0xff] }
 0x120   : > { %2444 = vmatpush.bf16.msrb.mxu0 %v7043_v25  ;;  %2458 = vmatpush.bf16.msrb.mxu1 %v7051_v0  ;;  %v675_v60 = vpop.f32.mrf.mxu2  ;;  %v689_v47 = vpop.f32.mrf.mxu3  ;;  %v7087_v25 = vld [vmem:[#allocation2 + $0x668] sm:$0xff]  ;;  %v2867_v0 = vpack.c.bf16 %v2863_v42, %v2863_v42  ;;  %v2904_v34 = vrot.slane %v2902_v41, 1  ;;  %v2915_v42 = vrot.slane %v2913_v15, 2  ;;  %v7090_v41 = vld [vmem:[#allocation2 + $0x680] sm:$0xff]  ;;  %v2709_v15 = vunpack.c.l.b16 %v7940_v1 }
 0x122   : > { %3034 = vmatpush.bf16.msra.mxu2 %v7096_v23  ;;  %3048 = vmatpush.bf16.msra.mxu3 %v7104_v46  ;;  %v7093_v23 = vld [vmem:[#allocation2 + $0x698] sm:$0xff]  ;;  %v2927_v35 = vshrl.u32 %v2867_v0, 16  ;;  %v2930_v53 = vshll.u32 %v2867_v0, 16 }
 0x123   : > { %v7101_v46 = vld [vmem:[#allocation2 + $0x6d8] sm:$0xff] }
 0x124   : > { %2445 = vmatpush.bf16.msrb.mxu0 %v7042_v7  ;;  %2459 = vmatpush.bf16.msrb.mxu1 %v7050_v55  ;;  %v2905_v7 = vshll.u32 %v2864_v21, 16  ;;  %v2910_v55 = vshrl.u32 %v2866_v22, 16  ;;  %v2921_v21 = vrot.slane %v2919_v3, 1  ;;  %v2924_v22 = vrot.slane %v2922_v50, 2  ;;  %v7966_v3 = vld [vmem:[%s7587_s20 + $0x10] sm:$0xff] }
 0x125   : > { %v2711_v50 = vunpack.c.l.b16 %v7966_v3 }
 0x126   : > { %3035 = vmatpush.bf16.msra.mxu2 %v7095_v61  ;;  %3049 = vmatpush.bf16.msra.mxu3 %v7103_v2  ;;  %v551_v61 = vpop.f32.mrf.mxu0  ;;  %v565_v2 = vpop.f32.mrf.mxu1 }
 0x127   : > { %2446 = vmatmul.bf16.vlgmr.msrb.gmra.mxu0 %v2307_v39  ;;  %2460 = vmatmul.bf16.vlgmr.msrb.gmra.mxu1 %v2308_v12  ;;  %v566_v28 = vadd.f32 %v565_v2, %v551_v61  ;;  %v2907_v39 = vrot.slane %v2905_v7, 2  ;;  %v2912_v12 = vrot.slane %v2910_v55, 1  ;;  %v7098_v7 = vld [vmem:[#allocation2 + $0x6c0] sm:$0xff] }
 0x128   : > { %2823 = vmatpush.bf16.msra.mxu0 %v7081_v14  ;;  %2837 = vmatpush.bf16.msra.mxu1 %v7089_v58  ;;  %v7092_v14 = vld [vmem:[#allocation2 + $0x690] sm:$0xff]  ;;  %v691_v45 = vpop.f32.mrf.mxu3 }
 0x129   : > { %v7100_v58 = vld [vmem:[#allocation2 + $0x6d0] sm:$0xff]  ;;  %v2908_v61 = vor.u32 %v2907_v39, %v2904_v34  ;;  %v2916_v55 = vor.u32 %v2915_v42, %v2912_v12  ;;  %v2712_v34 = vunpack.c.h.b16 %v7966_v3  ;;  %v2714_v39 = vunpack.c.h.b16 %v7923_v52 }
 0x12a   : > { %3036 = vmatpush.bf16.msra.mxu2 %v7094_v31  ;;  %3050 = vmatpush.bf16.msra.mxu3 %v7102_v18  ;;  %v676_v31 = vadd.f32 %v675_v60, %v566_v28  ;;  %v677_v18 = vpop.f32.mrf.mxu2  ;;  %v2932_v60 = vrot.slane %v2930_v53, 2  ;;  %v2925_v28 = vor.u32 %v2924_v22, %v2921_v21  ;;  %v7084_v53 = vld [vmem:[#allocation2 + $0x650] sm:$0xff] }
 0x12b   : > { %v2917_v21 = vsel %vm956_vm3, %v2908_v61, %v2916_v55  ;;  %v7128_v22 = vld [vmem:[#allocation2 + $0x7b0] sm:$0xff] }
 0x12c   : > { %2824 = vmatpush.bf16.msra.mxu0 %v7080_v24  ;;  %2838 = vmatpush.bf16.msra.mxu1 %v7088_v54  ;;  %v7091_v24 = vld [vmem:[#allocation2 + $0x688] sm:$0xff] }
 0x12d   : > { %v7099_v54 = vld [vmem:[#allocation2 + $0x6c8] sm:$0xff] }
 0x12e   : > { %3037 = vmatpush.bf16.msra.mxu2 %v7093_v23  ;;  %3051 = vmatpush.bf16.msra.mxu3 %v7101_v46  ;;  %v7962_v23 = vadd.f32 %v689_v47, %v676_v31  ;;  %v7077_v46 = vld [vmem:[#allocation2 + $0x618] sm:$0xff]  ;;  %v567_v0 = vpop.f32.mrf.mxu1  ;;  %v2710_v31 = vunpack.c.h.b16 %v7940_v1  ;;  %v2715_v1 = vpack.c.b16 %v2711_v50, %v2709_v15 }
 0x12f   : > { %v7129_v47 = vld [vmem:[#allocation2 + $0x7b8] sm:$0xff] }
 0x130   : > { %2825 = vmatpush.bf16.msra.mxu0 %v7079_v26  ;;  %2839 = vmatpush.bf16.msra.mxu1 %v7087_v25  ;;  %v2929_v26 = vrot.slane %v2927_v35, 1  ;;  %v553_v25 = vpop.f32.mrf.mxu0  ;;  %v7076_v35 = vld [vmem:[#allocation2 + $0x610] sm:$0xff] }
 0x131   : > { %v568_v2 = vadd.f32 %v567_v0, %v553_v25 }
 0x132   : > { %3038 = vmatpush.bf16.msra.mxu2 %v7092_v14  ;;  %3052 = vmatpush.bf16.msra.mxu3 %v7100_v58  ;;  %v7137_v14 = vld [vmem:[#allocation2 + $0x7f8] sm:$0xff]  ;;  %v2933_v58 = vor.u32 %v2932_v60, %v2929_v26  ;;  %v1098_v12 = vpop.f32.mrf.mxu2  ;;  %v2716_v60 = vpack.c.b16 %v2712_v34, %v2710_v31 }
 0x134   : > { %2826 = vmatpush.bf16.msra.mxu0 %v7078_v32  ;;  %2840 = vmatpush.bf16.msra.mxu1 %v7086_v10  ;;  %v2713_v32 = vunpack.c.l.b16 %v7923_v52  ;;  %v678_v10 = vadd.f32 %v677_v18, %v568_v2  ;;  %v2934_v18 = vsel %vm956_vm3, %v2925_v28, %v2933_v58  ;;  %v7075_v52 = vld [vmem:[#allocation2 + $0x608] sm:$0xff]  ;;  %v7074_v28 = vld [vmem:[#allocation2 + $0x600] sm:$0xff]  ;;  %v2722_v58 = vrot.slane %v2716_v60, 1 }
 0x135   : > { %v7127_v2 = vld [vmem:[#allocation2 + $0x7a8] sm:$0xff] }
 0x136   : > { %3039 = vmatpush.bf16.msra.mxu2 %v7091_v24  ;;  %3053 = vmatpush.bf16.msra.mxu3 %v7099_v54  ;;  %v1112_v24 = vpop.f32.mrf.mxu3  ;;  %v692_v42 = vadd.f32 %v691_v45, %v678_v10  ;;  %v2717_v26 = vpack.c.b16 %v2713_v32, %v2713_v32  ;;  %v2718_v45 = vpack.c.b16 %v2714_v39, %v2714_v39  ;;  %v869_v0 = vpop.f32.mrf.mxu1 }
 0x137   : > { %v1113_v54 = vadd.f32 %v1112_v24, %v1098_v12 }
 0x138   : > { %2827 = vmatpush.bf16.msra.mxu0 %v7077_v46  ;;  %2841 = vmatpush.bf16.msra.mxu1 %v7085_v13  ;;  %v7136_v46 = vld [vmem:[#allocation2 + $0x7f0] sm:$0xff]  ;;  %v7083_v13 = vld [vmem:[#allocation2 + $0x648] sm:$0xff]  ;;  %v855_v25 = vpop.f32.mrf.mxu0  ;;  %v2723_v15 = vrot.slane %v2718_v45, 1 }
 0x139   : > { %v870_v61 = vadd.f32 %v869_v0, %v855_v25  ;;  %v7111_v25 = vld [vmem:[#allocation2 + $0x728] sm:$0xff] }
 0x13a   : > { %3040 = vmatpush.bf16.msra.mxu2 %v7090_v41  ;;  %3054 = vmatpush.bf16.msra.mxu3 %v7098_v7  ;;  %v7135_v41 = vld [vmem:[#allocation2 + $0x7e8] sm:$0xff]  ;;  %v2719_v7 = vrot.slane %v2715_v1, 1  ;;  %v1100_v32 = vpop.f32.mrf.mxu2  ;;  %v2724_v24 = vsel %vm741_vm5, %v2722_v58, %v2723_v15  ;;  %v7120_v1 = vld [vmem:[#allocation2 + $0x770] sm:$0xff] }
 0x13b   : > { %v874_v55 = vadd.f32 %v870_v61, %v7962_v23  ;;  %v7126_v23 = vld [vmem:[#allocation2 + $0x7a0] sm:$0xff]  ;;  %v7119_v0 = vld [vmem:[#allocation2 + $0x768] sm:$0xff] }
 0x13c   : > { %2828 = vmatpush.bf16.msra.mxu0 %v7076_v35  ;;  %2842 = vmatpush.bf16.msra.mxu1 %v7084_v53  ;;  %v7113_v35 = vld [vmem:[#allocation2 + $0x738] sm:$0xff]  ;;  %v7123_v58 = vld [vmem:[#allocation2 + $0x788] sm:$0xff] }
 0x13d   : > { %3041 = vmatmul.bf16.vlgmr.msra.gmra.mxu2 %v2917_v21  ;;  %3055 = vmatmul.bf16.vlgmr.msra.gmra.mxu3 %v2934_v18  ;;  %v7121_v53 = vld [vmem:[#allocation2 + $0x778] sm:$0xff]  ;;  %v1117_v39 = vadd.f32 %v1113_v54, %v874_v55  ;;  %v7134_v21 = vld [vmem:[#allocation2 + $0x7e0] sm:$0xff]  ;;  %v7131_v15 = vld [vmem:[#allocation2 + $0x7c8] sm:$0xff] }
 0x13e   : > { %3398 = vmatpush.bf16.msrb.mxu2 %v7129_v47  ;;  %3412 = vmatpush.bf16.msrb.mxu3 %v7137_v14  ;;  %v7082_v47 = vld [vmem:[#allocation2 + $0x640] sm:$0xff]  ;;  %v2720_v14 = vrot.slane %v2717_v26, 1  ;;  %v1114_v10 = vpop.f32.mrf.mxu3  ;;  %v7133_v26 = vld [vmem:[#allocation2 + $0x7d8] sm:$0xff] }
 0x13f   : > { %v1115_v31 = vadd.f32 %v1114_v10, %v1100_v32  ;;  %v7110_v55 = vld [vmem:[#allocation2 + $0x720] sm:$0xff] }
 0x140   : > { %2829 = vmatpush.bf16.msra.mxu0 %v7075_v52  ;;  %2843 = vmatpush.bf16.msra.mxu1 %v7083_v13  ;;  %v2721_v12 = vsel %vm741_vm5, %v2719_v7, %v2720_v14  ;;  %v857_v18 = vpop.f32.mrf.mxu0  ;;  %v7125_v13 = vld [vmem:[#allocation2 + $0x798] sm:$0xff]  ;;  %v7132_v7 = vld [vmem:[#allocation2 + $0x7d0] sm:$0xff] }
 0x142   : > { %3399 = vmatpush.bf16.msrb.mxu2 %v7128_v22  ;;  %3413 = vmatpush.bf16.msrb.mxu3 %v7136_v46  ;;  %v871_v22 = vpop.f32.mrf.mxu1  ;;  %v7112_v46 = vld [vmem:[#allocation2 + $0x730] sm:$0xff]  ;;  %v1504_v60 = vpop.f32.mrf.mxu2 }
 0x143   : > { %v872_v52 = vadd.f32 %v871_v22, %v857_v18  ;;  %v7161_v18 = vld [vmem:[#allocation2 + $0x8b8] sm:$0xff] }
 0x144   : > { %2830 = vmatpush.bf16.msra.mxu0 %v7074_v28  ;;  %2844 = vmatpush.bf16.msra.mxu1 %v7082_v47  ;;  %v7118_v28 = vld [vmem:[#allocation2 + $0x760] sm:$0xff]  ;;  %v7169_v22 = vld [vmem:[#allocation2 + $0x8f8] sm:$0xff] }
 0x145   : > { %v875_v54 = vadd.f32 %v872_v52, %v692_v42  ;;  %v7116_v52 = vld [vmem:[#allocation2 + $0x750] sm:$0xff] }
 0x146   : > { %3400 = vmatpush.bf16.msrb.mxu2 %v7127_v2  ;;  %3414 = vmatpush.bf16.msrb.mxu3 %v7135_v41  ;;  %v1518_v45 = vpop.f32.mrf.mxu3  ;;  %v7124_v41 = vld [vmem:[#allocation2 + $0x790] sm:$0xff] }
 0x147   : > { %2831 = vmatmul.bf16.vlgmr.msra.gmra.mxu0 %v2721_v12  ;;  %2845 = vmatmul.bf16.vlgmr.msra.gmra.mxu1 %v2724_v24  ;;  %v1519_v61 = vadd.f32 %v1518_v45, %v1504_v60  ;;  %v1118_v2 = vadd.f32 %v1115_v31, %v875_v54  ;;  %v7117_v31 = vld [vmem:[#allocation2 + $0x758] sm:$0xff]  ;;  %v3070_v60 = vmul.f32 %v7815_v63, %v7721_v6  ;;  %v7115_v63 = vld [vmem:[#allocation2 + $0x748] sm:$0xff] }
 0x148   : > { %3217 = vmatpush.bf16.msrb.mxu0 %v7113_v35  ;;  %3231 = vmatpush.bf16.msrb.mxu1 %v7121_v53  ;;  %v1315_v47 = vpop.f32.mrf.mxu0  ;;  %v7109_v53 = vld [vmem:[#allocation2 + $0x718] sm:$0xff]  ;;  %v3067_v45 = vmul.f32 %v7826_v37, %v7718_v5 }
 0x14a   : > { %3401 = vmatpush.bf16.msrb.mxu2 %v7126_v23  ;;  %3415 = vmatpush.bf16.msrb.mxu3 %v7134_v21  ;;  %v1329_v42 = vpop.f32.mrf.mxu1  ;;  %v1506_v10 = vpop.f32.mrf.mxu2  ;;  %v7122_v23 = vld [vmem:[#allocation2 + $0x780] sm:$0xff] }
 0x14b   : > { %v1330_v14 = vadd.f32 %v1329_v42, %v1315_v47  ;;  %v7130_v21 = vld [vmem:[#allocation2 + $0x7c0] sm:$0xff] }
 0x14c   : > { %3218 = vmatpush.bf16.msrb.mxu0 %v7112_v46  ;;  %3232 = vmatpush.bf16.msrb.mxu1 %v7120_v1 }
 0x14d   : > { %v1334_v32 = vadd.f32 %v1330_v14, %v1117_v39  ;;  %v7108_v39 = vld [vmem:[#allocation2 + $0x710] sm:$0xff]  ;;  %v7106_v14 = vld [vmem:[#allocation2 + $0x700] sm:$0xff] }
 0x14e   : > { %3402 = vmatpush.bf16.msrb.mxu2 %v7125_v13  ;;  %3416 = vmatpush.bf16.msrb.mxu3 %v7133_v26  ;;  %v1520_v35 = vpop.f32.mrf.mxu3  ;;  %v3066_v13 = vmul.f32 %v7804_v8, %v7718_v5  ;;  %v3068_v26 = vmul.f32 %v7742_v43, %v7740_v17 }
 0x14f   : > { %v1521_v12 = vadd.f32 %v1520_v35, %v1506_v10  ;;  %v7982_v24 = vadd.f32 %v1519_v61, %v1334_v32  ;;  %v7160_v61 = vld [vmem:[#allocation2 + $0x8b0] sm:$0xff]  ;;  %v7153_v32 = vld [vmem:[#allocation2 + $0x878] sm:$0xff] }
 0x150   : > { %3219 = vmatpush.bf16.msrb.mxu0 %v7111_v25  ;;  %3233 = vmatpush.bf16.msrb.mxu1 %v7119_v0  ;;  %v1317_v46 = vpop.f32.mrf.mxu0  ;;  %v3069_v25 = vmul.f32 %v7744_v44, %v7740_v17  ;;  %v3071_v0 = vmul.f32 %v7824_v33, %v7721_v6  ;;  %v7159_v33 = vld [vmem:[#allocation2 + $0x8a8] sm:$0xff] }
 0x152   : > { %3403 = vmatpush.bf16.msrb.mxu2 %v7124_v41  ;;  %3417 = vmatpush.bf16.msrb.mxu3 %v7132_v7  ;;  %v1331_v1 = vpop.f32.mrf.mxu1  ;;  %v7168_v41 = vld [vmem:[#allocation2 + $0x8f0] sm:$0xff]  ;;  %v7107_v7 = vld [vmem:[#allocation2 + $0x708] sm:$0xff]  ;;  %v3073_v47 = vpack.c.bf16 %v3069_v25, %v3067_v45  ;;  %v3075_v42 = vpack.c.bf16 %v3071_v0, %v3071_v0 }
 0x153   : > { %v1332_v54 = vadd.f32 %v1331_v1, %v1317_v46  ;;  %v7165_v46 = vld [vmem:[#allocation2 + $0x8d8] sm:$0xff]  ;;  %v7164_v45 = vld [vmem:[#allocation2 + $0x8d0] sm:$0xff] }
 0x154   : > { %3220 = vmatpush.bf16.msrb.mxu0 %v7110_v55  ;;  %3234 = vmatpush.bf16.msrb.mxu1 %v7118_v28  ;;  %v3072_v55 = vpack.c.bf16 %v3068_v26, %v3066_v13  ;;  %v3074_v28 = vpack.c.bf16 %v3070_v60, %v3070_v60  ;;  %v3116_v35 = vrot.slane %v3073_v47, 2  ;;  %v3672_v26 = vunpack.c.l.b16 %v7885_v36  ;;  %v7156_v60 = vld [vmem:[#allocation2 + $0x890] sm:$0xff] }
 0x155   : > { %v1335_v8 = vadd.f32 %v1332_v54, %v1118_v2  ;;  %v7167_v2 = vld [vmem:[#allocation2 + $0x8e8] sm:$0xff] }
 0x156   : > { %3404 = vmatpush.bf16.msrb.mxu2 %v7123_v58  ;;  %3418 = vmatpush.bf16.msrb.mxu3 %v7131_v15  ;;  %v7114_v58 = vld [vmem:[#allocation2 + $0x740] sm:$0xff]  ;;  %v7145_v15 = vld [vmem:[#allocation2 + $0x838] sm:$0xff]  ;;  %v3113_v10 = vrot.slane %v3072_v55, 2  ;;  %v7151_v54 = vld [vmem:[#allocation2 + $0x868] sm:$0xff] }
 0x157   : > { %v7998_v37 = vadd.f32 %v1521_v12, %v1335_v8  ;;  %v7144_v12 = vld [vmem:[#allocation2 + $0x830] sm:$0xff]  ;;  %v7354_v8 = vld [vmem:[%s7587_s20 + $0x18] sm:$0x77]  ;;  %v7142_v55 = vld [vmem:[#allocation2 + $0x820] sm:$0xff] }
 0x158   : > { %3221 = vmatpush.bf16.msrb.mxu0 %v7109_v53  ;;  %3235 = vmatpush.bf16.msrb.mxu1 %v7117_v31  ;;  %v7158_v53 = vld [vmem:[#allocation2 + $0x8a0] sm:$0xff] }
 0x159   : > { %v7166_v31 = vld [vmem:[#allocation2 + $0x8e0] sm:$0xff] }
 0x15a   : > { %3405 = vmatpush.bf16.msrb.mxu2 %v7122_v23  ;;  %3419 = vmatpush.bf16.msrb.mxu3 %v7130_v21  ;;  %v7152_v23 = vld [vmem:[#allocation2 + $0x870] sm:$0xff] }
 0x15c   : > { %3222 = vmatpush.bf16.msrb.mxu0 %v7108_v39  ;;  %3236 = vmatpush.bf16.msrb.mxu1 %v7116_v52  ;;  %v7143_v52 = vld [vmem:[#allocation2 + $0x828] sm:$0xff] }
 0x15d   : > { %3406 = vmatmul.bf16.vlgmr.msrb.gmra.mxu2 %v7855_v9  ;;  %3420 = vmatmul.bf16.vlgmr.msrb.gmra.mxu3 %v7858_v16  ;;  %v3114_v9 = vrot.slane %v3074_v28, 2  ;;  %v3117_v16 = vrot.slane %v3075_v42, 2  ;;  %v7150_v28 = vld [vmem:[#allocation2 + $0x860] sm:$0xff]  ;;  %v3676_v42 = vpack.c.b16 %v2711_v50, %v3672_v26  ;;  %v7192_v26 = vld [vmem:[#allocation2 + $0x9b0] sm:$0xff] }
 0x15e   : > { %3784 = vmatpush.bf16.msra.mxu2 %v7161_v18  ;;  %3798 = vmatpush.bf16.msra.mxu3 %v7169_v22  ;;  %v7157_v22 = vld [vmem:[#allocation2 + $0x898] sm:$0xff]  ;;  %v7154_v50 = vld [vmem:[#allocation2 + $0x880] sm:$0xff] }
 0x15f   : > { %v3115_v21 = vsel %vm1201_vm6, %v3113_v10, %v3114_v9  ;;  %v3118_v18 = vsel %vm1201_vm6, %v3116_v35, %v3117_v16  ;;  %v7141_v9 = vld [vmem:[#allocation2 + $0x818] sm:$0xff]  ;;  %v7162_v16 = vld [vmem:[#allocation2 + $0x8c0] sm:$0xff] }
 0x160   : > { %3223 = vmatpush.bf16.msrb.mxu0 %v7107_v7  ;;  %3237 = vmatpush.bf16.msrb.mxu1 %v7115_v63  ;;  %v1899_v1 = vpop.f32.mrf.mxu2  ;;  %v1913_v39 = vpop.f32.mrf.mxu3  ;;  %v3675_v7 = vunpack.c.h.b16 %v7354_v8 }
 0x161   : > { %v1914_v13 = vadd.f32 %v1913_v39, %v1899_v1  ;;  %v7148_v1 = vld [vmem:[#allocation2 + $0x850] sm:$0xff] }
 0x162   : > { %3785 = vmatpush.bf16.msra.mxu2 %v7160_v61  ;;  %3799 = vmatpush.bf16.msra.mxu3 %v7168_v41  ;;  %v3674_v61 = vunpack.c.l.b16 %v7354_v8  ;;  %v3673_v41 = vunpack.c.h.b16 %v7885_v36  ;;  %v7138_v8 = vld [vmem:[#allocation2 + $0x800] sm:$0xff] }
 0x164   : > { %3224 = vmatpush.bf16.msrb.mxu0 %v7106_v14  ;;  %3238 = vmatpush.bf16.msrb.mxu1 %v7114_v58  ;;  %v1720_v25 = vpop.f32.mrf.mxu0  ;;  %v1734_v0 = vpop.f32.mrf.mxu1  ;;  %v3677_v36 = vpack.c.b16 %v2712_v34, %v3673_v41  ;;  %v7193_v34 = vld [vmem:[#allocation2 + $0x9b8] sm:$0xff] }
 0x165   : > { %v1735_v63 = vadd.f32 %v1734_v0, %v1720_v25  ;;  %v7147_v25 = vld [vmem:[#allocation2 + $0x848] sm:$0xff]  ;;  %v7177_v41 = vld [vmem:[#allocation2 + $0x938] sm:$0xff] }
 0x166   : > { %3786 = vmatpush.bf16.msra.mxu2 %v7159_v33  ;;  %3800 = vmatpush.bf16.msra.mxu3 %v7167_v2  ;;  %v7155_v33 = vld [vmem:[#allocation2 + $0x888] sm:$0xff] }
 0x167   : > { %3225 = vmatmul.bf16.vlgmr.msrb.gmra.mxu0 %v3115_v21  ;;  %3239 = vmatmul.bf16.vlgmr.msrb.gmra.mxu1 %v3118_v18  ;;  %v1739_v47 = vadd.f32 %v1735_v63, %v7982_v24  ;;  %v7163_v2 = vld [vmem:[#allocation2 + $0x8c8] sm:$0xff]  ;;  %v7149_v24 = vld [vmem:[#allocation2 + $0x858] sm:$0xff]  ;;  %v3683_v21 = vrot.slane %v3677_v36, 3  ;;  %v7190_v63 = vld [vmem:[#allocation2 + $0x9a0] sm:$0xff] }
 0x168   : > { %3606 = vmatpush.bf16.msra.mxu0 %v7145_v15  ;;  %3620 = vmatpush.bf16.msra.mxu1 %v7153_v32  ;;  %v1901_v14 = vpop.f32.mrf.mxu2  ;;  %v1915_v58 = vpop.f32.mrf.mxu3  ;;  %v3678_v15 = vpack.c.b16 %v3674_v61, %v3674_v61  ;;  %v3679_v32 = vpack.c.b16 %v3675_v7, %v3675_v7  ;;  %v7199_v0 = vld [vmem:[#allocation2 + $0x9e8] sm:$0xff]  ;;  %v7146_v61 = vld [vmem:[#allocation2 + $0x840] sm:$0xff]  ;;  %v7185_v7 = vld [vmem:[#allocation2 + $0x978] sm:$0xff] }
 0x169   : > { %v8010_v10 = vadd.f32 %v1914_v13, %v1739_v47  ;;  %v1916_v35 = vadd.f32 %v1915_v58, %v1901_v14  ;;  %v7184_v47 = vld [vmem:[#allocation2 + $0x970] sm:$0xff]  ;;  %v7183_v36 = vld [vmem:[#allocation2 + $0x968] sm:$0xff] }
 0x16a   : > { %3787 = vmatpush.bf16.msra.mxu2 %v7158_v53  ;;  %3801 = vmatpush.bf16.msra.mxu3 %v7166_v31  ;;  %v3684_v18 = vrot.slane %v3679_v32, 3  ;;  %v7188_v32 = vld [vmem:[#allocation2 + $0x990] sm:$0xff] }
 0x16c   : > { %3607 = vmatpush.bf16.msra.mxu0 %v7144_v12  ;;  %3621 = vmatpush.bf16.msra.mxu1 %v7152_v23  ;;  %v1722_v53 = vpop.f32.mrf.mxu0  ;;  %v1736_v31 = vpop.f32.mrf.mxu1  ;;  %v3680_v12 = vrot.slane %v3676_v42, 3  ;;  %v3681_v23 = vrot.slane %v3678_v15, 3  ;;  %v7189_v42 = vld [vmem:[#allocation2 + $0x998] sm:$0xff]  ;;  %v7175_v15 = vld [vmem:[#allocation2 + $0x928] sm:$0xff] }
 0x16d   : > { %v1737_v3 = vadd.f32 %v1736_v31, %v1722_v53  ;;  %v7187_v53 = vld [vmem:[#allocation2 + $0x988] sm:$0xff] }
 0x16e   : > { %3788 = vmatpush.bf16.msra.mxu2 %v7157_v22  ;;  %3802 = vmatpush.bf16.msra.mxu3 %v7165_v46  ;;  %v7201_v22 = vld [vmem:[#allocation2 + $0x9f8] sm:$0xff]  ;;  %v7140_v46 = vld [vmem:[#allocation2 + $0x810] sm:$0xff]  ;;  %v7195_v31 = vld [vmem:[#allocation2 + $0x9c8] sm:$0xff] }
 0x16f   : > { %v1740_v39 = vadd.f32 %v1737_v3, %v7998_v37  ;;  %v7191_v37 = vld [vmem:[#allocation2 + $0x9a8] sm:$0xff]  ;;  %v7181_v3 = vld [vmem:[#allocation2 + $0x958] sm:$0xff] }
 0x170   : > { %3608 = vmatpush.bf16.msra.mxu0 %v7143_v52  ;;  %3622 = vmatpush.bf16.msra.mxu1 %v7151_v54  ;;  %v3682_v52 = vsel %vm1528_vm8, %v3680_v12, %v3681_v23  ;;  %v3685_v54 = vsel %vm1528_vm8, %v3683_v21, %v3684_v18  ;;  %v7173_v18 = vld [vmem:[#allocation2 + $0x918] sm:$0xff] }
 0x171   : > { %v8015_v13 = vadd.f32 %v1916_v35, %v1740_v39 }
 0x172   : > { %3789 = vmatpush.bf16.msra.mxu2 %v7156_v60  ;;  %3803 = vmatpush.bf16.msra.mxu3 %v7164_v45  ;;  %v7200_v60 = vld [vmem:[#allocation2 + $0x9f0] sm:$0xff]  ;;  %v7139_v45 = vld [vmem:[#allocation2 + $0x808] sm:$0xff] }
 0x174   : > { %3609 = vmatpush.bf16.msra.mxu0 %v7142_v55  ;;  %3623 = vmatpush.bf16.msra.mxu1 %v7150_v28  ;;  %v7198_v55 = vld [vmem:[#allocation2 + $0x9e0] sm:$0xff]  ;;  %v7176_v28 = vld [vmem:[#allocation2 + $0x930] sm:$0xff] }
 0x176   : > { %3790 = vmatpush.bf16.msra.mxu2 %v7155_v33  ;;  %3804 = vmatpush.bf16.msra.mxu3 %v7163_v2  ;;  %v7197_v33 = vld [vmem:[#allocation2 + $0x9d8] sm:$0xff] }
 0x178   : > { %3610 = vmatpush.bf16.msra.mxu0 %v7141_v9  ;;  %3624 = vmatpush.bf16.msra.mxu1 %v7149_v24  ;;  %v7196_v9 = vld [vmem:[#allocation2 + $0x9d0] sm:$0xff] }
 0x17a   : > { %3791 = vmatpush.bf16.msra.mxu2 %v7154_v50  ;;  %3805 = vmatpush.bf16.msra.mxu3 %v7162_v16  ;;  %v7182_v50 = vld [vmem:[#allocation2 + $0x960] sm:$0xff] }
 0x17c   : > { %3611 = vmatpush.bf16.msra.mxu0 %v7140_v46  ;;  %3625 = vmatpush.bf16.msra.mxu1 %v7148_v1  ;;  %v7194_v46 = vld [vmem:[#allocation2 + $0x9c0] sm:$0xff] }
 0x17d   : > { %3792 = vmatmul.bf16.vlgmr.msra.gmra.mxu2 %v3682_v52  ;;  %3806 = vmatmul.bf16.vlgmr.msra.gmra.mxu3 %v3685_v54  ;;  %v4026_v52 = vmul.f32 %v7891_v57, %v7701_v49 }
 0x17e   : > { %4159 = vmatpush.bf16.msrb.mxu2 %v7193_v34  ;;  %4173 = vmatpush.bf16.msrb.mxu3 %v7201_v22  ;;  %v7186_v22 = vld [vmem:[#allocation2 + $0x980] sm:$0xff] }
 0x180   : > { %3612 = vmatpush.bf16.msra.mxu0 %v7139_v45  ;;  %3626 = vmatpush.bf16.msra.mxu1 %v7147_v25  ;;  %v2282_v2 = vpop.f32.mrf.mxu2  ;;  %v2296_v14 = vpop.f32.mrf.mxu3  ;;  %v4025_v45 = vmul.f32 %v7744_v44, %v7699_v48  ;;  %v4027_v25 = vmul.f32 %v7895_v59, %v7701_v49  ;;  %v7224_v49 = vld [vmem:[#allocation2 + $0xaa8] sm:$0xff] }
 0x181   : > { %v2297_v58 = vadd.f32 %v2296_v14, %v2282_v2  ;;  %v7217_v2 = vld [vmem:[#allocation2 + $0xa78] sm:$0xff]  ;;  %v4354_v14 = vld [vmem:[%s7587_s20 + $0x10] sm:$0xff] }
 0x182   : > { %4160 = vmatpush.bf16.msrb.mxu2 %v7192_v26  ;;  %4174 = vmatpush.bf16.msrb.mxu3 %v7200_v60  ;;  %v7226_v26 = vld [vmem:[#allocation2 + $0xab8] sm:$0xff] }
 0x183   : > { %v7234_v60 = vld [vmem:[#allocation2 + $0xaf8] sm:$0xff] }
 0x184   : > { %3613 = vmatpush.bf16.msra.mxu0 %v7138_v8  ;;  %3627 = vmatpush.bf16.msra.mxu1 %v7146_v61  ;;  %v2117_v24 = vpop.f32.mrf.mxu0  ;;  %v2131_v35 = vpop.f32.mrf.mxu1 }
 0x186   : > { %4161 = vmatpush.bf16.msrb.mxu2 %v7191_v37  ;;  %4175 = vmatpush.bf16.msrb.mxu3 %v7199_v0  ;;  %v7172_v37 = vld [vmem:[#allocation2 + $0x910] sm:$0xff] }
 0x187   : > { %3614 = vmatmul.bf16.vlgmr.msra.gmra.mxu0 %v7882_v4  ;;  %3628 = vmatmul.bf16.vlgmr.msra.gmra.mxu1 %v7888_v38  ;;  %v2132_v4 = vadd.f32 %v2131_v35, %v2117_v24  ;;  %v7174_v38 = vld [vmem:[#allocation2 + $0x920] sm:$0xff]  ;;  %v7180_v0 = vld [vmem:[#allocation2 + $0x950] sm:$0xff] }
 0x188   : > { %3994 = vmatpush.bf16.msrb.mxu0 %v7177_v41  ;;  %4008 = vmatpush.bf16.msrb.mxu1 %v7185_v7  ;;  %v2284_v12 = vpop.f32.mrf.mxu2  ;;  %v2298_v23 = vpop.f32.mrf.mxu3  ;;  %v4029_v41 = vpack.c.bf16 %v4027_v25, %v4025_v45  ;;  %v7225_v7 = vld [vmem:[#allocation2 + $0xab0] sm:$0xff]  ;;  %v8035_v35 = vld [vmem:[%s7587_s20 + $0x20] sm:$0x11] }
 0x189   : > { %v2136_v16 = vadd.f32 %v2132_v4, %v8010_v10  ;;  %v2299_v21 = vadd.f32 %v2298_v23, %v2284_v12  ;;  %v4024_v10 = vmul.f32 %v7742_v43, %v7699_v48  ;;  %v7171_v48 = vld [vmem:[#allocation2 + $0x908] sm:$0xff]  ;;  %v7216_v24 = vld [vmem:[#allocation2 + $0xa70] sm:$0xff]  ;;  %v4365_v4 = vmul.f32 %v7891_v57, %v7662_v11 }
 0x18a   : > { %4162 = vmatpush.bf16.msrb.mxu2 %v7190_v63  ;;  %4176 = vmatpush.bf16.msrb.mxu3 %v7198_v55  ;;  %v7233_v63 = vld [vmem:[#allocation2 + $0xaf0] sm:$0xff]  ;;  %v4361_v12 = vunpack.c.l.bf16 %v8035_v35 }
 0x18b   : > { %v8020_v34 = vadd.f32 %v2297_v58, %v2136_v16  ;;  %v4028_v61 = vpack.c.bf16 %v4026_v52, %v4024_v10  ;;  %v7223_v58 = vld [vmem:[#allocation2 + $0xaa0] sm:$0xff]  ;;  %v7230_v16 = vld [vmem:[#allocation2 + $0xad8] sm:$0xff] }
 0x18c   : > { %3995 = vmatpush.bf16.msrb.mxu0 %v7176_v28  ;;  %4009 = vmatpush.bf16.msrb.mxu1 %v7184_v47  ;;  %v2119_v1 = vpop.f32.mrf.mxu0  ;;  %v2133_v39 = vpop.f32.mrf.mxu1  ;;  %v7179_v28 = vld [vmem:[#allocation2 + $0x948] sm:$0xff]  ;;  %v7170_v47 = vld [vmem:[#allocation2 + $0x900] sm:$0xff]  ;;  %v4367_v52 = vmul.f32 %v4361_v12, %v7652_v62 }
 0x18d   : > { %v2134_v54 = vadd.f32 %v2133_v39, %v2119_v1  ;;  %v7229_v1 = vld [vmem:[#allocation2 + $0xad0] sm:$0xff] }
 0x18e   : > { %4163 = vmatpush.bf16.msrb.mxu2 %v7189_v42  ;;  %4177 = vmatpush.bf16.msrb.mxu3 %v7197_v33  ;;  %v7178_v42 = vld [vmem:[#allocation2 + $0x940] sm:$0xff]  ;;  %v7209_v33 = vld [vmem:[#allocation2 + $0xa38] sm:$0xff] }
 0x18f   : > { %v2137_v8 = vadd.f32 %v2134_v54, %v8015_v13  ;;  %v7232_v13 = vld [vmem:[#allocation2 + $0xae8] sm:$0xff] }
 0x190   : > { %3996 = vmatpush.bf16.msrb.mxu0 %v7175_v15  ;;  %4010 = vmatpush.bf16.msrb.mxu1 %v7183_v36  ;;  %v7231_v15 = vld [vmem:[#allocation2 + $0xae0] sm:$0xff]  ;;  %v4357_v36 = vunpack.c.l.bf16 %v4354_v14 }
 0x191   : > { %v8031_v55 = vadd.f32 %v2299_v21, %v2137_v8  ;;  %v4362_v21 = vunpack.c.h.bf16 %v8035_v35  ;;  %v7228_v8 = vld [vmem:[#allocation2 + $0xac8] sm:$0xff] }
 0x192   : > { %4164 = vmatpush.bf16.msrb.mxu2 %v7188_v32  ;;  %4178 = vmatpush.bf16.msrb.mxu3 %v7196_v9  ;;  %v4358_v32 = vunpack.c.h.bf16 %v4354_v14  ;;  %v7208_v9 = vld [vmem:[#allocation2 + $0xa30] sm:$0xff]  ;;  %v4363_v23 = vmul.f32 %v4357_v36, %v7641_v51 }
 0x193   : > { %v4368_v54 = vmul.f32 %v4362_v21, %v7652_v62  ;;  %v7266_v21 = vld [vmem:[#allocation2 + $0xbf0] sm:$0xff] }
 0x194   : > { %3997 = vmatpush.bf16.msrb.mxu0 %v7174_v38  ;;  %4011 = vmatpush.bf16.msrb.mxu1 %v7182_v50  ;;  %v4366_v38 = vmul.f32 %v7895_v59, %v7662_v11  ;;  %v7222_v50 = vld [vmem:[#allocation2 + $0xa98] sm:$0xff] }
 0x196   : > { %4165 = vmatpush.bf16.msrb.mxu2 %v7187_v53  ;;  %4179 = vmatpush.bf16.msrb.mxu3 %v7195_v31 }
 0x198   : > { %3998 = vmatpush.bf16.msrb.mxu0 %v7173_v18  ;;  %4012 = vmatpush.bf16.msrb.mxu1 %v7181_v3  ;;  %v4364_v18 = vmul.f32 %v4358_v32, %v7641_v51  ;;  %v7215_v3 = vld [vmem:[#allocation2 + $0xa68] sm:$0xff] }
 0x19a   : > { %4166 = vmatpush.bf16.msrb.mxu2 %v7186_v22  ;;  %4180 = vmatpush.bf16.msrb.mxu3 %v7194_v46  ;;  %v4370_v22 = vpack.c.bf16 %v4366_v38, %v4364_v18  ;;  %v7221_v46 = vld [vmem:[#allocation2 + $0xa90] sm:$0xff] }
 0x19b   : > { %v7212_v38 = vld [vmem:[#allocation2 + $0xa50] sm:$0xff] }
 0x19c   : > { %3999 = vmatpush.bf16.msrb.mxu0 %v7172_v37  ;;  %4013 = vmatpush.bf16.msrb.mxu1 %v7180_v0  ;;  %v4421_v25 = vshll.u32 %v4370_v22, 16  ;;  %v7220_v0 = vld [vmem:[#allocation2 + $0xa88] sm:$0xff] }
 0x19d   : > { %4167 = vmatmul.bf16.vlgmr.msrb.gmra.mxu2 %v4028_v61  ;;  %4181 = vmatmul.bf16.vlgmr.msrb.gmra.mxu3 %v4029_v41 }
 0x19e   : > { %4528 = vmatpush.bf16.msra.mxu2 %v7226_v26  ;;  %4542 = vmatpush.bf16.msra.mxu3 %v7234_v60  ;;  %v7206_v26 = vld [vmem:[#allocation2 + $0xa20] sm:$0xff] }
 0x19f   : > { %v7214_v60 = vld [vmem:[#allocation2 + $0xa60] sm:$0xff] }
 0x1a0   : > { %4000 = vmatpush.bf16.msrb.mxu0 %v7171_v48  ;;  %4014 = vmatpush.bf16.msrb.mxu1 %v7179_v28  ;;  %v2651_v53 = vpop.f32.mrf.mxu2  ;;  %v2665_v31 = vpop.f32.mrf.mxu3  ;;  %v7205_v48 = vld [vmem:[#allocation2 + $0xa18] sm:$0xff] }
 0x1a1   : > { %v2666_v11 = vadd.f32 %v2665_v31, %v2651_v53  ;;  %v7213_v28 = vld [vmem:[#allocation2 + $0xa58] sm:$0xff] }
 0x1a2   : > { %4529 = vmatpush.bf16.msra.mxu2 %v7225_v7  ;;  %4543 = vmatpush.bf16.msra.mxu3 %v7233_v63  ;;  %v4371_v7 = vpack.c.bf16 %v4367_v52, %v4367_v52  ;;  %v4372_v63 = vpack.c.bf16 %v4368_v54, %v4368_v54  ;;  %v7243_v54 = vld [vmem:[#allocation2 + $0xb38] sm:$0xff] }
 0x1a4   : > { %4001 = vmatpush.bf16.msrb.mxu0 %v7170_v47  ;;  %4015 = vmatpush.bf16.msrb.mxu1 %v7178_v42  ;;  %v2447_v39 = vpop.f32.mrf.mxu0  ;;  %v2461_v10 = vpop.f32.mrf.mxu1  ;;  %v4423_v47 = vrot.slane %v4421_v25, 1  ;;  %v7227_v42 = vld [vmem:[#allocation2 + $0xac0] sm:$0xff]  ;;  %v4426_v36 = vshll.u32 %v4372_v63, 16  ;;  %v4192_v25 = vmul.f32 %v7895_v59, %v7646_v56  ;;  %v7250_v63 = vld [vmem:[#allocation2 + $0xb70] sm:$0xff] }
 0x1a5   : > { %v2462_v51 = vadd.f32 %v2461_v10, %v2447_v39  ;;  %v7210_v39 = vld [vmem:[#allocation2 + $0xa40] sm:$0xff] }
 0x1a6   : > { %4530 = vmatpush.bf16.msra.mxu2 %v7224_v49  ;;  %4544 = vmatpush.bf16.msra.mxu3 %v7232_v13  ;;  %v4428_v12 = vrot.slane %v4426_v36, 1  ;;  %v8059_v10 = vld [vmem:[%s7587_s20 + $0x20] sm:$0x33] }
 0x1a7   : > { %4002 = vmatmul.bf16.vlgmr.msrb.gmra.mxu0 %v7916_v29  ;;  %4016 = vmatmul.bf16.vlgmr.msrb.gmra.mxu1 %v7919_v27  ;;  %v7207_v29 = vld [vmem:[#allocation2 + $0xa28] sm:$0xff]  ;;  %v4369_v27 = vpack.c.bf16 %v4365_v4, %v4363_v23  ;;  %v2466_v37 = vadd.f32 %v2462_v51, %v8020_v34  ;;  %v7219_v34 = vld [vmem:[#allocation2 + $0xa80] sm:$0xff]  ;;  %v7204_v4 = vld [vmem:[#allocation2 + $0xa10] sm:$0xff] }
 0x1a8   : > { %4324 = vmatpush.bf16.msra.mxu0 %v7209_v33  ;;  %4338 = vmatpush.bf16.msra.mxu1 %v7217_v2  ;;  %v2653_v61 = vpop.f32.mrf.mxu2  ;;  %v2667_v41 = vpop.f32.mrf.mxu3  ;;  %v7258_v23 = vld [vmem:[#allocation2 + $0xbb0] sm:$0xff]  ;;  %v7251_v51 = vld [vmem:[#allocation2 + $0xb78] sm:$0xff] }
 0x1a9   : > { %v4409_v45 = vshll.u32 %v4369_v27, 16  ;;  %v2668_v62 = vadd.f32 %v2667_v41, %v2653_v61  ;;  %v8050_v49 = vadd.f32 %v2666_v11, %v2466_v37  ;;  %v4407_v14 = vshrl.u32 %v4369_v27, 16  ;;  %v4558_v27 = vld [vmem:[%s7587_s20 + $0x10] sm:$0xee]  ;;  %v7264_v61 = vld [vmem:[#allocation2 + $0xbe0] sm:$0xff] }
 0x1aa   : > { %4531 = vmatpush.bf16.msra.mxu2 %v7223_v58  ;;  %4545 = vmatpush.bf16.msra.mxu3 %v7231_v15  ;;  %v4414_v58 = vshll.u32 %v4371_v7, 16  ;;  %v4419_v15 = vshrl.u32 %v4370_v22, 16  ;;  %v7257_v22 = vld [vmem:[#allocation2 + $0xba8] sm:$0xff]  ;;  %v4740_v52 = vunpack.c.l.bf16 %v4558_v27  ;;  %v4741_v37 = vunpack.c.h.bf16 %v4558_v27 }
 0x1ab   : > { %v4411_v13 = vrot.slane %v4409_v45, 1  ;;  %v4190_v45 = vmul.f32 %v7744_v44, %v7630_v40  ;;  %v4746_v41 = vmul.f32 %v7891_v57, %v7611_v30  ;;  %v4743_v7 = vunpack.c.h.bf16 %v8059_v10  ;;  %v7242_v44 = vld [vmem:[#allocation2 + $0xb30] sm:$0xff]  ;;  %v7261_v27 = vld [vmem:[#allocation2 + $0xbc8] sm:$0xff] }
 0x1ac   : > { %4325 = vmatpush.bf16.msra.mxu0 %v7208_v9  ;;  %4339 = vmatpush.bf16.msra.mxu1 %v7216_v24  ;;  %v2449_v33 = vpop.f32.mrf.mxu0  ;;  %v2463_v2 = vpop.f32.mrf.mxu1  ;;  %v7259_v9 = vld [vmem:[#allocation2 + $0xbb8] sm:$0xff]  ;;  %v4416_v31 = vrot.slane %v4414_v58, 1  ;;  %v7249_v58 = vld [vmem:[#allocation2 + $0xb68] sm:$0xff] }
 0x1ad   : > { %v2464_v32 = vadd.f32 %v2463_v2, %v2449_v33  ;;  %v7267_v24 = vld [vmem:[#allocation2 + $0xbf8] sm:$0xff] }
 0x1ae   : > { %4532 = vmatpush.bf16.msra.mxu2 %v7222_v50  ;;  %4546 = vmatpush.bf16.msra.mxu3 %v7230_v16  ;;  %v4412_v50 = vor.u32 %v4411_v13, %v4407_v14  ;;  %v4424_v16 = vor.u32 %v4423_v47, %v4419_v15  ;;  %v4749_v13 = vmul.f32 %v4743_v7, %v7594_v20  ;;  %v7255_v47 = vld [vmem:[#allocation2 + $0xb98] sm:$0xff] }
 0x1af   : > { %v2467_v53 = vadd.f32 %v2464_v32, %v8031_v55  ;;  %v7211_v55 = vld [vmem:[#allocation2 + $0xa48] sm:$0xff]  ;;  %v7262_v32 = vld [vmem:[#allocation2 + $0xbd0] sm:$0xff] }
 0x1b0   : > { %4326 = vmatpush.bf16.msra.mxu0 %v7207_v29  ;;  %4340 = vmatpush.bf16.msra.mxu1 %v7215_v3  ;;  %v4417_v11 = vsel %vm419_vm2, %v4412_v50, %v4416_v31  ;;  %v4429_v29 = vsel %vm419_vm2, %v4424_v16, %v4428_v12  ;;  %v7203_v3 = vld [vmem:[#allocation2 + $0xa08] sm:$0xff]  ;;  %v4753_v36 = vpack.c.bf16 %v4749_v13, %v4749_v13  ;;  %v7240_v50 = vld [vmem:[#allocation2 + $0xb20] sm:$0xff] }
 0x1b1   : > { %v8053_v18 = vadd.f32 %v2668_v62, %v2467_v53  ;;  %v7248_v16 = vld [vmem:[#allocation2 + $0xb60] sm:$0xff] }
 0x1b2   : > { %4533 = vmatpush.bf16.msra.mxu2 %v7221_v46  ;;  %4547 = vmatpush.bf16.msra.mxu3 %v7229_v1  ;;  %v7265_v46 = vld [vmem:[#allocation2 + $0xbe8] sm:$0xff]  ;;  %v7202_v1 = vld [vmem:[#allocation2 + $0xa00] sm:$0xff] }
 0x1b4   : > { %4327 = vmatpush.bf16.msra.mxu0 %v7206_v26  ;;  %4341 = vmatpush.bf16.msra.mxu1 %v7214_v60  ;;  %v4189_v26 = vmul.f32 %v7742_v43, %v7630_v40  ;;  %v4191_v60 = vmul.f32 %v7891_v57, %v7646_v56  ;;  %v4744_v43 = vmul.f32 %v4740_v52, %v7591_v19 }
 0x1b5   : > { %v4194_v56 = vpack.c.bf16 %v4192_v25, %v4190_v45  ;;  %v7252_v25 = vld [vmem:[#allocation2 + $0xb80] sm:$0xff] }
 0x1b6   : > { %4534 = vmatpush.bf16.msra.mxu2 %v7220_v0  ;;  %4548 = vmatpush.bf16.msra.mxu3 %v7228_v8  ;;  %v4742_v0 = vunpack.c.l.bf16 %v8059_v10  ;;  %v7256_v8 = vld [vmem:[#allocation2 + $0xba0] sm:$0xff]  ;;  %v4193_v40 = vpack.c.bf16 %v4191_v60, %v4189_v26  ;;  %v4750_v2 = vpack.c.bf16 %v4746_v41, %v4744_v43  ;;  %v7238_v43 = vld [vmem:[#allocation2 + $0xb10] sm:$0xff] }
 0x1b8   : > { %4328 = vmatpush.bf16.msra.mxu0 %v7205_v48  ;;  %4342 = vmatpush.bf16.msra.mxu1 %v7213_v28  ;;  %v4748_v62 = vmul.f32 %v4742_v0, %v7594_v20  ;;  %v4745_v48 = vmul.f32 %v4741_v37, %v7591_v19  ;;  %v4747_v28 = vmul.f32 %v7895_v59, %v7611_v30  ;;  %v7241_v19 = vld [vmem:[#allocation2 + $0xb28] sm:$0xff]  ;;  %v7254_v20 = vld [vmem:[#allocation2 + $0xb90] sm:$0xff]  ;;  %v4791_v53 = vshll.u32 %v4750_v2, 16  ;;  %v7260_v37 = vld [vmem:[#allocation2 + $0xbc0] sm:$0xff] }
 0x1ba   : > { %4535 = vmatpush.bf16.msra.mxu2 %v7219_v34  ;;  %4549 = vmatpush.bf16.msra.mxu3 %v7227_v42  ;;  %v7263_v34 = vld [vmem:[#allocation2 + $0xbd8] sm:$0xff]  ;;  %v4752_v15 = vpack.c.bf16 %v4748_v62, %v4748_v62  ;;  %v4751_v30 = vpack.c.bf16 %v4747_v28, %v4745_v48  ;;  %v4600_v62 = vunpack.c.h.b16 %v8035_v35 }
 0x1bc   : > { %4329 = vmatpush.bf16.msra.mxu0 %v7204_v4  ;;  %4343 = vmatpush.bf16.msra.mxu1 %v7212_v38  ;;  %v4788_v4 = vshrl.u32 %v4750_v2, 16  ;;  %v4796_v31 = vshrl.u32 %v4752_v15, 16  ;;  %v4799_v12 = vshll.u32 %v4752_v15, 16 }
 0x1bd   : > { %4536 = vmatmul.bf16.vlgmr.msra.gmra.mxu2 %v4417_v11  ;;  %4550 = vmatmul.bf16.vlgmr.msra.gmra.mxu3 %v4429_v29  ;;  %v4813_v11 = vshrl.u32 %v4753_v36, 16  ;;  %v4816_v29 = vshll.u32 %v4753_v36, 16 }
 0x1be   : > { %4919 = vmatpush.bf16.msrb.mxu2 %v7259_v9  ;;  %4933 = vmatpush.bf16.msrb.mxu3 %v7267_v24  ;;  %v4798_v52 = vrot.slane %v4796_v31, 1  ;;  %v7274_v31 = vld [vmem:[#allocation2 + $0xc30] sm:$0xff] }
 0x1bf   : > { %v4815_v45 = vrot.slane %v4813_v11, 1 }
 0x1c0   : > { %4330 = vmatpush.bf16.msra.mxu0 %v7203_v3  ;;  %4344 = vmatpush.bf16.msra.mxu1 %v7211_v55  ;;  %v3042_v42 = vpop.f32.mrf.mxu2  ;;  %v3056_v33 = vpop.f32.mrf.mxu3  ;;  %v7253_v55 = vld [vmem:[#allocation2 + $0xb88] sm:$0xff] }
 0x1c1   : > { %v3057_v14 = vadd.f32 %v3056_v33, %v3042_v42  ;;  %v7235_v42 = vld [vmem:[%s7587_s20 + $0x14] sm:$0xe] }
 0x1c2   : > { %4920 = vmatpush.bf16.msrb.mxu2 %v7258_v23  ;;  %4934 = vmatpush.bf16.msrb.mxu3 %v7266_v21  ;;  %v4805_v23 = vshrl.u32 %v4751_v30, 16  ;;  %v4808_v21 = vshll.u32 %v4751_v30, 16  ;;  %v4604_v30 = vpack.c.b16 %v4600_v62, %v4600_v62 }
 0x1c4   : > { %4331 = vmatpush.bf16.msra.mxu0 %v7202_v1  ;;  %4345 = vmatpush.bf16.msra.mxu1 %v7210_v39  ;;  %v2832_v9 = vpop.f32.mrf.mxu0  ;;  %v2846_v24 = vpop.f32.mrf.mxu1  ;;  %v7247_v1 = vld [vmem:[#allocation2 + $0xb58] sm:$0xff]  ;;  %v4793_v39 = vrot.slane %v4791_v53, 2  ;;  %v4807_v26 = vrot.slane %v4805_v23, 1  ;;  %v4810_v60 = vrot.slane %v4808_v21, 2  ;;  %v7273_v23 = vld [vmem:[#allocation2 + $0xc28] sm:$0xff] }
 0x1c5   : > { %v2847_v38 = vadd.f32 %v2846_v24, %v2832_v9  ;;  %v7281_v21 = vld [vmem:[#allocation2 + $0xc68] sm:$0xff] }
 0x1c6   : > { %4921 = vmatpush.bf16.msrb.mxu2 %v7257_v22  ;;  %4935 = vmatpush.bf16.msrb.mxu3 %v7265_v46  ;;  %v4790_v22 = vrot.slane %v4788_v4, 1  ;;  %v7239_v46 = vld [vmem:[#allocation2 + $0xb18] sm:$0xff]  ;;  %v4811_v13 = vor.u32 %v4810_v60, %v4807_v26  ;;  %v4609_v4 = vrot.slane %v4604_v30, 1  ;;  %v7270_v26 = vld [vmem:[#allocation2 + $0xc10] sm:$0xff] }
 0x1c7   : > { %4332 = vmatmul.bf16.vlgmr.msra.gmra.mxu0 %v4193_v40  ;;  %4346 = vmatmul.bf16.vlgmr.msra.gmra.mxu1 %v4194_v56  ;;  %v2851_v3 = vadd.f32 %v2847_v38, %v8050_v49  ;;  %v4818_v49 = vrot.slane %v4816_v29, 2  ;;  %v7246_v40 = vld [vmem:[#allocation2 + $0xb50] sm:$0xff]  ;;  %v7218_v56 = vld [vmem:[%s7587_s20 + $0x14] sm:$0xf0] }
 0x1c8   : > { %4709 = vmatpush.bf16.msrb.mxu0 %v7243_v54  ;;  %4723 = vmatpush.bf16.msrb.mxu1 %v7251_v51  ;;  %v4801_v54 = vrot.slane %v4799_v12, 2  ;;  %v4794_v48 = vor.u32 %v4793_v39, %v4790_v22  ;;  %v7275_v38 = vld [vmem:[#allocation2 + $0xc38] sm:$0xff]  ;;  %v7282_v12 = vld [vmem:[#allocation2 + $0xc70] sm:$0xff]  ;;  %v3044_v10 = vpop.f32.mrf.mxu2 }
 0x1c9   : > { %v8084_v51 = vadd.f32 %v3057_v14, %v2851_v3  ;;  %v7237_v14 = vld [vmem:[#allocation2 + $0xb08] sm:$0xff]  ;;  %v7272_v3 = vld [vmem:[#allocation2 + $0xc20] sm:$0xff]  ;;  %v4949_v22 = vld [vmem:[%s7587_s20 + $0x10] sm:$0xcc] }
 0x1ca   : > { %4922 = vmatpush.bf16.msrb.mxu2 %v7256_v8  ;;  %4936 = vmatpush.bf16.msrb.mxu3 %v7264_v61  ;;  %v4802_v28 = vor.u32 %v4801_v54, %v4798_v52  ;;  %v7279_v39 = vld [vmem:[#allocation2 + $0xc58] sm:$0xff]  ;;  %v4950_v52 = vunpack.c.l.bf16 %v4949_v22  ;;  %v4951_v54 = vunpack.c.h.bf16 %v4949_v22  ;;  %v7278_v60 = vld [vmem:[#allocation2 + $0xc50] sm:$0xff] }
 0x1cc   : > { %4710 = vmatpush.bf16.msrb.mxu0 %v7242_v44  ;;  %4724 = vmatpush.bf16.msrb.mxu1 %v7250_v63  ;;  %v2834_v8 = vpop.f32.mrf.mxu0  ;;  %v2848_v61 = vpop.f32.mrf.mxu1  ;;  %v6681_v44 = vld [vmem:[%s7587_s20 + $0x10] sm:$0xe]  ;;  %v4599_v63 = vunpack.c.l.b16 %v8035_v35  ;;  %v4803_v35 = vsel %vm956_vm3, %v4794_v48, %v4802_v28 }
 0x1cd   : > { %v2849_v41 = vadd.f32 %v2848_v61, %v2834_v8  ;;  %v6682_v2 = vor.u32 %v7218_v56, %v6681_v44  ;;  %v4957_v8 = vmul.f32 %v4743_v7, %v7721_v6  ;;  %v7269_v61 = vld [vmem:[#allocation2 + $0xc08] sm:$0xff]  ;;  %v7276_v44 = vld [vmem:[#allocation2 + $0xc40] sm:$0xff]  ;;  %v3058_v7 = vpop.f32.mrf.mxu3 }
 0x1ce   : > { %4923 = vmatpush.bf16.msrb.mxu2 %v7255_v47  ;;  %4937 = vmatpush.bf16.msrb.mxu3 %v7263_v34  ;;  %v4819_v47 = vor.u32 %v4818_v49, %v4815_v45  ;;  %v6683_v34 = vld [vmem:[%s7587_s20 + $0x18] sm:$0xf0]  ;;  %v4952_v45 = vmul.f32 %v4950_v52, %v7718_v5  ;;  %v4954_v49 = vmul.f32 %v7891_v57, %v7740_v17 }
 0x1cf   : > { %v8093_v33 = vadd.f32 %v2849_v41, %v8053_v18  ;;  %v6686_v15 = vor.u32 %v7235_v42, %v6683_v34  ;;  %v7236_v18 = vld [vmem:[#allocation2 + $0xb00] sm:$0xff]  ;;  %v4961_v56 = vpack.c.bf16 %v4957_v8, %v4957_v8 }
 0x1d0   : > { %4711 = vmatpush.bf16.msrb.mxu0 %v7241_v19  ;;  %4725 = vmatpush.bf16.msrb.mxu1 %v7249_v58  ;;  %v7245_v19 = vld [vmem:[#allocation2 + $0xb48] sm:$0xff]  ;;  %v4603_v58 = vpack.c.b16 %v4599_v63, %v4599_v63  ;;  %v4820_v36 = vsel %vm956_vm3, %v4811_v13, %v4819_v47  ;;  %v4958_v41 = vpack.c.bf16 %v4954_v49, %v4952_v45 }
 0x1d1   : > { %v4608_v24 = vrot.slane %v6686_v15, 1 }
 0x1d2   : > { %4924 = vmatpush.bf16.msrb.mxu2 %v7254_v20  ;;  %4938 = vmatpush.bf16.msrb.mxu3 %v7262_v32  ;;  %v7244_v20 = vld [vmem:[#allocation2 + $0xb40] sm:$0xff]  ;;  %v4605_v32 = vrot.slane %v6682_v2, 1  ;;  %v4606_v9 = vrot.slane %v4603_v58, 1 }
 0x1d3   : > { %v4610_v53 = vsel %vm741_vm5, %v4608_v24, %v4609_v4 }
 0x1d4   : > { %4712 = vmatpush.bf16.msrb.mxu0 %v7240_v50  ;;  %4726 = vmatpush.bf16.msrb.mxu1 %v7248_v16  ;;  %v7283_v50 = vld [vmem:[#allocation2 + $0xc78] sm:$0xff]  ;;  %v4607_v16 = vsel %vm741_vm5, %v4605_v32, %v4606_v9 }
 0x1d6   : > { %4925 = vmatpush.bf16.msrb.mxu2 %v7253_v55  ;;  %4939 = vmatpush.bf16.msrb.mxu3 %v7261_v27  ;;  %v7280_v55 = vld [vmem:[#allocation2 + $0xc60] sm:$0xff] }
 0x1d8   : > { %4713 = vmatpush.bf16.msrb.mxu0 %v7239_v46  ;;  %4727 = vmatpush.bf16.msrb.mxu1 %v7247_v1  ;;  %v7271_v1 = vld [vmem:[#allocation2 + $0xc18] sm:$0xff] }
 0x1da   : > { %4926 = vmatpush.bf16.msrb.mxu2 %v7252_v25  ;;  %4940 = vmatpush.bf16.msrb.mxu3 %v7260_v37  ;;  %v4953_v25 = vmul.f32 %v4951_v54, %v7718_v5  ;;  %v4955_v37 = vmul.f32 %v7895_v59, %v7740_v17  ;;  %v4999_v5 = vrot.slane %v4958_v41, 2  ;;  %v5003_v17 = vrot.slane %v4961_v56, 2 }
 0x1dc   : > { %4714 = vmatpush.bf16.msrb.mxu0 %v7238_v43  ;;  %4728 = vmatpush.bf16.msrb.mxu1 %v7246_v40  ;;  %v7277_v43 = vld [vmem:[#allocation2 + $0xc48] sm:$0xff]  ;;  %v4959_v57 = vpack.c.bf16 %v4955_v37, %v4953_v25 }
 0x1dd   : > { %4927 = vmatmul.bf16.vlgmr.msrb.gmra.mxu2 %v4803_v35  ;;  %4941 = vmatmul.bf16.vlgmr.msrb.gmra.mxu3 %v4820_v36 }
 0x1de   : > { %v5002_v62 = vrot.slane %v4959_v57, 2 }
 0x1e0   : > { %4715 = vmatpush.bf16.msrb.mxu0 %v7237_v14  ;;  %4729 = vmatpush.bf16.msrb.mxu1 %v7245_v19  ;;  %v5004_v59 = vsel %vm1201_vm6, %v5002_v62, %v5003_v17  ;;  %v3407_v13 = vpop.f32.mrf.mxu2  ;;  %v3421_v47 = vpop.f32.mrf.mxu3 }
 0x1e4   : > { %4716 = vmatpush.bf16.msrb.mxu0 %v7236_v18  ;;  %4730 = vmatpush.bf16.msrb.mxu1 %v7244_v20  ;;  %v3226_v11 = vpop.f32.mrf.mxu0  ;;  %v3240_v29 = vpop.f32.mrf.mxu1 }
 0x1e5   : > { %v3241_v27 = vadd.f32 %v3240_v29, %v3226_v11  ;;  %v3059_v11 = vadd.f32 %v3058_v7, %v3044_v10 }
 0x1e7   : > { %4717 = vmatmul.bf16.vlgmr.msrb.gmra.mxu0 %v4607_v16  ;;  %4731 = vmatmul.bf16.vlgmr.msrb.gmra.mxu1 %v4610_v53  ;;  %v8101_v46 = vadd.f32 %v3241_v27, %v8084_v51  ;;  %v4956_v51 = vmul.f32 %v4742_v0, %v7721_v6  ;;  %v7268_v0 = vld [vmem:[#allocation2 + $0xc00] sm:$0xff] }
 0x1e8   : > { %5103 = vmatpush.bf16.msra.mxu0 %v7275_v38  ;;  %5117 = vmatpush.bf16.msra.mxu1 %v7283_v50  ;;  %v3409_v2 = vpop.f32.mrf.mxu2  ;;  %v3423_v14 = vpop.f32.mrf.mxu3 }
 0x1e9   : > { %v4960_v40 = vpack.c.bf16 %v4956_v51, %v4956_v51  ;;  %v3424_v54 = vadd.f32 %v3423_v14, %v3409_v2 }
 0x1eb   : > { %v5000_v63 = vrot.slane %v4960_v40, 2 }
 0x1ec   : > { %5104 = vmatpush.bf16.msra.mxu0 %v7274_v31  ;;  %5118 = vmatpush.bf16.msra.mxu1 %v7282_v12  ;;  %v3228_v48 = vpop.f32.mrf.mxu0  ;;  %v3242_v28 = vpop.f32.mrf.mxu1 }
 0x1ed   : > { %v5001_v6 = vsel %vm1201_vm6, %v4999_v5, %v5000_v63  ;;  %v3243_v29 = vadd.f32 %v3242_v28, %v3228_v48 }
 0x1f0   : > { %5105 = vmatpush.bf16.msra.mxu0 %v7273_v23  ;;  %5119 = vmatpush.bf16.msra.mxu1 %v7281_v21 }
 0x1f4   : > { %5106 = vmatpush.bf16.msra.mxu0 %v7272_v3  ;;  %5120 = vmatpush.bf16.msra.mxu1 %v7280_v55  ;;  %v3422_v3 = vadd.f32 %v3421_v47, %v3407_v13  ;;  %v3062_v55 = vadd.f32 %v3059_v11, %v8093_v33 }
 0x1f6   : > { %v3246_v22 = vadd.f32 %v3243_v29, %v3062_v55 }
 0x1f8   : > { %5107 = vmatpush.bf16.msra.mxu0 %v7271_v1  ;;  %5121 = vmatpush.bf16.msra.mxu1 %v7279_v39  ;;  %v3426_v1 = vadd.f32 %v3422_v3, %v8101_v46  ;;  %v3427_v49 = vadd.f32 %v3424_v54, %v3246_v22 }
 0x1fc   : > { %5108 = vmatpush.bf16.msra.mxu0 %v7270_v26  ;;  %5122 = vmatpush.bf16.msra.mxu1 %v7278_v60 }
 0x200   : > { %5109 = vmatpush.bf16.msra.mxu0 %v7269_v61  ;;  %5123 = vmatpush.bf16.msra.mxu1 %v7277_v43  ;;  %v3793_v15 = vpop.f32.mrf.mxu2  ;;  %v3807_v30 = vpop.f32.mrf.mxu3 }
 0x201   : > { %v3808_v60 = vadd.f32 %v3807_v30, %v3793_v15 }
 0x204   : > { %5110 = vmatpush.bf16.msra.mxu0 %v7268_v0  ;;  %5124 = vmatpush.bf16.msra.mxu1 %v7276_v44  ;;  %v3615_v34 = vpop.f32.mrf.mxu0  ;;  %v3629_v42 = vpop.f32.mrf.mxu1 }
 0x205   : > { %v3630_v27 = vadd.f32 %v3629_v42, %v3615_v34 }
 0x207   : > { %5111 = vmatmul.bf16.vlgmr.msra.gmra.mxu0 %v5001_v6  ;;  %5125 = vmatmul.bf16.vlgmr.msra.gmra.mxu1 %v5004_v59  ;;  %v3634_v26 = vadd.f32 %v3630_v27, %v3426_v1 }
 0x208   : > { %v3795_v18 = vpop.f32.mrf.mxu2  ;;  %v3809_v20 = vpop.f32.mrf.mxu3 }
 0x209   : > { %v3812_v8 = vadd.f32 %v3808_v60, %v3634_v26  ;;  %v3810_v43 = vadd.f32 %v3809_v20, %v3795_v18 }
 0x20c   : > { %v3617_v19 = vpop.f32.mrf.mxu0  ;;  %v3631_v58 = vpop.f32.mrf.mxu1 }
 0x20d   : > { %v3632_v45 = vadd.f32 %v3631_v58, %v3617_v19 }
 0x20f   : > { %v3635_v61 = vadd.f32 %v3632_v45, %v3427_v49 }
 0x211   : > { %v3813_v33 = vadd.f32 %v3810_v43, %v3635_v61 }
 0x220   : > { %v4168_v24 = vpop.f32.mrf.mxu2  ;;  %v4182_v4 = vpop.f32.mrf.mxu3 }
 0x221   : > { %v4183_v57 = vadd.f32 %v4182_v4, %v4168_v24 }
 0x224   : > { %v4003_v35 = vpop.f32.mrf.mxu0  ;;  %v4017_v36 = vpop.f32.mrf.mxu1 }
 0x225   : > { %v4018_v51 = vadd.f32 %v4017_v36, %v4003_v35 }
 0x227   : > { %v4022_v41 = vadd.f32 %v4018_v51, %v3812_v8 }
 0x228   : > { %v4170_v16 = vpop.f32.mrf.mxu2  ;;  %v4184_v53 = vpop.f32.mrf.mxu3 }
 0x229   : > { %v4187_v5 = vadd.f32 %v4183_v57, %v4022_v41  ;;  %v4185_v17 = vadd.f32 %v4184_v53, %v4170_v16 }
 0x22c   : > { %v4005_v32 = vpop.f32.mrf.mxu0  ;;  %v4019_v9 = vpop.f32.mrf.mxu1 }
 0x22d   : > { %v4020_v40 = vadd.f32 %v4019_v9, %v4005_v32  ;;  %v7352_v9 = vld [vmem:[#allocation4] ss:$0 sm:$0xff] }
 0x22f   : > { %v4023_v44 = vadd.f32 %v4020_v40, %v3813_v33 }
 0x231   : > { %v4188_v7 = vadd.f32 %v4185_v17, %v4023_v44 }
 0x240   : > { %v4537_v23 = vpop.f32.mrf.mxu2  ;;  %v4551_v21 = vpop.f32.mrf.mxu3 }
 0x241   : > { %v4552_v10 = vadd.f32 %v4551_v21, %v4537_v23 }
 0x244   : > { %v4333_v38 = vpop.f32.mrf.mxu0  ;;  %v4347_v50 = vpop.f32.mrf.mxu1 }
 0x245   : > { %v4348_v56 = vadd.f32 %v4347_v50, %v4333_v38 }
 0x247   : > { %v4352_v6 = vadd.f32 %v4348_v56, %v4187_v5 }
 0x248   : > { %v4539_v25 = vpop.f32.mrf.mxu2  ;;  %v4553_v37 = vpop.f32.mrf.mxu3 }
 0x249   : > { %v4556_v13 = vadd.f32 %v4552_v10, %v4352_v6  ;;  %v4554_v42 = vadd.f32 %v4553_v37, %v4539_v25 }
 0x24c   : > { %v4335_v31 = vpop.f32.mrf.mxu0  ;;  %v4349_v12 = vpop.f32.mrf.mxu1 }
 0x24d   : > { %v4350_v59 = vadd.f32 %v4349_v12, %v4335_v31 }
 0x24f   : > { %v4353_v28 = vadd.f32 %v4350_v59, %v4188_v7 }
 0x251   : > { %v4557_v58 = vadd.f32 %v4554_v42, %v4353_v28 }
 0x260   : > { %v4928_v63 = vpop.f32.mrf.mxu2  ;;  %v4942_v62 = vpop.f32.mrf.mxu3 }
 0x261   : > { %v4943_v19 = vadd.f32 %v4942_v62, %v4928_v63 }
 0x264   : > { %v4718_v39 = vpop.f32.mrf.mxu0  ;;  %v4732_v52 = vpop.f32.mrf.mxu1 }
 0x265   : > { %v4733_v48 = vadd.f32 %v4732_v52, %v4718_v39 }
 0x267   : > { %v4737_v2 = vadd.f32 %v4733_v48, %v4556_v13 }
 0x268   : > { %v4930_v30 = vpop.f32.mrf.mxu2  ;;  %v4944_v35 = vpop.f32.mrf.mxu3 }
 0x269   : > { %v4947_v18 = vadd.f32 %v4943_v19, %v4737_v2  ;;  %v4945_v20 = vadd.f32 %v4944_v35, %v4930_v30 }
 0x26c   : > { %v4720_v0 = vpop.f32.mrf.mxu0  ;;  %v4734_v46 = vpop.f32.mrf.mxu1 }
 0x26d   : > { %v4735_v14 = vadd.f32 %v4734_v46, %v4720_v0 }
 0x26f   : > { %v4738_v36 = vadd.f32 %v4735_v14, %v4557_v58 }
 0x271   : > { %v4948_v38 = vadd.f32 %v4945_v20, %v4738_v36 }
 0x284   : > { %v5112_v47 = vpop.f32.mrf.mxu0  ;;  %v5126_v34 = vpop.f32.mrf.mxu1 }
 0x285   : > { %v5127_v15 = vadd.f32 %v5126_v34, %v5112_v47 }
 0x287   : > { %v5131_v32 = vadd.f32 %v5127_v15, %v4947_v18 }
 0x289   : > { %v5137_v16 = vadd.f32 %v7352_v9, %v5131_v32 }
 0x28b   : > { %v5139_v12 = vmax.f32 %v5137_v16, 0.0 }
 0x28c   : > { %v5114_v24 = vpop.f32.mrf.mxu0  ;;  %v5128_v4 = vpop.f32.mrf.mxu1 }
 0x28d   : > { %v5129_v50 = vadd.f32 %v5128_v4, %v5114_v24 }
 0x28f   : > { %v5132_v53 = vadd.f32 %v5129_v50, %v4948_v38 }
 0x291   : > { %v5138_v31 = vadd.f32 %v7352_v9, %v5132_v53 }
 0x293   : > { %v5140_v23 = vmax.f32 %v5138_v31, 0.0 }
 0x295   : > { %v7287_v21 = vpack.c.bf16 %v5140_v23, %v5139_v12 }
 0x297   : > { %7288 = vst [vmem:[%s267_s24] sm:$0xff] %v7287_v21  }
 0x298 PF: > { %s16_s17 = sadd.s32 1, %s7475_s17   ;;  %s8140_s15 = smov %s7471_s16 }
 0x299   : > { %p13_p8 = scmp.ge.s32.totalorder %s16_s17, 4   ;;  %s8141_s16 = smov %s8143_s27 }
 0x29b   :  { %15 = sbr.rel (!%p13_p8) target bundleno = 3 (0x3), region = 106 }
 0x2a0   :  { %5175 = vsyncpa [#allocation3], 1 }
 0x2a1   :  { %5177 = vsyncpa [#allocation3 + $0x1], 1 }
 0x2a2   :  { %5178 = vsyncpa [#allocation5], 1 }

</bundles_post_ra>
